<compile_context>
chip_gen: v6e
topology: v6e:2x2x1
jax: 0.10.0
libtpu: 0.0.40
codegen_flags: <defaults>
</compile_context>

<pallas_src>
import jax
import jax.numpy as jnp
from jax.experimental import pallas as pl
from jax.experimental.pallas import tpu as pltpu

STRIDE = 32        # ResNet layer4 overall stride (self.strides = [32])
C_OUT = 256        # stand-in for num_channels=[2048], kept small for the demo


# ---------------------------------------------------------------------------
# Tile selection: patch-rows per grid step. As large as practical (amortizes
# the ~0.35us/step pipeline overhead), but keep the grid even and >= 2 so both
# v7x TensorCores are used; cap the unroll depth of the in-kernel loop.
# ---------------------------------------------------------------------------
def _pick_row_tile(batch, hf, wf, *, target_patches=512, max_rows=8):
    divisors = [d for d in range(1, hf + 1) if hf % d == 0 and d <= max_rows]
    cands = [d for d in divisors
             if d * wf <= target_patches and batch * (hf // d) >= 2]
    if not cands:
        cands = [d for d in divisors if d * wf <= target_patches] or [1]
    even = [d for d in cands if (batch * (hf // d)) % 2 == 0]
    return max(even) if even else max(cands)


# ---------------------------------------------------------------------------
# Kernel: fused patchify + stride-32 patch conv (per-row matmuls on the MXU)
# + bias + ReLU, bf16 lane-dense (N=256) write-back.
#   x_ref: (1, th*STRIDE, wf, STRIDE*C) bf16 -- image rows, patch-column major
#   w_ref: (STRIDE, STRIDE*C, N)        bf16 -- weight, sliced by kernel row ky
#   b_ref: (1, N)                       f32
#   o_ref: (1, th, wf, N)               bf16
# ---------------------------------------------------------------------------
def _layer4_patch_conv_kernel(x_ref, w_ref, b_ref, o_ref):
    th, wf, n = o_ref.shape[1], o_ref.shape[2], o_ref.shape[3]
    for py in range(th):                              # patch row in this block
        acc = jnp.zeros((wf, n), jnp.float32)
        for ky in range(STRIDE):                      # conv kernel row
            acc = acc + jnp.dot(x_ref[0, py * STRIDE + ky], w_ref[ky],
                                preferred_element_type=jnp.float32)
        # f32 epilogue (bias + ReLU), single bf16 cast at the store.
        o_ref[0, py] = jnp.maximum(acc + b_ref[...], 0.0).astype(o_ref.dtype)


def backbone_layer4(x_rows, weight3, bias2, *, th):
    """x_rows: (B, H, wf, STRIDE*C) bf16, weight3: (STRIDE, STRIDE*C, N) bf16,
    bias2: (1, N) f32 -> (B, hf, wf, N) bf16 NHWC feature map."""
    B, H, wf, k_row = x_rows.shape
    s, k_row_w, n = weight3.shape
    assert s == STRIDE and k_row_w == k_row and n % 128 == 0
    hf = H // STRIDE
    assert H % STRIDE == 0 and hf % th == 0

    m = B * hf * wf                       # total output patches
    k = STRIDE * k_row                    # full contraction length
    flops = 2 * m * k * n
    bytes_accessed = (x_rows.size * 2 + weight3.size * 2
                      + bias2.size * 4 + m * n * 2)

    # VMEM budget: double-buffered LHS/out blocks + resident weight/bias.
    lhs_blk = 2 * (th * STRIDE) * wf * k_row
    out_blk = 2 * th * wf * n
    wgt_b = 2 * weight3.size
    vmem_limit = int(min(32 << 20,
                         max(8 << 20,
                             2 * (lhs_blk + out_blk) + 2 * wgt_b + (2 << 20))))

    def make(single_buffer_resident):
        res_kw = ({"pipeline_mode": pl.Buffered(1)}
                  if single_buffer_resident else {})
        return pl.pallas_call(
            _layer4_patch_conv_kernel,
            out_shape=jax.ShapeDtypeStruct((B, hf, wf, n), jnp.bfloat16),
            grid_spec=pltpu.PrefetchScalarGridSpec(
                num_scalar_prefetch=0,
                grid=(B, hf // th),
                in_specs=[
                    # stream th*STRIDE image rows of this batch element
                    pl.BlockSpec((1, th * STRIDE, wf, k_row),
                                 lambda b, r: (b, r, 0, 0)),
                    # weight + bias stay resident in VMEM (constant index_map)
                    pl.BlockSpec((STRIDE, k_row, n),
                                 lambda b, r: (0, 0, 0), **res_kw),
                    pl.BlockSpec((1, n), lambda b, r: (0, 0), **res_kw),
                ],
                out_specs=pl.BlockSpec((1, th, wf, n),
                                       lambda b, r: (b, r, 0, 0)),
            ),
            compiler_params=pltpu.CompilerParams(
                dimension_semantics=("parallel", "parallel"),
                vmem_limit_bytes=vmem_limit,
            ),
            cost_estimate=pl.CostEstimate(
                flops=flops, transcendentals=0, bytes_accessed=bytes_accessed),
        )

    try:
        return make(True)(x_rows, weight3, bias2)
    except Exception:
        # Single-buffered resident operands (pl.Buffered(1)) unsupported on
        # this jax/backend combo -> fall back to default double buffering.
        return make(False)(x_rows, weight3, bias2)


# ---------------------------------------------------------------------------
# F.interpolate(mask[None].float(), size=(Hf, Wf), mode='nearest').to(bool)[0]
# Nearest indexing: src = floor(dst * in / out). Few-KB gather -> plain XLA.
# ---------------------------------------------------------------------------
def interpolate_mask_nearest(mask, hf, wf):
    B, H, W = mask.shape
    rows = (jnp.arange(hf) * H) // hf
    cols = (jnp.arange(wf) * W) // wf
    return mask[:, rows][:, :, cols]


# ---------------------------------------------------------------------------
# BackboneBase.forward equivalent
# ---------------------------------------------------------------------------
def init_backbone_params(key, c_in):
    kw, kb = jax.random.split(key)
    p = STRIDE * STRIDE * c_in
    weight = jax.random.normal(kw, (p, C_OUT), dtype=jnp.float32) * 0.02
    bias = jax.random.normal(kb, (C_OUT,), dtype=jnp.float32) * 0.01
    return weight, bias


def backbone_base_forward(tensors, mask, weight, bias):
    """tensors: (B, C, H, W) f32 (NCHW, as PyTorch); mask: (B, H, W) bool.

    Returns {'0': (features, mask)} where features are kept bf16 NHWC
    (B, H/32, W/32, C_OUT) per the perf review (same values as the PyTorch
    NCHW map up to layout and bf16 rounding)."""
    B, C, H, W = tensors.shape
    # A stride-32 patch conv needs whole patches (PyTorch conv would floor).
    assert H % STRIDE == 0 and W % STRIDE == 0, "H, W must be multiples of 32"
    # TODO(synk): crop/floor non-multiple inputs like a real stride-32 conv.
    hf, wf = H // STRIDE, W // STRIDE

    # Single XLA pass over the input: NCHW -> NHWC + f32 -> bf16 cast.
    # The reshape to (B, H, wf, STRIDE*C) is contiguous (free); the remaining
    # patch relayout is fused into the Pallas kernel via its BlockSpec.
    x = jnp.transpose(tensors, (0, 2, 3, 1)).astype(jnp.bfloat16)
    x_rows = x.reshape(B, H, wf, STRIDE * C)

    w3 = weight.reshape(STRIDE, STRIDE * C, C_OUT).astype(jnp.bfloat16)
    b2 = bias.reshape(1, C_OUT).astype(jnp.float32)

    th = _pick_row_tile(B, hf, wf)
    feat = backbone_layer4(x_rows, w3, b2, th=th)    # (B, hf, wf, C_OUT) bf16

    mask_ds = interpolate_mask_nearest(mask, hf, wf)  # bool, like .to(bool)

    # return_interm_layers=False -> single entry '0' (NestedTensor ~ (x, mask))
    return {"0": (feat, mask_ds)}


# Pure-JAX reference of the stand-in layer4 (bf16 inputs, f32 math) for the
# tolerance check requested by the correctness review.
def reference_layer4(tensors, weight, bias):
    B, C, H, W = tensors.shape
    hf, wf = H // STRIDE, W // STRIDE
    x = jnp.transpose(tensors, (0, 2, 3, 1)).astype(jnp.bfloat16)
    x = x.astype(jnp.float32).reshape(B, hf, STRIDE, wf, STRIDE, C)
    x = jnp.transpose(x, (0, 1, 3, 2, 4, 5))
    patches = x.reshape(B * hf * wf, STRIDE * STRIDE * C)
    w = weight.astype(jnp.bfloat16).astype(jnp.float32)
    ref = jnp.maximum(patches @ w + bias[None, :], 0.0)
    return ref.reshape(B, hf, wf, C_OUT)


if __name__ == "__main__":
    key = jax.random.PRNGKey(0)
    k_x, k_m, k_p = jax.random.split(key, 3)

    B, C, H, W = 2, 3, 64, 64
    tensors = jax.random.normal(k_x, (B, C, H, W), dtype=jnp.float32)
    mask = jax.random.bernoulli(k_m, 0.3, (B, H, W))          # bool padding mask

    weight, bias = init_backbone_params(k_p, C)

    out = backbone_base_forward(tensors, mask, weight, bias)
    feat, mask_ds = out["0"]
    jax.block_until_ready(feat)
    jax.block_until_ready(mask_ds)

    hf, wf = H // STRIDE, W // STRIDE
    assert feat.shape == (B, hf, wf, C_OUT)
    assert feat.dtype == jnp.bfloat16
    assert mask_ds.shape == (B, hf, wf)
    assert mask_ds.dtype == jnp.bool_

    ref = reference_layer4(tensors, weight, bias)
    err = float(jnp.max(jnp.abs(feat.astype(jnp.float32) - ref)))
    assert jnp.allclose(feat.astype(jnp.float32), ref, rtol=2e-2, atol=2e-2), err

    print("KERNEL_OK")
</pallas_src>

<mosaic_0001>
module attributes {stable_mosaic.version = 11 : i64} {
  func.func @_layer4_patch_conv_kernel(%arg0: i32, %arg1: i32, %arg2: memref<1x64x2x96xbf16, #tpu.memory_space<vmem>>, %arg3: memref<32x96x256xbf16, #tpu.memory_space<vmem>>, %arg4: memref<1x256xf32, #tpu.memory_space<vmem>>, %arg5: memref<1x2x2x256xbf16, #tpu.memory_space<vmem>>) attributes {dimension_semantics = [#tpu.dimension_semantics<parallel>, #tpu.dimension_semantics<parallel>], iteration_bounds = array<i64: 2, 1>, scalar_prefetch = 0 : i64, scratch_operands = 0 : i64, tpu.core_type = #tpu.core_type<tc>, window_params = [{transform_indices = @transform_0, window_bounds = array<i64: 1, 64, 2, 96>}, {pipeline_mode = #tpu.pipeline_mode<synchronous>, transform_indices = @transform_1, window_bounds = array<i64: 32, 96, 256>}, {pipeline_mode = #tpu.pipeline_mode<synchronous>, transform_indices = @transform_2, window_bounds = array<i64: 1, 256>}, {transform_indices = @transform_3, window_bounds = array<i64: 1, 2, 2, 256>}]} {
    %cst = arith.constant 0.000000e+00 : f32
    %0 = vector.broadcast %cst : f32 to vector<2x256xf32>
    %c0 = arith.constant 0 : index
    %c0_0 = arith.constant 0 : index
    %c0_1 = arith.constant 0 : index
    %c0_2 = arith.constant 0 : index
    %1 = vector.load %arg2[%c0, %c0_0, %c0_1, %c0_2] : memref<1x64x2x96xbf16, #tpu.memory_space<vmem>>, vector<1x1x2x96xbf16>
    %2 = vector.shape_cast %1 : vector<1x1x2x96xbf16> to vector<2x96xbf16>
    %c0_3 = arith.constant 0 : index
    %c0_4 = arith.constant 0 : index
    %c0_5 = arith.constant 0 : index
    %3 = vector.load %arg3[%c0_3, %c0_4, %c0_5] : memref<32x96x256xbf16, #tpu.memory_space<vmem>>, vector<1x96x256xbf16>
    %4 = vector.shape_cast %3 : vector<1x96x256xbf16> to vector<96x256xbf16>
    %cst_6 = arith.constant dense<0.000000e+00> : vector<2x256xf32>
    %5 = tpu.matmul %2, %4, %cst_6 {dimension_numbers = #tpu.dot_dimension_numbers<[1], [0], [0], [1], [0, 0, 1, 1], [], []>} : vector<2x96xbf16>, vector<96x256xbf16>, vector<2x256xf32> -> vector<2x256xf32>
    %6 = arith.addf %0, %5 : vector<2x256xf32>
    %c0_7 = arith.constant 0 : index
    %c1 = arith.constant 1 : index
    %c0_8 = arith.constant 0 : index
    %c0_9 = arith.constant 0 : index
    %7 = vector.load %arg2[%c0_7, %c1, %c0_8, %c0_9] : memref<1x64x2x96xbf16, #tpu.memory_space<vmem>>, vector<1x1x2x96xbf16>
    %8 = vector.shape_cast %7 : vector<1x1x2x96xbf16> to vector<2x96xbf16>
    %c1_10 = arith.constant 1 : index
    %c0_11 = arith.constant 0 : index
    %c0_12 = arith.constant 0 : index
    %9 = vector.load %arg3[%c1_10, %c0_11, %c0_12] : memref<32x96x256xbf16, #tpu.memory_space<vmem>>, vector<1x96x256xbf16>
    %10 = vector.shape_cast %9 : vector<1x96x256xbf16> to vector<96x256xbf16>
    %cst_13 = arith.constant dense<0.000000e+00> : vector<2x256xf32>
    %11 = tpu.matmul %8, %10, %cst_13 {dimension_numbers = #tpu.dot_dimension_numbers<[1], [0], [0], [1], [0, 0, 1, 1], [], []>} : vector<2x96xbf16>, vector<96x256xbf16>, vector<2x256xf32> -> vector<2x256xf32>
    %12 = arith.addf %6, %11 : vector<2x256xf32>
    %c0_14 = arith.constant 0 : index
    %c2 = arith.constant 2 : index
    %c0_15 = arith.constant 0 : index
    %c0_16 = arith.constant 0 : index
    %13 = vector.load %arg2[%c0_14, %c2, %c0_15, %c0_16] : memref<1x64x2x96xbf16, #tpu.memory_space<vmem>>, vector<1x1x2x96xbf16>
    %14 = vector.shape_cast %13 : vector<1x1x2x96xbf16> to vector<2x96xbf16>
    %c2_17 = arith.constant 2 : index
    %c0_18 = arith.constant 0 : index
    %c0_19 = arith.constant 0 : index
    %15 = vector.load %arg3[%c2_17, %c0_18, %c0_19] : memref<32x96x256xbf16, #tpu.memory_space<vmem>>, vector<1x96x256xbf16>
    %16 = vector.shape_cast %15 : vector<1x96x256xbf16> to vector<96x256xbf16>
    %cst_20 = arith.constant dense<0.000000e+00> : vector<2x256xf32>
    %17 = tpu.matmul %14, %16, %cst_20 {dimension_numbers = #tpu.dot_dimension_numbers<[1], [0], [0], [1], [0, 0, 1, 1], [], []>} : vector<2x96xbf16>, vector<96x256xbf16>, vector<2x256xf32> -> vector<2x256xf32>
    %18 = arith.addf %12, %17 : vector<2x256xf32>
    %c0_21 = arith.constant 0 : index
    %c3 = arith.constant 3 : index
    %c0_22 = arith.constant 0 : index
    %c0_23 = arith.constant 0 : index
    %19 = vector.load %arg2[%c0_21, %c3, %c0_22, %c0_23] : memref<1x64x2x96xbf16, #tpu.memory_space<vmem>>, vector<1x1x2x96xbf16>
    %20 = vector.shape_cast %19 : vector<1x1x2x96xbf16> to vector<2x96xbf16>
    %c3_24 = arith.constant 3 : index
    %c0_25 = arith.constant 0 : index
    %c0_26 = arith.constant 0 : index
    %21 = vector.load %arg3[%c3_24, %c0_25, %c0_26] : memref<32x96x256xbf16, #tpu.memory_space<vmem>>, vector<1x96x256xbf16>
    %22 = vector.shape_cast %21 : vector<1x96x256xbf16> to vector<96x256xbf16>
    %cst_27 = arith.constant dense<0.000000e+00> : vector<2x256xf32>
    %23 = tpu.matmul %20, %22, %cst_27 {dimension_numbers = #tpu.dot_dimension_numbers<[1], [0], [0], [1], [0, 0, 1, 1], [], []>} : vector<2x96xbf16>, vector<96x256xbf16>, vector<2x256xf32> -> vector<2x256xf32>
    %24 = arith.addf %18, %23 : vector<2x256xf32>
    %c0_28 = arith.constant 0 : index
    %c4 = arith.constant 4 : index
    %c0_29 = arith.constant 0 : index
    %c0_30 = arith.constant 0 : index
    %25 = vector.load %arg2[%c0_28, %c4, %c0_29, %c0_30] : memref<1x64x2x96xbf16, #tpu.memory_space<vmem>>, vector<1x1x2x96xbf16>
    %26 = vector.shape_cast %25 : vector<1x1x2x96xbf16> to vector<2x96xbf16>
    %c4_31 = arith.constant 4 : index
    %c0_32 = arith.constant 0 : index
    %c0_33 = arith.constant 0 : index
    %27 = vector.load %arg3[%c4_31, %c0_32, %c0_33] : memref<32x96x256xbf16, #tpu.memory_space<vmem>>, vector<1x96x256xbf16>
    %28 = vector.shape_cast %27 : vector<1x96x256xbf16> to vector<96x256xbf16>
    %cst_34 = arith.constant dense<0.000000e+00> : vector<2x256xf32>
    %29 = tpu.matmul %26, %28, %cst_34 {dimension_numbers = #tpu.dot_dimension_numbers<[1], [0], [0], [1], [0, 0, 1, 1], [], []>} : vector<2x96xbf16>, vector<96x256xbf16>, vector<2x256xf32> -> vector<2x256xf32>
    %30 = arith.addf %24, %29 : vector<2x256xf32>
    %c0_35 = arith.constant 0 : index
    %c5 = arith.constant 5 : index
    %c0_36 = arith.constant 0 : index
    %c0_37 = arith.constant 0 : index
    %31 = vector.load %arg2[%c0_35, %c5, %c0_36, %c0_37] : memref<1x64x2x96xbf16, #tpu.memory_space<vmem>>, vector<1x1x2x96xbf16>
    %32 = vector.shape_cast %31 : vector<1x1x2x96xbf16> to vector<2x96xbf16>
    %c5_38 = arith.constant 5 : index
    %c0_39 = arith.constant 0 : index
    %c0_40 = arith.constant 0 : index
    %33 = vector.load %arg3[%c5_38, %c0_39, %c0_40] : memref<32x96x256xbf16, #tpu.memory_space<vmem>>, vector<1x96x256xbf16>
    %34 = vector.shape_cast %33 : vector<1x96x256xbf16> to vector<96x256xbf16>
    %cst_41 = arith.constant dense<0.000000e+00> : vector<2x256xf32>
    %35 = tpu.matmul %32, %34, %cst_41 {dimension_numbers = #tpu.dot_dimension_numbers<[1], [0], [0], [1], [0, 0, 1, 1], [], []>} : vector<2x96xbf16>, vector<96x256xbf16>, vector<2x256xf32> -> vector<2x256xf32>
    %36 = arith.addf %30, %35 : vector<2x256xf32>
    %c0_42 = arith.constant 0 : index
    %c6 = arith.constant 6 : index
    %c0_43 = arith.constant 0 : index
    %c0_44 = arith.constant 0 : index
    %37 = vector.load %arg2[%c0_42, %c6, %c0_43, %c0_44] : memref<1x64x2x96xbf16, #tpu.memory_space<vmem>>, vector<1x1x2x96xbf16>
    %38 = vector.shape_cast %37 : vector<1x1x2x96xbf16> to vector<2x96xbf16>
    %c6_45 = arith.constant 6 : index
    %c0_46 = arith.constant 0 : index
    %c0_47 = arith.constant 0 : index
    %39 = vector.load %arg3[%c6_45, %c0_46, %c0_47] : memref<32x96x256xbf16, #tpu.memory_space<vmem>>, vector<1x96x256xbf16>
    %40 = vector.shape_cast %39 : vector<1x96x256xbf16> to vector<96x256xbf16>
    %cst_48 = arith.constant dense<0.000000e+00> : vector<2x256xf32>
    %41 = tpu.matmul %38, %40, %cst_48 {dimension_numbers = #tpu.dot_dimension_numbers<[1], [0], [0], [1], [0, 0, 1, 1], [], []>} : vector<2x96xbf16>, vector<96x256xbf16>, vector<2x256xf32> -> vector<2x256xf32>
    %42 = arith.addf %36, %41 : vector<2x256xf32>
    %c0_49 = arith.constant 0 : index
    %c7 = arith.constant 7 : index
    %c0_50 = arith.constant 0 : index
    %c0_51 = arith.constant 0 : index
    %43 = vector.load %arg2[%c0_49, %c7, %c0_50, %c0_51] : memref<1x64x2x96xbf16, #tpu.memory_space<vmem>>, vector<1x1x2x96xbf16>
    %44 = vector.shape_cast %43 : vector<1x1x2x96xbf16> to vector<2x96xbf16>
    %c7_52 = arith.constant 7 : index
    %c0_53 = arith.constant 0 : index
    %c0_54 = arith.constant 0 : index
    %45 = vector.load %arg3[%c7_52, %c0_53, %c0_54] : memref<32x96x256xbf16, #tpu.memory_space<vmem>>, vector<1x96x256xbf16>
    %46 = vector.shape_cast %45 : vector<1x96x256xbf16> to vector<96x256xbf16>
    %cst_55 = arith.constant dense<0.000000e+00> : vector<2x256xf32>
    %47 = tpu.matmul %44, %46, %cst_55 {dimension_numbers = #tpu.dot_dimension_numbers<[1], [0], [0], [1], [0, 0, 1, 1], [], []>} : vector<2x96xbf16>, vector<96x256xbf16>, vector<2x256xf32> -> vector<2x256xf32>
    %48 = arith.addf %42, %47 : vector<2x256xf32>
    %c0_56 = arith.constant 0 : index
    %c8 = arith.constant 8 : index
    %c0_57 = arith.constant 0 : index
    %c0_58 = arith.constant 0 : index
    %49 = vector.load %arg2[%c0_56, %c8, %c0_57, %c0_58] : memref<1x64x2x96xbf16, #tpu.memory_space<vmem>>, vector<1x1x2x96xbf16>
    %50 = vector.shape_cast %49 : vector<1x1x2x96xbf16> to vector<2x96xbf16>
    %c8_59 = arith.constant 8 : index
    %c0_60 = arith.constant 0 : index
    %c0_61 = arith.constant 0 : index
    %51 = vector.load %arg3[%c8_59, %c0_60, %c0_61] : memref<32x96x256xbf16, #tpu.memory_space<vmem>>, vector<1x96x256xbf16>
    %52 = vector.shape_cast %51 : vector<1x96x256xbf16> to vector<96x256xbf16>
    %cst_62 = arith.constant dense<0.000000e+00> : vector<2x256xf32>
    %53 = tpu.matmul %50, %52, %cst_62 {dimension_numbers = #tpu.dot_dimension_numbers<[1], [0], [0], [1], [0, 0, 1, 1], [], []>} : vector<2x96xbf16>, vector<96x256xbf16>, vector<2x256xf32> -> vector<2x256xf32>
    %54 = arith.addf %48, %53 : vector<2x256xf32>
    %c0_63 = arith.constant 0 : index
    %c9 = arith.constant 9 : index
    %c0_64 = arith.constant 0 : index
    %c0_65 = arith.constant 0 : index
    %55 = vector.load %arg2[%c0_63, %c9, %c0_64, %c0_65] : memref<1x64x2x96xbf16, #tpu.memory_space<vmem>>, vector<1x1x2x96xbf16>
    %56 = vector.shape_cast %55 : vector<1x1x2x96xbf16> to vector<2x96xbf16>
    %c9_66 = arith.constant 9 : index
    %c0_67 = arith.constant 0 : index
    %c0_68 = arith.constant 0 : index
    %57 = vector.load %arg3[%c9_66, %c0_67, %c0_68] : memref<32x96x256xbf16, #tpu.memory_space<vmem>>, vector<1x96x256xbf16>
    %58 = vector.shape_cast %57 : vector<1x96x256xbf16> to vector<96x256xbf16>
    %cst_69 = arith.constant dense<0.000000e+00> : vector<2x256xf32>
    %59 = tpu.matmul %56, %58, %cst_69 {dimension_numbers = #tpu.dot_dimension_numbers<[1], [0], [0], [1], [0, 0, 1, 1], [], []>} : vector<2x96xbf16>, vector<96x256xbf16>, vector<2x256xf32> -> vector<2x256xf32>
    %60 = arith.addf %54, %59 : vector<2x256xf32>
    %c0_70 = arith.constant 0 : index
    %c10 = arith.constant 10 : index
    %c0_71 = arith.constant 0 : index
    %c0_72 = arith.constant 0 : index
    %61 = vector.load %arg2[%c0_70, %c10, %c0_71, %c0_72] : memref<1x64x2x96xbf16, #tpu.memory_space<vmem>>, vector<1x1x2x96xbf16>
    %62 = vector.shape_cast %61 : vector<1x1x2x96xbf16> to vector<2x96xbf16>
    %c10_73 = arith.constant 10 : index
    %c0_74 = arith.constant 0 : index
    %c0_75 = arith.constant 0 : index
    %63 = vector.load %arg3[%c10_73, %c0_74, %c0_75] : memref<32x96x256xbf16, #tpu.memory_space<vmem>>, vector<1x96x256xbf16>
    %64 = vector.shape_cast %63 : vector<1x96x256xbf16> to vector<96x256xbf16>
    %cst_76 = arith.constant dense<0.000000e+00> : vector<2x256xf32>
    %65 = tpu.matmul %62, %64, %cst_76 {dimension_numbers = #tpu.dot_dimension_numbers<[1], [0], [0], [1], [0, 0, 1, 1], [], []>} : vector<2x96xbf16>, vector<96x256xbf16>, vector<2x256xf32> -> vector<2x256xf32>
    %66 = arith.addf %60, %65 : vector<2x256xf32>
    %c0_77 = arith.constant 0 : index
    %c11 = arith.constant 11 : index
    %c0_78 = arith.constant 0 : index
    %c0_79 = arith.constant 0 : index
    %67 = vector.load %arg2[%c0_77, %c11, %c0_78, %c0_79] : memref<1x64x2x96xbf16, #tpu.memory_space<vmem>>, vector<1x1x2x96xbf16>
    %68 = vector.shape_cast %67 : vector<1x1x2x96xbf16> to vector<2x96xbf16>
    %c11_80 = arith.constant 11 : index
    %c0_81 = arith.constant 0 : index
    %c0_82 = arith.constant 0 : index
    %69 = vector.load %arg3[%c11_80, %c0_81, %c0_82] : memref<32x96x256xbf16, #tpu.memory_space<vmem>>, vector<1x96x256xbf16>
    %70 = vector.shape_cast %69 : vector<1x96x256xbf16> to vector<96x256xbf16>
    %cst_83 = arith.constant dense<0.000000e+00> : vector<2x256xf32>
    %71 = tpu.matmul %68, %70, %cst_83 {dimension_numbers = #tpu.dot_dimension_numbers<[1], [0], [0], [1], [0, 0, 1, 1], [], []>} : vector<2x96xbf16>, vector<96x256xbf16>, vector<2x256xf32> -> vector<2x256xf32>
    %72 = arith.addf %66, %71 : vector<2x256xf32>
    %c0_84 = arith.constant 0 : index
    %c12 = arith.constant 12 : index
    %c0_85 = arith.constant 0 : index
    %c0_86 = arith.constant 0 : index
    %73 = vector.load %arg2[%c0_84, %c12, %c0_85, %c0_86] : memref<1x64x2x96xbf16, #tpu.memory_space<vmem>>, vector<1x1x2x96xbf16>
    %74 = vector.shape_cast %73 : vector<1x1x2x96xbf16> to vector<2x96xbf16>
    %c12_87 = arith.constant 12 : index
    %c0_88 = arith.constant 0 : index
    %c0_89 = arith.constant 0 : index
    %75 = vector.load %arg3[%c12_87, %c0_88, %c0_89] : memref<32x96x256xbf16, #tpu.memory_space<vmem>>, vector<1x96x256xbf16>
    %76 = vector.shape_cast %75 : vector<1x96x256xbf16> to vector<96x256xbf16>
    %cst_90 = arith.constant dense<0.000000e+00> : vector<2x256xf32>
    %77 = tpu.matmul %74, %76, %cst_90 {dimension_numbers = #tpu.dot_dimension_numbers<[1], [0], [0], [1], [0, 0, 1, 1], [], []>} : vector<2x96xbf16>, vector<96x256xbf16>, vector<2x256xf32> -> vector<2x256xf32>
    %78 = arith.addf %72, %77 : vector<2x256xf32>
    %c0_91 = arith.constant 0 : index
    %c13 = arith.constant 13 : index
    %c0_92 = arith.constant 0 : index
    %c0_93 = arith.constant 0 : index
    %79 = vector.load %arg2[%c0_91, %c13, %c0_92, %c0_93] : memref<1x64x2x96xbf16, #tpu.memory_space<vmem>>, vector<1x1x2x96xbf16>
    %80 = vector.shape_cast %79 : vector<1x1x2x96xbf16> to vector<2x96xbf16>
    %c13_94 = arith.constant 13 : index
    %c0_95 = arith.constant 0 : index
    %c0_96 = arith.constant 0 : index
    %81 = vector.load %arg3[%c13_94, %c0_95, %c0_96] : memref<32x96x256xbf16, #tpu.memory_space<vmem>>, vector<1x96x256xbf16>
    %82 = vector.shape_cast %81 : vector<1x96x256xbf16> to vector<96x256xbf16>
    %cst_97 = arith.constant dense<0.000000e+00> : vector<2x256xf32>
    %83 = tpu.matmul %80, %82, %cst_97 {dimension_numbers = #tpu.dot_dimension_numbers<[1], [0], [0], [1], [0, 0, 1, 1], [], []>} : vector<2x96xbf16>, vector<96x256xbf16>, vector<2x256xf32> -> vector<2x256xf32>
    %84 = arith.addf %78, %83 : vector<2x256xf32>
    %c0_98 = arith.constant 0 : index
    %c14 = arith.constant 14 : index
    %c0_99 = arith.constant 0 : index
    %c0_100 = arith.constant 0 : index
    %85 = vector.load %arg2[%c0_98, %c14, %c0_99, %c0_100] : memref<1x64x2x96xbf16, #tpu.memory_space<vmem>>, vector<1x1x2x96xbf16>
    %86 = vector.shape_cast %85 : vector<1x1x2x96xbf16> to vector<2x96xbf16>
    %c14_101 = arith.constant 14 : index
    %c0_102 = arith.constant 0 : index
    %c0_103 = arith.constant 0 : index
    %87 = vector.load %arg3[%c14_101, %c0_102, %c0_103] : memref<32x96x256xbf16, #tpu.memory_space<vmem>>, vector<1x96x256xbf16>
    %88 = vector.shape_cast %87 : vector<1x96x256xbf16> to vector<96x256xbf16>
    %cst_104 = arith.constant dense<0.000000e+00> : vector<2x256xf32>
    %89 = tpu.matmul %86, %88, %cst_104 {dimension_numbers = #tpu.dot_dimension_numbers<[1], [0], [0], [1], [0, 0, 1, 1], [], []>} : vector<2x96xbf16>, vector<96x256xbf16>, vector<2x256xf32> -> vector<2x256xf32>
    %90 = arith.addf %84, %89 : vector<2x256xf32>
    %c0_105 = arith.constant 0 : index
    %c15 = arith.constant 15 : index
    %c0_106 = arith.constant 0 : index
    %c0_107 = arith.constant 0 : index
    %91 = vector.load %arg2[%c0_105, %c15, %c0_106, %c0_107] : memref<1x64x2x96xbf16, #tpu.memory_space<vmem>>, vector<1x1x2x96xbf16>
    %92 = vector.shape_cast %91 : vector<1x1x2x96xbf16> to vector<2x96xbf16>
    %c15_108 = arith.constant 15 : index
    %c0_109 = arith.constant 0 : index
    %c0_110 = arith.constant 0 : index
    %93 = vector.load %arg3[%c15_108, %c0_109, %c0_110] : memref<32x96x256xbf16, #tpu.memory_space<vmem>>, vector<1x96x256xbf16>
    %94 = vector.shape_cast %93 : vector<1x96x256xbf16> to vector<96x256xbf16>
    %cst_111 = arith.constant dense<0.000000e+00> : vector<2x256xf32>
    %95 = tpu.matmul %92, %94, %cst_111 {dimension_numbers = #tpu.dot_dimension_numbers<[1], [0], [0], [1], [0, 0, 1, 1], [], []>} : vector<2x96xbf16>, vector<96x256xbf16>, vector<2x256xf32> -> vector<2x256xf32>
    %96 = arith.addf %90, %95 : vector<2x256xf32>
    %c0_112 = arith.constant 0 : index
    %c16 = arith.constant 16 : index
    %c0_113 = arith.constant 0 : index
    %c0_114 = arith.constant 0 : index
    %97 = vector.load %arg2[%c0_112, %c16, %c0_113, %c0_114] : memref<1x64x2x96xbf16, #tpu.memory_space<vmem>>, vector<1x1x2x96xbf16>
    %98 = vector.shape_cast %97 : vector<1x1x2x96xbf16> to vector<2x96xbf16>
    %c16_115 = arith.constant 16 : index
    %c0_116 = arith.constant 0 : index
    %c0_117 = arith.constant 0 : index
    %99 = vector.load %arg3[%c16_115, %c0_116, %c0_117] : memref<32x96x256xbf16, #tpu.memory_space<vmem>>, vector<1x96x256xbf16>
    %100 = vector.shape_cast %99 : vector<1x96x256xbf16> to vector<96x256xbf16>
    %cst_118 = arith.constant dense<0.000000e+00> : vector<2x256xf32>
    %101 = tpu.matmul %98, %100, %cst_118 {dimension_numbers = #tpu.dot_dimension_numbers<[1], [0], [0], [1], [0, 0, 1, 1], [], []>} : vector<2x96xbf16>, vector<96x256xbf16>, vector<2x256xf32> -> vector<2x256xf32>
    %102 = arith.addf %96, %101 : vector<2x256xf32>
    %c0_119 = arith.constant 0 : index
    %c17 = arith.constant 17 : index
    %c0_120 = arith.constant 0 : index
    %c0_121 = arith.constant 0 : index
    %103 = vector.load %arg2[%c0_119, %c17, %c0_120, %c0_121] : memref<1x64x2x96xbf16, #tpu.memory_space<vmem>>, vector<1x1x2x96xbf16>
    %104 = vector.shape_cast %103 : vector<1x1x2x96xbf16> to vector<2x96xbf16>
    %c17_122 = arith.constant 17 : index
    %c0_123 = arith.constant 0 : index
    %c0_124 = arith.constant 0 : index
    %105 = vector.load %arg3[%c17_122, %c0_123, %c0_124] : memref<32x96x256xbf16, #tpu.memory_space<vmem>>, vector<1x96x256xbf16>
    %106 = vector.shape_cast %105 : vector<1x96x256xbf16> to vector<96x256xbf16>
    %cst_125 = arith.constant dense<0.000000e+00> : vector<2x256xf32>
    %107 = tpu.matmul %104, %106, %cst_125 {dimension_numbers = #tpu.dot_dimension_numbers<[1], [0], [0], [1], [0, 0, 1, 1], [], []>} : vector<2x96xbf16>, vector<96x256xbf16>, vector<2x256xf32> -> vector<2x256xf32>
    %108 = arith.addf %102, %107 : vector<2x256xf32>
    %c0_126 = arith.constant 0 : index
    %c18 = arith.constant 18 : index
    %c0_127 = arith.constant 0 : index
    %c0_128 = arith.constant 0 : index
    %109 = vector.load %arg2[%c0_126, %c18, %c0_127, %c0_128] : memref<1x64x2x96xbf16, #tpu.memory_space<vmem>>, vector<1x1x2x96xbf16>
    %110 = vector.shape_cast %109 : vector<1x1x2x96xbf16> to vector<2x96xbf16>
    %c18_129 = arith.constant 18 : index
    %c0_130 = arith.constant 0 : index
    %c0_131 = arith.constant 0 : index
    %111 = vector.load %arg3[%c18_129, %c0_130, %c0_131] : memref<32x96x256xbf16, #tpu.memory_space<vmem>>, vector<1x96x256xbf16>
    %112 = vector.shape_cast %111 : vector<1x96x256xbf16> to vector<96x256xbf16>
    %cst_132 = arith.constant dense<0.000000e+00> : vector<2x256xf32>
    %113 = tpu.matmul %110, %112, %cst_132 {dimension_numbers = #tpu.dot_dimension_numbers<[1], [0], [0], [1], [0, 0, 1, 1], [], []>} : vector<2x96xbf16>, vector<96x256xbf16>, vector<2x256xf32> -> vector<2x256xf32>
    %114 = arith.addf %108, %113 : vector<2x256xf32>
    %c0_133 = arith.constant 0 : index
    %c19 = arith.constant 19 : index
    %c0_134 = arith.constant 0 : index
    %c0_135 = arith.constant 0 : index
    %115 = vector.load %arg2[%c0_133, %c19, %c0_134, %c0_135] : memref<1x64x2x96xbf16, #tpu.memory_space<vmem>>, vector<1x1x2x96xbf16>
    %116 = vector.shape_cast %115 : vector<1x1x2x96xbf16> to vector<2x96xbf16>
    %c19_136 = arith.constant 19 : index
    %c0_137 = arith.constant 0 : index
    %c0_138 = arith.constant 0 : index
    %117 = vector.load %arg3[%c19_136, %c0_137, %c0_138] : memref<32x96x256xbf16, #tpu.memory_space<vmem>>, vector<1x96x256xbf16>
    %118 = vector.shape_cast %117 : vector<1x96x256xbf16> to vector<96x256xbf16>
    %cst_139 = arith.constant dense<0.000000e+00> : vector<2x256xf32>
    %119 = tpu.matmul %116, %118, %cst_139 {dimension_numbers = #tpu.dot_dimension_numbers<[1], [0], [0], [1], [0, 0, 1, 1], [], []>} : vector<2x96xbf16>, vector<96x256xbf16>, vector<2x256xf32> -> vector<2x256xf32>
    %120 = arith.addf %114, %119 : vector<2x256xf32>
    %c0_140 = arith.constant 0 : index
    %c20 = arith.constant 20 : index
    %c0_141 = arith.constant 0 : index
    %c0_142 = arith.constant 0 : index
    %121 = vector.load %arg2[%c0_140, %c20, %c0_141, %c0_142] : memref<1x64x2x96xbf16, #tpu.memory_space<vmem>>, vector<1x1x2x96xbf16>
    %122 = vector.shape_cast %121 : vector<1x1x2x96xbf16> to vector<2x96xbf16>
    %c20_143 = arith.constant 20 : index
    %c0_144 = arith.constant 0 : index
    %c0_145 = arith.constant 0 : index
    %123 = vector.load %arg3[%c20_143, %c0_144, %c0_145] : memref<32x96x256xbf16, #tpu.memory_space<vmem>>, vector<1x96x256xbf16>
    %124 = vector.shape_cast %123 : vector<1x96x256xbf16> to vector<96x256xbf16>
    %cst_146 = arith.constant dense<0.000000e+00> : vector<2x256xf32>
    %125 = tpu.matmul %122, %124, %cst_146 {dimension_numbers = #tpu.dot_dimension_numbers<[1], [0], [0], [1], [0, 0, 1, 1], [], []>} : vector<2x96xbf16>, vector<96x256xbf16>, vector<2x256xf32> -> vector<2x256xf32>
    %126 = arith.addf %120, %125 : vector<2x256xf32>
    %c0_147 = arith.constant 0 : index
    %c21 = arith.constant 21 : index
    %c0_148 = arith.constant 0 : index
    %c0_149 = arith.constant 0 : index
    %127 = vector.load %arg2[%c0_147, %c21, %c0_148, %c0_149] : memref<1x64x2x96xbf16, #tpu.memory_space<vmem>>, vector<1x1x2x96xbf16>
    %128 = vector.shape_cast %127 : vector<1x1x2x96xbf16> to vector<2x96xbf16>
    %c21_150 = arith.constant 21 : index
    %c0_151 = arith.constant 0 : index
    %c0_152 = arith.constant 0 : index
    %129 = vector.load %arg3[%c21_150, %c0_151, %c0_152] : memref<32x96x256xbf16, #tpu.memory_space<vmem>>, vector<1x96x256xbf16>
    %130 = vector.shape_cast %129 : vector<1x96x256xbf16> to vector<96x256xbf16>
    %cst_153 = arith.constant dense<0.000000e+00> : vector<2x256xf32>
    %131 = tpu.matmul %128, %130, %cst_153 {dimension_numbers = #tpu.dot_dimension_numbers<[1], [0], [0], [1], [0, 0, 1, 1], [], []>} : vector<2x96xbf16>, vector<96x256xbf16>, vector<2x256xf32> -> vector<2x256xf32>
    %132 = arith.addf %126, %131 : vector<2x256xf32>
    %c0_154 = arith.constant 0 : index
    %c22 = arith.constant 22 : index
    %c0_155 = arith.constant 0 : index
    %c0_156 = arith.constant 0 : index
    %133 = vector.load %arg2[%c0_154, %c22, %c0_155, %c0_156] : memref<1x64x2x96xbf16, #tpu.memory_space<vmem>>, vector<1x1x2x96xbf16>
    %134 = vector.shape_cast %133 : vector<1x1x2x96xbf16> to vector<2x96xbf16>
    %c22_157 = arith.constant 22 : index
    %c0_158 = arith.constant 0 : index
    %c0_159 = arith.constant 0 : index
    %135 = vector.load %arg3[%c22_157, %c0_158, %c0_159] : memref<32x96x256xbf16, #tpu.memory_space<vmem>>, vector<1x96x256xbf16>
    %136 = vector.shape_cast %135 : vector<1x96x256xbf16> to vector<96x256xbf16>
    %cst_160 = arith.constant dense<0.000000e+00> : vector<2x256xf32>
    %137 = tpu.matmul %134, %136, %cst_160 {dimension_numbers = #tpu.dot_dimension_numbers<[1], [0], [0], [1], [0, 0, 1, 1], [], []>} : vector<2x96xbf16>, vector<96x256xbf16>, vector<2x256xf32> -> vector<2x256xf32>
    %138 = arith.addf %132, %137 : vector<2x256xf32>
    %c0_161 = arith.constant 0 : index
    %c23 = arith.constant 23 : index
    %c0_162 = arith.constant 0 : index
    %c0_163 = arith.constant 0 : index
    %139 = vector.load %arg2[%c0_161, %c23, %c0_162, %c0_163] : memref<1x64x2x96xbf16, #tpu.memory_space<vmem>>, vector<1x1x2x96xbf16>
    %140 = vector.shape_cast %139 : vector<1x1x2x96xbf16> to vector<2x96xbf16>
    %c23_164 = arith.constant 23 : index
    %c0_165 = arith.constant 0 : index
    %c0_166 = arith.constant 0 : index
    %141 = vector.load %arg3[%c23_164, %c0_165, %c0_166] : memref<32x96x256xbf16, #tpu.memory_space<vmem>>, vector<1x96x256xbf16>
    %142 = vector.shape_cast %141 : vector<1x96x256xbf16> to vector<96x256xbf16>
    %cst_167 = arith.constant dense<0.000000e+00> : vector<2x256xf32>
    %143 = tpu.matmul %140, %142, %cst_167 {dimension_numbers = #tpu.dot_dimension_numbers<[1], [0], [0], [1], [0, 0, 1, 1], [], []>} : vector<2x96xbf16>, vector<96x256xbf16>, vector<2x256xf32> -> vector<2x256xf32>
    %144 = arith.addf %138, %143 : vector<2x256xf32>
    %c0_168 = arith.constant 0 : index
    %c24 = arith.constant 24 : index
    %c0_169 = arith.constant 0 : index
    %c0_170 = arith.constant 0 : index
    %145 = vector.load %arg2[%c0_168, %c24, %c0_169, %c0_170] : memref<1x64x2x96xbf16, #tpu.memory_space<vmem>>, vector<1x1x2x96xbf16>
    %146 = vector.shape_cast %145 : vector<1x1x2x96xbf16> to vector<2x96xbf16>
    %c24_171 = arith.constant 24 : index
    %c0_172 = arith.constant 0 : index
    %c0_173 = arith.constant 0 : index
    %147 = vector.load %arg3[%c24_171, %c0_172, %c0_173] : memref<32x96x256xbf16, #tpu.memory_space<vmem>>, vector<1x96x256xbf16>
    %148 = vector.shape_cast %147 : vector<1x96x256xbf16> to vector<96x256xbf16>
    %cst_174 = arith.constant dense<0.000000e+00> : vector<2x256xf32>
    %149 = tpu.matmul %146, %148, %cst_174 {dimension_numbers = #tpu.dot_dimension_numbers<[1], [0], [0], [1], [0, 0, 1, 1], [], []>} : vector<2x96xbf16>, vector<96x256xbf16>, vector<2x256xf32> -> vector<2x256xf32>
    %150 = arith.addf %144, %149 : vector<2x256xf32>
    %c0_175 = arith.constant 0 : index
    %c25 = arith.constant 25 : index
    %c0_176 = arith.constant 0 : index
    %c0_177 = arith.constant 0 : index
    %151 = vector.load %arg2[%c0_175, %c25, %c0_176, %c0_177] : memref<1x64x2x96xbf16, #tpu.memory_space<vmem>>, vector<1x1x2x96xbf16>
    %152 = vector.shape_cast %151 : vector<1x1x2x96xbf16> to vector<2x96xbf16>
    %c25_178 = arith.constant 25 : index
    %c0_179 = arith.constant 0 : index
    %c0_180 = arith.constant 0 : index
    %153 = vector.load %arg3[%c25_178, %c0_179, %c0_180] : memref<32x96x256xbf16, #tpu.memory_space<vmem>>, vector<1x96x256xbf16>
    %154 = vector.shape_cast %153 : vector<1x96x256xbf16> to vector<96x256xbf16>
    %cst_181 = arith.constant dense<0.000000e+00> : vector<2x256xf32>
    %155 = tpu.matmul %152, %154, %cst_181 {dimension_numbers = #tpu.dot_dimension_numbers<[1], [0], [0], [1], [0, 0, 1, 1], [], []>} : vector<2x96xbf16>, vector<96x256xbf16>, vector<2x256xf32> -> vector<2x256xf32>
    %156 = arith.addf %150, %155 : vector<2x256xf32>
    %c0_182 = arith.constant 0 : index
    %c26 = arith.constant 26 : index
    %c0_183 = arith.constant 0 : index
    %c0_184 = arith.constant 0 : index
    %157 = vector.load %arg2[%c0_182, %c26, %c0_183, %c0_184] : memref<1x64x2x96xbf16, #tpu.memory_space<vmem>>, vector<1x1x2x96xbf16>
    %158 = vector.shape_cast %157 : vector<1x1x2x96xbf16> to vector<2x96xbf16>
    %c26_185 = arith.constant 26 : index
    %c0_186 = arith.constant 0 : index
    %c0_187 = arith.constant 0 : index
    %159 = vector.load %arg3[%c26_185, %c0_186, %c0_187] : memref<32x96x256xbf16, #tpu.memory_space<vmem>>, vector<1x96x256xbf16>
    %160 = vector.shape_cast %159 : vector<1x96x256xbf16> to vector<96x256xbf16>
    %cst_188 = arith.constant dense<0.000000e+00> : vector<2x256xf32>
    %161 = tpu.matmul %158, %160, %cst_188 {dimension_numbers = #tpu.dot_dimension_numbers<[1], [0], [0], [1], [0, 0, 1, 1], [], []>} : vector<2x96xbf16>, vector<96x256xbf16>, vector<2x256xf32> -> vector<2x256xf32>
    %162 = arith.addf %156, %161 : vector<2x256xf32>
    %c0_189 = arith.constant 0 : index
    %c27 = arith.constant 27 : index
    %c0_190 = arith.constant 0 : index
    %c0_191 = arith.constant 0 : index
    %163 = vector.load %arg2[%c0_189, %c27, %c0_190, %c0_191] : memref<1x64x2x96xbf16, #tpu.memory_space<vmem>>, vector<1x1x2x96xbf16>
    %164 = vector.shape_cast %163 : vector<1x1x2x96xbf16> to vector<2x96xbf16>
    %c27_192 = arith.constant 27 : index
    %c0_193 = arith.constant 0 : index
    %c0_194 = arith.constant 0 : index
    %165 = vector.load %arg3[%c27_192, %c0_193, %c0_194] : memref<32x96x256xbf16, #tpu.memory_space<vmem>>, vector<1x96x256xbf16>
    %166 = vector.shape_cast %165 : vector<1x96x256xbf16> to vector<96x256xbf16>
    %cst_195 = arith.constant dense<0.000000e+00> : vector<2x256xf32>
    %167 = tpu.matmul %164, %166, %cst_195 {dimension_numbers = #tpu.dot_dimension_numbers<[1], [0], [0], [1], [0, 0, 1, 1], [], []>} : vector<2x96xbf16>, vector<96x256xbf16>, vector<2x256xf32> -> vector<2x256xf32>
    %168 = arith.addf %162, %167 : vector<2x256xf32>
    %c0_196 = arith.constant 0 : index
    %c28 = arith.constant 28 : index
    %c0_197 = arith.constant 0 : index
    %c0_198 = arith.constant 0 : index
    %169 = vector.load %arg2[%c0_196, %c28, %c0_197, %c0_198] : memref<1x64x2x96xbf16, #tpu.memory_space<vmem>>, vector<1x1x2x96xbf16>
    %170 = vector.shape_cast %169 : vector<1x1x2x96xbf16> to vector<2x96xbf16>
    %c28_199 = arith.constant 28 : index
    %c0_200 = arith.constant 0 : index
    %c0_201 = arith.constant 0 : index
    %171 = vector.load %arg3[%c28_199, %c0_200, %c0_201] : memref<32x96x256xbf16, #tpu.memory_space<vmem>>, vector<1x96x256xbf16>
    %172 = vector.shape_cast %171 : vector<1x96x256xbf16> to vector<96x256xbf16>
    %cst_202 = arith.constant dense<0.000000e+00> : vector<2x256xf32>
    %173 = tpu.matmul %170, %172, %cst_202 {dimension_numbers = #tpu.dot_dimension_numbers<[1], [0], [0], [1], [0, 0, 1, 1], [], []>} : vector<2x96xbf16>, vector<96x256xbf16>, vector<2x256xf32> -> vector<2x256xf32>
    %174 = arith.addf %168, %173 : vector<2x256xf32>
    %c0_203 = arith.constant 0 : index
    %c29 = arith.constant 29 : index
    %c0_204 = arith.constant 0 : index
    %c0_205 = arith.constant 0 : index
    %175 = vector.load %arg2[%c0_203, %c29, %c0_204, %c0_205] : memref<1x64x2x96xbf16, #tpu.memory_space<vmem>>, vector<1x1x2x96xbf16>
    %176 = vector.shape_cast %175 : vector<1x1x2x96xbf16> to vector<2x96xbf16>
    %c29_206 = arith.constant 29 : index
    %c0_207 = arith.constant 0 : index
    %c0_208 = arith.constant 0 : index
    %177 = vector.load %arg3[%c29_206, %c0_207, %c0_208] : memref<32x96x256xbf16, #tpu.memory_space<vmem>>, vector<1x96x256xbf16>
    %178 = vector.shape_cast %177 : vector<1x96x256xbf16> to vector<96x256xbf16>
    %cst_209 = arith.constant dense<0.000000e+00> : vector<2x256xf32>
    %179 = tpu.matmul %176, %178, %cst_209 {dimension_numbers = #tpu.dot_dimension_numbers<[1], [0], [0], [1], [0, 0, 1, 1], [], []>} : vector<2x96xbf16>, vector<96x256xbf16>, vector<2x256xf32> -> vector<2x256xf32>
    %180 = arith.addf %174, %179 : vector<2x256xf32>
    %c0_210 = arith.constant 0 : index
    %c30 = arith.constant 30 : index
    %c0_211 = arith.constant 0 : index
    %c0_212 = arith.constant 0 : index
    %181 = vector.load %arg2[%c0_210, %c30, %c0_211, %c0_212] : memref<1x64x2x96xbf16, #tpu.memory_space<vmem>>, vector<1x1x2x96xbf16>
    %182 = vector.shape_cast %181 : vector<1x1x2x96xbf16> to vector<2x96xbf16>
    %c30_213 = arith.constant 30 : index
    %c0_214 = arith.constant 0 : index
    %c0_215 = arith.constant 0 : index
    %183 = vector.load %arg3[%c30_213, %c0_214, %c0_215] : memref<32x96x256xbf16, #tpu.memory_space<vmem>>, vector<1x96x256xbf16>
    %184 = vector.shape_cast %183 : vector<1x96x256xbf16> to vector<96x256xbf16>
    %cst_216 = arith.constant dense<0.000000e+00> : vector<2x256xf32>
    %185 = tpu.matmul %182, %184, %cst_216 {dimension_numbers = #tpu.dot_dimension_numbers<[1], [0], [0], [1], [0, 0, 1, 1], [], []>} : vector<2x96xbf16>, vector<96x256xbf16>, vector<2x256xf32> -> vector<2x256xf32>
    %186 = arith.addf %180, %185 : vector<2x256xf32>
    %c0_217 = arith.constant 0 : index
    %c31 = arith.constant 31 : index
    %c0_218 = arith.constant 0 : index
    %c0_219 = arith.constant 0 : index
    %187 = vector.load %arg2[%c0_217, %c31, %c0_218, %c0_219] : memref<1x64x2x96xbf16, #tpu.memory_space<vmem>>, vector<1x1x2x96xbf16>
    %188 = vector.shape_cast %187 : vector<1x1x2x96xbf16> to vector<2x96xbf16>
    %c31_220 = arith.constant 31 : index
    %c0_221 = arith.constant 0 : index
    %c0_222 = arith.constant 0 : index
    %189 = vector.load %arg3[%c31_220, %c0_221, %c0_222] : memref<32x96x256xbf16, #tpu.memory_space<vmem>>, vector<1x96x256xbf16>
    %190 = vector.shape_cast %189 : vector<1x96x256xbf16> to vector<96x256xbf16>
    %cst_223 = arith.constant dense<0.000000e+00> : vector<2x256xf32>
    %191 = tpu.matmul %188, %190, %cst_223 {dimension_numbers = #tpu.dot_dimension_numbers<[1], [0], [0], [1], [0, 0, 1, 1], [], []>} : vector<2x96xbf16>, vector<96x256xbf16>, vector<2x256xf32> -> vector<2x256xf32>
    %192 = arith.addf %186, %191 : vector<2x256xf32>
    %c0_224 = arith.constant 0 : index
    %c0_225 = arith.constant 0 : index
    %193 = vector.load %arg4[%c0_224, %c0_225] : memref<1x256xf32, #tpu.memory_space<vmem>>, vector<1x256xf32>
    %194 = vector.broadcast %193 : vector<1x256xf32> to vector<2x256xf32>
    %195 = arith.addf %192, %194 : vector<2x256xf32>
    %cst_226 = arith.constant 0.000000e+00 : f32
    %196 = vector.broadcast %cst_226 : f32 to vector<2x256xf32>
    %197 = arith.maximumf %195, %196 : vector<2x256xf32>
    %198 = arith.truncf %197 : vector<2x256xf32> to vector<2x256xbf16>
    %c0_227 = arith.constant 0 : index
    %c0_228 = arith.constant 0 : index
    %c0_229 = arith.constant 0 : index
    %c0_230 = arith.constant 0 : index
    %199 = vector.load %arg5[%c0_227, %c0_228, %c0_229, %c0_230] : memref<1x2x2x256xbf16, #tpu.memory_space<vmem>>, vector<1x1x2x256xbf16>
    %200 = vector.shape_cast %199 : vector<1x1x2x256xbf16> to vector<2x256xbf16>
    %201 = vector.shape_cast %198 : vector<2x256xbf16> to vector<1x1x2x256xbf16>
    tpu.vector_store %arg5[%c0_227, %c0_228, %c0_229, %c0_230], %201 {strides = array<i32>} : memref<1x2x2x256xbf16, #tpu.memory_space<vmem>>, vector<1x1x2x256xbf16>,
    %cst_231 = arith.constant 0.000000e+00 : f32
    %202 = vector.broadcast %cst_231 : f32 to vector<2x256xf32>
    %c0_232 = arith.constant 0 : index
    %c32 = arith.constant 32 : index
    %c0_233 = arith.constant 0 : index
    %c0_234 = arith.constant 0 : index
    %203 = vector.load %arg2[%c0_232, %c32, %c0_233, %c0_234] : memref<1x64x2x96xbf16, #tpu.memory_space<vmem>>, vector<1x1x2x96xbf16>
    %204 = vector.shape_cast %203 : vector<1x1x2x96xbf16> to vector<2x96xbf16>
    %c0_235 = arith.constant 0 : index
    %c0_236 = arith.constant 0 : index
    %c0_237 = arith.constant 0 : index
    %205 = vector.load %arg3[%c0_235, %c0_236, %c0_237] : memref<32x96x256xbf16, #tpu.memory_space<vmem>>, vector<1x96x256xbf16>
    %206 = vector.shape_cast %205 : vector<1x96x256xbf16> to vector<96x256xbf16>
    %cst_238 = arith.constant dense<0.000000e+00> : vector<2x256xf32>
    %207 = tpu.matmul %204, %206, %cst_238 {dimension_numbers = #tpu.dot_dimension_numbers<[1], [0], [0], [1], [0, 0, 1, 1], [], []>} : vector<2x96xbf16>, vector<96x256xbf16>, vector<2x256xf32> -> vector<2x256xf32>
    %208 = arith.addf %202, %207 : vector<2x256xf32>
    %c0_239 = arith.constant 0 : index
    %c33 = arith.constant 33 : index
    %c0_240 = arith.constant 0 : index
    %c0_241 = arith.constant 0 : index
    %209 = vector.load %arg2[%c0_239, %c33, %c0_240, %c0_241] : memref<1x64x2x96xbf16, #tpu.memory_space<vmem>>, vector<1x1x2x96xbf16>
    %210 = vector.shape_cast %209 : vector<1x1x2x96xbf16> to vector<2x96xbf16>
    %c1_242 = arith.constant 1 : index
    %c0_243 = arith.constant 0 : index
    %c0_244 = arith.constant 0 : index
    %211 = vector.load %arg3[%c1_242, %c0_243, %c0_244] : memref<32x96x256xbf16, #tpu.memory_space<vmem>>, vector<1x96x256xbf16>
    %212 = vector.shape_cast %211 : vector<1x96x256xbf16> to vector<96x256xbf16>
    %cst_245 = arith.constant dense<0.000000e+00> : vector<2x256xf32>
    %213 = tpu.matmul %210, %212, %cst_245 {dimension_numbers = #tpu.dot_dimension_numbers<[1], [0], [0], [1], [0, 0, 1, 1], [], []>} : vector<2x96xbf16>, vector<96x256xbf16>, vector<2x256xf32> -> vector<2x256xf32>
    %214 = arith.addf %208, %213 : vector<2x256xf32>
    %c0_246 = arith.constant 0 : index
    %c34 = arith.constant 34 : index
    %c0_247 = arith.constant 0 : index
    %c0_248 = arith.constant 0 : index
    %215 = vector.load %arg2[%c0_246, %c34, %c0_247, %c0_248] : memref<1x64x2x96xbf16, #tpu.memory_space<vmem>>, vector<1x1x2x96xbf16>
    %216 = vector.shape_cast %215 : vector<1x1x2x96xbf16> to vector<2x96xbf16>
    %c2_249 = arith.constant 2 : index
    %c0_250 = arith.constant 0 : index
    %c0_251 = arith.constant 0 : index
    %217 = vector.load %arg3[%c2_249, %c0_250, %c0_251] : memref<32x96x256xbf16, #tpu.memory_space<vmem>>, vector<1x96x256xbf16>
    %218 = vector.shape_cast %217 : vector<1x96x256xbf16> to vector<96x256xbf16>
    %cst_252 = arith.constant dense<0.000000e+00> : vector<2x256xf32>
    %219 = tpu.matmul %216, %218, %cst_252 {dimension_numbers = #tpu.dot_dimension_numbers<[1], [0], [0], [1], [0, 0, 1, 1], [], []>} : vector<2x96xbf16>, vector<96x256xbf16>, vector<2x256xf32> -> vector<2x256xf32>
    %220 = arith.addf %214, %219 : vector<2x256xf32>
    %c0_253 = arith.constant 0 : index
    %c35 = arith.constant 35 : index
    %c0_254 = arith.constant 0 : index
    %c0_255 = arith.constant 0 : index
    %221 = vector.load %arg2[%c0_253, %c35, %c0_254, %c0_255] : memref<1x64x2x96xbf16, #tpu.memory_space<vmem>>, vector<1x1x2x96xbf16>
    %222 = vector.shape_cast %221 : vector<1x1x2x96xbf16> to vector<2x96xbf16>
    %c3_256 = arith.constant 3 : index
    %c0_257 = arith.constant 0 : index
    %c0_258 = arith.constant 0 : index
    %223 = vector.load %arg3[%c3_256, %c0_257, %c0_258] : memref<32x96x256xbf16, #tpu.memory_space<vmem>>, vector<1x96x256xbf16>
    %224 = vector.shape_cast %223 : vector<1x96x256xbf16> to vector<96x256xbf16>
    %cst_259 = arith.constant dense<0.000000e+00> : vector<2x256xf32>
    %225 = tpu.matmul %222, %224, %cst_259 {dimension_numbers = #tpu.dot_dimension_numbers<[1], [0], [0], [1], [0, 0, 1, 1], [], []>} : vector<2x96xbf16>, vector<96x256xbf16>, vector<2x256xf32> -> vector<2x256xf32>
    %226 = arith.addf %220, %225 : vector<2x256xf32>
    %c0_260 = arith.constant 0 : index
    %c36 = arith.constant 36 : index
    %c0_261 = arith.constant 0 : index
    %c0_262 = arith.constant 0 : index
    %227 = vector.load %arg2[%c0_260, %c36, %c0_261, %c0_262] : memref<1x64x2x96xbf16, #tpu.memory_space<vmem>>, vector<1x1x2x96xbf16>
    %228 = vector.shape_cast %227 : vector<1x1x2x96xbf16> to vector<2x96xbf16>
    %c4_263 = arith.constant 4 : index
    %c0_264 = arith.constant 0 : index
    %c0_265 = arith.constant 0 : index
    %229 = vector.load %arg3[%c4_263, %c0_264, %c0_265] : memref<32x96x256xbf16, #tpu.memory_space<vmem>>, vector<1x96x256xbf16>
    %230 = vector.shape_cast %229 : vector<1x96x256xbf16> to vector<96x256xbf16>
    %cst_266 = arith.constant dense<0.000000e+00> : vector<2x256xf32>
    %231 = tpu.matmul %228, %230, %cst_266 {dimension_numbers = #tpu.dot_dimension_numbers<[1], [0], [0], [1], [0, 0, 1, 1], [], []>} : vector<2x96xbf16>, vector<96x256xbf16>, vector<2x256xf32> -> vector<2x256xf32>
    %232 = arith.addf %226, %231 : vector<2x256xf32>
    %c0_267 = arith.constant 0 : index
    %c37 = arith.constant 37 : index
    %c0_268 = arith.constant 0 : index
    %c0_269 = arith.constant 0 : index
    %233 = vector.load %arg2[%c0_267, %c37, %c0_268, %c0_269] : memref<1x64x2x96xbf16, #tpu.memory_space<vmem>>, vector<1x1x2x96xbf16>
    %234 = vector.shape_cast %233 : vector<1x1x2x96xbf16> to vector<2x96xbf16>
    %c5_270 = arith.constant 5 : index
    %c0_271 = arith.constant 0 : index
    %c0_272 = arith.constant 0 : index
    %235 = vector.load %arg3[%c5_270, %c0_271, %c0_272] : memref<32x96x256xbf16, #tpu.memory_space<vmem>>, vector<1x96x256xbf16>
    %236 = vector.shape_cast %235 : vector<1x96x256xbf16> to vector<96x256xbf16>
    %cst_273 = arith.constant dense<0.000000e+00> : vector<2x256xf32>
    %237 = tpu.matmul %234, %236, %cst_273 {dimension_numbers = #tpu.dot_dimension_numbers<[1], [0], [0], [1], [0, 0, 1, 1], [], []>} : vector<2x96xbf16>, vector<96x256xbf16>, vector<2x256xf32> -> vector<2x256xf32>
    %238 = arith.addf %232, %237 : vector<2x256xf32>
    %c0_274 = arith.constant 0 : index
    %c38 = arith.constant 38 : index
    %c0_275 = arith.constant 0 : index
    %c0_276 = arith.constant 0 : index
    %239 = vector.load %arg2[%c0_274, %c38, %c0_275, %c0_276] : memref<1x64x2x96xbf16, #tpu.memory_space<vmem>>, vector<1x1x2x96xbf16>
    %240 = vector.shape_cast %239 : vector<1x1x2x96xbf16> to vector<2x96xbf16>
    %c6_277 = arith.constant 6 : index
    %c0_278 = arith.constant 0 : index
    %c0_279 = arith.constant 0 : index
    %241 = vector.load %arg3[%c6_277, %c0_278, %c0_279] : memref<32x96x256xbf16, #tpu.memory_space<vmem>>, vector<1x96x256xbf16>
    %242 = vector.shape_cast %241 : vector<1x96x256xbf16> to vector<96x256xbf16>
    %cst_280 = arith.constant dense<0.000000e+00> : vector<2x256xf32>
    %243 = tpu.matmul %240, %242, %cst_280 {dimension_numbers = #tpu.dot_dimension_numbers<[1], [0], [0], [1], [0, 0, 1, 1], [], []>} : vector<2x96xbf16>, vector<96x256xbf16>, vector<2x256xf32> -> vector<2x256xf32>
    %244 = arith.addf %238, %243 : vector<2x256xf32>
    %c0_281 = arith.constant 0 : index
    %c39 = arith.constant 39 : index
    %c0_282 = arith.constant 0 : index
    %c0_283 = arith.constant 0 : index
    %245 = vector.load %arg2[%c0_281, %c39, %c0_282, %c0_283] : memref<1x64x2x96xbf16, #tpu.memory_space<vmem>>, vector<1x1x2x96xbf16>
    %246 = vector.shape_cast %245 : vector<1x1x2x96xbf16> to vector<2x96xbf16>
    %c7_284 = arith.constant 7 : index
    %c0_285 = arith.constant 0 : index
    %c0_286 = arith.constant 0 : index
    %247 = vector.load %arg3[%c7_284, %c0_285, %c0_286] : memref<32x96x256xbf16, #tpu.memory_space<vmem>>, vector<1x96x256xbf16>
    %248 = vector.shape_cast %247 : vector<1x96x256xbf16> to vector<96x256xbf16>
    %cst_287 = arith.constant dense<0.000000e+00> : vector<2x256xf32>
    %249 = tpu.matmul %246, %248, %cst_287 {dimension_numbers = #tpu.dot_dimension_numbers<[1], [0], [0], [1], [0, 0, 1, 1], [], []>} : vector<2x96xbf16>, vector<96x256xbf16>, vector<2x256xf32> -> vector<2x256xf32>
    %250 = arith.addf %244, %249 : vector<2x256xf32>
    %c0_288 = arith.constant 0 : index
    %c40 = arith.constant 40 : index
    %c0_289 = arith.constant 0 : index
    %c0_290 = arith.constant 0 : index
    %251 = vector.load %arg2[%c0_288, %c40, %c0_289, %c0_290] : memref<1x64x2x96xbf16, #tpu.memory_space<vmem>>, vector<1x1x2x96xbf16>
    %252 = vector.shape_cast %251 : vector<1x1x2x96xbf16> to vector<2x96xbf16>
    %c8_291 = arith.constant 8 : index
    %c0_292 = arith.constant 0 : index
    %c0_293 = arith.constant 0 : index
    %253 = vector.load %arg3[%c8_291, %c0_292, %c0_293] : memref<32x96x256xbf16, #tpu.memory_space<vmem>>, vector<1x96x256xbf16>
    %254 = vector.shape_cast %253 : vector<1x96x256xbf16> to vector<96x256xbf16>
    %cst_294 = arith.constant dense<0.000000e+00> : vector<2x256xf32>
    %255 = tpu.matmul %252, %254, %cst_294 {dimension_numbers = #tpu.dot_dimension_numbers<[1], [0], [0], [1], [0, 0, 1, 1], [], []>} : vector<2x96xbf16>, vector<96x256xbf16>, vector<2x256xf32> -> vector<2x256xf32>
    %256 = arith.addf %250, %255 : vector<2x256xf32>
    %c0_295 = arith.constant 0 : index
    %c41 = arith.constant 41 : index
    %c0_296 = arith.constant 0 : index
    %c0_297 = arith.constant 0 : index
    %257 = vector.load %arg2[%c0_295, %c41, %c0_296, %c0_297] : memref<1x64x2x96xbf16, #tpu.memory_space<vmem>>, vector<1x1x2x96xbf16>
    %258 = vector.shape_cast %257 : vector<1x1x2x96xbf16> to vector<2x96xbf16>
    %c9_298 = arith.constant 9 : index
    %c0_299 = arith.constant 0 : index
    %c0_300 = arith.constant 0 : index
    %259 = vector.load %arg3[%c9_298, %c0_299, %c0_300] : memref<32x96x256xbf16, #tpu.memory_space<vmem>>, vector<1x96x256xbf16>
    %260 = vector.shape_cast %259 : vector<1x96x256xbf16> to vector<96x256xbf16>
    %cst_301 = arith.constant dense<0.000000e+00> : vector<2x256xf32>
    %261 = tpu.matmul %258, %260, %cst_301 {dimension_numbers = #tpu.dot_dimension_numbers<[1], [0], [0], [1], [0, 0, 1, 1], [], []>} : vector<2x96xbf16>, vector<96x256xbf16>, vector<2x256xf32> -> vector<2x256xf32>
    %262 = arith.addf %256, %261 : vector<2x256xf32>
    %c0_302 = arith.constant 0 : index
    %c42 = arith.constant 42 : index
    %c0_303 = arith.constant 0 : index
    %c0_304 = arith.constant 0 : index
    %263 = vector.load %arg2[%c0_302, %c42, %c0_303, %c0_304] : memref<1x64x2x96xbf16, #tpu.memory_space<vmem>>, vector<1x1x2x96xbf16>
    %264 = vector.shape_cast %263 : vector<1x1x2x96xbf16> to vector<2x96xbf16>
    %c10_305 = arith.constant 10 : index
    %c0_306 = arith.constant 0 : index
    %c0_307 = arith.constant 0 : index
    %265 = vector.load %arg3[%c10_305, %c0_306, %c0_307] : memref<32x96x256xbf16, #tpu.memory_space<vmem>>, vector<1x96x256xbf16>
    %266 = vector.shape_cast %265 : vector<1x96x256xbf16> to vector<96x256xbf16>
    %cst_308 = arith.constant dense<0.000000e+00> : vector<2x256xf32>
    %267 = tpu.matmul %264, %266, %cst_308 {dimension_numbers = #tpu.dot_dimension_numbers<[1], [0], [0], [1], [0, 0, 1, 1], [], []>} : vector<2x96xbf16>, vector<96x256xbf16>, vector<2x256xf32> -> vector<2x256xf32>
    %268 = arith.addf %262, %267 : vector<2x256xf32>
    %c0_309 = arith.constant 0 : index
    %c43 = arith.constant 43 : index
    %c0_310 = arith.constant 0 : index
    %c0_311 = arith.constant 0 : index
    %269 = vector.load %arg2[%c0_309, %c43, %c0_310, %c0_311] : memref<1x64x2x96xbf16, #tpu.memory_space<vmem>>, vector<1x1x2x96xbf16>
    %270 = vector.shape_cast %269 : vector<1x1x2x96xbf16> to vector<2x96xbf16>
    %c11_312 = arith.constant 11 : index
    %c0_313 = arith.constant 0 : index
    %c0_314 = arith.constant 0 : index
    %271 = vector.load %arg3[%c11_312, %c0_313, %c0_314] : memref<32x96x256xbf16, #tpu.memory_space<vmem>>, vector<1x96x256xbf16>
    %272 = vector.shape_cast %271 : vector<1x96x256xbf16> to vector<96x256xbf16>
    %cst_315 = arith.constant dense<0.000000e+00> : vector<2x256xf32>
    %273 = tpu.matmul %270, %272, %cst_315 {dimension_numbers = #tpu.dot_dimension_numbers<[1], [0], [0], [1], [0, 0, 1, 1], [], []>} : vector<2x96xbf16>, vector<96x256xbf16>, vector<2x256xf32> -> vector<2x256xf32>
    %274 = arith.addf %268, %273 : vector<2x256xf32>
    %c0_316 = arith.constant 0 : index
    %c44 = arith.constant 44 : index
    %c0_317 = arith.constant 0 : index
    %c0_318 = arith.constant 0 : index
    %275 = vector.load %arg2[%c0_316, %c44, %c0_317, %c0_318] : memref<1x64x2x96xbf16, #tpu.memory_space<vmem>>, vector<1x1x2x96xbf16>
    %276 = vector.shape_cast %275 : vector<1x1x2x96xbf16> to vector<2x96xbf16>
    %c12_319 = arith.constant 12 : index
    %c0_320 = arith.constant 0 : index
    %c0_321 = arith.constant 0 : index
    %277 = vector.load %arg3[%c12_319, %c0_320, %c0_321] : memref<32x96x256xbf16, #tpu.memory_space<vmem>>, vector<1x96x256xbf16>
    %278 = vector.shape_cast %277 : vector<1x96x256xbf16> to vector<96x256xbf16>
    %cst_322 = arith.constant dense<0.000000e+00> : vector<2x256xf32>
    %279 = tpu.matmul %276, %278, %cst_322 {dimension_numbers = #tpu.dot_dimension_numbers<[1], [0], [0], [1], [0, 0, 1, 1], [], []>} : vector<2x96xbf16>, vector<96x256xbf16>, vector<2x256xf32> -> vector<2x256xf32>
    %280 = arith.addf %274, %279 : vector<2x256xf32>
    %c0_323 = arith.constant 0 : index
    %c45 = arith.constant 45 : index
    %c0_324 = arith.constant 0 : index
    %c0_325 = arith.constant 0 : index
    %281 = vector.load %arg2[%c0_323, %c45, %c0_324, %c0_325] : memref<1x64x2x96xbf16, #tpu.memory_space<vmem>>, vector<1x1x2x96xbf16>
    %282 = vector.shape_cast %281 : vector<1x1x2x96xbf16> to vector<2x96xbf16>
    %c13_326 = arith.constant 13 : index
    %c0_327 = arith.constant 0 : index
    %c0_328 = arith.constant 0 : index
    %283 = vector.load %arg3[%c13_326, %c0_327, %c0_328] : memref<32x96x256xbf16, #tpu.memory_space<vmem>>, vector<1x96x256xbf16>
    %284 = vector.shape_cast %283 : vector<1x96x256xbf16> to vector<96x256xbf16>
    %cst_329 = arith.constant dense<0.000000e+00> : vector<2x256xf32>
    %285 = tpu.matmul %282, %284, %cst_329 {dimension_numbers = #tpu.dot_dimension_numbers<[1], [0], [0], [1], [0, 0, 1, 1], [], []>} : vector<2x96xbf16>, vector<96x256xbf16>, vector<2x256xf32> -> vector<2x256xf32>
    %286 = arith.addf %280, %285 : vector<2x256xf32>
    %c0_330 = arith.constant 0 : index
    %c46 = arith.constant 46 : index
    %c0_331 = arith.constant 0 : index
    %c0_332 = arith.constant 0 : index
    %287 = vector.load %arg2[%c0_330, %c46, %c0_331, %c0_332] : memref<1x64x2x96xbf16, #tpu.memory_space<vmem>>, vector<1x1x2x96xbf16>
    %288 = vector.shape_cast %287 : vector<1x1x2x96xbf16> to vector<2x96xbf16>
    %c14_333 = arith.constant 14 : index
    %c0_334 = arith.constant 0 : index
    %c0_335 = arith.constant 0 : index
    %289 = vector.load %arg3[%c14_333, %c0_334, %c0_335] : memref<32x96x256xbf16, #tpu.memory_space<vmem>>, vector<1x96x256xbf16>
    %290 = vector.shape_cast %289 : vector<1x96x256xbf16> to vector<96x256xbf16>
    %cst_336 = arith.constant dense<0.000000e+00> : vector<2x256xf32>
    %291 = tpu.matmul %288, %290, %cst_336 {dimension_numbers = #tpu.dot_dimension_numbers<[1], [0], [0], [1], [0, 0, 1, 1], [], []>} : vector<2x96xbf16>, vector<96x256xbf16>, vector<2x256xf32> -> vector<2x256xf32>
    %292 = arith.addf %286, %291 : vector<2x256xf32>
    %c0_337 = arith.constant 0 : index
    %c47 = arith.constant 47 : index
    %c0_338 = arith.constant 0 : index
    %c0_339 = arith.constant 0 : index
    %293 = vector.load %arg2[%c0_337, %c47, %c0_338, %c0_339] : memref<1x64x2x96xbf16, #tpu.memory_space<vmem>>, vector<1x1x2x96xbf16>
    %294 = vector.shape_cast %293 : vector<1x1x2x96xbf16> to vector<2x96xbf16>
    %c15_340 = arith.constant 15 : index
    %c0_341 = arith.constant 0 : index
    %c0_342 = arith.constant 0 : index
    %295 = vector.load %arg3[%c15_340, %c0_341, %c0_342] : memref<32x96x256xbf16, #tpu.memory_space<vmem>>, vector<1x96x256xbf16>
    %296 = vector.shape_cast %295 : vector<1x96x256xbf16> to vector<96x256xbf16>
    %cst_343 = arith.constant dense<0.000000e+00> : vector<2x256xf32>
    %297 = tpu.matmul %294, %296, %cst_343 {dimension_numbers = #tpu.dot_dimension_numbers<[1], [0], [0], [1], [0, 0, 1, 1], [], []>} : vector<2x96xbf16>, vector<96x256xbf16>, vector<2x256xf32> -> vector<2x256xf32>
    %298 = arith.addf %292, %297 : vector<2x256xf32>
    %c0_344 = arith.constant 0 : index
    %c48 = arith.constant 48 : index
    %c0_345 = arith.constant 0 : index
    %c0_346 = arith.constant 0 : index
    %299 = vector.load %arg2[%c0_344, %c48, %c0_345, %c0_346] : memref<1x64x2x96xbf16, #tpu.memory_space<vmem>>, vector<1x1x2x96xbf16>
    %300 = vector.shape_cast %299 : vector<1x1x2x96xbf16> to vector<2x96xbf16>
    %c16_347 = arith.constant 16 : index
    %c0_348 = arith.constant 0 : index
    %c0_349 = arith.constant 0 : index
    %301 = vector.load %arg3[%c16_347, %c0_348, %c0_349] : memref<32x96x256xbf16, #tpu.memory_space<vmem>>, vector<1x96x256xbf16>
    %302 = vector.shape_cast %301 : vector<1x96x256xbf16> to vector<96x256xbf16>
    %cst_350 = arith.constant dense<0.000000e+00> : vector<2x256xf32>
    %303 = tpu.matmul %300, %302, %cst_350 {dimension_numbers = #tpu.dot_dimension_numbers<[1], [0], [0], [1], [0, 0, 1, 1], [], []>} : vector<2x96xbf16>, vector<96x256xbf16>, vector<2x256xf32> -> vector<2x256xf32>
    %304 = arith.addf %298, %303 : vector<2x256xf32>
    %c0_351 = arith.constant 0 : index
    %c49 = arith.constant 49 : index
    %c0_352 = arith.constant 0 : index
    %c0_353 = arith.constant 0 : index
    %305 = vector.load %arg2[%c0_351, %c49, %c0_352, %c0_353] : memref<1x64x2x96xbf16, #tpu.memory_space<vmem>>, vector<1x1x2x96xbf16>
    %306 = vector.shape_cast %305 : vector<1x1x2x96xbf16> to vector<2x96xbf16>
    %c17_354 = arith.constant 17 : index
    %c0_355 = arith.constant 0 : index
    %c0_356 = arith.constant 0 : index
    %307 = vector.load %arg3[%c17_354, %c0_355, %c0_356] : memref<32x96x256xbf16, #tpu.memory_space<vmem>>, vector<1x96x256xbf16>
    %308 = vector.shape_cast %307 : vector<1x96x256xbf16> to vector<96x256xbf16>
    %cst_357 = arith.constant dense<0.000000e+00> : vector<2x256xf32>
    %309 = tpu.matmul %306, %308, %cst_357 {dimension_numbers = #tpu.dot_dimension_numbers<[1], [0], [0], [1], [0, 0, 1, 1], [], []>} : vector<2x96xbf16>, vector<96x256xbf16>, vector<2x256xf32> -> vector<2x256xf32>
    %310 = arith.addf %304, %309 : vector<2x256xf32>
    %c0_358 = arith.constant 0 : index
    %c50 = arith.constant 50 : index
    %c0_359 = arith.constant 0 : index
    %c0_360 = arith.constant 0 : index
    %311 = vector.load %arg2[%c0_358, %c50, %c0_359, %c0_360] : memref<1x64x2x96xbf16, #tpu.memory_space<vmem>>, vector<1x1x2x96xbf16>
    %312 = vector.shape_cast %311 : vector<1x1x2x96xbf16> to vector<2x96xbf16>
    %c18_361 = arith.constant 18 : index
    %c0_362 = arith.constant 0 : index
    %c0_363 = arith.constant 0 : index
    %313 = vector.load %arg3[%c18_361, %c0_362, %c0_363] : memref<32x96x256xbf16, #tpu.memory_space<vmem>>, vector<1x96x256xbf16>
    %314 = vector.shape_cast %313 : vector<1x96x256xbf16> to vector<96x256xbf16>
    %cst_364 = arith.constant dense<0.000000e+00> : vector<2x256xf32>
    %315 = tpu.matmul %312, %314, %cst_364 {dimension_numbers = #tpu.dot_dimension_numbers<[1], [0], [0], [1], [0, 0, 1, 1], [], []>} : vector<2x96xbf16>, vector<96x256xbf16>, vector<2x256xf32> -> vector<2x256xf32>
    %316 = arith.addf %310, %315 : vector<2x256xf32>
    %c0_365 = arith.constant 0 : index
    %c51 = arith.constant 51 : index
    %c0_366 = arith.constant 0 : index
    %c0_367 = arith.constant 0 : index
    %317 = vector.load %arg2[%c0_365, %c51, %c0_366, %c0_367] : memref<1x64x2x96xbf16, #tpu.memory_space<vmem>>, vector<1x1x2x96xbf16>
    %318 = vector.shape_cast %317 : vector<1x1x2x96xbf16> to vector<2x96xbf16>
    %c19_368 = arith.constant 19 : index
    %c0_369 = arith.constant 0 : index
    %c0_370 = arith.constant 0 : index
    %319 = vector.load %arg3[%c19_368, %c0_369, %c0_370] : memref<32x96x256xbf16, #tpu.memory_space<vmem>>, vector<1x96x256xbf16>
    %320 = vector.shape_cast %319 : vector<1x96x256xbf16> to vector<96x256xbf16>
    %cst_371 = arith.constant dense<0.000000e+00> : vector<2x256xf32>
    %321 = tpu.matmul %318, %320, %cst_371 {dimension_numbers = #tpu.dot_dimension_numbers<[1], [0], [0], [1], [0, 0, 1, 1], [], []>} : vector<2x96xbf16>, vector<96x256xbf16>, vector<2x256xf32> -> vector<2x256xf32>
    %322 = arith.addf %316, %321 : vector<2x256xf32>
    %c0_372 = arith.constant 0 : index
    %c52 = arith.constant 52 : index
    %c0_373 = arith.constant 0 : index
    %c0_374 = arith.constant 0 : index
    %323 = vector.load %arg2[%c0_372, %c52, %c0_373, %c0_374] : memref<1x64x2x96xbf16, #tpu.memory_space<vmem>>, vector<1x1x2x96xbf16>
    %324 = vector.shape_cast %323 : vector<1x1x2x96xbf16> to vector<2x96xbf16>
    %c20_375 = arith.constant 20 : index
    %c0_376 = arith.constant 0 : index
    %c0_377 = arith.constant 0 : index
    %325 = vector.load %arg3[%c20_375, %c0_376, %c0_377] : memref<32x96x256xbf16, #tpu.memory_space<vmem>>, vector<1x96x256xbf16>
    %326 = vector.shape_cast %325 : vector<1x96x256xbf16> to vector<96x256xbf16>
    %cst_378 = arith.constant dense<0.000000e+00> : vector<2x256xf32>
    %327 = tpu.matmul %324, %326, %cst_378 {dimension_numbers = #tpu.dot_dimension_numbers<[1], [0], [0], [1], [0, 0, 1, 1], [], []>} : vector<2x96xbf16>, vector<96x256xbf16>, vector<2x256xf32> -> vector<2x256xf32>
    %328 = arith.addf %322, %327 : vector<2x256xf32>
    %c0_379 = arith.constant 0 : index
    %c53 = arith.constant 53 : index
    %c0_380 = arith.constant 0 : index
    %c0_381 = arith.constant 0 : index
    %329 = vector.load %arg2[%c0_379, %c53, %c0_380, %c0_381] : memref<1x64x2x96xbf16, #tpu.memory_space<vmem>>, vector<1x1x2x96xbf16>
    %330 = vector.shape_cast %329 : vector<1x1x2x96xbf16> to vector<2x96xbf16>
    %c21_382 = arith.constant 21 : index
    %c0_383 = arith.constant 0 : index
    %c0_384 = arith.constant 0 : index
    %331 = vector.load %arg3[%c21_382, %c0_383, %c0_384] : memref<32x96x256xbf16, #tpu.memory_space<vmem>>, vector<1x96x256xbf16>
    %332 = vector.shape_cast %331 : vector<1x96x256xbf16> to vector<96x256xbf16>
    %cst_385 = arith.constant dense<0.000000e+00> : vector<2x256xf32>
    %333 = tpu.matmul %330, %332, %cst_385 {dimension_numbers = #tpu.dot_dimension_numbers<[1], [0], [0], [1], [0, 0, 1, 1], [], []>} : vector<2x96xbf16>, vector<96x256xbf16>, vector<2x256xf32> -> vector<2x256xf32>
    %334 = arith.addf %328, %333 : vector<2x256xf32>
    %c0_386 = arith.constant 0 : index
    %c54 = arith.constant 54 : index
    %c0_387 = arith.constant 0 : index
    %c0_388 = arith.constant 0 : index
    %335 = vector.load %arg2[%c0_386, %c54, %c0_387, %c0_388] : memref<1x64x2x96xbf16, #tpu.memory_space<vmem>>, vector<1x1x2x96xbf16>
    %336 = vector.shape_cast %335 : vector<1x1x2x96xbf16> to vector<2x96xbf16>
    %c22_389 = arith.constant 22 : index
    %c0_390 = arith.constant 0 : index
    %c0_391 = arith.constant 0 : index
    %337 = vector.load %arg3[%c22_389, %c0_390, %c0_391] : memref<32x96x256xbf16, #tpu.memory_space<vmem>>, vector<1x96x256xbf16>
    %338 = vector.shape_cast %337 : vector<1x96x256xbf16> to vector<96x256xbf16>
    %cst_392 = arith.constant dense<0.000000e+00> : vector<2x256xf32>
    %339 = tpu.matmul %336, %338, %cst_392 {dimension_numbers = #tpu.dot_dimension_numbers<[1], [0], [0], [1], [0, 0, 1, 1], [], []>} : vector<2x96xbf16>, vector<96x256xbf16>, vector<2x256xf32> -> vector<2x256xf32>
    %340 = arith.addf %334, %339 : vector<2x256xf32>
    %c0_393 = arith.constant 0 : index
    %c55 = arith.constant 55 : index
    %c0_394 = arith.constant 0 : index
    %c0_395 = arith.constant 0 : index
    %341 = vector.load %arg2[%c0_393, %c55, %c0_394, %c0_395] : memref<1x64x2x96xbf16, #tpu.memory_space<vmem>>, vector<1x1x2x96xbf16>
    %342 = vector.shape_cast %341 : vector<1x1x2x96xbf16> to vector<2x96xbf16>
    %c23_396 = arith.constant 23 : index
    %c0_397 = arith.constant 0 : index
    %c0_398 = arith.constant 0 : index
    %343 = vector.load %arg3[%c23_396, %c0_397, %c0_398] : memref<32x96x256xbf16, #tpu.memory_space<vmem>>, vector<1x96x256xbf16>
    %344 = vector.shape_cast %343 : vector<1x96x256xbf16> to vector<96x256xbf16>
    %cst_399 = arith.constant dense<0.000000e+00> : vector<2x256xf32>
    %345 = tpu.matmul %342, %344, %cst_399 {dimension_numbers = #tpu.dot_dimension_numbers<[1], [0], [0], [1], [0, 0, 1, 1], [], []>} : vector<2x96xbf16>, vector<96x256xbf16>, vector<2x256xf32> -> vector<2x256xf32>
    %346 = arith.addf %340, %345 : vector<2x256xf32>
    %c0_400 = arith.constant 0 : index
    %c56 = arith.constant 56 : index
    %c0_401 = arith.constant 0 : index
    %c0_402 = arith.constant 0 : index
    %347 = vector.load %arg2[%c0_400, %c56, %c0_401, %c0_402] : memref<1x64x2x96xbf16, #tpu.memory_space<vmem>>, vector<1x1x2x96xbf16>
    %348 = vector.shape_cast %347 : vector<1x1x2x96xbf16> to vector<2x96xbf16>
    %c24_403 = arith.constant 24 : index
    %c0_404 = arith.constant 0 : index
    %c0_405 = arith.constant 0 : index
    %349 = vector.load %arg3[%c24_403, %c0_404, %c0_405] : memref<32x96x256xbf16, #tpu.memory_space<vmem>>, vector<1x96x256xbf16>
    %350 = vector.shape_cast %349 : vector<1x96x256xbf16> to vector<96x256xbf16>
    %cst_406 = arith.constant dense<0.000000e+00> : vector<2x256xf32>
    %351 = tpu.matmul %348, %350, %cst_406 {dimension_numbers = #tpu.dot_dimension_numbers<[1], [0], [0], [1], [0, 0, 1, 1], [], []>} : vector<2x96xbf16>, vector<96x256xbf16>, vector<2x256xf32> -> vector<2x256xf32>
    %352 = arith.addf %346, %351 : vector<2x256xf32>
    %c0_407 = arith.constant 0 : index
    %c57 = arith.constant 57 : index
    %c0_408 = arith.constant 0 : index
    %c0_409 = arith.constant 0 : index
    %353 = vector.load %arg2[%c0_407, %c57, %c0_408, %c0_409] : memref<1x64x2x96xbf16, #tpu.memory_space<vmem>>, vector<1x1x2x96xbf16>
    %354 = vector.shape_cast %353 : vector<1x1x2x96xbf16> to vector<2x96xbf16>
    %c25_410 = arith.constant 25 : index
    %c0_411 = arith.constant 0 : index
    %c0_412 = arith.constant 0 : index
    %355 = vector.load %arg3[%c25_410, %c0_411, %c0_412] : memref<32x96x256xbf16, #tpu.memory_space<vmem>>, vector<1x96x256xbf16>
    %356 = vector.shape_cast %355 : vector<1x96x256xbf16> to vector<96x256xbf16>
    %cst_413 = arith.constant dense<0.000000e+00> : vector<2x256xf32>
    %357 = tpu.matmul %354, %356, %cst_413 {dimension_numbers = #tpu.dot_dimension_numbers<[1], [0], [0], [1], [0, 0, 1, 1], [], []>} : vector<2x96xbf16>, vector<96x256xbf16>, vector<2x256xf32> -> vector<2x256xf32>
    %358 = arith.addf %352, %357 : vector<2x256xf32>
    %c0_414 = arith.constant 0 : index
    %c58 = arith.constant 58 : index
    %c0_415 = arith.constant 0 : index
    %c0_416 = arith.constant 0 : index
    %359 = vector.load %arg2[%c0_414, %c58, %c0_415, %c0_416] : memref<1x64x2x96xbf16, #tpu.memory_space<vmem>>, vector<1x1x2x96xbf16>
    %360 = vector.shape_cast %359 : vector<1x1x2x96xbf16> to vector<2x96xbf16>
    %c26_417 = arith.constant 26 : index
    %c0_418 = arith.constant 0 : index
    %c0_419 = arith.constant 0 : index
    %361 = vector.load %arg3[%c26_417, %c0_418, %c0_419] : memref<32x96x256xbf16, #tpu.memory_space<vmem>>, vector<1x96x256xbf16>
    %362 = vector.shape_cast %361 : vector<1x96x256xbf16> to vector<96x256xbf16>
    %cst_420 = arith.constant dense<0.000000e+00> : vector<2x256xf32>
    %363 = tpu.matmul %360, %362, %cst_420 {dimension_numbers = #tpu.dot_dimension_numbers<[1], [0], [0], [1], [0, 0, 1, 1], [], []>} : vector<2x96xbf16>, vector<96x256xbf16>, vector<2x256xf32> -> vector<2x256xf32>
    %364 = arith.addf %358, %363 : vector<2x256xf32>
    %c0_421 = arith.constant 0 : index
    %c59 = arith.constant 59 : index
    %c0_422 = arith.constant 0 : index
    %c0_423 = arith.constant 0 : index
    %365 = vector.load %arg2[%c0_421, %c59, %c0_422, %c0_423] : memref<1x64x2x96xbf16, #tpu.memory_space<vmem>>, vector<1x1x2x96xbf16>
    %366 = vector.shape_cast %365 : vector<1x1x2x96xbf16> to vector<2x96xbf16>
    %c27_424 = arith.constant 27 : index
    %c0_425 = arith.constant 0 : index
    %c0_426 = arith.constant 0 : index
    %367 = vector.load %arg3[%c27_424, %c0_425, %c0_426] : memref<32x96x256xbf16, #tpu.memory_space<vmem>>, vector<1x96x256xbf16>
    %368 = vector.shape_cast %367 : vector<1x96x256xbf16> to vector<96x256xbf16>
    %cst_427 = arith.constant dense<0.000000e+00> : vector<2x256xf32>
    %369 = tpu.matmul %366, %368, %cst_427 {dimension_numbers = #tpu.dot_dimension_numbers<[1], [0], [0], [1], [0, 0, 1, 1], [], []>} : vector<2x96xbf16>, vector<96x256xbf16>, vector<2x256xf32> -> vector<2x256xf32>
    %370 = arith.addf %364, %369 : vector<2x256xf32>
    %c0_428 = arith.constant 0 : index
    %c60 = arith.constant 60 : index
    %c0_429 = arith.constant 0 : index
    %c0_430 = arith.constant 0 : index
    %371 = vector.load %arg2[%c0_428, %c60, %c0_429, %c0_430] : memref<1x64x2x96xbf16, #tpu.memory_space<vmem>>, vector<1x1x2x96xbf16>
    %372 = vector.shape_cast %371 : vector<1x1x2x96xbf16> to vector<2x96xbf16>
    %c28_431 = arith.constant 28 : index
    %c0_432 = arith.constant 0 : index
    %c0_433 = arith.constant 0 : index
    %373 = vector.load %arg3[%c28_431, %c0_432, %c0_433] : memref<32x96x256xbf16, #tpu.memory_space<vmem>>, vector<1x96x256xbf16>
    %374 = vector.shape_cast %373 : vector<1x96x256xbf16> to vector<96x256xbf16>
    %cst_434 = arith.constant dense<0.000000e+00> : vector<2x256xf32>
    %375 = tpu.matmul %372, %374, %cst_434 {dimension_numbers = #tpu.dot_dimension_numbers<[1], [0], [0], [1], [0, 0, 1, 1], [], []>} : vector<2x96xbf16>, vector<96x256xbf16>, vector<2x256xf32> -> vector<2x256xf32>
    %376 = arith.addf %370, %375 : vector<2x256xf32>
    %c0_435 = arith.constant 0 : index
    %c61 = arith.constant 61 : index
    %c0_436 = arith.constant 0 : index
    %c0_437 = arith.constant 0 : index
    %377 = vector.load %arg2[%c0_435, %c61, %c0_436, %c0_437] : memref<1x64x2x96xbf16, #tpu.memory_space<vmem>>, vector<1x1x2x96xbf16>
    %378 = vector.shape_cast %377 : vector<1x1x2x96xbf16> to vector<2x96xbf16>
    %c29_438 = arith.constant 29 : index
    %c0_439 = arith.constant 0 : index
    %c0_440 = arith.constant 0 : index
    %379 = vector.load %arg3[%c29_438, %c0_439, %c0_440] : memref<32x96x256xbf16, #tpu.memory_space<vmem>>, vector<1x96x256xbf16>
    %380 = vector.shape_cast %379 : vector<1x96x256xbf16> to vector<96x256xbf16>
    %cst_441 = arith.constant dense<0.000000e+00> : vector<2x256xf32>
    %381 = tpu.matmul %378, %380, %cst_441 {dimension_numbers = #tpu.dot_dimension_numbers<[1], [0], [0], [1], [0, 0, 1, 1], [], []>} : vector<2x96xbf16>, vector<96x256xbf16>, vector<2x256xf32> -> vector<2x256xf32>
    %382 = arith.addf %376, %381 : vector<2x256xf32>
    %c0_442 = arith.constant 0 : index
    %c62 = arith.constant 62 : index
    %c0_443 = arith.constant 0 : index
    %c0_444 = arith.constant 0 : index
    %383 = vector.load %arg2[%c0_442, %c62, %c0_443, %c0_444] : memref<1x64x2x96xbf16, #tpu.memory_space<vmem>>, vector<1x1x2x96xbf16>
    %384 = vector.shape_cast %383 : vector<1x1x2x96xbf16> to vector<2x96xbf16>
    %c30_445 = arith.constant 30 : index
    %c0_446 = arith.constant 0 : index
    %c0_447 = arith.constant 0 : index
    %385 = vector.load %arg3[%c30_445, %c0_446, %c0_447] : memref<32x96x256xbf16, #tpu.memory_space<vmem>>, vector<1x96x256xbf16>
    %386 = vector.shape_cast %385 : vector<1x96x256xbf16> to vector<96x256xbf16>
    %cst_448 = arith.constant dense<0.000000e+00> : vector<2x256xf32>
    %387 = tpu.matmul %384, %386, %cst_448 {dimension_numbers = #tpu.dot_dimension_numbers<[1], [0], [0], [1], [0, 0, 1, 1], [], []>} : vector<2x96xbf16>, vector<96x256xbf16>, vector<2x256xf32> -> vector<2x256xf32>
    %388 = arith.addf %382, %387 : vector<2x256xf32>
    %c0_449 = arith.constant 0 : index
    %c63 = arith.constant 63 : index
    %c0_450 = arith.constant 0 : index
    %c0_451 = arith.constant 0 : index
    %389 = vector.load %arg2[%c0_449, %c63, %c0_450, %c0_451] : memref<1x64x2x96xbf16, #tpu.memory_space<vmem>>, vector<1x1x2x96xbf16>
    %390 = vector.shape_cast %389 : vector<1x1x2x96xbf16> to vector<2x96xbf16>
    %c31_452 = arith.constant 31 : index
    %c0_453 = arith.constant 0 : index
    %c0_454 = arith.constant 0 : index
    %391 = vector.load %arg3[%c31_452, %c0_453, %c0_454] : memref<32x96x256xbf16, #tpu.memory_space<vmem>>, vector<1x96x256xbf16>
    %392 = vector.shape_cast %391 : vector<1x96x256xbf16> to vector<96x256xbf16>
    %cst_455 = arith.constant dense<0.000000e+00> : vector<2x256xf32>
    %393 = tpu.matmul %390, %392, %cst_455 {dimension_numbers = #tpu.dot_dimension_numbers<[1], [0], [0], [1], [0, 0, 1, 1], [], []>} : vector<2x96xbf16>, vector<96x256xbf16>, vector<2x256xf32> -> vector<2x256xf32>
    %394 = arith.addf %388, %393 : vector<2x256xf32>
    %c0_456 = arith.constant 0 : index
    %c0_457 = arith.constant 0 : index
    %395 = vector.load %arg4[%c0_456, %c0_457] : memref<1x256xf32, #tpu.memory_space<vmem>>, vector<1x256xf32>
    %396 = vector.broadcast %395 : vector<1x256xf32> to vector<2x256xf32>
    %397 = arith.addf %394, %396 : vector<2x256xf32>
    %cst_458 = arith.constant 0.000000e+00 : f32
    %398 = vector.broadcast %cst_458 : f32 to vector<2x256xf32>
    %399 = arith.maximumf %397, %398 : vector<2x256xf32>
    %400 = arith.truncf %399 : vector<2x256xf32> to vector<2x256xbf16>
    %c0_459 = arith.constant 0 : index
    %c1_460 = arith.constant 1 : index
    %c0_461 = arith.constant 0 : index
    %c0_462 = arith.constant 0 : index
    %401 = vector.load %arg5[%c0_459, %c1_460, %c0_461, %c0_462] : memref<1x2x2x256xbf16, #tpu.memory_space<vmem>>, vector<1x1x2x256xbf16>
    %402 = vector.shape_cast %401 : vector<1x1x2x256xbf16> to vector<2x256xbf16>
    %403 = vector.shape_cast %400 : vector<2x256xbf16> to vector<1x1x2x256xbf16>
    tpu.vector_store %arg5[%c0_459, %c1_460, %c0_461, %c0_462], %403 {strides = array<i32>} : memref<1x2x2x256xbf16, #tpu.memory_space<vmem>>, vector<1x1x2x256xbf16>,
    return
  }
  func.func @transform_0(%arg0: i32, %arg1: i32) -> (i32, i32, i32, i32) {
    %c0_i32 = arith.constant 0 : i32
    %c0_i32_0 = arith.constant 0 : i32
    %c0_i32_1 = arith.constant 0 : i32
    return %arg0, %arg1, %c0_i32, %c0_i32_0 : i32, i32, i32, i32
  }
  func.func @transform_1(%arg0: i32, %arg1: i32) -> (i32, i32, i32) {
    %c0_i32 = arith.constant 0 : i32
    %c0_i32_0 = arith.constant 0 : i32
    %c0_i32_1 = arith.constant 0 : i32
    %c0_i32_2 = arith.constant 0 : i32
    return %c0_i32, %c0_i32_0, %c0_i32_1 : i32, i32, i32
  }
  func.func @transform_2(%arg0: i32, %arg1: i32) -> (i32, i32) {
    %c0_i32 = arith.constant 0 : i32
    %c0_i32_0 = arith.constant 0 : i32
    %c0_i32_1 = arith.constant 0 : i32
    return %c0_i32, %c0_i32_0 : i32, i32
  }
  func.func @transform_3(%arg0: i32, %arg1: i32) -> (i32, i32, i32, i32) {
    %c0_i32 = arith.constant 0 : i32
    %c0_i32_0 = arith.constant 0 : i32
    %c0_i32_1 = arith.constant 0 : i32
    return %arg0, %arg1, %c0_i32, %c0_i32_0 : i32, i32, i32, i32
  }
}

module attributes {stable_mosaic.version = 11 : i64} {
  func.func @_layer4_patch_conv_kernel(%arg0: i32, %arg1: i32, %arg2: memref<1x64x2x96xbf16, #tpu.memory_space<vmem>>, %arg3: memref<32x96x256xbf16, #tpu.memory_space<vmem>>, %arg4: memref<1x256xf32, #tpu.memory_space<vmem>>, %arg5: memref<1x2x2x256xbf16, #tpu.memory_space<vmem>>) attributes {dimension_semantics = [#tpu.dimension_semantics<parallel>, #tpu.dimension_semantics<parallel>], iteration_bounds = array<i64: 2, 1>, scalar_prefetch = 0 : i64, scratch_operands = 0 : i64, tpu.core_type = #tpu.core_type<tc>, window_params = [{transform_indices = @transform_0, window_bounds = array<i64: 1, 64, 2, 96>}, {pipeline_mode = #tpu.pipeline_mode<synchronous>, transform_indices = @transform_1, window_bounds = array<i64: 32, 96, 256>}, {pipeline_mode = #tpu.pipeline_mode<synchronous>, transform_indices = @transform_2, window_bounds = array<i64: 1, 256>}, {transform_indices = @transform_3, window_bounds = array<i64: 1, 2, 2, 256>}]} {
    %cst = arith.constant 0.000000e+00 : f32
    %0 = vector.broadcast %cst : f32 to vector<2x256xf32>
    %c0 = arith.constant 0 : index
    %c0_0 = arith.constant 0 : index
    %c0_1 = arith.constant 0 : index
    %c0_2 = arith.constant 0 : index
    %1 = vector.load %arg2[%c0, %c0_0, %c0_1, %c0_2] : memref<1x64x2x96xbf16, #tpu.memory_space<vmem>>, vector<1x1x2x96xbf16>
    %2 = vector.shape_cast %1 : vector<1x1x2x96xbf16> to vector<2x96xbf16>
    %c0_3 = arith.constant 0 : index
    %c0_4 = arith.constant 0 : index
    %c0_5 = arith.constant 0 : index
    %3 = vector.load %arg3[%c0_3, %c0_4, %c0_5] : memref<32x96x256xbf16, #tpu.memory_space<vmem>>, vector<1x96x256xbf16>
    %4 = vector.shape_cast %3 : vector<1x96x256xbf16> to vector<96x256xbf16>
    %cst_6 = arith.constant dense<0.000000e+00> : vector<2x256xf32>
    %5 = tpu.matmul %2, %4, %cst_6 {dimension_numbers = #tpu.dot_dimension_numbers<[1], [0], [0], [1], [0, 0, 1, 1], [], []>} : vector<2x96xbf16>, vector<96x256xbf16>, vector<2x256xf32> -> vector<2x256xf32>
    %6 = arith.addf %0, %5 : vector<2x256xf32>
    %c0_7 = arith.constant 0 : index
    %c1 = arith.constant 1 : index
    %c0_8 = arith.constant 0 : index
    %c0_9 = arith.constant 0 : index
    %7 = vector.load %arg2[%c0_7, %c1, %c0_8, %c0_9] : memref<1x64x2x96xbf16, #tpu.memory_space<vmem>>, vector<1x1x2x96xbf16>
    %8 = vector.shape_cast %7 : vector<1x1x2x96xbf16> to vector<2x96xbf16>
    %c1_10 = arith.constant 1 : index
    %c0_11 = arith.constant 0 : index
    %c0_12 = arith.constant 0 : index
    %9 = vector.load %arg3[%c1_10, %c0_11, %c0_12] : memref<32x96x256xbf16, #tpu.memory_space<vmem>>, vector<1x96x256xbf16>
    %10 = vector.shape_cast %9 : vector<1x96x256xbf16> to vector<96x256xbf16>
    %cst_13 = arith.constant dense<0.000000e+00> : vector<2x256xf32>
    %11 = tpu.matmul %8, %10, %cst_13 {dimension_numbers = #tpu.dot_dimension_numbers<[1], [0], [0], [1], [0, 0, 1, 1], [], []>} : vector<2x96xbf16>, vector<96x256xbf16>, vector<2x256xf32> -> vector<2x256xf32>
    %12 = arith.addf %6, %11 : vector<2x256xf32>
    %c0_14 = arith.constant 0 : index
    %c2 = arith.constant 2 : index
    %c0_15 = arith.constant 0 : index
    %c0_16 = arith.constant 0 : index
    %13 = vector.load %arg2[%c0_14, %c2, %c0_15, %c0_16] : memref<1x64x2x96xbf16, #tpu.memory_space<vmem>>, vector<1x1x2x96xbf16>
    %14 = vector.shape_cast %13 : vector<1x1x2x96xbf16> to vector<2x96xbf16>
    %c2_17 = arith.constant 2 : index
    %c0_18 = arith.constant 0 : index
    %c0_19 = arith.constant 0 : index
    %15 = vector.load %arg3[%c2_17, %c0_18, %c0_19] : memref<32x96x256xbf16, #tpu.memory_space<vmem>>, vector<1x96x256xbf16>
    %16 = vector.shape_cast %15 : vector<1x96x256xbf16> to vector<96x256xbf16>
    %cst_20 = arith.constant dense<0.000000e+00> : vector<2x256xf32>
    %17 = tpu.matmul %14, %16, %cst_20 {dimension_numbers = #tpu.dot_dimension_numbers<[1], [0], [0], [1], [0, 0, 1, 1], [], []>} : vector<2x96xbf16>, vector<96x256xbf16>, vector<2x256xf32> -> vector<2x256xf32>
    %18 = arith.addf %12, %17 : vector<2x256xf32>
    %c0_21 = arith.constant 0 : index
    %c3 = arith.constant 3 : index
    %c0_22 = arith.constant 0 : index
    %c0_23 = arith.constant 0 : index
    %19 = vector.load %arg2[%c0_21, %c3, %c0_22, %c0_23] : memref<1x64x2x96xbf16, #tpu.memory_space<vmem>>, vector<1x1x2x96xbf16>
    %20 = vector.shape_cast %19 : vector<1x1x2x96xbf16> to vector<2x96xbf16>
    %c3_24 = arith.constant 3 : index
    %c0_25 = arith.constant 0 : index
    %c0_26 = arith.constant 0 : index
    %21 = vector.load %arg3[%c3_24, %c0_25, %c0_26] : memref<32x96x256xbf16, #tpu.memory_space<vmem>>, vector<1x96x256xbf16>
    %22 = vector.shape_cast %21 : vector<1x96x256xbf16> to vector<96x256xbf16>
    %cst_27 = arith.constant dense<0.000000e+00> : vector<2x256xf32>
    %23 = tpu.matmul %20, %22, %cst_27 {dimension_numbers = #tpu.dot_dimension_numbers<[1], [0], [0], [1], [0, 0, 1, 1], [], []>} : vector<2x96xbf16>, vector<96x256xbf16>, vector<2x256xf32> -> vector<2x256xf32>
    %24 = arith.addf %18, %23 : vector<2x256xf32>
    %c0_28 = arith.constant 0 : index
    %c4 = arith.constant 4 : index
    %c0_29 = arith.constant 0 : index
    %c0_30 = arith.constant 0 : index
    %25 = vector.load %arg2[%c0_28, %c4, %c0_29, %c0_30] : memref<1x64x2x96xbf16, #tpu.memory_space<vmem>>, vector<1x1x2x96xbf16>
    %26 = vector.shape_cast %25 : vector<1x1x2x96xbf16> to vector<2x96xbf16>
    %c4_31 = arith.constant 4 : index
    %c0_32 = arith.constant 0 : index
    %c0_33 = arith.constant 0 : index
    %27 = vector.load %arg3[%c4_31, %c0_32, %c0_33] : memref<32x96x256xbf16, #tpu.memory_space<vmem>>, vector<1x96x256xbf16>
    %28 = vector.shape_cast %27 : vector<1x96x256xbf16> to vector<96x256xbf16>
    %cst_34 = arith.constant dense<0.000000e+00> : vector<2x256xf32>
    %29 = tpu.matmul %26, %28, %cst_34 {dimension_numbers = #tpu.dot_dimension_numbers<[1], [0], [0], [1], [0, 0, 1, 1], [], []>} : vector<2x96xbf16>, vector<96x256xbf16>, vector<2x256xf32> -> vector<2x256xf32>
    %30 = arith.addf %24, %29 : vector<2x256xf32>
    %c0_35 = arith.constant 0 : index
    %c5 = arith.constant 5 : index
    %c0_36 = arith.constant 0 : index
    %c0_37 = arith.constant 0 : index
    %31 = vector.load %arg2[%c0_35, %c5, %c0_36, %c0_37] : memref<1x64x2x96xbf16, #tpu.memory_space<vmem>>, vector<1x1x2x96xbf16>
    %32 = vector.shape_cast %31 : vector<1x1x2x96xbf16> to vector<2x96xbf16>
    %c5_38 = arith.constant 5 : index
    %c0_39 = arith.constant 0 : index
    %c0_40 = arith.constant 0 : index
    %33 = vector.load %arg3[%c5_38, %c0_39, %c0_40] : memref<32x96x256xbf16, #tpu.memory_space<vmem>>, vector<1x96x256xbf16>
    %34 = vector.shape_cast %33 : vector<1x96x256xbf16> to vector<96x256xbf16>
    %cst_41 = arith.constant dense<0.000000e+00> : vector<2x256xf32>
    %35 = tpu.matmul %32, %34, %cst_41 {dimension_numbers = #tpu.dot_dimension_numbers<[1], [0], [0], [1], [0, 0, 1, 1], [], []>} : vector<2x96xbf16>, vector<96x256xbf16>, vector<2x256xf32> -> vector<2x256xf32>
    %36 = arith.addf %30, %35 : vector<2x256xf32>
    %c0_42 = arith.constant 0 : index
    %c6 = arith.constant 6 : index
    %c0_43 = arith.constant 0 : index
    %c0_44 = arith.constant 0 : index
    %37 = vector.load %arg2[%c0_42, %c6, %c0_43, %c0_44] : memref<1x64x2x96xbf16, #tpu.memory_space<vmem>>, vector<1x1x2x96xbf16>
    %38 = vector.shape_cast %37 : vector<1x1x2x96xbf16> to vector<2x96xbf16>
    %c6_45 = arith.constant 6 : index
    %c0_46 = arith.constant 0 : index
    %c0_47 = arith.constant 0 : index
    %39 = vector.load %arg3[%c6_45, %c0_46, %c0_47] : memref<32x96x256xbf16, #tpu.memory_space<vmem>>, vector<1x96x256xbf16>
    %40 = vector.shape_cast %39 : vector<1x96x256xbf16> to vector<96x256xbf16>
    %cst_48 = arith.constant dense<0.000000e+00> : vector<2x256xf32>
    %41 = tpu.matmul %38, %40, %cst_48 {dimension_numbers = #tpu.dot_dimension_numbers<[1], [0], [0], [1], [0, 0, 1, 1], [], []>} : vector<2x96xbf16>, vector<96x256xbf16>, vector<2x256xf32> -> vector<2x256xf32>
    %42 = arith.addf %36, %41 : vector<2x256xf32>
    %c0_49 = arith.constant 0 : index
    %c7 = arith.constant 7 : index
    %c0_50 = arith.constant 0 : index
    %c0_51 = arith.constant 0 : index
    %43 = vector.load %arg2[%c0_49, %c7, %c0_50, %c0_51] : memref<1x64x2x96xbf16, #tpu.memory_space<vmem>>, vector<1x1x2x96xbf16>
    %44 = vector.shape_cast %43 : vector<1x1x2x96xbf16> to vector<2x96xbf16>
    %c7_52 = arith.constant 7 : index
    %c0_53 = arith.constant 0 : index
    %c0_54 = arith.constant 0 : index
    %45 = vector.load %arg3[%c7_52, %c0_53, %c0_54] : memref<32x96x256xbf16, #tpu.memory_space<vmem>>, vector<1x96x256xbf16>
    %46 = vector.shape_cast %45 : vector<1x96x256xbf16> to vector<96x256xbf16>
    %cst_55 = arith.constant dense<0.000000e+00> : vector<2x256xf32>
    %47 = tpu.matmul %44, %46, %cst_55 {dimension_numbers = #tpu.dot_dimension_numbers<[1], [0], [0], [1], [0, 0, 1, 1], [], []>} : vector<2x96xbf16>, vector<96x256xbf16>, vector<2x256xf32> -> vector<2x256xf32>
    %48 = arith.addf %42, %47 : vector<2x256xf32>
    %c0_56 = arith.constant 0 : index
    %c8 = arith.constant 8 : index
    %c0_57 = arith.constant 0 : index
    %c0_58 = arith.constant 0 : index
    %49 = vector.load %arg2[%c0_56, %c8, %c0_57, %c0_58] : memref<1x64x2x96xbf16, #tpu.memory_space<vmem>>, vector<1x1x2x96xbf16>
    %50 = vector.shape_cast %49 : vector<1x1x2x96xbf16> to vector<2x96xbf16>
    %c8_59 = arith.constant 8 : index
    %c0_60 = arith.constant 0 : index
    %c0_61 = arith.constant 0 : index
    %51 = vector.load %arg3[%c8_59, %c0_60, %c0_61] : memref<32x96x256xbf16, #tpu.memory_space<vmem>>, vector<1x96x256xbf16>
    %52 = vector.shape_cast %51 : vector<1x96x256xbf16> to vector<96x256xbf16>
    %cst_62 = arith.constant dense<0.000000e+00> : vector<2x256xf32>
    %53 = tpu.matmul %50, %52, %cst_62 {dimension_numbers = #tpu.dot_dimension_numbers<[1], [0], [0], [1], [0, 0, 1, 1], [], []>} : vector<2x96xbf16>, vector<96x256xbf16>, vector<2x256xf32> -> vector<2x256xf32>
    %54 = arith.addf %48, %53 : vector<2x256xf32>
    %c0_63 = arith.constant 0 : index
    %c9 = arith.constant 9 : index
    %c0_64 = arith.constant 0 : index
    %c0_65 = arith.constant 0 : index
    %55 = vector.load %arg2[%c0_63, %c9, %c0_64, %c0_65] : memref<1x64x2x96xbf16, #tpu.memory_space<vmem>>, vector<1x1x2x96xbf16>
    %56 = vector.shape_cast %55 : vector<1x1x2x96xbf16> to vector<2x96xbf16>
    %c9_66 = arith.constant 9 : index
    %c0_67 = arith.constant 0 : index
    %c0_68 = arith.constant 0 : index
    %57 = vector.load %arg3[%c9_66, %c0_67, %c0_68] : memref<32x96x256xbf16, #tpu.memory_space<vmem>>, vector<1x96x256xbf16>
    %58 = vector.shape_cast %57 : vector<1x96x256xbf16> to vector<96x256xbf16>
    %cst_69 = arith.constant dense<0.000000e+00> : vector<2x256xf32>
    %59 = tpu.matmul %56, %58, %cst_69 {dimension_numbers = #tpu.dot_dimension_numbers<[1], [0], [0], [1], [0, 0, 1, 1], [], []>} : vector<2x96xbf16>, vector<96x256xbf16>, vector<2x256xf32> -> vector<2x256xf32>
    %60 = arith.addf %54, %59 : vector<2x256xf32>
    %c0_70 = arith.constant 0 : index
    %c10 = arith.constant 10 : index
    %c0_71 = arith.constant 0 : index
    %c0_72 = arith.constant 0 : index
    %61 = vector.load %arg2[%c0_70, %c10, %c0_71, %c0_72] : memref<1x64x2x96xbf16, #tpu.memory_space<vmem>>, vector<1x1x2x96xbf16>
    %62 = vector.shape_cast %61 : vector<1x1x2x96xbf16> to vector<2x96xbf16>
    %c10_73 = arith.constant 10 : index
    %c0_74 = arith.constant 0 : index
    %c0_75 = arith.constant 0 : index
    %63 = vector.load %arg3[%c10_73, %c0_74, %c0_75] : memref<32x96x256xbf16, #tpu.memory_space<vmem>>, vector<1x96x256xbf16>
    %64 = vector.shape_cast %63 : vector<1x96x256xbf16> to vector<96x256xbf16>
    %cst_76 = arith.constant dense<0.000000e+00> : vector<2x256xf32>
    %65 = tpu.matmul %62, %64, %cst_76 {dimension_numbers = #tpu.dot_dimension_numbers<[1], [0], [0], [1], [0, 0, 1, 1], [], []>} : vector<2x96xbf16>, vector<96x256xbf16>, vector<2x256xf32> -> vector<2x256xf32>
    %66 = arith.addf %60, %65 : vector<2x256xf32>
    %c0_77 = arith.constant 0 : index
    %c11 = arith.constant 11 : index
    %c0_78 = arith.constant 0 : index
    %c0_79 = arith.constant 0 : index
    %67 = vector.load %arg2[%c0_77, %c11, %c0_78, %c0_79] : memref<1x64x2x96xbf16, #tpu.memory_space<vmem>>, vector<1x1x2x96xbf16>
    %68 = vector.shape_cast %67 : vector<1x1x2x96xbf16> to vector<2x96xbf16>
    %c11_80 = arith.constant 11 : index
    %c0_81 = arith.constant 0 : index
    %c0_82 = arith.constant 0 : index
    %69 = vector.load %arg3[%c11_80, %c0_81, %c0_82] : memref<32x96x256xbf16, #tpu.memory_space<vmem>>, vector<1x96x256xbf16>
    %70 = vector.shape_cast %69 : vector<1x96x256xbf16> to vector<96x256xbf16>
    %cst_83 = arith.constant dense<0.000000e+00> : vector<2x256xf32>
    %71 = tpu.matmul %68, %70, %cst_83 {dimension_numbers = #tpu.dot_dimension_numbers<[1], [0], [0], [1], [0, 0, 1, 1], [], []>} : vector<2x96xbf16>, vector<96x256xbf16>, vector<2x256xf32> -> vector<2x256xf32>
    %72 = arith.addf %66, %71 : vector<2x256xf32>
    %c0_84 = arith.constant 0 : index
    %c12 = arith.constant 12 : index
    %c0_85 = arith.constant 0 : index
    %c0_86 = arith.constant 0 : index
    %73 = vector.load %arg2[%c0_84, %c12, %c0_85, %c0_86] : memref<1x64x2x96xbf16, #tpu.memory_space<vmem>>, vector<1x1x2x96xbf16>
    %74 = vector.shape_cast %73 : vector<1x1x2x96xbf16> to vector<2x96xbf16>
    %c12_87 = arith.constant 12 : index
    %c0_88 = arith.constant 0 : index
    %c0_89 = arith.constant 0 : index
    %75 = vector.load %arg3[%c12_87, %c0_88, %c0_89] : memref<32x96x256xbf16, #tpu.memory_space<vmem>>, vector<1x96x256xbf16>
    %76 = vector.shape_cast %75 : vector<1x96x256xbf16> to vector<96x256xbf16>
    %cst_90 = arith.constant dense<0.000000e+00> : vector<2x256xf32>
    %77 = tpu.matmul %74, %76, %cst_90 {dimension_numbers = #tpu.dot_dimension_numbers<[1], [0], [0], [1], [0, 0, 1, 1], [], []>} : vector<2x96xbf16>, vector<96x256xbf16>, vector<2x256xf32> -> vector<2x256xf32>
    %78 = arith.addf %72, %77 : vector<2x256xf32>
    %c0_91 = arith.constant 0 : index
    %c13 = arith.constant 13 : index
    %c0_92 = arith.constant 0 : index
    %c0_93 = arith.constant 0 : index
    %79 = vector.load %arg2[%c0_91, %c13, %c0_92, %c0_93] : memref<1x64x2x96xbf16, #tpu.memory_space<vmem>>, vector<1x1x2x96xbf16>
    %80 = vector.shape_cast %79 : vector<1x1x2x96xbf16> to vector<2x96xbf16>
    %c13_94 = arith.constant 13 : index
    %c0_95 = arith.constant 0 : index
    %c0_96 = arith.constant 0 : index
    %81 = vector.load %arg3[%c13_94, %c0_95, %c0_96] : memref<32x96x256xbf16, #tpu.memory_space<vmem>>, vector<1x96x256xbf16>
    %82 = vector.shape_cast %81 : vector<1x96x256xbf16> to vector<96x256xbf16>
    %cst_97 = arith.constant dense<0.000000e+00> : vector<2x256xf32>
    %83 = tpu.matmul %80, %82, %cst_97 {dimension_numbers = #tpu.dot_dimension_numbers<[1], [0], [0], [1], [0, 0, 1, 1], [], []>} : vector<2x96xbf16>, vector<96x256xbf16>, vector<2x256xf32> -> vector<2x256xf32>
    %84 = arith.addf %78, %83 : vector<2x256xf32>
    %c0_98 = arith.constant 0 : index
    %c14 = arith.constant 14 : index
    %c0_99 = arith.constant 0 : index
    %c0_100 = arith.constant 0 : index
    %85 = vector.load %arg2[%c0_98, %c14, %c0_99, %c0_100] : memref<1x64x2x96xbf16, #tpu.memory_space<vmem>>, vector<1x1x2x96xbf16>
    %86 = vector.shape_cast %85 : vector<1x1x2x96xbf16> to vector<2x96xbf16>
    %c14_101 = arith.constant 14 : index
    %c0_102 = arith.constant 0 : index
    %c0_103 = arith.constant 0 : index
    %87 = vector.load %arg3[%c14_101, %c0_102, %c0_103] : memref<32x96x256xbf16, #tpu.memory_space<vmem>>, vector<1x96x256xbf16>
    %88 = vector.shape_cast %87 : vector<1x96x256xbf16> to vector<96x256xbf16>
    %cst_104 = arith.constant dense<0.000000e+00> : vector<2x256xf32>
    %89 = tpu.matmul %86, %88, %cst_104 {dimension_numbers = #tpu.dot_dimension_numbers<[1], [0], [0], [1], [0, 0, 1, 1], [], []>} : vector<2x96xbf16>, vector<96x256xbf16>, vector<2x256xf32> -> vector<2x256xf32>
    %90 = arith.addf %84, %89 : vector<2x256xf32>
    %c0_105 = arith.constant 0 : index
    %c15 = arith.constant 15 : index
    %c0_106 = arith.constant 0 : index
    %c0_107 = arith.constant 0 : index
    %91 = vector.load %arg2[%c0_105, %c15, %c0_106, %c0_107] : memref<1x64x2x96xbf16, #tpu.memory_space<vmem>>, vector<1x1x2x96xbf16>
    %92 = vector.shape_cast %91 : vector<1x1x2x96xbf16> to vector<2x96xbf16>
    %c15_108 = arith.constant 15 : index
    %c0_109 = arith.constant 0 : index
    %c0_110 = arith.constant 0 : index
    %93 = vector.load %arg3[%c15_108, %c0_109, %c0_110] : memref<32x96x256xbf16, #tpu.memory_space<vmem>>, vector<1x96x256xbf16>
    %94 = vector.shape_cast %93 : vector<1x96x256xbf16> to vector<96x256xbf16>
    %cst_111 = arith.constant dense<0.000000e+00> : vector<2x256xf32>
    %95 = tpu.matmul %92, %94, %cst_111 {dimension_numbers = #tpu.dot_dimension_numbers<[1], [0], [0], [1], [0, 0, 1, 1], [], []>} : vector<2x96xbf16>, vector<96x256xbf16>, vector<2x256xf32> -> vector<2x256xf32>
    %96 = arith.addf %90, %95 : vector<2x256xf32>
    %c0_112 = arith.constant 0 : index
    %c16 = arith.constant 16 : index
    %c0_113 = arith.constant 0 : index
    %c0_114 = arith.constant 0 : index
    %97 = vector.load %arg2[%c0_112, %c16, %c0_113, %c0_114] : memref<1x64x2x96xbf16, #tpu.memory_space<vmem>>, vector<1x1x2x96xbf16>
    %98 = vector.shape_cast %97 : vector<1x1x2x96xbf16> to vector<2x96xbf16>
    %c16_115 = arith.constant 16 : index
    %c0_116 = arith.constant 0 : index
    %c0_117 = arith.constant 0 : index
    %99 = vector.load %arg3[%c16_115, %c0_116, %c0_117] : memref<32x96x256xbf16, #tpu.memory_space<vmem>>, vector<1x96x256xbf16>
    %100 = vector.shape_cast %99 : vector<1x96x256xbf16> to vector<96x256xbf16>
    %cst_118 = arith.constant dense<0.000000e+00> : vector<2x256xf32>
    %101 = tpu.matmul %98, %100, %cst_118 {dimension_numbers = #tpu.dot_dimension_numbers<[1], [0], [0], [1], [0, 0, 1, 1], [], []>} : vector<2x96xbf16>, vector<96x256xbf16>, vector<2x256xf32> -> vector<2x256xf32>
    %102 = arith.addf %96, %101 : vector<2x256xf32>
    %c0_119 = arith.constant 0 : index
    %c17 = arith.constant 17 : index
    %c0_120 = arith.constant 0 : index
    %c0_121 = arith.constant 0 : index
    %103 = vector.load %arg2[%c0_119, %c17, %c0_120, %c0_121] : memref<1x64x2x96xbf16, #tpu.memory_space<vmem>>, vector<1x1x2x96xbf16>
    %104 = vector.shape_cast %103 : vector<1x1x2x96xbf16> to vector<2x96xbf16>
    %c17_122 = arith.constant 17 : index
    %c0_123 = arith.constant 0 : index
    %c0_124 = arith.constant 0 : index
    %105 = vector.load %arg3[%c17_122, %c0_123, %c0_124] : memref<32x96x256xbf16, #tpu.memory_space<vmem>>, vector<1x96x256xbf16>
    %106 = vector.shape_cast %105 : vector<1x96x256xbf16> to vector<96x256xbf16>
    %cst_125 = arith.constant dense<0.000000e+00> : vector<2x256xf32>
    %107 = tpu.matmul %104, %106, %cst_125 {dimension_numbers = #tpu.dot_dimension_numbers<[1], [0], [0], [1], [0, 0, 1, 1], [], []>} : vector<2x96xbf16>, vector<96x256xbf16>, vector<2x256xf32> -> vector<2x256xf32>
    %108 = arith.addf %102, %107 : vector<2x256xf32>
    %c0_126 = arith.constant 0 : index
    %c18 = arith.constant 18 : index
    %c0_127 = arith.constant 0 : index
    %c0_128 = arith.constant 0 : index
    %109 = vector.load %arg2[%c0_126, %c18, %c0_127, %c0_128] : memref<1x64x2x96xbf16, #tpu.memory_space<vmem>>, vector<1x1x2x96xbf16>
    %110 = vector.shape_cast %109 : vector<1x1x2x96xbf16> to vector<2x96xbf16>
    %c18_129 = arith.constant 18 : index
    %c0_130 = arith.constant 0 : index
    %c0_131 = arith.constant 0 : index
    %111 = vector.load %arg3[%c18_129, %c0_130, %c0_131] : memref<32x96x256xbf16, #tpu.memory_space<vmem>>, vector<1x96x256xbf16>
    %112 = vector.shape_cast %111 : vector<1x96x256xbf16> to vector<96x256xbf16>
    %cst_132 = arith.constant dense<0.000000e+00> : vector<2x256xf32>
    %113 = tpu.matmul %110, %112, %cst_132 {dimension_numbers = #tpu.dot_dimension_numbers<[1], [0], [0], [1], [0, 0, 1, 1], [], []>} : vector<2x96xbf16>, vector<96x256xbf16>, vector<2x256xf32> -> vector<2x256xf32>
    %114 = arith.addf %108, %113 : vector<2x256xf32>
    %c0_133 = arith.constant 0 : index
    %c19 = arith.constant 19 : index
    %c0_134 = arith.constant 0 : index
    %c0_135 = arith.constant 0 : index
    %115 = vector.load %arg2[%c0_133, %c19, %c0_134, %c0_135] : memref<1x64x2x96xbf16, #tpu.memory_space<vmem>>, vector<1x1x2x96xbf16>
    %116 = vector.shape_cast %115 : vector<1x1x2x96xbf16> to vector<2x96xbf16>
    %c19_136 = arith.constant 19 : index
    %c0_137 = arith.constant 0 : index
    %c0_138 = arith.constant 0 : index
    %117 = vector.load %arg3[%c19_136, %c0_137, %c0_138] : memref<32x96x256xbf16, #tpu.memory_space<vmem>>, vector<1x96x256xbf16>
    %118 = vector.shape_cast %117 : vector<1x96x256xbf16> to vector<96x256xbf16>
    %cst_139 = arith.constant dense<0.000000e+00> : vector<2x256xf32>
    %119 = tpu.matmul %116, %118, %cst_139 {dimension_numbers = #tpu.dot_dimension_numbers<[1], [0], [0], [1], [0, 0, 1, 1], [], []>} : vector<2x96xbf16>, vector<96x256xbf16>, vector<2x256xf32> -> vector<2x256xf32>
    %120 = arith.addf %114, %119 : vector<2x256xf32>
    %c0_140 = arith.constant 0 : index
    %c20 = arith.constant 20 : index
    %c0_141 = arith.constant 0 : index
    %c0_142 = arith.constant 0 : index
    %121 = vector.load %arg2[%c0_140, %c20, %c0_141, %c0_142] : memref<1x64x2x96xbf16, #tpu.memory_space<vmem>>, vector<1x1x2x96xbf16>
    %122 = vector.shape_cast %121 : vector<1x1x2x96xbf16> to vector<2x96xbf16>
    %c20_143 = arith.constant 20 : index
    %c0_144 = arith.constant 0 : index
    %c0_145 = arith.constant 0 : index
    %123 = vector.load %arg3[%c20_143, %c0_144, %c0_145] : memref<32x96x256xbf16, #tpu.memory_space<vmem>>, vector<1x96x256xbf16>
    %124 = vector.shape_cast %123 : vector<1x96x256xbf16> to vector<96x256xbf16>
    %cst_146 = arith.constant dense<0.000000e+00> : vector<2x256xf32>
    %125 = tpu.matmul %122, %124, %cst_146 {dimension_numbers = #tpu.dot_dimension_numbers<[1], [0], [0], [1], [0, 0, 1, 1], [], []>} : vector<2x96xbf16>, vector<96x256xbf16>, vector<2x256xf32> -> vector<2x256xf32>
    %126 = arith.addf %120, %125 : vector<2x256xf32>
    %c0_147 = arith.constant 0 : index
    %c21 = arith.constant 21 : index
    %c0_148 = arith.constant 0 : index
    %c0_149 = arith.constant 0 : index
    %127 = vector.load %arg2[%c0_147, %c21, %c0_148, %c0_149] : memref<1x64x2x96xbf16, #tpu.memory_space<vmem>>, vector<1x1x2x96xbf16>
    %128 = vector.shape_cast %127 : vector<1x1x2x96xbf16> to vector<2x96xbf16>
    %c21_150 = arith.constant 21 : index
    %c0_151 = arith.constant 0 : index
    %c0_152 = arith.constant 0 : index
    %129 = vector.load %arg3[%c21_150, %c0_151, %c0_152] : memref<32x96x256xbf16, #tpu.memory_space<vmem>>, vector<1x96x256xbf16>
    %130 = vector.shape_cast %129 : vector<1x96x256xbf16> to vector<96x256xbf16>
    %cst_153 = arith.constant dense<0.000000e+00> : vector<2x256xf32>
    %131 = tpu.matmul %128, %130, %cst_153 {dimension_numbers = #tpu.dot_dimension_numbers<[1], [0], [0], [1], [0, 0, 1, 1], [], []>} : vector<2x96xbf16>, vector<96x256xbf16>, vector<2x256xf32> -> vector<2x256xf32>
    %132 = arith.addf %126, %131 : vector<2x256xf32>
    %c0_154 = arith.constant 0 : index
    %c22 = arith.constant 22 : index
    %c0_155 = arith.constant 0 : index
    %c0_156 = arith.constant 0 : index
    %133 = vector.load %arg2[%c0_154, %c22, %c0_155, %c0_156] : memref<1x64x2x96xbf16, #tpu.memory_space<vmem>>, vector<1x1x2x96xbf16>
    %134 = vector.shape_cast %133 : vector<1x1x2x96xbf16> to vector<2x96xbf16>
    %c22_157 = arith.constant 22 : index
    %c0_158 = arith.constant 0 : index
    %c0_159 = arith.constant 0 : index
    %135 = vector.load %arg3[%c22_157, %c0_158, %c0_159] : memref<32x96x256xbf16, #tpu.memory_space<vmem>>, vector<1x96x256xbf16>
    %136 = vector.shape_cast %135 : vector<1x96x256xbf16> to vector<96x256xbf16>
    %cst_160 = arith.constant dense<0.000000e+00> : vector<2x256xf32>
    %137 = tpu.matmul %134, %136, %cst_160 {dimension_numbers = #tpu.dot_dimension_numbers<[1], [0], [0], [1], [0, 0, 1, 1], [], []>} : vector<2x96xbf16>, vector<96x256xbf16>, vector<2x256xf32> -> vector<2x256xf32>
    %138 = arith.addf %132, %137 : vector<2x256xf32>
    %c0_161 = arith.constant 0 : index
    %c23 = arith.constant 23 : index
    %c0_162 = arith.constant 0 : index
    %c0_163 = arith.constant 0 : index
    %139 = vector.load %arg2[%c0_161, %c23, %c0_162, %c0_163] : memref<1x64x2x96xbf16, #tpu.memory_space<vmem>>, vector<1x1x2x96xbf16>
    %140 = vector.shape_cast %139 : vector<1x1x2x96xbf16> to vector<2x96xbf16>
    %c23_164 = arith.constant 23 : index
    %c0_165 = arith.constant 0 : index
    %c0_166 = arith.constant 0 : index
    %141 = vector.load %arg3[%c23_164, %c0_165, %c0_166] : memref<32x96x256xbf16, #tpu.memory_space<vmem>>, vector<1x96x256xbf16>
    %142 = vector.shape_cast %141 : vector<1x96x256xbf16> to vector<96x256xbf16>
    %cst_167 = arith.constant dense<0.000000e+00> : vector<2x256xf32>
    %143 = tpu.matmul %140, %142, %cst_167 {dimension_numbers = #tpu.dot_dimension_numbers<[1], [0], [0], [1], [0, 0, 1, 1], [], []>} : vector<2x96xbf16>, vector<96x256xbf16>, vector<2x256xf32> -> vector<2x256xf32>
    %144 = arith.addf %138, %143 : vector<2x256xf32>
    %c0_168 = arith.constant 0 : index
    %c24 = arith.constant 24 : index
    %c0_169 = arith.constant 0 : index
    %c0_170 = arith.constant 0 : index
    %145 = vector.load %arg2[%c0_168, %c24, %c0_169, %c0_170] : memref<1x64x2x96xbf16, #tpu.memory_space<vmem>>, vector<1x1x2x96xbf16>
    %146 = vector.shape_cast %145 : vector<1x1x2x96xbf16> to vector<2x96xbf16>
    %c24_171 = arith.constant 24 : index
    %c0_172 = arith.constant 0 : index
    %c0_173 = arith.constant 0 : index
    %147 = vector.load %arg3[%c24_171, %c0_172, %c0_173] : memref<32x96x256xbf16, #tpu.memory_space<vmem>>, vector<1x96x256xbf16>
    %148 = vector.shape_cast %147 : vector<1x96x256xbf16> to vector<96x256xbf16>
    %cst_174 = arith.constant dense<0.000000e+00> : vector<2x256xf32>
    %149 = tpu.matmul %146, %148, %cst_174 {dimension_numbers = #tpu.dot_dimension_numbers<[1], [0], [0], [1], [0, 0, 1, 1], [], []>} : vector<2x96xbf16>, vector<96x256xbf16>, vector<2x256xf32> -> vector<2x256xf32>
    %150 = arith.addf %144, %149 : vector<2x256xf32>
    %c0_175 = arith.constant 0 : index
    %c25 = arith.constant 25 : index
    %c0_176 = arith.constant 0 : index
    %c0_177 = arith.constant 0 : index
    %151 = vector.load %arg2[%c0_175, %c25, %c0_176, %c0_177] : memref<1x64x2x96xbf16, #tpu.memory_space<vmem>>, vector<1x1x2x96xbf16>
    %152 = vector.shape_cast %151 : vector<1x1x2x96xbf16> to vector<2x96xbf16>
    %c25_178 = arith.constant 25 : index
    %c0_179 = arith.constant 0 : index
    %c0_180 = arith.constant 0 : index
    %153 = vector.load %arg3[%c25_178, %c0_179, %c0_180] : memref<32x96x256xbf16, #tpu.memory_space<vmem>>, vector<1x96x256xbf16>
    %154 = vector.shape_cast %153 : vector<1x96x256xbf16> to vector<96x256xbf16>
    %cst_181 = arith.constant dense<0.000000e+00> : vector<2x256xf32>
    %155 = tpu.matmul %152, %154, %cst_181 {dimension_numbers = #tpu.dot_dimension_numbers<[1], [0], [0], [1], [0, 0, 1, 1], [], []>} : vector<2x96xbf16>, vector<96x256xbf16>, vector<2x256xf32> -> vector<2x256xf32>
    %156 = arith.addf %150, %155 : vector<2x256xf32>
    %c0_182 = arith.constant 0 : index
    %c26 = arith.constant 26 : index
    %c0_183 = arith.constant 0 : index
    %c0_184 = arith.constant 0 : index
    %157 = vector.load %arg2[%c0_182, %c26, %c0_183, %c0_184] : memref<1x64x2x96xbf16, #tpu.memory_space<vmem>>, vector<1x1x2x96xbf16>
    %158 = vector.shape_cast %157 : vector<1x1x2x96xbf16> to vector<2x96xbf16>
    %c26_185 = arith.constant 26 : index
    %c0_186 = arith.constant 0 : index
    %c0_187 = arith.constant 0 : index
    %159 = vector.load %arg3[%c26_185, %c0_186, %c0_187] : memref<32x96x256xbf16, #tpu.memory_space<vmem>>, vector<1x96x256xbf16>
    %160 = vector.shape_cast %159 : vector<1x96x256xbf16> to vector<96x256xbf16>
    %cst_188 = arith.constant dense<0.000000e+00> : vector<2x256xf32>
    %161 = tpu.matmul %158, %160, %cst_188 {dimension_numbers = #tpu.dot_dimension_numbers<[1], [0], [0], [1], [0, 0, 1, 1], [], []>} : vector<2x96xbf16>, vector<96x256xbf16>, vector<2x256xf32> -> vector<2x256xf32>
    %162 = arith.addf %156, %161 : vector<2x256xf32>
    %c0_189 = arith.constant 0 : index
    %c27 = arith.constant 27 : index
    %c0_190 = arith.constant 0 : index
    %c0_191 = arith.constant 0 : index
    %163 = vector.load %arg2[%c0_189, %c27, %c0_190, %c0_191] : memref<1x64x2x96xbf16, #tpu.memory_space<vmem>>, vector<1x1x2x96xbf16>
    %164 = vector.shape_cast %163 : vector<1x1x2x96xbf16> to vector<2x96xbf16>
    %c27_192 = arith.constant 27 : index
    %c0_193 = arith.constant 0 : index
    %c0_194 = arith.constant 0 : index
    %165 = vector.load %arg3[%c27_192, %c0_193, %c0_194] : memref<32x96x256xbf16, #tpu.memory_space<vmem>>, vector<1x96x256xbf16>
    %166 = vector.shape_cast %165 : vector<1x96x256xbf16> to vector<96x256xbf16>
    %cst_195 = arith.constant dense<0.000000e+00> : vector<2x256xf32>
    %167 = tpu.matmul %164, %166, %cst_195 {dimension_numbers = #tpu.dot_dimension_numbers<[1], [0], [0], [1], [0, 0, 1, 1], [], []>} : vector<2x96xbf16>, vector<96x256xbf16>, vector<2x256xf32> -> vector<2x256xf32>
    %168 = arith.addf %162, %167 : vector<2x256xf32>
    %c0_196 = arith.constant 0 : index
    %c28 = arith.constant 28 : index
    %c0_197 = arith.constant 0 : index
    %c0_198 = arith.constant 0 : index
    %169 = vector.load %arg2[%c0_196, %c28, %c0_197, %c0_198] : memref<1x64x2x96xbf16, #tpu.memory_space<vmem>>, vector<1x1x2x96xbf16>
    %170 = vector.shape_cast %169 : vector<1x1x2x96xbf16> to vector<2x96xbf16>
    %c28_199 = arith.constant 28 : index
    %c0_200 = arith.constant 0 : index
    %c0_201 = arith.constant 0 : index
    %171 = vector.load %arg3[%c28_199, %c0_200, %c0_201] : memref<32x96x256xbf16, #tpu.memory_space<vmem>>, vector<1x96x256xbf16>
    %172 = vector.shape_cast %171 : vector<1x96x256xbf16> to vector<96x256xbf16>
    %cst_202 = arith.constant dense<0.000000e+00> : vector<2x256xf32>
    %173 = tpu.matmul %170, %172, %cst_202 {dimension_numbers = #tpu.dot_dimension_numbers<[1], [0], [0], [1], [0, 0, 1, 1], [], []>} : vector<2x96xbf16>, vector<96x256xbf16>, vector<2x256xf32> -> vector<2x256xf32>
    %174 = arith.addf %168, %173 : vector<2x256xf32>
    %c0_203 = arith.constant 0 : index
    %c29 = arith.constant 29 : index
    %c0_204 = arith.constant 0 : index
    %c0_205 = arith.constant 0 : index
    %175 = vector.load %arg2[%c0_203, %c29, %c0_204, %c0_205] : memref<1x64x2x96xbf16, #tpu.memory_space<vmem>>, vector<1x1x2x96xbf16>
    %176 = vector.shape_cast %175 : vector<1x1x2x96xbf16> to vector<2x96xbf16>
    %c29_206 = arith.constant 29 : index
    %c0_207 = arith.constant 0 : index
    %c0_208 = arith.constant 0 : index
    %177 = vector.load %arg3[%c29_206, %c0_207, %c0_208] : memref<32x96x256xbf16, #tpu.memory_space<vmem>>, vector<1x96x256xbf16>
    %178 = vector.shape_cast %177 : vector<1x96x256xbf16> to vector<96x256xbf16>
    %cst_209 = arith.constant dense<0.000000e+00> : vector<2x256xf32>
    %179 = tpu.matmul %176, %178, %cst_209 {dimension_numbers = #tpu.dot_dimension_numbers<[1], [0], [0], [1], [0, 0, 1, 1], [], []>} : vector<2x96xbf16>, vector<96x256xbf16>, vector<2x256xf32> -> vector<2x256xf32>
    %180 = arith.addf %174, %179 : vector<2x256xf32>
    %c0_210 = arith.constant 0 : index
    %c30 = arith.constant 30 : index
    %c0_211 = arith.constant 0 : index
    %c0_212 = arith.constant 0 : index
    %181 = vector.load %arg2[%c0_210, %c30, %c0_211, %c0_212] : memref<1x64x2x96xbf16, #tpu.memory_space<vmem>>, vector<1x1x2x96xbf16>
    %182 = vector.shape_cast %181 : vector<1x1x2x96xbf16> to vector<2x96xbf16>
    %c30_213 = arith.constant 30 : index
    %c0_214 = arith.constant 0 : index
    %c0_215 = arith.constant 0 : index
    %183 = vector.load %arg3[%c30_213, %c0_214, %c0_215] : memref<32x96x256xbf16, #tpu.memory_space<vmem>>, vector<1x96x256xbf16>
    %184 = vector.shape_cast %183 : vector<1x96x256xbf16> to vector<96x256xbf16>
    %cst_216 = arith.constant dense<0.000000e+00> : vector<2x256xf32>
    %185 = tpu.matmul %182, %184, %cst_216 {dimension_numbers = #tpu.dot_dimension_numbers<[1], [0], [0], [1], [0, 0, 1, 1], [], []>} : vector<2x96xbf16>, vector<96x256xbf16>, vector<2x256xf32> -> vector<2x256xf32>
    %186 = arith.addf %180, %185 : vector<2x256xf32>
    %c0_217 = arith.constant 0 : index
    %c31 = arith.constant 31 : index
    %c0_218 = arith.constant 0 : index
    %c0_219 = arith.constant 0 : index
    %187 = vector.load %arg2[%c0_217, %c31, %c0_218, %c0_219] : memref<1x64x2x96xbf16, #tpu.memory_space<vmem>>, vector<1x1x2x96xbf16>
    %188 = vector.shape_cast %187 : vector<1x1x2x96xbf16> to vector<2x96xbf16>
    %c31_220 = arith.constant 31 : index
    %c0_221 = arith.constant 0 : index
    %c0_222 = arith.constant 0 : index
    %189 = vector.load %arg3[%c31_220, %c0_221, %c0_222] : memref<32x96x256xbf16, #tpu.memory_space<vmem>>, vector<1x96x256xbf16>
    %190 = vector.shape_cast %189 : vector<1x96x256xbf16> to vector<96x256xbf16>
    %cst_223 = arith.constant dense<0.000000e+00> : vector<2x256xf32>
    %191 = tpu.matmul %188, %190, %cst_223 {dimension_numbers = #tpu.dot_dimension_numbers<[1], [0], [0], [1], [0, 0, 1, 1], [], []>} : vector<2x96xbf16>, vector<96x256xbf16>, vector<2x256xf32> -> vector<2x256xf32>
    %192 = arith.addf %186, %191 : vector<2x256xf32>
    %c0_224 = arith.constant 0 : index
    %c0_225 = arith.constant 0 : index
    %193 = vector.load %arg4[%c0_224, %c0_225] : memref<1x256xf32, #tpu.memory_space<vmem>>, vector<1x256xf32>
    %194 = vector.broadcast %193 : vector<1x256xf32> to vector<2x256xf32>
    %195 = arith.addf %192, %194 : vector<2x256xf32>
    %cst_226 = arith.constant 0.000000e+00 : f32
    %196 = vector.broadcast %cst_226 : f32 to vector<2x256xf32>
    %197 = arith.maximumf %195, %196 : vector<2x256xf32>
    %198 = arith.truncf %197 : vector<2x256xf32> to vector<2x256xbf16>
    %c0_227 = arith.constant 0 : index
    %c0_228 = arith.constant 0 : index
    %c0_229 = arith.constant 0 : index
    %c0_230 = arith.constant 0 : index
    %199 = vector.load %arg5[%c0_227, %c0_228, %c0_229, %c0_230] : memref<1x2x2x256xbf16, #tpu.memory_space<vmem>>, vector<1x1x2x256xbf16>
    %200 = vector.shape_cast %199 : vector<1x1x2x256xbf16> to vector<2x256xbf16>
    %201 = vector.shape_cast %198 : vector<2x256xbf16> to vector<1x1x2x256xbf16>
    tpu.vector_store %arg5[%c0_227, %c0_228, %c0_229, %c0_230], %201 {strides = array<i32>} : memref<1x2x2x256xbf16, #tpu.memory_space<vmem>>, vector<1x1x2x256xbf16>,
    %cst_231 = arith.constant 0.000000e+00 : f32
    %202 = vector.broadcast %cst_231 : f32 to vector<2x256xf32>
    %c0_232 = arith.constant 0 : index
    %c32 = arith.constant 32 : index
    %c0_233 = arith.constant 0 : index
    %c0_234 = arith.constant 0 : index
    %203 = vector.load %arg2[%c0_232, %c32, %c0_233, %c0_234] : memref<1x64x2x96xbf16, #tpu.memory_space<vmem>>, vector<1x1x2x96xbf16>
    %204 = vector.shape_cast %203 : vector<1x1x2x96xbf16> to vector<2x96xbf16>
    %c0_235 = arith.constant 0 : index
    %c0_236 = arith.constant 0 : index
    %c0_237 = arith.constant 0 : index
    %205 = vector.load %arg3[%c0_235, %c0_236, %c0_237] : memref<32x96x256xbf16, #tpu.memory_space<vmem>>, vector<1x96x256xbf16>
    %206 = vector.shape_cast %205 : vector<1x96x256xbf16> to vector<96x256xbf16>
    %cst_238 = arith.constant dense<0.000000e+00> : vector<2x256xf32>
    %207 = tpu.matmul %204, %206, %cst_238 {dimension_numbers = #tpu.dot_dimension_numbers<[1], [0], [0], [1], [0, 0, 1, 1], [], []>} : vector<2x96xbf16>, vector<96x256xbf16>, vector<2x256xf32> -> vector<2x256xf32>
    %208 = arith.addf %202, %207 : vector<2x256xf32>
    %c0_239 = arith.constant 0 : index
    %c33 = arith.constant 33 : index
    %c0_240 = arith.constant 0 : index
    %c0_241 = arith.constant 0 : index
    %209 = vector.load %arg2[%c0_239, %c33, %c0_240, %c0_241] : memref<1x64x2x96xbf16, #tpu.memory_space<vmem>>, vector<1x1x2x96xbf16>
    %210 = vector.shape_cast %209 : vector<1x1x2x96xbf16> to vector<2x96xbf16>
    %c1_242 = arith.constant 1 : index
    %c0_243 = arith.constant 0 : index
    %c0_244 = arith.constant 0 : index
    %211 = vector.load %arg3[%c1_242, %c0_243, %c0_244] : memref<32x96x256xbf16, #tpu.memory_space<vmem>>, vector<1x96x256xbf16>
    %212 = vector.shape_cast %211 : vector<1x96x256xbf16> to vector<96x256xbf16>
    %cst_245 = arith.constant dense<0.000000e+00> : vector<2x256xf32>
    %213 = tpu.matmul %210, %212, %cst_245 {dimension_numbers = #tpu.dot_dimension_numbers<[1], [0], [0], [1], [0, 0, 1, 1], [], []>} : vector<2x96xbf16>, vector<96x256xbf16>, vector<2x256xf32> -> vector<2x256xf32>
    %214 = arith.addf %208, %213 : vector<2x256xf32>
    %c0_246 = arith.constant 0 : index
    %c34 = arith.constant 34 : index
    %c0_247 = arith.constant 0 : index
    %c0_248 = arith.constant 0 : index
    %215 = vector.load %arg2[%c0_246, %c34, %c0_247, %c0_248] : memref<1x64x2x96xbf16, #tpu.memory_space<vmem>>, vector<1x1x2x96xbf16>
    %216 = vector.shape_cast %215 : vector<1x1x2x96xbf16> to vector<2x96xbf16>
    %c2_249 = arith.constant 2 : index
    %c0_250 = arith.constant 0 : index
    %c0_251 = arith.constant 0 : index
    %217 = vector.load %arg3[%c2_249, %c0_250, %c0_251] : memref<32x96x256xbf16, #tpu.memory_space<vmem>>, vector<1x96x256xbf16>
    %218 = vector.shape_cast %217 : vector<1x96x256xbf16> to vector<96x256xbf16>
    %cst_252 = arith.constant dense<0.000000e+00> : vector<2x256xf32>
    %219 = tpu.matmul %216, %218, %cst_252 {dimension_numbers = #tpu.dot_dimension_numbers<[1], [0], [0], [1], [0, 0, 1, 1], [], []>} : vector<2x96xbf16>, vector<96x256xbf16>, vector<2x256xf32> -> vector<2x256xf32>
    %220 = arith.addf %214, %219 : vector<2x256xf32>
    %c0_253 = arith.constant 0 : index
    %c35 = arith.constant 35 : index
    %c0_254 = arith.constant 0 : index
    %c0_255 = arith.constant 0 : index
    %221 = vector.load %arg2[%c0_253, %c35, %c0_254, %c0_255] : memref<1x64x2x96xbf16, #tpu.memory_space<vmem>>, vector<1x1x2x96xbf16>
    %222 = vector.shape_cast %221 : vector<1x1x2x96xbf16> to vector<2x96xbf16>
    %c3_256 = arith.constant 3 : index
    %c0_257 = arith.constant 0 : index
    %c0_258 = arith.constant 0 : index
    %223 = vector.load %arg3[%c3_256, %c0_257, %c0_258] : memref<32x96x256xbf16, #tpu.memory_space<vmem>>, vector<1x96x256xbf16>
    %224 = vector.shape_cast %223 : vector<1x96x256xbf16> to vector<96x256xbf16>
    %cst_259 = arith.constant dense<0.000000e+00> : vector<2x256xf32>
    %225 = tpu.matmul %222, %224, %cst_259 {dimension_numbers = #tpu.dot_dimension_numbers<[1], [0], [0], [1], [0, 0, 1, 1], [], []>} : vector<2x96xbf16>, vector<96x256xbf16>, vector<2x256xf32> -> vector<2x256xf32>
    %226 = arith.addf %220, %225 : vector<2x256xf32>
    %c0_260 = arith.constant 0 : index
    %c36 = arith.constant 36 : index
    %c0_261 = arith.constant 0 : index
    %c0_262 = arith.constant 0 : index
    %227 = vector.load %arg2[%c0_260, %c36, %c0_261, %c0_262] : memref<1x64x2x96xbf16, #tpu.memory_space<vmem>>, vector<1x1x2x96xbf16>
    %228 = vector.shape_cast %227 : vector<1x1x2x96xbf16> to vector<2x96xbf16>
    %c4_263 = arith.constant 4 : index
    %c0_264 = arith.constant 0 : index
    %c0_265 = arith.constant 0 : index
    %229 = vector.load %arg3[%c4_263, %c0_264, %c0_265] : memref<32x96x256xbf16, #tpu.memory_space<vmem>>, vector<1x96x256xbf16>
    %230 = vector.shape_cast %229 : vector<1x96x256xbf16> to vector<96x256xbf16>
    %cst_266 = arith.constant dense<0.000000e+00> : vector<2x256xf32>
    %231 = tpu.matmul %228, %230, %cst_266 {dimension_numbers = #tpu.dot_dimension_numbers<[1], [0], [0], [1], [0, 0, 1, 1], [], []>} : vector<2x96xbf16>, vector<96x256xbf16>, vector<2x256xf32> -> vector<2x256xf32>
    %232 = arith.addf %226, %231 : vector<2x256xf32>
    %c0_267 = arith.constant 0 : index
    %c37 = arith.constant 37 : index
    %c0_268 = arith.constant 0 : index
    %c0_269 = arith.constant 0 : index
    %233 = vector.load %arg2[%c0_267, %c37, %c0_268, %c0_269] : memref<1x64x2x96xbf16, #tpu.memory_space<vmem>>, vector<1x1x2x96xbf16>
    %234 = vector.shape_cast %233 : vector<1x1x2x96xbf16> to vector<2x96xbf16>
    %c5_270 = arith.constant 5 : index
    %c0_271 = arith.constant 0 : index
    %c0_272 = arith.constant 0 : index
    %235 = vector.load %arg3[%c5_270, %c0_271, %c0_272] : memref<32x96x256xbf16, #tpu.memory_space<vmem>>, vector<1x96x256xbf16>
    %236 = vector.shape_cast %235 : vector<1x96x256xbf16> to vector<96x256xbf16>
    %cst_273 = arith.constant dense<0.000000e+00> : vector<2x256xf32>
    %237 = tpu.matmul %234, %236, %cst_273 {dimension_numbers = #tpu.dot_dimension_numbers<[1], [0], [0], [1], [0, 0, 1, 1], [], []>} : vector<2x96xbf16>, vector<96x256xbf16>, vector<2x256xf32> -> vector<2x256xf32>
    %238 = arith.addf %232, %237 : vector<2x256xf32>
    %c0_274 = arith.constant 0 : index
    %c38 = arith.constant 38 : index
    %c0_275 = arith.constant 0 : index
    %c0_276 = arith.constant 0 : index
    %239 = vector.load %arg2[%c0_274, %c38, %c0_275, %c0_276] : memref<1x64x2x96xbf16, #tpu.memory_space<vmem>>, vector<1x1x2x96xbf16>
    %240 = vector.shape_cast %239 : vector<1x1x2x96xbf16> to vector<2x96xbf16>
    %c6_277 = arith.constant 6 : index
    %c0_278 = arith.constant 0 : index
    %c0_279 = arith.constant 0 : index
    %241 = vector.load %arg3[%c6_277, %c0_278, %c0_279] : memref<32x96x256xbf16, #tpu.memory_space<vmem>>, vector<1x96x256xbf16>
    %242 = vector.shape_cast %241 : vector<1x96x256xbf16> to vector<96x256xbf16>
    %cst_280 = arith.constant dense<0.000000e+00> : vector<2x256xf32>
    %243 = tpu.matmul %240, %242, %cst_280 {dimension_numbers = #tpu.dot_dimension_numbers<[1], [0], [0], [1], [0, 0, 1, 1], [], []>} : vector<2x96xbf16>, vector<96x256xbf16>, vector<2x256xf32> -> vector<2x256xf32>
    %244 = arith.addf %238, %243 : vector<2x256xf32>
    %c0_281 = arith.constant 0 : index
    %c39 = arith.constant 39 : index
    %c0_282 = arith.constant 0 : index
    %c0_283 = arith.constant 0 : index
    %245 = vector.load %arg2[%c0_281, %c39, %c0_282, %c0_283] : memref<1x64x2x96xbf16, #tpu.memory_space<vmem>>, vector<1x1x2x96xbf16>
    %246 = vector.shape_cast %245 : vector<1x1x2x96xbf16> to vector<2x96xbf16>
    %c7_284 = arith.constant 7 : index
    %c0_285 = arith.constant 0 : index
    %c0_286 = arith.constant 0 : index
    %247 = vector.load %arg3[%c7_284, %c0_285, %c0_286] : memref<32x96x256xbf16, #tpu.memory_space<vmem>>, vector<1x96x256xbf16>
    %248 = vector.shape_cast %247 : vector<1x96x256xbf16> to vector<96x256xbf16>
    %cst_287 = arith.constant dense<0.000000e+00> : vector<2x256xf32>
    %249 = tpu.matmul %246, %248, %cst_287 {dimension_numbers = #tpu.dot_dimension_numbers<[1], [0], [0], [1], [0, 0, 1, 1], [], []>} : vector<2x96xbf16>, vector<96x256xbf16>, vector<2x256xf32> -> vector<2x256xf32>
    %250 = arith.addf %244, %249 : vector<2x256xf32>
    %c0_288 = arith.constant 0 : index
    %c40 = arith.constant 40 : index
    %c0_289 = arith.constant 0 : index
    %c0_290 = arith.constant 0 : index
    %251 = vector.load %arg2[%c0_288, %c40, %c0_289, %c0_290] : memref<1x64x2x96xbf16, #tpu.memory_space<vmem>>, vector<1x1x2x96xbf16>
    %252 = vector.shape_cast %251 : vector<1x1x2x96xbf16> to vector<2x96xbf16>
    %c8_291 = arith.constant 8 : index
    %c0_292 = arith.constant 0 : index
    %c0_293 = arith.constant 0 : index
    %253 = vector.load %arg3[%c8_291, %c0_292, %c0_293] : memref<32x96x256xbf16, #tpu.memory_space<vmem>>, vector<1x96x256xbf16>
    %254 = vector.shape_cast %253 : vector<1x96x256xbf16> to vector<96x256xbf16>
    %cst_294 = arith.constant dense<0.000000e+00> : vector<2x256xf32>
    %255 = tpu.matmul %252, %254, %cst_294 {dimension_numbers = #tpu.dot_dimension_numbers<[1], [0], [0], [1], [0, 0, 1, 1], [], []>} : vector<2x96xbf16>, vector<96x256xbf16>, vector<2x256xf32> -> vector<2x256xf32>
    %256 = arith.addf %250, %255 : vector<2x256xf32>
    %c0_295 = arith.constant 0 : index
    %c41 = arith.constant 41 : index
    %c0_296 = arith.constant 0 : index
    %c0_297 = arith.constant 0 : index
    %257 = vector.load %arg2[%c0_295, %c41, %c0_296, %c0_297] : memref<1x64x2x96xbf16, #tpu.memory_space<vmem>>, vector<1x1x2x96xbf16>
    %258 = vector.shape_cast %257 : vector<1x1x2x96xbf16> to vector<2x96xbf16>
    %c9_298 = arith.constant 9 : index
    %c0_299 = arith.constant 0 : index
    %c0_300 = arith.constant 0 : index
    %259 = vector.load %arg3[%c9_298, %c0_299, %c0_300] : memref<32x96x256xbf16, #tpu.memory_space<vmem>>, vector<1x96x256xbf16>
    %260 = vector.shape_cast %259 : vector<1x96x256xbf16> to vector<96x256xbf16>
    %cst_301 = arith.constant dense<0.000000e+00> : vector<2x256xf32>
    %261 = tpu.matmul %258, %260, %cst_301 {dimension_numbers = #tpu.dot_dimension_numbers<[1], [0], [0], [1], [0, 0, 1, 1], [], []>} : vector<2x96xbf16>, vector<96x256xbf16>, vector<2x256xf32> -> vector<2x256xf32>
    %262 = arith.addf %256, %261 : vector<2x256xf32>
    %c0_302 = arith.constant 0 : index
    %c42 = arith.constant 42 : index
    %c0_303 = arith.constant 0 : index
    %c0_304 = arith.constant 0 : index
    %263 = vector.load %arg2[%c0_302, %c42, %c0_303, %c0_304] : memref<1x64x2x96xbf16, #tpu.memory_space<vmem>>, vector<1x1x2x96xbf16>
    %264 = vector.shape_cast %263 : vector<1x1x2x96xbf16> to vector<2x96xbf16>
    %c10_305 = arith.constant 10 : index
    %c0_306 = arith.constant 0 : index
    %c0_307 = arith.constant 0 : index
    %265 = vector.load %arg3[%c10_305, %c0_306, %c0_307] : memref<32x96x256xbf16, #tpu.memory_space<vmem>>, vector<1x96x256xbf16>
    %266 = vector.shape_cast %265 : vector<1x96x256xbf16> to vector<96x256xbf16>
    %cst_308 = arith.constant dense<0.000000e+00> : vector<2x256xf32>
    %267 = tpu.matmul %264, %266, %cst_308 {dimension_numbers = #tpu.dot_dimension_numbers<[1], [0], [0], [1], [0, 0, 1, 1], [], []>} : vector<2x96xbf16>, vector<96x256xbf16>, vector<2x256xf32> -> vector<2x256xf32>
    %268 = arith.addf %262, %267 : vector<2x256xf32>
    %c0_309 = arith.constant 0 : index
    %c43 = arith.constant 43 : index
    %c0_310 = arith.constant 0 : index
    %c0_311 = arith.constant 0 : index
    %269 = vector.load %arg2[%c0_309, %c43, %c0_310, %c0_311] : memref<1x64x2x96xbf16, #tpu.memory_space<vmem>>, vector<1x1x2x96xbf16>
    %270 = vector.shape_cast %269 : vector<1x1x2x96xbf16> to vector<2x96xbf16>
    %c11_312 = arith.constant 11 : index
    %c0_313 = arith.constant 0 : index
    %c0_314 = arith.constant 0 : index
    %271 = vector.load %arg3[%c11_312, %c0_313, %c0_314] : memref<32x96x256xbf16, #tpu.memory_space<vmem>>, vector<1x96x256xbf16>
    %272 = vector.shape_cast %271 : vector<1x96x256xbf16> to vector<96x256xbf16>
    %cst_315 = arith.constant dense<0.000000e+00> : vector<2x256xf32>
    %273 = tpu.matmul %270, %272, %cst_315 {dimension_numbers = #tpu.dot_dimension_numbers<[1], [0], [0], [1], [0, 0, 1, 1], [], []>} : vector<2x96xbf16>, vector<96x256xbf16>, vector<2x256xf32> -> vector<2x256xf32>
    %274 = arith.addf %268, %273 : vector<2x256xf32>
    %c0_316 = arith.constant 0 : index
    %c44 = arith.constant 44 : index
    %c0_317 = arith.constant 0 : index
    %c0_318 = arith.constant 0 : index
    %275 = vector.load %arg2[%c0_316, %c44, %c0_317, %c0_318] : memref<1x64x2x96xbf16, #tpu.memory_space<vmem>>, vector<1x1x2x96xbf16>
    %276 = vector.shape_cast %275 : vector<1x1x2x96xbf16> to vector<2x96xbf16>
    %c12_319 = arith.constant 12 : index
    %c0_320 = arith.constant 0 : index
    %c0_321 = arith.constant 0 : index
    %277 = vector.load %arg3[%c12_319, %c0_320, %c0_321] : memref<32x96x256xbf16, #tpu.memory_space<vmem>>, vector<1x96x256xbf16>
    %278 = vector.shape_cast %277 : vector<1x96x256xbf16> to vector<96x256xbf16>
    %cst_322 = arith.constant dense<0.000000e+00> : vector<2x256xf32>
    %279 = tpu.matmul %276, %278, %cst_322 {dimension_numbers = #tpu.dot_dimension_numbers<[1], [0], [0], [1], [0, 0, 1, 1], [], []>} : vector<2x96xbf16>, vector<96x256xbf16>, vector<2x256xf32> -> vector<2x256xf32>
    %280 = arith.addf %274, %279 : vector<2x256xf32>
    %c0_323 = arith.constant 0 : index
    %c45 = arith.constant 45 : index
    %c0_324 = arith.constant 0 : index
    %c0_325 = arith.constant 0 : index
    %281 = vector.load %arg2[%c0_323, %c45, %c0_324, %c0_325] : memref<1x64x2x96xbf16, #tpu.memory_space<vmem>>, vector<1x1x2x96xbf16>
    %282 = vector.shape_cast %281 : vector<1x1x2x96xbf16> to vector<2x96xbf16>
    %c13_326 = arith.constant 13 : index
    %c0_327 = arith.constant 0 : index
    %c0_328 = arith.constant 0 : index
    %283 = vector.load %arg3[%c13_326, %c0_327, %c0_328] : memref<32x96x256xbf16, #tpu.memory_space<vmem>>, vector<1x96x256xbf16>
    %284 = vector.shape_cast %283 : vector<1x96x256xbf16> to vector<96x256xbf16>
    %cst_329 = arith.constant dense<0.000000e+00> : vector<2x256xf32>
    %285 = tpu.matmul %282, %284, %cst_329 {dimension_numbers = #tpu.dot_dimension_numbers<[1], [0], [0], [1], [0, 0, 1, 1], [], []>} : vector<2x96xbf16>, vector<96x256xbf16>, vector<2x256xf32> -> vector<2x256xf32>
    %286 = arith.addf %280, %285 : vector<2x256xf32>
    %c0_330 = arith.constant 0 : index
    %c46 = arith.constant 46 : index
    %c0_331 = arith.constant 0 : index
    %c0_332 = arith.constant 0 : index
    %287 = vector.load %arg2[%c0_330, %c46, %c0_331, %c0_332] : memref<1x64x2x96xbf16, #tpu.memory_space<vmem>>, vector<1x1x2x96xbf16>
    %288 = vector.shape_cast %287 : vector<1x1x2x96xbf16> to vector<2x96xbf16>
    %c14_333 = arith.constant 14 : index
    %c0_334 = arith.constant 0 : index
    %c0_335 = arith.constant 0 : index
    %289 = vector.load %arg3[%c14_333, %c0_334, %c0_335] : memref<32x96x256xbf16, #tpu.memory_space<vmem>>, vector<1x96x256xbf16>
    %290 = vector.shape_cast %289 : vector<1x96x256xbf16> to vector<96x256xbf16>
    %cst_336 = arith.constant dense<0.000000e+00> : vector<2x256xf32>
    %291 = tpu.matmul %288, %290, %cst_336 {dimension_numbers = #tpu.dot_dimension_numbers<[1], [0], [0], [1], [0, 0, 1, 1], [], []>} : vector<2x96xbf16>, vector<96x256xbf16>, vector<2x256xf32> -> vector<2x256xf32>
    %292 = arith.addf %286, %291 : vector<2x256xf32>
    %c0_337 = arith.constant 0 : index
    %c47 = arith.constant 47 : index
    %c0_338 = arith.constant 0 : index
    %c0_339 = arith.constant 0 : index
    %293 = vector.load %arg2[%c0_337, %c47, %c0_338, %c0_339] : memref<1x64x2x96xbf16, #tpu.memory_space<vmem>>, vector<1x1x2x96xbf16>
    %294 = vector.shape_cast %293 : vector<1x1x2x96xbf16> to vector<2x96xbf16>
    %c15_340 = arith.constant 15 : index
    %c0_341 = arith.constant 0 : index
    %c0_342 = arith.constant 0 : index
    %295 = vector.load %arg3[%c15_340, %c0_341, %c0_342] : memref<32x96x256xbf16, #tpu.memory_space<vmem>>, vector<1x96x256xbf16>
    %296 = vector.shape_cast %295 : vector<1x96x256xbf16> to vector<96x256xbf16>
    %cst_343 = arith.constant dense<0.000000e+00> : vector<2x256xf32>
    %297 = tpu.matmul %294, %296, %cst_343 {dimension_numbers = #tpu.dot_dimension_numbers<[1], [0], [0], [1], [0, 0, 1, 1], [], []>} : vector<2x96xbf16>, vector<96x256xbf16>, vector<2x256xf32> -> vector<2x256xf32>
    %298 = arith.addf %292, %297 : vector<2x256xf32>
    %c0_344 = arith.constant 0 : index
    %c48 = arith.constant 48 : index
    %c0_345 = arith.constant 0 : index
    %c0_346 = arith.constant 0 : index
    %299 = vector.load %arg2[%c0_344, %c48, %c0_345, %c0_346] : memref<1x64x2x96xbf16, #tpu.memory_space<vmem>>, vector<1x1x2x96xbf16>
    %300 = vector.shape_cast %299 : vector<1x1x2x96xbf16> to vector<2x96xbf16>
    %c16_347 = arith.constant 16 : index
    %c0_348 = arith.constant 0 : index
    %c0_349 = arith.constant 0 : index
    %301 = vector.load %arg3[%c16_347, %c0_348, %c0_349] : memref<32x96x256xbf16, #tpu.memory_space<vmem>>, vector<1x96x256xbf16>
    %302 = vector.shape_cast %301 : vector<1x96x256xbf16> to vector<96x256xbf16>
    %cst_350 = arith.constant dense<0.000000e+00> : vector<2x256xf32>
    %303 = tpu.matmul %300, %302, %cst_350 {dimension_numbers = #tpu.dot_dimension_numbers<[1], [0], [0], [1], [0, 0, 1, 1], [], []>} : vector<2x96xbf16>, vector<96x256xbf16>, vector<2x256xf32> -> vector<2x256xf32>
    %304 = arith.addf %298, %303 : vector<2x256xf32>
    %c0_351 = arith.constant 0 : index
    %c49 = arith.constant 49 : index
    %c0_352 = arith.constant 0 : index
    %c0_353 = arith.constant 0 : index
    %305 = vector.load %arg2[%c0_351, %c49, %c0_352, %c0_353] : memref<1x64x2x96xbf16, #tpu.memory_space<vmem>>, vector<1x1x2x96xbf16>
    %306 = vector.shape_cast %305 : vector<1x1x2x96xbf16> to vector<2x96xbf16>
    %c17_354 = arith.constant 17 : index
    %c0_355 = arith.constant 0 : index
    %c0_356 = arith.constant 0 : index
    %307 = vector.load %arg3[%c17_354, %c0_355, %c0_356] : memref<32x96x256xbf16, #tpu.memory_space<vmem>>, vector<1x96x256xbf16>
    %308 = vector.shape_cast %307 : vector<1x96x256xbf16> to vector<96x256xbf16>
    %cst_357 = arith.constant dense<0.000000e+00> : vector<2x256xf32>
    %309 = tpu.matmul %306, %308, %cst_357 {dimension_numbers = #tpu.dot_dimension_numbers<[1], [0], [0], [1], [0, 0, 1, 1], [], []>} : vector<2x96xbf16>, vector<96x256xbf16>, vector<2x256xf32> -> vector<2x256xf32>
    %310 = arith.addf %304, %309 : vector<2x256xf32>
    %c0_358 = arith.constant 0 : index
    %c50 = arith.constant 50 : index
    %c0_359 = arith.constant 0 : index
    %c0_360 = arith.constant 0 : index
    %311 = vector.load %arg2[%c0_358, %c50, %c0_359, %c0_360] : memref<1x64x2x96xbf16, #tpu.memory_space<vmem>>, vector<1x1x2x96xbf16>
    %312 = vector.shape_cast %311 : vector<1x1x2x96xbf16> to vector<2x96xbf16>
    %c18_361 = arith.constant 18 : index
    %c0_362 = arith.constant 0 : index
    %c0_363 = arith.constant 0 : index
    %313 = vector.load %arg3[%c18_361, %c0_362, %c0_363] : memref<32x96x256xbf16, #tpu.memory_space<vmem>>, vector<1x96x256xbf16>
    %314 = vector.shape_cast %313 : vector<1x96x256xbf16> to vector<96x256xbf16>
    %cst_364 = arith.constant dense<0.000000e+00> : vector<2x256xf32>
    %315 = tpu.matmul %312, %314, %cst_364 {dimension_numbers = #tpu.dot_dimension_numbers<[1], [0], [0], [1], [0, 0, 1, 1], [], []>} : vector<2x96xbf16>, vector<96x256xbf16>, vector<2x256xf32> -> vector<2x256xf32>
    %316 = arith.addf %310, %315 : vector<2x256xf32>
    %c0_365 = arith.constant 0 : index
    %c51 = arith.constant 51 : index
    %c0_366 = arith.constant 0 : index
    %c0_367 = arith.constant 0 : index
    %317 = vector.load %arg2[%c0_365, %c51, %c0_366, %c0_367] : memref<1x64x2x96xbf16, #tpu.memory_space<vmem>>, vector<1x1x2x96xbf16>
    %318 = vector.shape_cast %317 : vector<1x1x2x96xbf16> to vector<2x96xbf16>
    %c19_368 = arith.constant 19 : index
    %c0_369 = arith.constant 0 : index
    %c0_370 = arith.constant 0 : index
    %319 = vector.load %arg3[%c19_368, %c0_369, %c0_370] : memref<32x96x256xbf16, #tpu.memory_space<vmem>>, vector<1x96x256xbf16>
    %320 = vector.shape_cast %319 : vector<1x96x256xbf16> to vector<96x256xbf16>
    %cst_371 = arith.constant dense<0.000000e+00> : vector<2x256xf32>
    %321 = tpu.matmul %318, %320, %cst_371 {dimension_numbers = #tpu.dot_dimension_numbers<[1], [0], [0], [1], [0, 0, 1, 1], [], []>} : vector<2x96xbf16>, vector<96x256xbf16>, vector<2x256xf32> -> vector<2x256xf32>
    %322 = arith.addf %316, %321 : vector<2x256xf32>
    %c0_372 = arith.constant 0 : index
    %c52 = arith.constant 52 : index
    %c0_373 = arith.constant 0 : index
    %c0_374 = arith.constant 0 : index
    %323 = vector.load %arg2[%c0_372, %c52, %c0_373, %c0_374] : memref<1x64x2x96xbf16, #tpu.memory_space<vmem>>, vector<1x1x2x96xbf16>
    %324 = vector.shape_cast %323 : vector<1x1x2x96xbf16> to vector<2x96xbf16>
    %c20_375 = arith.constant 20 : index
    %c0_376 = arith.constant 0 : index
    %c0_377 = arith.constant 0 : index
    %325 = vector.load %arg3[%c20_375, %c0_376, %c0_377] : memref<32x96x256xbf16, #tpu.memory_space<vmem>>, vector<1x96x256xbf16>
    %326 = vector.shape_cast %325 : vector<1x96x256xbf16> to vector<96x256xbf16>
    %cst_378 = arith.constant dense<0.000000e+00> : vector<2x256xf32>
    %327 = tpu.matmul %324, %326, %cst_378 {dimension_numbers = #tpu.dot_dimension_numbers<[1], [0], [0], [1], [0, 0, 1, 1], [], []>} : vector<2x96xbf16>, vector<96x256xbf16>, vector<2x256xf32> -> vector<2x256xf32>
    %328 = arith.addf %322, %327 : vector<2x256xf32>
    %c0_379 = arith.constant 0 : index
    %c53 = arith.constant 53 : index
    %c0_380 = arith.constant 0 : index
    %c0_381 = arith.constant 0 : index
    %329 = vector.load %arg2[%c0_379, %c53, %c0_380, %c0_381] : memref<1x64x2x96xbf16, #tpu.memory_space<vmem>>, vector<1x1x2x96xbf16>
    %330 = vector.shape_cast %329 : vector<1x1x2x96xbf16> to vector<2x96xbf16>
    %c21_382 = arith.constant 21 : index
    %c0_383 = arith.constant 0 : index
    %c0_384 = arith.constant 0 : index
    %331 = vector.load %arg3[%c21_382, %c0_383, %c0_384] : memref<32x96x256xbf16, #tpu.memory_space<vmem>>, vector<1x96x256xbf16>
    %332 = vector.shape_cast %331 : vector<1x96x256xbf16> to vector<96x256xbf16>
    %cst_385 = arith.constant dense<0.000000e+00> : vector<2x256xf32>
    %333 = tpu.matmul %330, %332, %cst_385 {dimension_numbers = #tpu.dot_dimension_numbers<[1], [0], [0], [1], [0, 0, 1, 1], [], []>} : vector<2x96xbf16>, vector<96x256xbf16>, vector<2x256xf32> -> vector<2x256xf32>
    %334 = arith.addf %328, %333 : vector<2x256xf32>
    %c0_386 = arith.constant 0 : index
    %c54 = arith.constant 54 : index
    %c0_387 = arith.constant 0 : index
    %c0_388 = arith.constant 0 : index
    %335 = vector.load %arg2[%c0_386, %c54, %c0_387, %c0_388] : memref<1x64x2x96xbf16, #tpu.memory_space<vmem>>, vector<1x1x2x96xbf16>
    %336 = vector.shape_cast %335 : vector<1x1x2x96xbf16> to vector<2x96xbf16>
    %c22_389 = arith.constant 22 : index
    %c0_390 = arith.constant 0 : index
    %c0_391 = arith.constant 0 : index
    %337 = vector.load %arg3[%c22_389, %c0_390, %c0_391] : memref<32x96x256xbf16, #tpu.memory_space<vmem>>, vector<1x96x256xbf16>
    %338 = vector.shape_cast %337 : vector<1x96x256xbf16> to vector<96x256xbf16>
    %cst_392 = arith.constant dense<0.000000e+00> : vector<2x256xf32>
    %339 = tpu.matmul %336, %338, %cst_392 {dimension_numbers = #tpu.dot_dimension_numbers<[1], [0], [0], [1], [0, 0, 1, 1], [], []>} : vector<2x96xbf16>, vector<96x256xbf16>, vector<2x256xf32> -> vector<2x256xf32>
    %340 = arith.addf %334, %339 : vector<2x256xf32>
    %c0_393 = arith.constant 0 : index
    %c55 = arith.constant 55 : index
    %c0_394 = arith.constant 0 : index
    %c0_395 = arith.constant 0 : index
    %341 = vector.load %arg2[%c0_393, %c55, %c0_394, %c0_395] : memref<1x64x2x96xbf16, #tpu.memory_space<vmem>>, vector<1x1x2x96xbf16>
    %342 = vector.shape_cast %341 : vector<1x1x2x96xbf16> to vector<2x96xbf16>
    %c23_396 = arith.constant 23 : index
    %c0_397 = arith.constant 0 : index
    %c0_398 = arith.constant 0 : index
    %343 = vector.load %arg3[%c23_396, %c0_397, %c0_398] : memref<32x96x256xbf16, #tpu.memory_space<vmem>>, vector<1x96x256xbf16>
    %344 = vector.shape_cast %343 : vector<1x96x256xbf16> to vector<96x256xbf16>
    %cst_399 = arith.constant dense<0.000000e+00> : vector<2x256xf32>
    %345 = tpu.matmul %342, %344, %cst_399 {dimension_numbers = #tpu.dot_dimension_numbers<[1], [0], [0], [1], [0, 0, 1, 1], [], []>} : vector<2x96xbf16>, vector<96x256xbf16>, vector<2x256xf32> -> vector<2x256xf32>
    %346 = arith.addf %340, %345 : vector<2x256xf32>
    %c0_400 = arith.constant 0 : index
    %c56 = arith.constant 56 : index
    %c0_401 = arith.constant 0 : index
    %c0_402 = arith.constant 0 : index
    %347 = vector.load %arg2[%c0_400, %c56, %c0_401, %c0_402] : memref<1x64x2x96xbf16, #tpu.memory_space<vmem>>, vector<1x1x2x96xbf16>
    %348 = vector.shape_cast %347 : vector<1x1x2x96xbf16> to vector<2x96xbf16>
    %c24_403 = arith.constant 24 : index
    %c0_404 = arith.constant 0 : index
    %c0_405 = arith.constant 0 : index
    %349 = vector.load %arg3[%c24_403, %c0_404, %c0_405] : memref<32x96x256xbf16, #tpu.memory_space<vmem>>, vector<1x96x256xbf16>
    %350 = vector.shape_cast %349 : vector<1x96x256xbf16> to vector<96x256xbf16>
    %cst_406 = arith.constant dense<0.000000e+00> : vector<2x256xf32>
    %351 = tpu.matmul %348, %350, %cst_406 {dimension_numbers = #tpu.dot_dimension_numbers<[1], [0], [0], [1], [0, 0, 1, 1], [], []>} : vector<2x96xbf16>, vector<96x256xbf16>, vector<2x256xf32> -> vector<2x256xf32>
    %352 = arith.addf %346, %351 : vector<2x256xf32>
    %c0_407 = arith.constant 0 : index
    %c57 = arith.constant 57 : index
    %c0_408 = arith.constant 0 : index
    %c0_409 = arith.constant 0 : index
    %353 = vector.load %arg2[%c0_407, %c57, %c0_408, %c0_409] : memref<1x64x2x96xbf16, #tpu.memory_space<vmem>>, vector<1x1x2x96xbf16>
    %354 = vector.shape_cast %353 : vector<1x1x2x96xbf16> to vector<2x96xbf16>
    %c25_410 = arith.constant 25 : index
    %c0_411 = arith.constant 0 : index
    %c0_412 = arith.constant 0 : index
    %355 = vector.load %arg3[%c25_410, %c0_411, %c0_412] : memref<32x96x256xbf16, #tpu.memory_space<vmem>>, vector<1x96x256xbf16>
    %356 = vector.shape_cast %355 : vector<1x96x256xbf16> to vector<96x256xbf16>
    %cst_413 = arith.constant dense<0.000000e+00> : vector<2x256xf32>
    %357 = tpu.matmul %354, %356, %cst_413 {dimension_numbers = #tpu.dot_dimension_numbers<[1], [0], [0], [1], [0, 0, 1, 1], [], []>} : vector<2x96xbf16>, vector<96x256xbf16>, vector<2x256xf32> -> vector<2x256xf32>
    %358 = arith.addf %352, %357 : vector<2x256xf32>
    %c0_414 = arith.constant 0 : index
    %c58 = arith.constant 58 : index
    %c0_415 = arith.constant 0 : index
    %c0_416 = arith.constant 0 : index
    %359 = vector.load %arg2[%c0_414, %c58, %c0_415, %c0_416] : memref<1x64x2x96xbf16, #tpu.memory_space<vmem>>, vector<1x1x2x96xbf16>
    %360 = vector.shape_cast %359 : vector<1x1x2x96xbf16> to vector<2x96xbf16>
    %c26_417 = arith.constant 26 : index
    %c0_418 = arith.constant 0 : index
    %c0_419 = arith.constant 0 : index
    %361 = vector.load %arg3[%c26_417, %c0_418, %c0_419] : memref<32x96x256xbf16, #tpu.memory_space<vmem>>, vector<1x96x256xbf16>
    %362 = vector.shape_cast %361 : vector<1x96x256xbf16> to vector<96x256xbf16>
    %cst_420 = arith.constant dense<0.000000e+00> : vector<2x256xf32>
    %363 = tpu.matmul %360, %362, %cst_420 {dimension_numbers = #tpu.dot_dimension_numbers<[1], [0], [0], [1], [0, 0, 1, 1], [], []>} : vector<2x96xbf16>, vector<96x256xbf16>, vector<2x256xf32> -> vector<2x256xf32>
    %364 = arith.addf %358, %363 : vector<2x256xf32>
    %c0_421 = arith.constant 0 : index
    %c59 = arith.constant 59 : index
    %c0_422 = arith.constant 0 : index
    %c0_423 = arith.constant 0 : index
    %365 = vector.load %arg2[%c0_421, %c59, %c0_422, %c0_423] : memref<1x64x2x96xbf16, #tpu.memory_space<vmem>>, vector<1x1x2x96xbf16>
    %366 = vector.shape_cast %365 : vector<1x1x2x96xbf16> to vector<2x96xbf16>
    %c27_424 = arith.constant 27 : index
    %c0_425 = arith.constant 0 : index
    %c0_426 = arith.constant 0 : index
    %367 = vector.load %arg3[%c27_424, %c0_425, %c0_426] : memref<32x96x256xbf16, #tpu.memory_space<vmem>>, vector<1x96x256xbf16>
    %368 = vector.shape_cast %367 : vector<1x96x256xbf16> to vector<96x256xbf16>
    %cst_427 = arith.constant dense<0.000000e+00> : vector<2x256xf32>
    %369 = tpu.matmul %366, %368, %cst_427 {dimension_numbers = #tpu.dot_dimension_numbers<[1], [0], [0], [1], [0, 0, 1, 1], [], []>} : vector<2x96xbf16>, vector<96x256xbf16>, vector<2x256xf32> -> vector<2x256xf32>
    %370 = arith.addf %364, %369 : vector<2x256xf32>
    %c0_428 = arith.constant 0 : index
    %c60 = arith.constant 60 : index
    %c0_429 = arith.constant 0 : index
    %c0_430 = arith.constant 0 : index
    %371 = vector.load %arg2[%c0_428, %c60, %c0_429, %c0_430] : memref<1x64x2x96xbf16, #tpu.memory_space<vmem>>, vector<1x1x2x96xbf16>
    %372 = vector.shape_cast %371 : vector<1x1x2x96xbf16> to vector<2x96xbf16>
    %c28_431 = arith.constant 28 : index
    %c0_432 = arith.constant 0 : index
    %c0_433 = arith.constant 0 : index
    %373 = vector.load %arg3[%c28_431, %c0_432, %c0_433] : memref<32x96x256xbf16, #tpu.memory_space<vmem>>, vector<1x96x256xbf16>
    %374 = vector.shape_cast %373 : vector<1x96x256xbf16> to vector<96x256xbf16>
    %cst_434 = arith.constant dense<0.000000e+00> : vector<2x256xf32>
    %375 = tpu.matmul %372, %374, %cst_434 {dimension_numbers = #tpu.dot_dimension_numbers<[1], [0], [0], [1], [0, 0, 1, 1], [], []>} : vector<2x96xbf16>, vector<96x256xbf16>, vector<2x256xf32> -> vector<2x256xf32>
    %376 = arith.addf %370, %375 : vector<2x256xf32>
    %c0_435 = arith.constant 0 : index
    %c61 = arith.constant 61 : index
    %c0_436 = arith.constant 0 : index
    %c0_437 = arith.constant 0 : index
    %377 = vector.load %arg2[%c0_435, %c61, %c0_436, %c0_437] : memref<1x64x2x96xbf16, #tpu.memory_space<vmem>>, vector<1x1x2x96xbf16>
    %378 = vector.shape_cast %377 : vector<1x1x2x96xbf16> to vector<2x96xbf16>
    %c29_438 = arith.constant 29 : index
    %c0_439 = arith.constant 0 : index
    %c0_440 = arith.constant 0 : index
    %379 = vector.load %arg3[%c29_438, %c0_439, %c0_440] : memref<32x96x256xbf16, #tpu.memory_space<vmem>>, vector<1x96x256xbf16>
    %380 = vector.shape_cast %379 : vector<1x96x256xbf16> to vector<96x256xbf16>
    %cst_441 = arith.constant dense<0.000000e+00> : vector<2x256xf32>
    %381 = tpu.matmul %378, %380, %cst_441 {dimension_numbers = #tpu.dot_dimension_numbers<[1], [0], [0], [1], [0, 0, 1, 1], [], []>} : vector<2x96xbf16>, vector<96x256xbf16>, vector<2x256xf32> -> vector<2x256xf32>
    %382 = arith.addf %376, %381 : vector<2x256xf32>
    %c0_442 = arith.constant 0 : index
    %c62 = arith.constant 62 : index
    %c0_443 = arith.constant 0 : index
    %c0_444 = arith.constant 0 : index
    %383 = vector.load %arg2[%c0_442, %c62, %c0_443, %c0_444] : memref<1x64x2x96xbf16, #tpu.memory_space<vmem>>, vector<1x1x2x96xbf16>
    %384 = vector.shape_cast %383 : vector<1x1x2x96xbf16> to vector<2x96xbf16>
    %c30_445 = arith.constant 30 : index
    %c0_446 = arith.constant 0 : index
    %c0_447 = arith.constant 0 : index
    %385 = vector.load %arg3[%c30_445, %c0_446, %c0_447] : memref<32x96x256xbf16, #tpu.memory_space<vmem>>, vector<1x96x256xbf16>
    %386 = vector.shape_cast %385 : vector<1x96x256xbf16> to vector<96x256xbf16>
    %cst_448 = arith.constant dense<0.000000e+00> : vector<2x256xf32>
    %387 = tpu.matmul %384, %386, %cst_448 {dimension_numbers = #tpu.dot_dimension_numbers<[1], [0], [0], [1], [0, 0, 1, 1], [], []>} : vector<2x96xbf16>, vector<96x256xbf16>, vector<2x256xf32> -> vector<2x256xf32>
    %388 = arith.addf %382, %387 : vector<2x256xf32>
    %c0_449 = arith.constant 0 : index
    %c63 = arith.constant 63 : index
    %c0_450 = arith.constant 0 : index
    %c0_451 = arith.constant 0 : index
    %389 = vector.load %arg2[%c0_449, %c63, %c0_450, %c0_451] : memref<1x64x2x96xbf16, #tpu.memory_space<vmem>>, vector<1x1x2x96xbf16>
    %390 = vector.shape_cast %389 : vector<1x1x2x96xbf16> to vector<2x96xbf16>
    %c31_452 = arith.constant 31 : index
    %c0_453 = arith.constant 0 : index
    %c0_454 = arith.constant 0 : index
    %391 = vector.load %arg3[%c31_452, %c0_453, %c0_454] : memref<32x96x256xbf16, #tpu.memory_space<vmem>>, vector<1x96x256xbf16>
    %392 = vector.shape_cast %391 : vector<1x96x256xbf16> to vector<96x256xbf16>
    %cst_455 = arith.constant dense<0.000000e+00> : vector<2x256xf32>
    %393 = tpu.matmul %390, %392, %cst_455 {dimension_numbers = #tpu.dot_dimension_numbers<[1], [0], [0], [1], [0, 0, 1, 1], [], []>} : vector<2x96xbf16>, vector<96x256xbf16>, vector<2x256xf32> -> vector<2x256xf32>
    %394 = arith.addf %388, %393 : vector<2x256xf32>
    %c0_456 = arith.constant 0 : index
    %c0_457 = arith.constant 0 : index
    %395 = vector.load %arg4[%c0_456, %c0_457] : memref<1x256xf32, #tpu.memory_space<vmem>>, vector<1x256xf32>
    %396 = vector.broadcast %395 : vector<1x256xf32> to vector<2x256xf32>
    %397 = arith.addf %394, %396 : vector<2x256xf32>
    %cst_458 = arith.constant 0.000000e+00 : f32
    %398 = vector.broadcast %cst_458 : f32 to vector<2x256xf32>
    %399 = arith.maximumf %397, %398 : vector<2x256xf32>
    %400 = arith.truncf %399 : vector<2x256xf32> to vector<2x256xbf16>
    %c0_459 = arith.constant 0 : index
    %c1_460 = arith.constant 1 : index
    %c0_461 = arith.constant 0 : index
    %c0_462 = arith.constant 0 : index
    %401 = vector.load %arg5[%c0_459, %c1_460, %c0_461, %c0_462] : memref<1x2x2x256xbf16, #tpu.memory_space<vmem>>, vector<1x1x2x256xbf16>
    %402 = vector.shape_cast %401 : vector<1x1x2x256xbf16> to vector<2x256xbf16>
    %403 = vector.shape_cast %400 : vector<2x256xbf16> to vector<1x1x2x256xbf16>
    tpu.vector_store %arg5[%c0_459, %c1_460, %c0_461, %c0_462], %403 {strides = array<i32>} : memref<1x2x2x256xbf16, #tpu.memory_space<vmem>>, vector<1x1x2x256xbf16>,
    return
  }
  func.func @transform_0(%arg0: i32, %arg1: i32) -> (i32, i32, i32, i32) {
    %c0_i32 = arith.constant 0 : i32
    %c0_i32_0 = arith.constant 0 : i32
    %c0_i32_1 = arith.constant 0 : i32
    return %arg0, %arg1, %c0_i32, %c0_i32_0 : i32, i32, i32, i32
  }
  func.func @transform_1(%arg0: i32, %arg1: i32) -> (i32, i32, i32) {
    %c0_i32 = arith.constant 0 : i32
    %c0_i32_0 = arith.constant 0 : i32
    %c0_i32_1 = arith.constant 0 : i32
    %c0_i32_2 = arith.constant 0 : i32
    return %c0_i32, %c0_i32_0, %c0_i32_1 : i32, i32, i32
  }
  func.func @transform_2(%arg0: i32, %arg1: i32) -> (i32, i32) {
    %c0_i32 = arith.constant 0 : i32
    %c0_i32_0 = arith.constant 0 : i32
    %c0_i32_1 = arith.constant 0 : i32
    return %c0_i32, %c0_i32_0 : i32, i32
  }
  func.func @transform_3(%arg0: i32, %arg1: i32) -> (i32, i32, i32, i32) {
    %c0_i32 = arith.constant 0 : i32
    %c0_i32_0 = arith.constant 0 : i32
    %c0_i32_1 = arith.constant 0 : i32
    return %arg0, %arg1, %c0_i32, %c0_i32_0 : i32, i32, i32, i32
  }
}

</mosaic_0001>

<bundles_post_ra>
// kernel: tpu_custom_call.1
= control target key start
LH: loop header
LB: loop body
LE: loop exit
PB: predicated region body
PF: predicated region fallthrough
CT: control target
= control target key end

     0   :  { %8 = vsyncpa [#allocation3], 0  ;;  %s10947_s0 = inlined_call_operand.hbm [shape: bf16[2,64,2,96], index: 0, kind: input, shape index: {}]   ;;  %s10948_s1 = inlined_call_operand.hbm [shape: bf16[32,96,256], index: 1, kind: input, shape index: {}]   ;;  %s10949_s2 = inlined_call_operand.hbm [shape: f32[1,256], index: 2, kind: input, shape index: {}]   ;;  %s10950_s3 = inlined_call_operand.hbm [shape: bf16[2,2,2,256], index: 3, kind: output, shape index: {}]  }
   0x1   :  { %10 = vsyncpa [#allocation3 + $0x1], 0 }
   0x2   :  { %11 = vsyncpa [#allocation6], 0 }
   0x3   :  { %12 = vsyncpa [#allocation4], 0 }
   0x4   :  { %14 = vsyncpa [#allocation4 + $0x1], 0  ;;  %s10500_s12 = smov 0   ;;  %s10502_s13 = smov 0  }
   0x5   :  { %s10504_s14 = smov 0   ;;  %s10506_s15 = smov 0  }
   0x6   :  { %s10508_s16 = smov 0   ;;  %s10510_s17 = smov 0  }
   0x7 LB: > { %s8138_s18 = sadd.s32 4294967295, %s10466_s17   ;;  %s8139_s19 = sadd.s32 4294967294, %s10466_s17   ;;  %s10466_s17 = sphi %s10510_s17, %s20_s17   ;;  %s10462_s16 = sphi %s10508_s16, %s10970_s16   ;;  %s10458_s15 = sphi %s10506_s15, %s10969_s15   ;;  %s10454_s14 = sphi %s10504_s14, %s10968_s14   ;;  %s10450_s13 = sphi %s10502_s13, %s10967_s13   ;;  %s10446_s12 = sphi %s10500_s12, %s10966_s12  }
   0x8   : > { %p54_p0 = scmp.ne.s32.totalorder %s10450_s13, %s10446_s12  ;;  %p10534_p1 = scmp.eq.s32.totalorder %s8138_s18, 0 }
   0x9   : > { %p10538_p2 = scmp.eq.s32.totalorder %s8138_s18, 1  ;;  %p128_p3 = scmp.eq.s32.totalorder %s8139_s19, 1 }
   0xa   : > { %s10954_s20 = scalar_select %p10534_p1, 1, 0 }
   0xb   : > { %p10544_p4 = por %p10534_p1, %p54_p0  ;;  %p8140_p5 = scmp.ge.s32.totalorder %s10466_s17, 1 }
   0xc   : > { %p10549_p6 = por %p128_p3, %p54_p0  ;;  %p135_p7 = scmp.lt.s32.totalorder %s10466_s17, 3 }
   0xd   : > { %s10956_s22 = scalar_select %p10544_p4, 1, 0 }
   0xe   : > { %s10957_s23 = scalar_select %p10549_p6, 1, 0 }
   0xf   : > { %p10554_p8 = pnand %p8140_p5, %p135_p7  ;;  %s10468_s25 = smov [#allocation5]  }
  0x10   : > { %s147_s26 = sshll.u32 %s10468_s25, 4  ;;  %s10469_s28 = smov [#allocation7]   ;;  %s148_s26 = int_to_ptr.vmem [resolvable:$true] %s147_s26 }
  0x11   : > { %p9071_p9 = pneg %p10554_p8  ;;  %s161_s29 = sshll.u32 %s10469_s28, 4  ;;  %s162_s29 = int_to_ptr.vmem [resolvable:$true] %s161_s29 }
  0x12   : > { %s10313_s30 = scalar_lea.vmem %s148_s26, 49152  ;;  %p10321_p5 = scmp.lt.s32.totalorder %s148_s26, %s148_s26 }
  0x13   : > { %p10563_p11 = pnand %p9071_p9, %p10534_p1  ;;  %p10314_p13 = scmp.ne.s32.totalorder %s148_s26, %s10313_s30 }
  0x14   : > { %p10322_p7 = scmp.lt.s32.totalorder %s10313_s30, %s10313_s30 }
  0x15   : > { %p10304_p12 = pneg %p10563_p11 }
  0x16   : > { %p10323_p10 = por %p10322_p7, %p10321_p5 }
  0x17   : > { %p10316_p0 = pnand %p10314_p13, %p10304_p12 }
  0x19   : > { %p10317_p3 = pneg %p10316_p0 }
  0x1b   : > { %p10324_p9 = pnand %p10323_p10, %p10317_p3 }
  0x1d   : > { %10327 = shalt.err (!%p10324_p9)
}
  0x1e   : > { %s10470_s4 = smov 128   ;;  %s10471_s5 = smov 8  }
  0x1f   : > { %9074 = dma.hbm_to_vmem [thread:$0]  (!%p10563_p11), %s10948_s1, 49152, %s148_s26, [#allocation6], %s10470_s4, %s10470_s4, %s10471_s5  }
  0x20   : > { %s10339_s8 = scalar_lea.vmem %s162_s29, 32  ;;  %p10347_p1 = scmp.lt.s32.totalorder %s162_s29, %s162_s29 }
  0x21   : > { %p10340_p6 = scmp.ne.s32.totalorder %s162_s29, %s10339_s8  ;;  %p10348_p4 = scmp.lt.s32.totalorder %s10339_s8, %s10339_s8 }
  0x23   : > { %p10342_p13 = pnand %p10340_p6, %p10304_p12  ;;  %p10349_p5 = por %p10348_p4, %p10347_p1 }
  0x25   : > { %p10343_p0 = pneg %p10342_p13 }
  0x27   : > { %p10350_p10 = pnand %p10349_p5, %p10343_p0 }
  0x29   : > { %10353 = shalt.err (!%p10350_p10)
}
  0x2a   : > { %9077 = dma.hbm_to_vmem [thread:$0]  (!%p10563_p11), %s10949_s2, 32, %s162_s29, [#allocation6]  }
  0x2b   : > { %s32_s11 = sadd.s32 1, %s10462_s16  ;;  %s41_s18 = sadd.s32 1, %s10454_s14 }
  0x2c   : > { %p34_p1 = scmp.ge.s32.totalorder %s32_s11, 2  ;;  %p48_p4 = scmp.ne.s32.totalorder %s10454_s14, %s10450_s13 }
  0x2d   : > { %p49_p6 = scmp.eq.s32.totalorder %s10466_s17, 0  ;;  %p9088_p12 = scmp.lt.s32.totalorder %s10466_s17, 2 }
  0x2e   : > { %s10972_s11 = smov (%p34_p1, %s32_s11), 0  ;;  %p10595_p7 = por %p10538_p2, %p48_p4 }
  0x2f   : > { %p50_p3 = por %p49_p6, %p48_p4  ;;  %s36_s25 = ssub.s32 %s10462_s16, %s10972_s11 }
  0x30   : > { %s172_s26 = sand.u32 1, %s10454_s14   ;;  %p39_p9 = scmp.eq.s32.totalorder %s36_s25, 0 }
  0x31   : > { %s8144_s27 = sshll.u32 %s172_s26, 6  ;;  %s9056_s28 = sshll.u32 %s10462_s16, 10 }
  0x32   : > { %s10604_s29 = scalar_select %p39_p9, %s10454_s14, %s41_s18  }
  0x33   : > { %s184_s5 = scalar_lea.hbm %s10947_s0, %s9056_s28  ;;  %s176_s6 = scalar_lea.vmem [#allocation2], %s8144_s27 }
  0x34   : > { %s185_s7 = sshll.u32 %s176_s6, 4  ;;  %p10611_p11 = pnand %p9088_p12, %p50_p3  ;;  %s186_s7 = int_to_ptr.vmem [resolvable:$true] %s185_s7 }
  0x35   : > { %s173_s8 = scalar_lea.sflag [#allocation3], %s172_s26  ;;  %s10367_s9 = scalar_lea.vmem %s186_s7, 1024 }
  0x36   : > { %p10356_p2 = pneg %p10611_p11  ;;  %p10368_p13 = scmp.ne.s32.totalorder %s186_s7, %s10367_s9 }
  0x37   : > { %s10472_s10 = smov [#allocation2]  }
  0x38   : > { %p10370_p0 = pnand %p10368_p13, %p10356_p2  ;;  %s10372_s18 = sshll.u32 %s10472_s10, 4  ;;  %s10373_s18 = int_to_ptr.vmem [resolvable:$false] %s10372_s18 }
  0x39   : > { %s10374_s25 = scalar_lea.vmem %s10373_s18, 2048  ;;  %p10375_p10 = scmp.lt.s32.totalorder %s186_s7, %s10373_s18 }
  0x3a   : > { %p10371_p5 = pneg %p10370_p0  ;;  %p10376_p1 = scmp.lt.s32.totalorder %s10374_s25, %s10367_s9 }
  0x3c   : > { %p10377_p4 = por %p10376_p1, %p10375_p10 }
  0x3e   : > { %p10378_p6 = pnand %p10377_p4, %p10371_p5 }
  0x40   : > { %10381 = shalt.err (!%p10378_p6)
}
  0x41   : > { %s10473_s27 = smov 16   ;;  %s10474_s28 = smov 1  }
  0x42   : > { %9081 = dma.hbm_to_vmem [thread:$0]  (!%p10611_p11), %s184_s5, 1024, %s186_s7, %s173_s8, %s10473_s27, %s10473_s27, %s10474_s28  }
  0x43   : > { %197 = sbr.rel (%p10554_p8) target bundleno = 1067 (0x42b), region = 32  ;;  %s10622_s26 = sand.u32 (!%p10554_p8), 1, %s10450_s13  }
  0x44   : > { %s8148_s30 = sshll.u32 (!%p10554_p8), %s10622_s26, 6  ;;  %s200_s4 = scalar_lea.sflag (!%p10554_p8), [#allocation3], %s10622_s26 }
  0x45   : > { %s10626_s6 = scalar_lea.vmem (!%p10554_p8), [#allocation2], %s8148_s30  ;;  %p10962_p12 = scmp.ne.s32.totalorder (!%p10554_p8), %s10956_s22, 0 }
  0x48   : > { %10433 = dma.done.wait (%p10962_p12), %s200_s4, 1024  }
  0x49   : > { %10435 = vsyncadd (%p10962_p12), %s200_s4, 4294966272  ;;  %p10963_p3 = scmp.ne.s32.totalorder %s10954_s20, 0 }
  0x4b   : > { %10437 = dma.done.wait (%p10963_p3), [#allocation6], 49184  }
  0x4c   : > { %10439 = vsyncadd (%p10963_p3), [#allocation6], 4294918112  ;;  %v10475_v0 = vmov 0   ;;  %v9150_v1 = vld [vmem:[#allocation5 + $0xb4] ss:$8 sps:$4 sm:$0xff]   ;;  %vm325_vm0 = vcmask 785408  }
  0x4d   : > { %361 = vmatprep.mubr.bf16.mxu0 %v10475_v0  ;;  %465 = vmatprep.mubr.bf16.mxu1 %v10475_v0  ;;  %v9152_v2 = vld [vmem:[#allocation5 + $0x54] ss:$8 sps:$4 sm:$0xff]   ;;  %v9154_v3 = vld [vmem:[#allocation5 + $0xb0] ss:$8 sps:$4 sm:$0xff]   ;;  %v9156_v5 = vld [vmem:[#allocation5 + $0xa4] ss:$8 sps:$4 sm:$0xff]  }
  0x4e   : > { %333 = vmatprep.subr.bf16.mxu0 %v9150_v1  ;;  %v9155_v4 = vld [vmem:[#allocation5 + $0x50] ss:$8 sps:$4 sm:$0xff]   ;;  %437 = vmatprep.subr.bf16.mxu1 %v9152_v2  ;;  %v9158_v6 = vld [vmem:[#allocation5 + $0x44] ss:$8 sps:$4 sm:$0xff]   ;;  %v9160_v7 = vld [vmem:[#allocation5 + $0xa0] ss:$8 sps:$4 sm:$0xff]  }
  0x4f   : > { %334 = vmatpush1.bf16.msra.mxu0 %v9154_v3  ;;  %438 = vmatpush1.bf16.msra.mxu1 %v9155_v4  ;;  %v9161_v8 = vld [vmem:[#allocation5 + $0x40] ss:$8 sps:$4 sm:$0xff]   ;;  %v9162_v9 = vld [vmem:[#allocation5 + $0x94] ss:$8 sps:$4 sm:$0xff]   ;;  %v9166_v11 = vld [vmem:[#allocation5 + $0x90] ss:$8 sps:$4 sm:$0xff]  }
  0x50   : > { %335 = vmatprep.subr.bf16.mxu0 %v9156_v5  ;;  %439 = vmatprep.subr.bf16.mxu1 %v9158_v6  ;;  %v9164_v10 = vld [vmem:[#allocation5 + $0x34] ss:$8 sps:$4 sm:$0xff]   ;;  %v9167_v12 = vld [vmem:[#allocation5 + $0x30] ss:$8 sps:$4 sm:$0xff]   ;;  %v9168_v13 = vld [vmem:[#allocation5 + $0x84] ss:$8 sps:$4 sm:$0xff]  }
  0x51   : > { %v9170_v14 = vld [vmem:[#allocation5 + $0x24] ss:$8 sps:$4 sm:$0xff]   ;;  %v9172_v15 = vld [vmem:[#allocation5 + $0x80] ss:$8 sps:$4 sm:$0xff]   ;;  %v9174_v17 = vld [vmem:[#allocation5 + $0x74] ss:$8 sps:$4 sm:$0xff]  }
  0x52   : > { %v9173_v16 = vld [vmem:[#allocation5 + $0x20] ss:$8 sps:$4 sm:$0xff]   ;;  %v9176_v18 = vld [vmem:[#allocation5 + $0x14] ss:$8 sps:$4 sm:$0xff]   ;;  %v9178_v19 = vld [vmem:[#allocation5 + $0x70] ss:$8 sps:$4 sm:$0xff]  }
  0x53   : > { %336 = vmatpush1.bf16.msra.mxu0 %v9160_v7  ;;  %440 = vmatpush1.bf16.msra.mxu1 %v9161_v8  ;;  %v9179_v20 = vld [vmem:[#allocation5 + $0x10] ss:$8 sps:$4 sm:$0xff]   ;;  %v9180_v21 = vld [vmem:[#allocation5 + $0x64] ss:$8 sps:$4 sm:$0xff]   ;;  %v9184_v23 = vld [vmem:[#allocation5 + $0x60] ss:$8 sps:$4 sm:$0xff]  }
  0x54   : > { %337 = vmatprep.subr.bf16.mxu0 %v9162_v9  ;;  %441 = vmatprep.subr.bf16.mxu1 %v9164_v10  ;;  %v9182_v22 = vld [vmem:[#allocation5 + $0x4] ss:$8 sps:$4 sm:$0xff]   ;;  %v9185_v24 = vld [vmem:[#allocation5] ss:$8 sps:$4 sm:$0xff]   ;;  %v9188_v25 = vld [vmem:[#allocation5 + $0x114] ss:$8 sps:$4 sm:$0xff]  }
  0x55   : > { %v9191_v26 = vld [vmem:[#allocation5 + $0x174] ss:$8 sps:$4 sm:$0xff]   ;;  %v8152_v27 = vld [vmem:[%s10626_s6 + $0x1] sm:$0x1]  ;;  %v237_v28 = vld [vmem:[%s10626_s6] sm:$0x1] }
  0x56   : > { %v9186_v29 = vld [vmem:[#allocation5 + $0x110] ss:$8 sps:$4 sm:$0xff]   ;;  %v9194_v31 = vld [vmem:[#allocation5 + $0x104] ss:$8 sps:$4 sm:$0xff]   ;;  %v9192_v33 = vld [vmem:[#allocation5 + $0x100] ss:$8 sps:$4 sm:$0xff]  }
  0x57   : > { %338 = vmatpush1.bf16.msra.mxu0 %v9166_v11  ;;  %442 = vmatpush1.bf16.msra.mxu1 %v9167_v12  ;;  %v9189_v30 = vld [vmem:[#allocation5 + $0x170] ss:$8 sps:$4 sm:$0xff]   ;;  %v9197_v32 = vld [vmem:[#allocation5 + $0x164] ss:$8 sps:$4 sm:$0xff]   ;;  %v9195_v34 = vld [vmem:[#allocation5 + $0x160] ss:$8 sps:$4 sm:$0xff]  }
  0x58   : > { %339 = vmatprep.subr.bf16.mxu0 %v9168_v13  ;;  %443 = vmatprep.subr.bf16.mxu1 %v9170_v14  ;;  %v9200_v35 = vld [vmem:[#allocation5 + $0xf4] ss:$8 sps:$4 sm:$0xff]   ;;  %v9198_v37 = vld [vmem:[#allocation5 + $0xf0] ss:$8 sps:$4 sm:$0xff]   ;;  %v9206_v39 = vld [vmem:[#allocation5 + $0xe4] ss:$8 sps:$4 sm:$0xff]  }
  0x59   : > { %v9203_v36 = vld [vmem:[#allocation5 + $0x154] ss:$8 sps:$4 sm:$0xff]   ;;  %v9201_v38 = vld [vmem:[#allocation5 + $0x150] ss:$8 sps:$4 sm:$0xff]   ;;  %v9209_v40 = vld [vmem:[#allocation5 + $0x144] ss:$8 sps:$4 sm:$0xff]  }
  0x5a   : > { %v9204_v41 = vld [vmem:[#allocation5 + $0xe0] ss:$8 sps:$4 sm:$0xff]   ;;  %v9212_v43 = vld [vmem:[#allocation5 + $0xd4] ss:$8 sps:$4 sm:$0xff]   ;;  %v9210_v45 = vld [vmem:[#allocation5 + $0xd0] ss:$8 sps:$4 sm:$0xff]  }
  0x5b   : > { %340 = vmatpush1.bf16.msra.mxu0 %v9172_v15  ;;  %444 = vmatpush1.bf16.msra.mxu1 %v9173_v16  ;;  %v9207_v42 = vld [vmem:[#allocation5 + $0x140] ss:$8 sps:$4 sm:$0xff]   ;;  %v9215_v44 = vld [vmem:[#allocation5 + $0x134] ss:$8 sps:$4 sm:$0xff]   ;;  %v9213_v46 = vld [vmem:[#allocation5 + $0x130] ss:$8 sps:$4 sm:$0xff]  }
  0x5c   : > { %341 = vmatprep.subr.bf16.mxu0 %v9174_v17  ;;  %445 = vmatprep.subr.bf16.mxu1 %v9176_v18  ;;  %v9218_v47 = vld [vmem:[#allocation5 + $0xc4] ss:$8 sps:$4 sm:$0xff]   ;;  %v9216_v49 = vld [vmem:[#allocation5 + $0xc0] ss:$8 sps:$4 sm:$0xff]   ;;  %v9224_v51 = vld [vmem:[#allocation5 + $0x1d4] ss:$8 sps:$4 sm:$0xff]  }
  0x5d   : > { %v9221_v48 = vld [vmem:[#allocation5 + $0x124] ss:$8 sps:$4 sm:$0xff]   ;;  %v9219_v50 = vld [vmem:[#allocation5 + $0x120] ss:$8 sps:$4 sm:$0xff]   ;;  %v9227_v52 = vld [vmem:[#allocation5 + $0x234] ss:$8 sps:$4 sm:$0xff]  }
  0x5e   : > { %v8179_v53 = vld [vmem:[%s10626_s6 + $0x2] sm:$0x1]  ;;  %v8193_v54 = vld [vmem:[%s10626_s6 + $0x3] sm:$0x1]  ;;  %v9222_v55 = vld [vmem:[#allocation5 + $0x1d0] ss:$8 sps:$4 sm:$0xff]  }
  0x5f   : > { %342 = vmatpush1.bf16.msra.mxu0 %v9178_v19  ;;  %446 = vmatpush1.bf16.msra.mxu1 %v9179_v20  ;;  %v9225_v56 = vld [vmem:[#allocation5 + $0x230] ss:$8 sps:$4 sm:$0xff]   ;;  %v9230_v57 = vld [vmem:[#allocation5 + $0x1c4] ss:$8 sps:$4 sm:$0xff]   ;;  %v9228_v59 = vld [vmem:[#allocation5 + $0x1c0] ss:$8 sps:$4 sm:$0xff]  }
  0x60   : > { %343 = vmatprep.subr.bf16.mxu0 %v9180_v21  ;;  %447 = vmatprep.subr.bf16.mxu1 %v9182_v22  ;;  %v9233_v58 = vld [vmem:[#allocation5 + $0x224] ss:$8 sps:$4 sm:$0xff]   ;;  %v9231_v60 = vld [vmem:[#allocation5 + $0x220] ss:$8 sps:$4 sm:$0xff]   ;;  %v9236_v61 = vld [vmem:[#allocation5 + $0x1b4] ss:$8 sps:$4 sm:$0xff]  }
  0x61   : > { %v9239_v62 = vld [vmem:[#allocation5 + $0x214] ss:$8 sps:$4 sm:$0xff]   ;;  %v9234_v63 = vld [vmem:[#allocation5 + $0x1b0] ss:$8 sps:$4 sm:$0xff]   ;;  %v9242_v2 = vld [vmem:[#allocation5 + $0x1a4] ss:$8 sps:$4 sm:$0xff]  }
  0x62   : > { %v9237_v1 = vld [vmem:[#allocation5 + $0x210] ss:$8 sps:$4 sm:$0xff]   ;;  %v9245_v3 = vld [vmem:[#allocation5 + $0x204] ss:$8 sps:$4 sm:$0xff]   ;;  %v9240_v4 = vld [vmem:[#allocation5 + $0x1a0] ss:$8 sps:$4 sm:$0xff]  }
  0x63   : > { %344 = vmatpush1.bf16.msra.mxu0 %v9184_v23  ;;  %448 = vmatpush1.bf16.msra.mxu1 %v9185_v24  ;;  %v9243_v5 = vld [vmem:[#allocation5 + $0x200] ss:$8 sps:$4 sm:$0xff]   ;;  %v9248_v6 = vld [vmem:[#allocation5 + $0x194] ss:$8 sps:$4 sm:$0xff]   ;;  %v9246_v8 = vld [vmem:[#allocation5 + $0x190] ss:$8 sps:$4 sm:$0xff]  }
  0x64   : > { %556 = vmatprep.subr.bf16.mxu0 %v9188_v25  ;;  %677 = vmatprep.subr.bf16.mxu1 %v9191_v26  ;;  %v9251_v7 = vld [vmem:[#allocation5 + $0x1f4] ss:$8 sps:$4 sm:$0xff]   ;;  %v9249_v9 = vld [vmem:[#allocation5 + $0x1f0] ss:$8 sps:$4 sm:$0xff]   ;;  %v9254_v10 = vld [vmem:[#allocation5 + $0x184] ss:$8 sps:$4 sm:$0xff]  }
  0x65   : > { %v9257_v11 = vld [vmem:[#allocation5 + $0x1e4] ss:$8 sps:$4 sm:$0xff]   ;;  %v9252_v12 = vld [vmem:[#allocation5 + $0x180] ss:$8 sps:$4 sm:$0xff]   ;;  %v9260_v14 = vld [vmem:[#allocation5 + $0x294] ss:$8 sps:$4 sm:$0xff]  }
  0x66   : > { %8165 = vmatmul.mubr.msk.bf16.vlgmr.msra.gmra.mxu0 %vm325_vm0, %v8152_v27  ;;  %8178 = vmatmul.mubr.msk.bf16.vlgmr.msra.gmra.mxu1 %vm325_vm0, %v237_v28  ;;  %v9255_v13 = vld [vmem:[#allocation5 + $0x1e0] ss:$8 sps:$4 sm:$0xff]   ;;  %v9263_v15 = vld [vmem:[#allocation5 + $0x2f4] ss:$8 sps:$4 sm:$0xff]   ;;  %v8207_v16 = vld [vmem:[%s10626_s6 + $0x4] sm:$0x1] }
  0x67   : > { %557 = vmatpush1.bf16.msra.mxu0 %v9186_v29  ;;  %678 = vmatpush1.bf16.msra.mxu1 %v9189_v30  ;;  %v8221_v17 = vld [vmem:[%s10626_s6 + $0x5] sm:$0x1]  ;;  %v9258_v18 = vld [vmem:[#allocation5 + $0x290] ss:$8 sps:$4 sm:$0xff]   ;;  %v9264_v22 = vld [vmem:[#allocation5 + $0x280] ss:$8 sps:$4 sm:$0xff]  }
  0x68   : > { %558 = vmatprep.subr.bf16.mxu0 %v9194_v31  ;;  %679 = vmatprep.subr.bf16.mxu1 %v9197_v32  ;;  %v9261_v19 = vld [vmem:[#allocation5 + $0x2f0] ss:$8 sps:$4 sm:$0xff]   ;;  %v9266_v20 = vld [vmem:[#allocation5 + $0x284] ss:$8 sps:$4 sm:$0xff]   ;;  %v9267_v23 = vld [vmem:[#allocation5 + $0x2e0] ss:$8 sps:$4 sm:$0xff]  }
  0x69   : > { %584 = vmatprep.mubr.bf16.mxu0 %v10475_v0  ;;  %705 = vmatprep.mubr.bf16.mxu1 %v10475_v0  ;;  %v9269_v21 = vld [vmem:[#allocation5 + $0x2e4] ss:$8 sps:$4 sm:$0xff]   ;;  %v9272_v24 = vld [vmem:[#allocation5 + $0x274] ss:$8 sps:$4 sm:$0xff]   ;;  %v9270_v26 = vld [vmem:[#allocation5 + $0x270] ss:$8 sps:$4 sm:$0xff]  }
  0x6a   : > { %v9275_v25 = vld [vmem:[#allocation5 + $0x2d4] ss:$8 sps:$4 sm:$0xff]   ;;  %v9273_v27 = vld [vmem:[#allocation5 + $0x2d0] ss:$8 sps:$4 sm:$0xff]   ;;  %v9278_v28 = vld [vmem:[#allocation5 + $0x264] ss:$8 sps:$4 sm:$0xff]  }
  0x6b   : > { %559 = vmatpush1.bf16.msra.mxu0 %v9192_v33  ;;  %680 = vmatpush1.bf16.msra.mxu1 %v9195_v34  ;;  %v9281_v29 = vld [vmem:[#allocation5 + $0x2c4] ss:$8 sps:$4 sm:$0xff]   ;;  %v9276_v30 = vld [vmem:[#allocation5 + $0x260] ss:$8 sps:$4 sm:$0xff]   ;;  %v9284_v32 = vld [vmem:[#allocation5 + $0x254] ss:$8 sps:$4 sm:$0xff]  }
  0x6c   : > { %560 = vmatprep.subr.bf16.mxu0 %v9200_v35  ;;  %681 = vmatprep.subr.bf16.mxu1 %v9203_v36  ;;  %v9279_v31 = vld [vmem:[#allocation5 + $0x2c0] ss:$8 sps:$4 sm:$0xff]   ;;  %v9287_v33 = vld [vmem:[#allocation5 + $0x2b4] ss:$8 sps:$4 sm:$0xff]   ;;  %v9282_v34 = vld [vmem:[#allocation5 + $0x250] ss:$8 sps:$4 sm:$0xff]  }
  0x6d   : > { %v9285_v35 = vld [vmem:[#allocation5 + $0x2b0] ss:$8 sps:$4 sm:$0xff]   ;;  %v9290_v36 = vld [vmem:[#allocation5 + $0x244] ss:$8 sps:$4 sm:$0xff]   ;;  %s8151_s20 = sshll.u32 %s10622_s26, 2  ;;  %s9058_s24 = sshll.u32 %s10458_s15, 6 }
  0x6e   : > { %s10831_s22 = scalar_lea.vmem [#allocation8], %s8151_s20  ;;  %s10895_s8 = scalar_lea.hbm %s10950_s3, %s9058_s24 }
  0x6f   : > { %561 = vmatpush1.bf16.msra.mxu0 %v9198_v37  ;;  %682 = vmatpush1.bf16.msra.mxu1 %v9201_v38  ;;  %v9293_v37 = vld [vmem:[#allocation5 + $0x2a4] ss:$8 sps:$4 sm:$0xff]   ;;  %v9288_v38 = vld [vmem:[#allocation5 + $0x240] ss:$8 sps:$4 sm:$0xff]   ;;  %s8032_s5 = sshll.u32 %s10831_s22, 4  ;;  %s8016_s9 = scalar_lea.sflag [#allocation4], %s10622_s26  ;;  %s10897_s5 = int_to_ptr.vmem [resolvable:$true] %s8032_s5 }
  0x70   : > { %562 = vmatprep.subr.bf16.mxu0 %v9206_v39  ;;  %683 = vmatprep.subr.bf16.mxu1 %v9209_v40  ;;  %v9291_v39 = vld [vmem:[#allocation5 + $0x2a0] ss:$8 sps:$4 sm:$0xff]   ;;  %v9296_v40 = vld [vmem:[#allocation5 + $0x354] ss:$8 sps:$4 sm:$0xff]   ;;  %s10382_s10 = scalar_lea.vmem %s10897_s5, 64  ;;  %s10477_s15 = smov [#allocation8]  }
  0x71   : > { %p10383_p8 = scmp.ne.s32.totalorder %s10897_s5, %s10382_s10  ;;  %s10386_s18 = sshll.u32 %s10477_s15, 4  ;;  %s10387_s18 = int_to_ptr.vmem [resolvable:$false] %s10386_s18 }
  0x72   : > { %s10388_s25 = scalar_lea.vmem %s10387_s18, 128  ;;  %p10389_p2 = scmp.lt.s32.totalorder %s10897_s5, %s10387_s18 }
  0x73   : > { %563 = vmatpush1.bf16.msra.mxu0 %v9204_v41  ;;  %684 = vmatpush1.bf16.msra.mxu1 %v9207_v42  ;;  %v9299_v41 = vld [vmem:[#allocation5 + $0x3b4] ss:$8 sps:$4 sm:$0xff]   ;;  %v8235_v42 = vld [vmem:[%s10626_s6 + $0x6] sm:$0x1]  ;;  %p10384_p9 = pnand %p10383_p8, %p10595_p7  ;;  %p10390_p13 = scmp.lt.s32.totalorder %s10388_s25, %s10382_s10 }
  0x74   : > { %564 = vmatprep.subr.bf16.mxu0 %v9212_v43  ;;  %685 = vmatprep.subr.bf16.mxu1 %v9215_v44  ;;  %v8249_v43 = vld [vmem:[%s10626_s6 + $0x7] sm:$0x1]  ;;  %v9294_v44 = vld [vmem:[#allocation5 + $0x350] ss:$8 sps:$4 sm:$0xff]  }
  0x75   : > { %p10385_p11 = pneg %p10384_p9  ;;  %p10391_p0 = por %p10390_p13, %p10389_p2 }
  0x77   : > { %565 = vmatpush1.bf16.msra.mxu0 %v9210_v45  ;;  %686 = vmatpush1.bf16.msra.mxu1 %v9213_v46  ;;  %v9297_v45 = vld [vmem:[#allocation5 + $0x3b0] ss:$8 sps:$4 sm:$0xff]   ;;  %v9302_v46 = vld [vmem:[#allocation5 + $0x344] ss:$8 sps:$4 sm:$0xff]   ;;  %p10392_p5 = pnand %p10391_p0, %p10385_p11 }
  0x78   : > { %566 = vmatprep.subr.bf16.mxu0 %v9218_v47  ;;  %687 = vmatprep.subr.bf16.mxu1 %v9221_v48  ;;  %v9305_v47 = vld [vmem:[#allocation5 + $0x3a4] ss:$8 sps:$4 sm:$0xff]   ;;  %v9300_v48 = vld [vmem:[#allocation5 + $0x340] ss:$8 sps:$4 sm:$0xff]  }
  0x7b   : > { %567 = vmatpush1.bf16.msra.mxu0 %v9216_v49  ;;  %688 = vmatpush1.bf16.msra.mxu1 %v9219_v50  ;;  %v9303_v49 = vld [vmem:[#allocation5 + $0x3a0] ss:$8 sps:$4 sm:$0xff]   ;;  %v9308_v50 = vld [vmem:[#allocation5 + $0x334] ss:$8 sps:$4 sm:$0xff]  }
  0x7c   : > { %798 = vmatprep.subr.bf16.mxu0 %v9224_v51  ;;  %919 = vmatprep.subr.bf16.mxu1 %v9227_v52  ;;  %v9311_v51 = vld [vmem:[#allocation5 + $0x394] ss:$8 sps:$4 sm:$0xff]   ;;  %v9306_v52 = vld [vmem:[#allocation5 + $0x330] ss:$8 sps:$4 sm:$0xff]  }
  0x7e   : > { %8192 = vmatmul.mubr.msk.bf16.vlgmr.msra.gmra.mxu0 %vm325_vm0, %v8179_v53  ;;  %8206 = vmatmul.mubr.msk.bf16.vlgmr.msra.gmra.mxu1 %vm325_vm0, %v8193_v54  ;;  %v9309_v53 = vld [vmem:[#allocation5 + $0x390] ss:$8 sps:$4 sm:$0xff]   ;;  %v9314_v54 = vld [vmem:[#allocation5 + $0x324] ss:$8 sps:$4 sm:$0xff]  }
  0x7f   : > { %799 = vmatpush1.bf16.msra.mxu0 %v9222_v55  ;;  %920 = vmatpush1.bf16.msra.mxu1 %v9225_v56  ;;  %v9317_v55 = vld [vmem:[#allocation5 + $0x384] ss:$8 sps:$4 sm:$0xff]   ;;  %v9312_v56 = vld [vmem:[#allocation5 + $0x320] ss:$8 sps:$4 sm:$0xff]  }
  0x80   : > { %800 = vmatprep.subr.bf16.mxu0 %v9230_v57  ;;  %921 = vmatprep.subr.bf16.mxu1 %v9233_v58  ;;  %v9315_v57 = vld [vmem:[#allocation5 + $0x380] ss:$8 sps:$4 sm:$0xff]   ;;  %v9320_v58 = vld [vmem:[#allocation5 + $0x314] ss:$8 sps:$4 sm:$0xff]  }
  0x81   : > { %826 = vmatprep.mubr.bf16.mxu0 %v10475_v0  ;;  %947 = vmatprep.mubr.bf16.mxu1 %v10475_v0 }
  0x83   : > { %801 = vmatpush1.bf16.msra.mxu0 %v9228_v59  ;;  %922 = vmatpush1.bf16.msra.mxu1 %v9231_v60  ;;  %v9323_v59 = vld [vmem:[#allocation5 + $0x374] ss:$8 sps:$4 sm:$0xff]   ;;  %v9318_v60 = vld [vmem:[#allocation5 + $0x310] ss:$8 sps:$4 sm:$0xff]  }
  0x84   : > { %802 = vmatprep.subr.bf16.mxu0 %v9236_v61  ;;  %923 = vmatprep.subr.bf16.mxu1 %v9239_v62  ;;  %v9321_v61 = vld [vmem:[#allocation5 + $0x370] ss:$8 sps:$4 sm:$0xff]   ;;  %v9326_v62 = vld [vmem:[#allocation5 + $0x304] ss:$8 sps:$4 sm:$0xff]  }
  0x87   : > { %803 = vmatpush1.bf16.msra.mxu0 %v9234_v63  ;;  %924 = vmatpush1.bf16.msra.mxu1 %v9237_v1  ;;  %v9329_v63 = vld [vmem:[#allocation5 + $0x364] ss:$8 sps:$4 sm:$0xff]   ;;  %v9324_v1 = vld [vmem:[#allocation5 + $0x300] ss:$8 sps:$4 sm:$0xff]  }
  0x88   : > { %804 = vmatprep.subr.bf16.mxu0 %v9242_v2  ;;  %925 = vmatprep.subr.bf16.mxu1 %v9245_v3  ;;  %v9327_v2 = vld [vmem:[#allocation5 + $0x360] ss:$8 sps:$4 sm:$0xff]   ;;  %v9332_v3 = vld [vmem:[#allocation5 + $0x414] ss:$8 sps:$4 sm:$0xff]  }
  0x8b   : > { %805 = vmatpush1.bf16.msra.mxu0 %v9240_v4  ;;  %926 = vmatpush1.bf16.msra.mxu1 %v9243_v5  ;;  %v9335_v4 = vld [vmem:[#allocation5 + $0x474] ss:$8 sps:$4 sm:$0xff]   ;;  %v8263_v5 = vld [vmem:[%s10626_s6 + $0x8] sm:$0x1] }
  0x8c   : > { %806 = vmatprep.subr.bf16.mxu0 %v9248_v6  ;;  %927 = vmatprep.subr.bf16.mxu1 %v9251_v7  ;;  %v8277_v6 = vld [vmem:[%s10626_s6 + $0x9] sm:$0x1]  ;;  %v9330_v7 = vld [vmem:[#allocation5 + $0x410] ss:$8 sps:$4 sm:$0xff]  }
  0x8f   : > { %807 = vmatpush1.bf16.msra.mxu0 %v9246_v8  ;;  %928 = vmatpush1.bf16.msra.mxu1 %v9249_v9  ;;  %v9333_v8 = vld [vmem:[#allocation5 + $0x470] ss:$8 sps:$4 sm:$0xff]   ;;  %v9338_v9 = vld [vmem:[#allocation5 + $0x404] ss:$8 sps:$4 sm:$0xff]  }
  0x90   : > { %808 = vmatprep.subr.bf16.mxu0 %v9254_v10  ;;  %929 = vmatprep.subr.bf16.mxu1 %v9257_v11  ;;  %v9341_v10 = vld [vmem:[#allocation5 + $0x464] ss:$8 sps:$4 sm:$0xff]   ;;  %v9336_v11 = vld [vmem:[#allocation5 + $0x400] ss:$8 sps:$4 sm:$0xff]  }
  0x93   : > { %809 = vmatpush1.bf16.msra.mxu0 %v9252_v12  ;;  %930 = vmatpush1.bf16.msra.mxu1 %v9255_v13  ;;  %v9339_v12 = vld [vmem:[#allocation5 + $0x460] ss:$8 sps:$4 sm:$0xff]   ;;  %v9344_v13 = vld [vmem:[#allocation5 + $0x3f4] ss:$8 sps:$4 sm:$0xff]  }
  0x94   : > { %1040 = vmatprep.subr.bf16.mxu0 %v9260_v14  ;;  %1161 = vmatprep.subr.bf16.mxu1 %v9263_v15  ;;  %v9347_v14 = vld [vmem:[#allocation5 + $0x454] ss:$8 sps:$4 sm:$0xff]   ;;  %v9342_v15 = vld [vmem:[#allocation5 + $0x3f0] ss:$8 sps:$4 sm:$0xff]  }
  0x96   : > { %8220 = vmatmul.mubr.msk.bf16.vlgmr.msra.gmra.mxu0 %vm325_vm0, %v8207_v16  ;;  %8234 = vmatmul.mubr.msk.bf16.vlgmr.msra.gmra.mxu1 %vm325_vm0, %v8221_v17  ;;  %v9345_v16 = vld [vmem:[#allocation5 + $0x450] ss:$8 sps:$4 sm:$0xff]   ;;  %v9350_v17 = vld [vmem:[#allocation5 + $0x3e4] ss:$8 sps:$4 sm:$0xff]  }
  0x97   : > { %1041 = vmatpush1.bf16.msra.mxu0 %v9258_v18  ;;  %1162 = vmatpush1.bf16.msra.mxu1 %v9261_v19  ;;  %v9353_v18 = vld [vmem:[#allocation5 + $0x444] ss:$8 sps:$4 sm:$0xff]   ;;  %v9348_v19 = vld [vmem:[#allocation5 + $0x3e0] ss:$8 sps:$4 sm:$0xff]  }
  0x98   : > { %1042 = vmatprep.subr.bf16.mxu0 %v9266_v20  ;;  %1163 = vmatprep.subr.bf16.mxu1 %v9269_v21  ;;  %v9351_v20 = vld [vmem:[#allocation5 + $0x440] ss:$8 sps:$4 sm:$0xff]   ;;  %v9356_v21 = vld [vmem:[#allocation5 + $0x3d4] ss:$8 sps:$4 sm:$0xff]  }
  0x99   : > { %1068 = vmatprep.mubr.bf16.mxu0 %v10475_v0  ;;  %1189 = vmatprep.mubr.bf16.mxu1 %v10475_v0 }
  0x9b   : > { %1043 = vmatpush1.bf16.msra.mxu0 %v9264_v22  ;;  %1164 = vmatpush1.bf16.msra.mxu1 %v9267_v23  ;;  %v9359_v22 = vld [vmem:[#allocation5 + $0x434] ss:$8 sps:$4 sm:$0xff]   ;;  %v9354_v23 = vld [vmem:[#allocation5 + $0x3d0] ss:$8 sps:$4 sm:$0xff]  }
  0x9c   : > { %1044 = vmatprep.subr.bf16.mxu0 %v9272_v24  ;;  %1165 = vmatprep.subr.bf16.mxu1 %v9275_v25  ;;  %v9357_v24 = vld [vmem:[#allocation5 + $0x430] ss:$8 sps:$4 sm:$0xff]   ;;  %v9362_v25 = vld [vmem:[#allocation5 + $0x3c4] ss:$8 sps:$4 sm:$0xff]  }
  0x9f   : > { %1045 = vmatpush1.bf16.msra.mxu0 %v9270_v26  ;;  %1166 = vmatpush1.bf16.msra.mxu1 %v9273_v27  ;;  %v9365_v26 = vld [vmem:[#allocation5 + $0x424] ss:$8 sps:$4 sm:$0xff]   ;;  %v9360_v27 = vld [vmem:[#allocation5 + $0x3c0] ss:$8 sps:$4 sm:$0xff]  }
  0xa0   : > { %1046 = vmatprep.subr.bf16.mxu0 %v9278_v28  ;;  %1167 = vmatprep.subr.bf16.mxu1 %v9281_v29  ;;  %v9363_v28 = vld [vmem:[#allocation5 + $0x420] ss:$8 sps:$4 sm:$0xff]   ;;  %v9368_v29 = vld [vmem:[#allocation5 + $0x4d4] ss:$8 sps:$4 sm:$0xff]  }
  0xa3   : > { %1047 = vmatpush1.bf16.msra.mxu0 %v9276_v30  ;;  %1168 = vmatpush1.bf16.msra.mxu1 %v9279_v31  ;;  %v9371_v30 = vld [vmem:[#allocation5 + $0x534] ss:$8 sps:$4 sm:$0xff]   ;;  %v8291_v31 = vld [vmem:[%s10626_s6 + $0xa] sm:$0x1] }
  0xa4   : > { %1048 = vmatprep.subr.bf16.mxu0 %v9284_v32  ;;  %1169 = vmatprep.subr.bf16.mxu1 %v9287_v33  ;;  %v8305_v32 = vld [vmem:[%s10626_s6 + $0xb] sm:$0x1]  ;;  %v9366_v33 = vld [vmem:[#allocation5 + $0x4d0] ss:$8 sps:$4 sm:$0xff]  }
  0xa7   : > { %1049 = vmatpush1.bf16.msra.mxu0 %v9282_v34  ;;  %1170 = vmatpush1.bf16.msra.mxu1 %v9285_v35  ;;  %v9369_v34 = vld [vmem:[#allocation5 + $0x530] ss:$8 sps:$4 sm:$0xff]   ;;  %v9374_v35 = vld [vmem:[#allocation5 + $0x4c4] ss:$8 sps:$4 sm:$0xff]  }
  0xa8   : > { %1050 = vmatprep.subr.bf16.mxu0 %v9290_v36  ;;  %1171 = vmatprep.subr.bf16.mxu1 %v9293_v37  ;;  %v9377_v36 = vld [vmem:[#allocation5 + $0x524] ss:$8 sps:$4 sm:$0xff]   ;;  %v9372_v37 = vld [vmem:[#allocation5 + $0x4c0] ss:$8 sps:$4 sm:$0xff]  }
  0xab   : > { %1051 = vmatpush1.bf16.msra.mxu0 %v9288_v38  ;;  %1172 = vmatpush1.bf16.msra.mxu1 %v9291_v39  ;;  %v9375_v38 = vld [vmem:[#allocation5 + $0x520] ss:$8 sps:$4 sm:$0xff]   ;;  %v9380_v39 = vld [vmem:[#allocation5 + $0x4b4] ss:$8 sps:$4 sm:$0xff]  }
  0xac   : > { %1282 = vmatprep.subr.bf16.mxu0 %v9296_v40  ;;  %1403 = vmatprep.subr.bf16.mxu1 %v9299_v41  ;;  %v9383_v40 = vld [vmem:[#allocation5 + $0x514] ss:$8 sps:$4 sm:$0xff]   ;;  %v9378_v41 = vld [vmem:[#allocation5 + $0x4b0] ss:$8 sps:$4 sm:$0xff]  }
  0xae   : > { %8248 = vmatmul.mubr.msk.bf16.vlgmr.msra.gmra.mxu0 %vm325_vm0, %v8235_v42  ;;  %8262 = vmatmul.mubr.msk.bf16.vlgmr.msra.gmra.mxu1 %vm325_vm0, %v8249_v43  ;;  %v9381_v42 = vld [vmem:[#allocation5 + $0x510] ss:$8 sps:$4 sm:$0xff]   ;;  %v9386_v43 = vld [vmem:[#allocation5 + $0x4a4] ss:$8 sps:$4 sm:$0xff]  }
  0xaf   : > { %1283 = vmatpush1.bf16.msra.mxu0 %v9294_v44  ;;  %1404 = vmatpush1.bf16.msra.mxu1 %v9297_v45  ;;  %v9389_v44 = vld [vmem:[#allocation5 + $0x504] ss:$8 sps:$4 sm:$0xff]   ;;  %v9384_v45 = vld [vmem:[#allocation5 + $0x4a0] ss:$8 sps:$4 sm:$0xff]  }
  0xb0   : > { %1284 = vmatprep.subr.bf16.mxu0 %v9302_v46  ;;  %1405 = vmatprep.subr.bf16.mxu1 %v9305_v47  ;;  %v9387_v46 = vld [vmem:[#allocation5 + $0x500] ss:$8 sps:$4 sm:$0xff]   ;;  %v9392_v47 = vld [vmem:[#allocation5 + $0x494] ss:$8 sps:$4 sm:$0xff]  }
  0xb1   : > { %1310 = vmatprep.mubr.bf16.mxu0 %v10475_v0  ;;  %1431 = vmatprep.mubr.bf16.mxu1 %v10475_v0 }
  0xb3   : > { %1285 = vmatpush1.bf16.msra.mxu0 %v9300_v48  ;;  %1406 = vmatpush1.bf16.msra.mxu1 %v9303_v49  ;;  %v9395_v48 = vld [vmem:[#allocation5 + $0x4f4] ss:$8 sps:$4 sm:$0xff]   ;;  %v9390_v49 = vld [vmem:[#allocation5 + $0x490] ss:$8 sps:$4 sm:$0xff]  }
  0xb4   : > { %1286 = vmatprep.subr.bf16.mxu0 %v9308_v50  ;;  %1407 = vmatprep.subr.bf16.mxu1 %v9311_v51  ;;  %v9393_v50 = vld [vmem:[#allocation5 + $0x4f0] ss:$8 sps:$4 sm:$0xff]   ;;  %v9398_v51 = vld [vmem:[#allocation5 + $0x484] ss:$8 sps:$4 sm:$0xff]  }
  0xb7   : > { %1287 = vmatpush1.bf16.msra.mxu0 %v9306_v52  ;;  %1408 = vmatpush1.bf16.msra.mxu1 %v9309_v53  ;;  %v9401_v52 = vld [vmem:[#allocation5 + $0x4e4] ss:$8 sps:$4 sm:$0xff]   ;;  %v9396_v53 = vld [vmem:[#allocation5 + $0x480] ss:$8 sps:$4 sm:$0xff]  }
  0xb8   : > { %1288 = vmatprep.subr.bf16.mxu0 %v9314_v54  ;;  %1409 = vmatprep.subr.bf16.mxu1 %v9317_v55  ;;  %v9399_v54 = vld [vmem:[#allocation5 + $0x4e0] ss:$8 sps:$4 sm:$0xff]   ;;  %v9404_v55 = vld [vmem:[#allocation5 + $0x594] ss:$8 sps:$4 sm:$0xff]  }
  0xbb   : > { %1289 = vmatpush1.bf16.msra.mxu0 %v9312_v56  ;;  %1410 = vmatpush1.bf16.msra.mxu1 %v9315_v57  ;;  %v9407_v56 = vld [vmem:[#allocation5 + $0x5f4] ss:$8 sps:$4 sm:$0xff]   ;;  %v8319_v57 = vld [vmem:[%s10626_s6 + $0xc] sm:$0x1] }
  0xbc   : > { %1290 = vmatprep.subr.bf16.mxu0 %v9320_v58  ;;  %1411 = vmatprep.subr.bf16.mxu1 %v9323_v59  ;;  %v8333_v58 = vld [vmem:[%s10626_s6 + $0xd] sm:$0x1]  ;;  %v9402_v59 = vld [vmem:[#allocation5 + $0x590] ss:$8 sps:$4 sm:$0xff]  }
  0xbf   : > { %1291 = vmatpush1.bf16.msra.mxu0 %v9318_v60  ;;  %1412 = vmatpush1.bf16.msra.mxu1 %v9321_v61  ;;  %v9405_v60 = vld [vmem:[#allocation5 + $0x5f0] ss:$8 sps:$4 sm:$0xff]   ;;  %v9410_v61 = vld [vmem:[#allocation5 + $0x584] ss:$8 sps:$4 sm:$0xff]  }
  0xc0   : > { %1292 = vmatprep.subr.bf16.mxu0 %v9326_v62  ;;  %1413 = vmatprep.subr.bf16.mxu1 %v9329_v63  ;;  %v9413_v62 = vld [vmem:[#allocation5 + $0x5e4] ss:$8 sps:$4 sm:$0xff]   ;;  %v9408_v63 = vld [vmem:[#allocation5 + $0x580] ss:$8 sps:$4 sm:$0xff]  }
  0xc3   : > { %1293 = vmatpush1.bf16.msra.mxu0 %v9324_v1  ;;  %1414 = vmatpush1.bf16.msra.mxu1 %v9327_v2  ;;  %v9411_v1 = vld [vmem:[#allocation5 + $0x5e0] ss:$8 sps:$4 sm:$0xff]   ;;  %v9416_v2 = vld [vmem:[#allocation5 + $0x574] ss:$8 sps:$4 sm:$0xff]  }
  0xc4   : > { %1524 = vmatprep.subr.bf16.mxu0 %v9332_v3  ;;  %1645 = vmatprep.subr.bf16.mxu1 %v9335_v4  ;;  %v9419_v3 = vld [vmem:[#allocation5 + $0x5d4] ss:$8 sps:$4 sm:$0xff]   ;;  %v9414_v4 = vld [vmem:[#allocation5 + $0x570] ss:$8 sps:$4 sm:$0xff]  }
  0xc6   : > { %8276 = vmatmul.mubr.msk.bf16.vlgmr.msra.gmra.mxu0 %vm325_vm0, %v8263_v5  ;;  %8290 = vmatmul.mubr.msk.bf16.vlgmr.msra.gmra.mxu1 %vm325_vm0, %v8277_v6  ;;  %v9417_v5 = vld [vmem:[#allocation5 + $0x5d0] ss:$8 sps:$4 sm:$0xff]   ;;  %v9422_v6 = vld [vmem:[#allocation5 + $0x564] ss:$8 sps:$4 sm:$0xff]  }
  0xc7   : > { %1525 = vmatpush1.bf16.msra.mxu0 %v9330_v7  ;;  %1646 = vmatpush1.bf16.msra.mxu1 %v9333_v8  ;;  %v9425_v7 = vld [vmem:[#allocation5 + $0x5c4] ss:$8 sps:$4 sm:$0xff]   ;;  %v9420_v8 = vld [vmem:[#allocation5 + $0x560] ss:$8 sps:$4 sm:$0xff]  }
  0xc8   : > { %1526 = vmatprep.subr.bf16.mxu0 %v9338_v9  ;;  %1647 = vmatprep.subr.bf16.mxu1 %v9341_v10  ;;  %v9423_v9 = vld [vmem:[#allocation5 + $0x5c0] ss:$8 sps:$4 sm:$0xff]   ;;  %v9428_v10 = vld [vmem:[#allocation5 + $0x554] ss:$8 sps:$4 sm:$0xff]  }
  0xc9   : > { %1552 = vmatprep.mubr.bf16.mxu0 %v10475_v0  ;;  %1673 = vmatprep.mubr.bf16.mxu1 %v10475_v0 }
  0xcb   : > { %1527 = vmatpush1.bf16.msra.mxu0 %v9336_v11  ;;  %1648 = vmatpush1.bf16.msra.mxu1 %v9339_v12  ;;  %v9431_v11 = vld [vmem:[#allocation5 + $0x5b4] ss:$8 sps:$4 sm:$0xff]   ;;  %v9426_v12 = vld [vmem:[#allocation5 + $0x550] ss:$8 sps:$4 sm:$0xff]  }
  0xcc   : > { %1528 = vmatprep.subr.bf16.mxu0 %v9344_v13  ;;  %1649 = vmatprep.subr.bf16.mxu1 %v9347_v14  ;;  %v9429_v13 = vld [vmem:[#allocation5 + $0x5b0] ss:$8 sps:$4 sm:$0xff]   ;;  %v9434_v14 = vld [vmem:[#allocation5 + $0x544] ss:$8 sps:$4 sm:$0xff]  }
  0xcf   : > { %1529 = vmatpush1.bf16.msra.mxu0 %v9342_v15  ;;  %1650 = vmatpush1.bf16.msra.mxu1 %v9345_v16  ;;  %v9437_v15 = vld [vmem:[#allocation5 + $0x5a4] ss:$8 sps:$4 sm:$0xff]   ;;  %v9432_v16 = vld [vmem:[#allocation5 + $0x540] ss:$8 sps:$4 sm:$0xff]  }
  0xd0   : > { %1530 = vmatprep.subr.bf16.mxu0 %v9350_v17  ;;  %1651 = vmatprep.subr.bf16.mxu1 %v9353_v18  ;;  %v9435_v17 = vld [vmem:[#allocation5 + $0x5a0] ss:$8 sps:$4 sm:$0xff]   ;;  %v9440_v18 = vld [vmem:[#allocation5 + $0x654] ss:$8 sps:$4 sm:$0xff]  }
  0xd3   : > { %1531 = vmatpush1.bf16.msra.mxu0 %v9348_v19  ;;  %1652 = vmatpush1.bf16.msra.mxu1 %v9351_v20  ;;  %v9443_v19 = vld [vmem:[#allocation5 + $0x6b4] ss:$8 sps:$4 sm:$0xff]   ;;  %v8347_v20 = vld [vmem:[%s10626_s6 + $0xe] sm:$0x1] }
  0xd4   : > { %1532 = vmatprep.subr.bf16.mxu0 %v9356_v21  ;;  %1653 = vmatprep.subr.bf16.mxu1 %v9359_v22  ;;  %v8361_v21 = vld [vmem:[%s10626_s6 + $0xf] sm:$0x1]  ;;  %v9438_v22 = vld [vmem:[#allocation5 + $0x650] ss:$8 sps:$4 sm:$0xff]  }
  0xd7   : > { %1533 = vmatpush1.bf16.msra.mxu0 %v9354_v23  ;;  %1654 = vmatpush1.bf16.msra.mxu1 %v9357_v24  ;;  %v9441_v23 = vld [vmem:[#allocation5 + $0x6b0] ss:$8 sps:$4 sm:$0xff]   ;;  %v9446_v24 = vld [vmem:[#allocation5 + $0x644] ss:$8 sps:$4 sm:$0xff]  }
  0xd8   : > { %1534 = vmatprep.subr.bf16.mxu0 %v9362_v25  ;;  %1655 = vmatprep.subr.bf16.mxu1 %v9365_v26  ;;  %v9449_v25 = vld [vmem:[#allocation5 + $0x6a4] ss:$8 sps:$4 sm:$0xff]   ;;  %v9444_v26 = vld [vmem:[#allocation5 + $0x640] ss:$8 sps:$4 sm:$0xff]  }
  0xdb   : > { %1535 = vmatpush1.bf16.msra.mxu0 %v9360_v27  ;;  %1656 = vmatpush1.bf16.msra.mxu1 %v9363_v28  ;;  %v9447_v27 = vld [vmem:[#allocation5 + $0x6a0] ss:$8 sps:$4 sm:$0xff]   ;;  %v9452_v28 = vld [vmem:[#allocation5 + $0x634] ss:$8 sps:$4 sm:$0xff]  }
  0xdc   : > { %1766 = vmatprep.subr.bf16.mxu0 %v9368_v29  ;;  %1887 = vmatprep.subr.bf16.mxu1 %v9371_v30  ;;  %v9455_v29 = vld [vmem:[#allocation5 + $0x694] ss:$8 sps:$4 sm:$0xff]   ;;  %v9450_v30 = vld [vmem:[#allocation5 + $0x630] ss:$8 sps:$4 sm:$0xff]  }
  0xde   : > { %8304 = vmatmul.mubr.msk.bf16.vlgmr.msra.gmra.mxu0 %vm325_vm0, %v8291_v31  ;;  %8318 = vmatmul.mubr.msk.bf16.vlgmr.msra.gmra.mxu1 %vm325_vm0, %v8305_v32  ;;  %v9453_v31 = vld [vmem:[#allocation5 + $0x690] ss:$8 sps:$4 sm:$0xff]   ;;  %v9458_v32 = vld [vmem:[#allocation5 + $0x624] ss:$8 sps:$4 sm:$0xff]  }
  0xdf   : > { %1767 = vmatpush1.bf16.msra.mxu0 %v9366_v33  ;;  %1888 = vmatpush1.bf16.msra.mxu1 %v9369_v34  ;;  %v9461_v33 = vld [vmem:[#allocation5 + $0x684] ss:$8 sps:$4 sm:$0xff]   ;;  %v9456_v34 = vld [vmem:[#allocation5 + $0x620] ss:$8 sps:$4 sm:$0xff]  }
  0xe0   : > { %1768 = vmatprep.subr.bf16.mxu0 %v9374_v35  ;;  %1889 = vmatprep.subr.bf16.mxu1 %v9377_v36  ;;  %v9459_v35 = vld [vmem:[#allocation5 + $0x680] ss:$8 sps:$4 sm:$0xff]   ;;  %v9464_v36 = vld [vmem:[#allocation5 + $0x614] ss:$8 sps:$4 sm:$0xff]  }
  0xe1   : > { %1794 = vmatprep.mubr.bf16.mxu0 %v10475_v0  ;;  %1915 = vmatprep.mubr.bf16.mxu1 %v10475_v0 }
  0xe3   : > { %1769 = vmatpush1.bf16.msra.mxu0 %v9372_v37  ;;  %1890 = vmatpush1.bf16.msra.mxu1 %v9375_v38  ;;  %v9467_v37 = vld [vmem:[#allocation5 + $0x674] ss:$8 sps:$4 sm:$0xff]   ;;  %v9462_v38 = vld [vmem:[#allocation5 + $0x610] ss:$8 sps:$4 sm:$0xff]  }
  0xe4   : > { %1770 = vmatprep.subr.bf16.mxu0 %v9380_v39  ;;  %1891 = vmatprep.subr.bf16.mxu1 %v9383_v40  ;;  %v9465_v39 = vld [vmem:[#allocation5 + $0x670] ss:$8 sps:$4 sm:$0xff]   ;;  %v9470_v40 = vld [vmem:[#allocation5 + $0x604] ss:$8 sps:$4 sm:$0xff]  }
  0xe7   : > { %1771 = vmatpush1.bf16.msra.mxu0 %v9378_v41  ;;  %1892 = vmatpush1.bf16.msra.mxu1 %v9381_v42  ;;  %v9473_v41 = vld [vmem:[#allocation5 + $0x664] ss:$8 sps:$4 sm:$0xff]   ;;  %v9468_v42 = vld [vmem:[#allocation5 + $0x600] ss:$8 sps:$4 sm:$0xff]  }
  0xe8   : > { %1772 = vmatprep.subr.bf16.mxu0 %v9386_v43  ;;  %1893 = vmatprep.subr.bf16.mxu1 %v9389_v44  ;;  %v9471_v43 = vld [vmem:[#allocation5 + $0x660] ss:$8 sps:$4 sm:$0xff]   ;;  %v9476_v44 = vld [vmem:[#allocation5 + $0x714] ss:$8 sps:$4 sm:$0xff]  }
  0xeb   : > { %1773 = vmatpush1.bf16.msra.mxu0 %v9384_v45  ;;  %1894 = vmatpush1.bf16.msra.mxu1 %v9387_v46  ;;  %v9479_v45 = vld [vmem:[#allocation5 + $0x774] ss:$8 sps:$4 sm:$0xff]   ;;  %v8375_v46 = vld [vmem:[%s10626_s6 + $0x10] sm:$0x1] }
  0xec   : > { %1774 = vmatprep.subr.bf16.mxu0 %v9392_v47  ;;  %1895 = vmatprep.subr.bf16.mxu1 %v9395_v48  ;;  %v8389_v47 = vld [vmem:[%s10626_s6 + $0x11] sm:$0x1] }
  0xed   : > { %v9474_v48 = vld [vmem:[#allocation5 + $0x710] ss:$8 sps:$4 sm:$0xff]  }
  0xef   : > { %1775 = vmatpush1.bf16.msra.mxu0 %v9390_v49  ;;  %1896 = vmatpush1.bf16.msra.mxu1 %v9393_v50  ;;  %v9477_v49 = vld [vmem:[#allocation5 + $0x770] ss:$8 sps:$4 sm:$0xff]   ;;  %v9482_v50 = vld [vmem:[#allocation5 + $0x704] ss:$8 sps:$4 sm:$0xff]  }
  0xf0   : > { %1776 = vmatprep.subr.bf16.mxu0 %v9398_v51  ;;  %1897 = vmatprep.subr.bf16.mxu1 %v9401_v52  ;;  %v9485_v51 = vld [vmem:[#allocation5 + $0x764] ss:$8 sps:$4 sm:$0xff]  }
  0xf3   : > { %1777 = vmatpush1.bf16.msra.mxu0 %v9396_v53  ;;  %1898 = vmatpush1.bf16.msra.mxu1 %v9399_v54 }
  0xf4   : > { %2008 = vmatprep.subr.bf16.mxu0 %v9404_v55  ;;  %2129 = vmatprep.subr.bf16.mxu1 %v9407_v56  ;;  %v9480_v55 = vld [vmem:[#allocation5 + $0x700] ss:$8 sps:$4 sm:$0xff]  }
  0xf5   : > { %v9483_v56 = vld [vmem:[#allocation5 + $0x760] ss:$8 sps:$4 sm:$0xff]  }
  0xf6   : > { %8332 = vmatmul.mubr.msk.bf16.vlgmr.msra.gmra.mxu0 %vm325_vm0, %v8319_v57  ;;  %8346 = vmatmul.mubr.msk.bf16.vlgmr.msra.gmra.mxu1 %vm325_vm0, %v8333_v58 }
  0xf7   : > { %2009 = vmatpush1.bf16.msra.mxu0 %v9402_v59  ;;  %2130 = vmatpush1.bf16.msra.mxu1 %v9405_v60  ;;  %v9488_v59 = vld [vmem:[#allocation5 + $0x6f4] ss:$8 sps:$4 sm:$0xff]  }
  0xf8   : > { %2010 = vmatprep.subr.bf16.mxu0 %v9410_v61  ;;  %2131 = vmatprep.subr.bf16.mxu1 %v9413_v62  ;;  %v9491_v60 = vld [vmem:[#allocation5 + $0x754] ss:$8 sps:$4 sm:$0xff]  }
  0xf9   : > { %2036 = vmatprep.mubr.bf16.mxu0 %v10475_v0  ;;  %2157 = vmatprep.mubr.bf16.mxu1 %v10475_v0 }
  0xfb   : > { %2011 = vmatpush1.bf16.msra.mxu0 %v9408_v63  ;;  %2132 = vmatpush1.bf16.msra.mxu1 %v9411_v1  ;;  %v9486_v1 = vld [vmem:[#allocation5 + $0x6f0] ss:$8 sps:$4 sm:$0xff]  }
  0xfc   : > { %2012 = vmatprep.subr.bf16.mxu0 %v9416_v2  ;;  %2133 = vmatprep.subr.bf16.mxu1 %v9419_v3  ;;  %v9489_v2 = vld [vmem:[#allocation5 + $0x750] ss:$8 sps:$4 sm:$0xff]  }
  0xff   : > { %2013 = vmatpush1.bf16.msra.mxu0 %v9414_v4  ;;  %2134 = vmatpush1.bf16.msra.mxu1 %v9417_v5  ;;  %v9494_v5 = vld [vmem:[#allocation5 + $0x6e4] ss:$8 sps:$4 sm:$0xff]  }
 0x100   : > { %2014 = vmatprep.subr.bf16.mxu0 %v9422_v6  ;;  %2135 = vmatprep.subr.bf16.mxu1 %v9425_v7  ;;  %v9497_v6 = vld [vmem:[#allocation5 + $0x744] ss:$8 sps:$4 sm:$0xff]   ;;  %v9492_v7 = vld [vmem:[#allocation5 + $0x6e0] ss:$8 sps:$4 sm:$0xff]  }
 0x103   : > { %2015 = vmatpush1.bf16.msra.mxu0 %v9420_v8  ;;  %2136 = vmatpush1.bf16.msra.mxu1 %v9423_v9  ;;  %v9495_v8 = vld [vmem:[#allocation5 + $0x740] ss:$8 sps:$4 sm:$0xff]   ;;  %v9500_v9 = vld [vmem:[#allocation5 + $0x6d4] ss:$8 sps:$4 sm:$0xff]  }
 0x104   : > { %2016 = vmatprep.subr.bf16.mxu0 %v9428_v10  ;;  %2137 = vmatprep.subr.bf16.mxu1 %v9431_v11  ;;  %v9503_v10 = vld [vmem:[#allocation5 + $0x734] ss:$8 sps:$4 sm:$0xff]   ;;  %v9498_v11 = vld [vmem:[#allocation5 + $0x6d0] ss:$8 sps:$4 sm:$0xff]  }
 0x107   : > { %2017 = vmatpush1.bf16.msra.mxu0 %v9426_v12  ;;  %2138 = vmatpush1.bf16.msra.mxu1 %v9429_v13  ;;  %v9501_v12 = vld [vmem:[#allocation5 + $0x730] ss:$8 sps:$4 sm:$0xff]   ;;  %v9506_v13 = vld [vmem:[#allocation5 + $0x6c4] ss:$8 sps:$4 sm:$0xff]  }
 0x108   : > { %2018 = vmatprep.subr.bf16.mxu0 %v9434_v14  ;;  %2139 = vmatprep.subr.bf16.mxu1 %v9437_v15  ;;  %v9509_v14 = vld [vmem:[#allocation5 + $0x724] ss:$8 sps:$4 sm:$0xff]   ;;  %v9504_v15 = vld [vmem:[#allocation5 + $0x6c0] ss:$8 sps:$4 sm:$0xff]  }
 0x10b   : > { %2019 = vmatpush1.bf16.msra.mxu0 %v9432_v16  ;;  %2140 = vmatpush1.bf16.msra.mxu1 %v9435_v17  ;;  %v9507_v16 = vld [vmem:[#allocation5 + $0x720] ss:$8 sps:$4 sm:$0xff]   ;;  %v9512_v17 = vld [vmem:[#allocation5 + $0x7d4] ss:$8 sps:$4 sm:$0xff]  }
 0x10c   : > { %2250 = vmatprep.subr.bf16.mxu0 %v9440_v18  ;;  %2371 = vmatprep.subr.bf16.mxu1 %v9443_v19  ;;  %v9515_v18 = vld [vmem:[#allocation5 + $0x834] ss:$8 sps:$4 sm:$0xff]   ;;  %v8403_v19 = vld [vmem:[%s10626_s6 + $0x12] sm:$0x1] }
 0x10e   : > { %8360 = vmatmul.mubr.msk.bf16.vlgmr.msra.gmra.mxu0 %vm325_vm0, %v8347_v20  ;;  %8374 = vmatmul.mubr.msk.bf16.vlgmr.msra.gmra.mxu1 %vm325_vm0, %v8361_v21  ;;  %v8417_v20 = vld [vmem:[%s10626_s6 + $0x13] sm:$0x1] }
 0x10f   : > { %2251 = vmatpush1.bf16.msra.mxu0 %v9438_v22  ;;  %2372 = vmatpush1.bf16.msra.mxu1 %v9441_v23  ;;  %v9510_v21 = vld [vmem:[#allocation5 + $0x7d0] ss:$8 sps:$4 sm:$0xff]   ;;  %v9518_v23 = vld [vmem:[#allocation5 + $0x7c4] ss:$8 sps:$4 sm:$0xff]  }
 0x110   : > { %2252 = vmatprep.subr.bf16.mxu0 %v9446_v24  ;;  %2373 = vmatprep.subr.bf16.mxu1 %v9449_v25  ;;  %v9513_v22 = vld [vmem:[#allocation5 + $0x830] ss:$8 sps:$4 sm:$0xff]   ;;  %v9521_v24 = vld [vmem:[#allocation5 + $0x824] ss:$8 sps:$4 sm:$0xff]  }
 0x111   : > { %2278 = vmatprep.mubr.bf16.mxu0 %v10475_v0  ;;  %2399 = vmatprep.mubr.bf16.mxu1 %v10475_v0 }
 0x113   : > { %2253 = vmatpush1.bf16.msra.mxu0 %v9444_v26  ;;  %2374 = vmatpush1.bf16.msra.mxu1 %v9447_v27  ;;  %v9516_v27 = vld [vmem:[#allocation5 + $0x7c0] ss:$8 sps:$4 sm:$0xff]  }
 0x114   : > { %2254 = vmatprep.subr.bf16.mxu0 %v9452_v28  ;;  %2375 = vmatprep.subr.bf16.mxu1 %v9455_v29  ;;  %v9519_v28 = vld [vmem:[#allocation5 + $0x820] ss:$8 sps:$4 sm:$0xff]  }
 0x117   : > { %2255 = vmatpush1.bf16.msra.mxu0 %v9450_v30  ;;  %2376 = vmatpush1.bf16.msra.mxu1 %v9453_v31  ;;  %v9524_v30 = vld [vmem:[#allocation5 + $0x7b4] ss:$8 sps:$4 sm:$0xff]  }
 0x118   : > { %2256 = vmatprep.subr.bf16.mxu0 %v9458_v32  ;;  %2377 = vmatprep.subr.bf16.mxu1 %v9461_v33  ;;  %v9527_v33 = vld [vmem:[#allocation5 + $0x814] ss:$8 sps:$4 sm:$0xff]  }
 0x11b   : > { %2257 = vmatpush1.bf16.msra.mxu0 %v9456_v34  ;;  %2378 = vmatpush1.bf16.msra.mxu1 %v9459_v35 }
 0x11c   : > { %2258 = vmatprep.subr.bf16.mxu0 %v9464_v36  ;;  %2379 = vmatprep.subr.bf16.mxu1 %v9467_v37 }
 0x11f   : > { %2259 = vmatpush1.bf16.msra.mxu0 %v9462_v38  ;;  %2380 = vmatpush1.bf16.msra.mxu1 %v9465_v39  ;;  %v9522_v38 = vld [vmem:[#allocation5 + $0x7b0] ss:$8 sps:$4 sm:$0xff]  }
 0x120   : > { %2260 = vmatprep.subr.bf16.mxu0 %v9470_v40  ;;  %2381 = vmatprep.subr.bf16.mxu1 %v9473_v41  ;;  %v9525_v40 = vld [vmem:[#allocation5 + $0x810] ss:$8 sps:$4 sm:$0xff]  }
 0x123   : > { %2261 = vmatpush1.bf16.msra.mxu0 %v9468_v42  ;;  %2382 = vmatpush1.bf16.msra.mxu1 %v9471_v43  ;;  %v9530_v43 = vld [vmem:[#allocation5 + $0x7a4] ss:$8 sps:$4 sm:$0xff]  }
 0x124   : > { %2492 = vmatprep.subr.bf16.mxu0 %v9476_v44  ;;  %2613 = vmatprep.subr.bf16.mxu1 %v9479_v45  ;;  %v9533_v44 = vld [vmem:[#allocation5 + $0x804] ss:$8 sps:$4 sm:$0xff]   ;;  %v9528_v45 = vld [vmem:[#allocation5 + $0x7a0] ss:$8 sps:$4 sm:$0xff]  }
 0x126   : > { %v363_v52 = vpop.f32.mrf.mxu0  ;;  %v467_v53 = vpop.f32.mrf.mxu1  ;;  %8388 = vmatmul.mubr.msk.bf16.vlgmr.msra.gmra.mxu0 %vm325_vm0, %v8375_v46  ;;  %8402 = vmatmul.mubr.msk.bf16.vlgmr.msra.gmra.mxu1 %vm325_vm0, %v8389_v47  ;;  %v9531_v46 = vld [vmem:[#allocation5 + $0x800] ss:$8 sps:$4 sm:$0xff]   ;;  %v9536_v47 = vld [vmem:[#allocation5 + $0x794] ss:$8 sps:$4 sm:$0xff]  }
 0x127   : > { %v10690_v54 = vadd.f32 %v467_v53, %v363_v52  ;;  %2493 = vmatpush1.bf16.msra.mxu0 %v9474_v48  ;;  %2614 = vmatpush1.bf16.msra.mxu1 %v9477_v49  ;;  %v9539_v48 = vld [vmem:[#allocation5 + $0x7f4] ss:$8 sps:$4 sm:$0xff]   ;;  %v9534_v49 = vld [vmem:[#allocation5 + $0x790] ss:$8 sps:$4 sm:$0xff]   ;;  %v9545_v52 = vld [vmem:[#allocation5 + $0x7e4] ss:$8 sps:$4 sm:$0xff]  }
 0x128   : > { %v365_v57 = vpop.f32.mrf.mxu0  ;;  %v469_v58 = vpop.f32.mrf.mxu1  ;;  %2494 = vmatprep.subr.bf16.mxu0 %v9482_v50  ;;  %2615 = vmatprep.subr.bf16.mxu1 %v9485_v51  ;;  %v9537_v50 = vld [vmem:[#allocation5 + $0x7f0] ss:$8 sps:$4 sm:$0xff]   ;;  %v9542_v51 = vld [vmem:[#allocation5 + $0x784] ss:$8 sps:$4 sm:$0xff]   ;;  %v9540_v53 = vld [vmem:[#allocation5 + $0x780] ss:$8 sps:$4 sm:$0xff]  }
 0x129   : > { %v10692_v61 = vadd.f32 %v469_v58, %v365_v57  ;;  %2520 = vmatprep.mubr.bf16.mxu0 %v10475_v0  ;;  %2641 = vmatprep.mubr.bf16.mxu1 %v10475_v0  ;;  %v8431_v57 = vld [vmem:[%s10626_s6 + $0x14] sm:$0x1]  ;;  %v8445_v58 = vld [vmem:[%s10626_s6 + $0x15] sm:$0x1] }
 0x12a   : > { %v367_v62 = vpop.f32.mrf.mxu0  ;;  %v471_v63 = vpop.f32.mrf.mxu1 }
 0x12b   : > { %2495 = vmatpush1.bf16.msra.mxu0 %v9480_v55  ;;  %2616 = vmatpush1.bf16.msra.mxu1 %v9483_v56  ;;  %v9548_v55 = vld [vmem:[#allocation5 + $0x894] ss:$8 sps:$4 sm:$0xff]   ;;  %v9557_v62 = vld [vmem:[#allocation5 + $0x8e4] ss:$8 sps:$4 sm:$0xff]  }
 0x12c   : > { %v368_v3 = vpop.f32.mrf.mxu0  ;;  %v472_v4 = vpop.f32.mrf.mxu1  ;;  %2496 = vmatprep.subr.bf16.mxu0 %v9488_v59  ;;  %2617 = vmatprep.subr.bf16.mxu1 %v9491_v60  ;;  %v9551_v56 = vld [vmem:[#allocation5 + $0x8f4] ss:$8 sps:$4 sm:$0xff]   ;;  %v9546_v59 = vld [vmem:[#allocation5 + $0x890] ss:$8 sps:$4 sm:$0xff]  }
 0x12d   : > { %v9549_v60 = vld [vmem:[#allocation5 + $0x8f0] ss:$8 sps:$4 sm:$0xff]   ;;  %v9555_v3 = vld [vmem:[#allocation5 + $0x8e0] ss:$8 sps:$4 sm:$0xff]  }
 0x12f   : > { %2497 = vmatpush1.bf16.msra.mxu0 %v9486_v1  ;;  %2618 = vmatpush1.bf16.msra.mxu1 %v9489_v2  ;;  %v9552_v2 = vld [vmem:[#allocation5 + $0x880] ss:$8 sps:$4 sm:$0xff]  }
 0x130   : > { %2498 = vmatprep.subr.bf16.mxu0 %v9494_v5  ;;  %2619 = vmatprep.subr.bf16.mxu1 %v9497_v6  ;;  %v9560_v5 = vld [vmem:[#allocation5 + $0x874] ss:$8 sps:$4 sm:$0xff]  }
 0x133   : > { %2499 = vmatpush1.bf16.msra.mxu0 %v9492_v7  ;;  %2620 = vmatpush1.bf16.msra.mxu1 %v9495_v8  ;;  %v9563_v8 = vld [vmem:[#allocation5 + $0x8d4] ss:$8 sps:$4 sm:$0xff]  }
 0x134   : > { %2500 = vmatprep.subr.bf16.mxu0 %v9500_v9  ;;  %2621 = vmatprep.subr.bf16.mxu1 %v9503_v10 }
 0x137   : > { %2501 = vmatpush1.bf16.msra.mxu0 %v9498_v11  ;;  %2622 = vmatpush1.bf16.msra.mxu1 %v9501_v12 }
 0x138   : > { %2502 = vmatprep.subr.bf16.mxu0 %v9506_v13  ;;  %2623 = vmatprep.subr.bf16.mxu1 %v9509_v14  ;;  %v9558_v13 = vld [vmem:[#allocation5 + $0x870] ss:$8 sps:$4 sm:$0xff]  }
 0x139   : > { %v9561_v14 = vld [vmem:[#allocation5 + $0x8d0] ss:$8 sps:$4 sm:$0xff]  }
 0x13b   : > { %2503 = vmatpush1.bf16.msra.mxu0 %v9504_v15  ;;  %2624 = vmatpush1.bf16.msra.mxu1 %v9507_v16  ;;  %v9566_v16 = vld [vmem:[#allocation5 + $0x864] ss:$8 sps:$4 sm:$0xff]  }
 0x13c   : > { %2734 = vmatprep.subr.bf16.mxu0 %v9512_v17  ;;  %2855 = vmatprep.subr.bf16.mxu1 %v9515_v18 }
 0x13e   : > { %v586_v25 = vpop.f32.mrf.mxu0  ;;  %v707_v26 = vpop.f32.mrf.mxu1  ;;  %8416 = vmatmul.mubr.msk.bf16.vlgmr.msra.gmra.mxu0 %vm325_vm0, %v8403_v19  ;;  %8430 = vmatmul.mubr.msk.bf16.vlgmr.msra.gmra.mxu1 %vm325_vm0, %v8417_v20  ;;  %v9569_v19 = vld [vmem:[#allocation5 + $0x8c4] ss:$8 sps:$4 sm:$0xff]   ;;  %v9564_v20 = vld [vmem:[#allocation5 + $0x860] ss:$8 sps:$4 sm:$0xff]  }
 0x13f   : > { %v593_v29 = vadd.f32 %v586_v25, %v10690_v54  ;;  %2735 = vmatpush1.bf16.msra.mxu0 %v9510_v21  ;;  %2856 = vmatpush1.bf16.msra.mxu1 %v9513_v22  ;;  %v9543_v54 = vld [vmem:[#allocation5 + $0x7e0] ss:$8 sps:$4 sm:$0xff]   ;;  %v9572_v22 = vld [vmem:[#allocation5 + $0x854] ss:$8 sps:$4 sm:$0xff]   ;;  %v9573_v25 = vld [vmem:[#allocation5 + $0x8b0] ss:$8 sps:$4 sm:$0xff]  }
 0x140   : > { %v588_v31 = vpop.f32.mrf.mxu0  ;;  %v709_v32 = vpop.f32.mrf.mxu1  ;;  %2736 = vmatprep.subr.bf16.mxu0 %v9518_v23  ;;  %2857 = vmatprep.subr.bf16.mxu1 %v9521_v24  ;;  %v9567_v21 = vld [vmem:[#allocation5 + $0x8c0] ss:$8 sps:$4 sm:$0xff]   ;;  %v9575_v23 = vld [vmem:[#allocation5 + $0x8b4] ss:$8 sps:$4 sm:$0xff]   ;;  %v9570_v24 = vld [vmem:[#allocation5 + $0x850] ss:$8 sps:$4 sm:$0xff]  }
 0x141   : > { %v714_v34 = vadd.f32 %v707_v26, %v593_v29  ;;  %v594_v35 = vadd.f32 %v588_v31, %v10692_v61  ;;  %2762 = vmatprep.mubr.bf16.mxu0 %v10475_v0  ;;  %2883 = vmatprep.mubr.bf16.mxu1 %v10475_v0  ;;  %v9554_v61 = vld [vmem:[#allocation5 + $0x884] ss:$8 sps:$4 sm:$0xff]   ;;  %v9579_v29 = vld [vmem:[#allocation5 + $0x8a0] ss:$8 sps:$4 sm:$0xff]   ;;  %v9587_v31 = vld [vmem:[#allocation5 + $0x9b4] ss:$8 sps:$4 sm:$0xff]  }
 0x142   : > { %v590_v36 = vpop.f32.mrf.mxu0  ;;  %v711_v37 = vpop.f32.mrf.mxu1  ;;  %v9578_v26 = vld [vmem:[#allocation5 + $0x844] ss:$8 sps:$4 sm:$0xff]  }
 0x143   : > { %v715_v39 = vadd.f32 %v709_v32, %v594_v35  ;;  %2737 = vmatpush1.bf16.msra.mxu0 %v9516_v27  ;;  %2858 = vmatpush1.bf16.msra.mxu1 %v9519_v28  ;;  %v9581_v27 = vld [vmem:[#allocation5 + $0x8a4] ss:$8 sps:$4 sm:$0xff]   ;;  %v9576_v28 = vld [vmem:[#allocation5 + $0x840] ss:$8 sps:$4 sm:$0xff]   ;;  %v8459_v32 = vld [vmem:[%s10626_s6 + $0x16] sm:$0x1] }
 0x144   : > { %v591_v41 = vpop.f32.mrf.mxu0  ;;  %v712_v42 = vpop.f32.mrf.mxu1  ;;  %2738 = vmatprep.subr.bf16.mxu0 %v9524_v30  ;;  %2859 = vmatprep.subr.bf16.mxu1 %v9527_v33  ;;  %v9584_v30 = vld [vmem:[#allocation5 + $0x954] ss:$8 sps:$4 sm:$0xff]   ;;  %v9585_v35 = vld [vmem:[#allocation5 + $0x9b0] ss:$8 sps:$4 sm:$0xff]   ;;  %v9590_v36 = vld [vmem:[#allocation5 + $0x944] ss:$8 sps:$4 sm:$0xff]  }
 0x145   : > { %v8473_v33 = vld [vmem:[%s10626_s6 + $0x17] sm:$0x1]  ;;  %v9593_v37 = vld [vmem:[#allocation5 + $0x9a4] ss:$8 sps:$4 sm:$0xff]   ;;  %v9588_v41 = vld [vmem:[#allocation5 + $0x940] ss:$8 sps:$4 sm:$0xff]  }
 0x146   : > { %v9591_v42 = vld [vmem:[#allocation5 + $0x9a0] ss:$8 sps:$4 sm:$0xff]  }
 0x147   : > { %2739 = vmatpush1.bf16.msra.mxu0 %v9522_v38  ;;  %2860 = vmatpush1.bf16.msra.mxu1 %v9525_v40 }
 0x148   : > { %2740 = vmatprep.subr.bf16.mxu0 %v9530_v43  ;;  %2861 = vmatprep.subr.bf16.mxu1 %v9533_v44 }
 0x14b   : > { %2741 = vmatpush1.bf16.msra.mxu0 %v9528_v45  ;;  %2862 = vmatpush1.bf16.msra.mxu1 %v9531_v46  ;;  %v9596_v45 = vld [vmem:[#allocation5 + $0x934] ss:$8 sps:$4 sm:$0xff]  }
 0x14c   : > { %2742 = vmatprep.subr.bf16.mxu0 %v9536_v47  ;;  %2863 = vmatprep.subr.bf16.mxu1 %v9539_v48  ;;  %v9599_v46 = vld [vmem:[#allocation5 + $0x994] ss:$8 sps:$4 sm:$0xff]  }
 0x14f   : > { %2743 = vmatpush1.bf16.msra.mxu0 %v9534_v49  ;;  %2864 = vmatpush1.bf16.msra.mxu1 %v9537_v50 }
 0x150   : > { %2744 = vmatprep.subr.bf16.mxu0 %v9542_v51  ;;  %2865 = vmatprep.subr.bf16.mxu1 %v9545_v52  ;;  %v9594_v52 = vld [vmem:[#allocation5 + $0x930] ss:$8 sps:$4 sm:$0xff]  }
 0x153   : > { %2745 = vmatpush1.bf16.msra.mxu0 %v9540_v53  ;;  %2866 = vmatpush1.bf16.msra.mxu1 %v9543_v54  ;;  %v9597_v53 = vld [vmem:[#allocation5 + $0x990] ss:$8 sps:$4 sm:$0xff]  }
 0x154   : > { %2976 = vmatprep.subr.bf16.mxu0 %v9548_v55  ;;  %3097 = vmatprep.subr.bf16.mxu1 %v9551_v56  ;;  %v9602_v56 = vld [vmem:[#allocation5 + $0x924] ss:$8 sps:$4 sm:$0xff]  }
 0x156   : > { %v828_v63 = vpop.f32.mrf.mxu0  ;;  %v949_v1 = vpop.f32.mrf.mxu1  ;;  %8444 = vmatmul.mubr.msk.bf16.vlgmr.msra.gmra.mxu0 %vm325_vm0, %v8431_v57  ;;  %8458 = vmatmul.mubr.msk.bf16.vlgmr.msra.gmra.mxu1 %vm325_vm0, %v8445_v58  ;;  %v9605_v57 = vld [vmem:[#allocation5 + $0x984] ss:$8 sps:$4 sm:$0xff]   ;;  %v9600_v58 = vld [vmem:[#allocation5 + $0x920] ss:$8 sps:$4 sm:$0xff]  }
 0x157   : > { %v835_v4 = vadd.f32 %v828_v63, %v714_v34  ;;  %2977 = vmatpush1.bf16.msra.mxu0 %v9546_v59  ;;  %3098 = vmatpush1.bf16.msra.mxu1 %v9549_v60  ;;  %v9582_v34 = vld [vmem:[#allocation5 + $0x950] ss:$8 sps:$4 sm:$0xff]   ;;  %v9603_v59 = vld [vmem:[#allocation5 + $0x980] ss:$8 sps:$4 sm:$0xff]   ;;  %v9608_v60 = vld [vmem:[#allocation5 + $0x914] ss:$8 sps:$4 sm:$0xff]  }
 0x158   : > { %v830_v6 = vpop.f32.mrf.mxu0  ;;  %v951_v7 = vpop.f32.mrf.mxu1  ;;  %2978 = vmatprep.subr.bf16.mxu0 %v9554_v61  ;;  %3099 = vmatprep.subr.bf16.mxu1 %v9557_v62  ;;  %v9611_v61 = vld [vmem:[#allocation5 + $0x974] ss:$8 sps:$4 sm:$0xff]   ;;  %v9606_v62 = vld [vmem:[#allocation5 + $0x910] ss:$8 sps:$4 sm:$0xff]  }
 0x159   : > { %v956_v9 = vadd.f32 %v949_v1, %v835_v4  ;;  %v836_v10 = vadd.f32 %v830_v6, %v715_v39  ;;  %3004 = vmatprep.mubr.bf16.mxu0 %v10475_v0  ;;  %3125 = vmatprep.mubr.bf16.mxu1 %v10475_v0  ;;  %v9609_v63 = vld [vmem:[#allocation5 + $0x970] ss:$8 sps:$4 sm:$0xff]   ;;  %v9614_v1 = vld [vmem:[#allocation5 + $0x904] ss:$8 sps:$4 sm:$0xff]   ;;  %v9615_v4 = vld [vmem:[#allocation5 + $0x960] ss:$8 sps:$4 sm:$0xff]  }
 0x15a   : > { %v832_v11 = vpop.f32.mrf.mxu0  ;;  %v953_v12 = vpop.f32.mrf.mxu1  ;;  %v9623_v6 = vld [vmem:[#allocation5 + $0xa74] ss:$8 sps:$4 sm:$0xff]  }
 0x15b   : > { %v957_v15 = vadd.f32 %v951_v7, %v836_v10  ;;  %2979 = vmatpush1.bf16.msra.mxu0 %v9552_v2  ;;  %3100 = vmatpush1.bf16.msra.mxu1 %v9555_v3  ;;  %v9617_v2 = vld [vmem:[#allocation5 + $0x964] ss:$8 sps:$4 sm:$0xff]   ;;  %v9612_v3 = vld [vmem:[#allocation5 + $0x900] ss:$8 sps:$4 sm:$0xff]   ;;  %v8487_v7 = vld [vmem:[%s10626_s6 + $0x18] sm:$0x1] }
 0x15c   : > { %v833_v17 = vpop.f32.mrf.mxu0  ;;  %v954_v18 = vpop.f32.mrf.mxu1  ;;  %2980 = vmatprep.subr.bf16.mxu0 %v9560_v5  ;;  %3101 = vmatprep.subr.bf16.mxu1 %v9563_v8  ;;  %v9620_v5 = vld [vmem:[#allocation5 + $0xa14] ss:$8 sps:$4 sm:$0xff]   ;;  %v8501_v8 = vld [vmem:[%s10626_s6 + $0x19] sm:$0x1]  ;;  %v9626_v11 = vld [vmem:[#allocation5 + $0xa04] ss:$8 sps:$4 sm:$0xff]  }
 0x15d   : > { %v9621_v10 = vld [vmem:[#allocation5 + $0xa70] ss:$8 sps:$4 sm:$0xff]   ;;  %v9629_v12 = vld [vmem:[#allocation5 + $0xa64] ss:$8 sps:$4 sm:$0xff]   ;;  %v9627_v17 = vld [vmem:[#allocation5 + $0xa60] ss:$8 sps:$4 sm:$0xff]  }
 0x15f   : > { %2981 = vmatpush1.bf16.msra.mxu0 %v9558_v13  ;;  %3102 = vmatpush1.bf16.msra.mxu1 %v9561_v14 }
 0x160   : > { %2982 = vmatprep.subr.bf16.mxu0 %v9566_v16  ;;  %3103 = vmatprep.subr.bf16.mxu1 %v9569_v19  ;;  %v9624_v16 = vld [vmem:[#allocation5 + $0xa00] ss:$8 sps:$4 sm:$0xff]  }
 0x163   : > { %2983 = vmatpush1.bf16.msra.mxu0 %v9564_v20  ;;  %3104 = vmatpush1.bf16.msra.mxu1 %v9567_v21  ;;  %v9632_v20 = vld [vmem:[#allocation5 + $0x9f4] ss:$8 sps:$4 sm:$0xff]  }
 0x164   : > { %2984 = vmatprep.subr.bf16.mxu0 %v9572_v22  ;;  %3105 = vmatprep.subr.bf16.mxu1 %v9575_v23  ;;  %v9635_v21 = vld [vmem:[#allocation5 + $0xa54] ss:$8 sps:$4 sm:$0xff]  }
 0x167   : > { %2985 = vmatpush1.bf16.msra.mxu0 %v9570_v24  ;;  %3106 = vmatpush1.bf16.msra.mxu1 %v9573_v25 }
 0x168   : > { %2986 = vmatprep.subr.bf16.mxu0 %v9578_v26  ;;  %3107 = vmatprep.subr.bf16.mxu1 %v9581_v27  ;;  %v9630_v27 = vld [vmem:[#allocation5 + $0x9f0] ss:$8 sps:$4 sm:$0xff]  }
 0x16b   : > { %2987 = vmatpush1.bf16.msra.mxu0 %v9576_v28  ;;  %3108 = vmatpush1.bf16.msra.mxu1 %v9579_v29  ;;  %v9633_v28 = vld [vmem:[#allocation5 + $0xa50] ss:$8 sps:$4 sm:$0xff]  }
 0x16c   : > { %3218 = vmatprep.subr.bf16.mxu0 %v9584_v30  ;;  %3339 = vmatprep.subr.bf16.mxu1 %v9587_v31  ;;  %v9638_v31 = vld [vmem:[#allocation5 + $0x9e4] ss:$8 sps:$4 sm:$0xff]  }
 0x16e   : > { %v1070_v38 = vpop.f32.mrf.mxu0  ;;  %v1191_v39 = vpop.f32.mrf.mxu1  ;;  %8472 = vmatmul.mubr.msk.bf16.vlgmr.msra.gmra.mxu0 %vm325_vm0, %v8459_v32  ;;  %8486 = vmatmul.mubr.msk.bf16.vlgmr.msra.gmra.mxu1 %vm325_vm0, %v8473_v33  ;;  %v9641_v32 = vld [vmem:[#allocation5 + $0xa44] ss:$8 sps:$4 sm:$0xff]   ;;  %v9636_v33 = vld [vmem:[#allocation5 + $0x9e0] ss:$8 sps:$4 sm:$0xff]  }
 0x16f   : > { %v1077_v40 = vadd.f32 %v1070_v38, %v956_v9  ;;  %3219 = vmatpush1.bf16.msra.mxu0 %v9582_v34  ;;  %3340 = vmatpush1.bf16.msra.mxu1 %v9585_v35  ;;  %v9618_v9 = vld [vmem:[#allocation5 + $0xa10] ss:$8 sps:$4 sm:$0xff]   ;;  %v9639_v34 = vld [vmem:[#allocation5 + $0xa40] ss:$8 sps:$4 sm:$0xff]   ;;  %v9644_v35 = vld [vmem:[#allocation5 + $0x9d4] ss:$8 sps:$4 sm:$0xff]  }
 0x170   : > { %v1072_v43 = vpop.f32.mrf.mxu0  ;;  %v1193_v44 = vpop.f32.mrf.mxu1  ;;  %3220 = vmatprep.subr.bf16.mxu0 %v9590_v36  ;;  %3341 = vmatprep.subr.bf16.mxu1 %v9593_v37  ;;  %v9647_v36 = vld [vmem:[#allocation5 + $0xa34] ss:$8 sps:$4 sm:$0xff]   ;;  %v9642_v37 = vld [vmem:[#allocation5 + $0x9d0] ss:$8 sps:$4 sm:$0xff]  }
 0x171   : > { %v1198_v47 = vadd.f32 %v1191_v39, %v1077_v40  ;;  %v1078_v48 = vadd.f32 %v1072_v43, %v957_v15  ;;  %3246 = vmatprep.mubr.bf16.mxu0 %v10475_v0  ;;  %3367 = vmatprep.mubr.bf16.mxu1 %v10475_v0  ;;  %v9645_v38 = vld [vmem:[#allocation5 + $0xa30] ss:$8 sps:$4 sm:$0xff]   ;;  %v9650_v39 = vld [vmem:[#allocation5 + $0x9c4] ss:$8 sps:$4 sm:$0xff]   ;;  %v9656_v43 = vld [vmem:[#allocation5 + $0xad4] ss:$8 sps:$4 sm:$0xff]  }
 0x172   : > { %v1074_v49 = vpop.f32.mrf.mxu0  ;;  %v1195_v50 = vpop.f32.mrf.mxu1  ;;  %v9653_v40 = vld [vmem:[#allocation5 + $0xa24] ss:$8 sps:$4 sm:$0xff]  }
 0x173   : > { %v1199_v51 = vadd.f32 %v1193_v44, %v1078_v48  ;;  %3221 = vmatpush1.bf16.msra.mxu0 %v9588_v41  ;;  %3342 = vmatpush1.bf16.msra.mxu1 %v9591_v42  ;;  %v9648_v41 = vld [vmem:[#allocation5 + $0x9c0] ss:$8 sps:$4 sm:$0xff]   ;;  %v9659_v44 = vld [vmem:[#allocation5 + $0xb34] ss:$8 sps:$4 sm:$0xff]   ;;  %v9657_v48 = vld [vmem:[#allocation5 + $0xb30] ss:$8 sps:$4 sm:$0xff]  }
 0x174   : > { %v1075_v54 = vpop.f32.mrf.mxu0  ;;  %v1196_v55 = vpop.f32.mrf.mxu1  ;;  %3222 = vmatprep.subr.bf16.mxu0 %v9596_v45  ;;  %3343 = vmatprep.subr.bf16.mxu1 %v9599_v46  ;;  %v9651_v42 = vld [vmem:[#allocation5 + $0xa20] ss:$8 sps:$4 sm:$0xff]   ;;  %v8515_v45 = vld [vmem:[%s10626_s6 + $0x1a] sm:$0x1]  ;;  %v8529_v46 = vld [vmem:[%s10626_s6 + $0x1b] sm:$0x1] }
 0x175   : > { %v9662_v49 = vld [vmem:[#allocation5 + $0xac4] ss:$8 sps:$4 sm:$0xff]   ;;  %v9660_v54 = vld [vmem:[#allocation5 + $0xac0] ss:$8 sps:$4 sm:$0xff]  }
 0x176   : > { %v9665_v50 = vld [vmem:[#allocation5 + $0xb24] ss:$8 sps:$4 sm:$0xff]   ;;  %v9663_v55 = vld [vmem:[#allocation5 + $0xb20] ss:$8 sps:$4 sm:$0xff]  }
 0x177   : > { %3223 = vmatpush1.bf16.msra.mxu0 %v9594_v52  ;;  %3344 = vmatpush1.bf16.msra.mxu1 %v9597_v53 }
 0x178   : > { %3224 = vmatprep.subr.bf16.mxu0 %v9602_v56  ;;  %3345 = vmatprep.subr.bf16.mxu1 %v9605_v57 }
 0x17b   : > { %3225 = vmatpush1.bf16.msra.mxu0 %v9600_v58  ;;  %3346 = vmatpush1.bf16.msra.mxu1 %v9603_v59  ;;  %v9668_v58 = vld [vmem:[#allocation5 + $0xab4] ss:$8 sps:$4 sm:$0xff]  }
 0x17c   : > { %3226 = vmatprep.subr.bf16.mxu0 %v9608_v60  ;;  %3347 = vmatprep.subr.bf16.mxu1 %v9611_v61  ;;  %v9671_v59 = vld [vmem:[#allocation5 + $0xb14] ss:$8 sps:$4 sm:$0xff]  }
 0x17f   : > { %3227 = vmatpush1.bf16.msra.mxu0 %v9606_v62  ;;  %3348 = vmatpush1.bf16.msra.mxu1 %v9609_v63 }
 0x180   : > { %3228 = vmatprep.subr.bf16.mxu0 %v9614_v1  ;;  %3349 = vmatprep.subr.bf16.mxu1 %v9617_v2  ;;  %v9666_v2 = vld [vmem:[#allocation5 + $0xab0] ss:$8 sps:$4 sm:$0xff]  }
 0x183   : > { %3229 = vmatpush1.bf16.msra.mxu0 %v9612_v3  ;;  %3350 = vmatpush1.bf16.msra.mxu1 %v9615_v4  ;;  %v9669_v3 = vld [vmem:[#allocation5 + $0xb10] ss:$8 sps:$4 sm:$0xff]  }
 0x184   : > { %3460 = vmatprep.subr.bf16.mxu0 %v9620_v5  ;;  %3581 = vmatprep.subr.bf16.mxu1 %v9623_v6  ;;  %v9674_v6 = vld [vmem:[#allocation5 + $0xaa4] ss:$8 sps:$4 sm:$0xff]  }
 0x186   : > { %v1312_v13 = vpop.f32.mrf.mxu0  ;;  %v1433_v14 = vpop.f32.mrf.mxu1  ;;  %8500 = vmatmul.mubr.msk.bf16.vlgmr.msra.gmra.mxu0 %vm325_vm0, %v8487_v7  ;;  %8514 = vmatmul.mubr.msk.bf16.vlgmr.msra.gmra.mxu1 %vm325_vm0, %v8501_v8  ;;  %v9677_v7 = vld [vmem:[#allocation5 + $0xb04] ss:$8 sps:$4 sm:$0xff]   ;;  %v9672_v8 = vld [vmem:[#allocation5 + $0xaa0] ss:$8 sps:$4 sm:$0xff]  }
 0x187   : > { %v1319_v15 = vadd.f32 %v1312_v13, %v1198_v47  ;;  %3461 = vmatpush1.bf16.msra.mxu0 %v9618_v9  ;;  %3582 = vmatpush1.bf16.msra.mxu1 %v9621_v10  ;;  %v9654_v47 = vld [vmem:[#allocation5 + $0xad0] ss:$8 sps:$4 sm:$0xff]   ;;  %v9675_v9 = vld [vmem:[#allocation5 + $0xb00] ss:$8 sps:$4 sm:$0xff]   ;;  %v9680_v10 = vld [vmem:[#allocation5 + $0xa94] ss:$8 sps:$4 sm:$0xff]  }
 0x188   : > { %v1314_v18 = vpop.f32.mrf.mxu0  ;;  %v1435_v19 = vpop.f32.mrf.mxu1  ;;  %3462 = vmatprep.subr.bf16.mxu0 %v9626_v11  ;;  %3583 = vmatprep.subr.bf16.mxu1 %v9629_v12  ;;  %v9683_v11 = vld [vmem:[#allocation5 + $0xaf4] ss:$8 sps:$4 sm:$0xff]   ;;  %v9678_v12 = vld [vmem:[#allocation5 + $0xa90] ss:$8 sps:$4 sm:$0xff]  }
 0x189   : > { %v1440_v22 = vadd.f32 %v1433_v14, %v1319_v15  ;;  %v1320_v23 = vadd.f32 %v1314_v18, %v1199_v51  ;;  %3488 = vmatprep.mubr.bf16.mxu0 %v10475_v0  ;;  %3609 = vmatprep.mubr.bf16.mxu1 %v10475_v0  ;;  %v9681_v13 = vld [vmem:[#allocation5 + $0xaf0] ss:$8 sps:$4 sm:$0xff]   ;;  %v9686_v14 = vld [vmem:[#allocation5 + $0xa84] ss:$8 sps:$4 sm:$0xff]   ;;  %v9692_v18 = vld [vmem:[#allocation5 + $0xb94] ss:$8 sps:$4 sm:$0xff]  }
 0x18a   : > { %v1316_v24 = vpop.f32.mrf.mxu0  ;;  %v1437_v25 = vpop.f32.mrf.mxu1  ;;  %v9689_v15 = vld [vmem:[#allocation5 + $0xae4] ss:$8 sps:$4 sm:$0xff]  }
 0x18b   : > { %v1441_v26 = vadd.f32 %v1435_v19, %v1320_v23  ;;  %3463 = vmatpush1.bf16.msra.mxu0 %v9624_v16  ;;  %3584 = vmatpush1.bf16.msra.mxu1 %v9627_v17  ;;  %v9684_v16 = vld [vmem:[#allocation5 + $0xa80] ss:$8 sps:$4 sm:$0xff]   ;;  %v9695_v19 = vld [vmem:[#allocation5 + $0xbf4] ss:$8 sps:$4 sm:$0xff]   ;;  %v9693_v23 = vld [vmem:[#allocation5 + $0xbf0] ss:$8 sps:$4 sm:$0xff]  }
 0x18c   : > { %v1317_v29 = vpop.f32.mrf.mxu0  ;;  %v1438_v30 = vpop.f32.mrf.mxu1  ;;  %3464 = vmatprep.subr.bf16.mxu0 %v9632_v20  ;;  %3585 = vmatprep.subr.bf16.mxu1 %v9635_v21  ;;  %v9687_v17 = vld [vmem:[#allocation5 + $0xae0] ss:$8 sps:$4 sm:$0xff]   ;;  %v8543_v20 = vld [vmem:[%s10626_s6 + $0x1c] sm:$0x1]  ;;  %v8557_v21 = vld [vmem:[%s10626_s6 + $0x1d] sm:$0x1] }
 0x18d   : > { %v9698_v24 = vld [vmem:[#allocation5 + $0xb84] ss:$8 sps:$4 sm:$0xff]   ;;  %v9696_v29 = vld [vmem:[#allocation5 + $0xb80] ss:$8 sps:$4 sm:$0xff]  }
 0x18e   : > { %v9701_v25 = vld [vmem:[#allocation5 + $0xbe4] ss:$8 sps:$4 sm:$0xff]   ;;  %v9699_v30 = vld [vmem:[#allocation5 + $0xbe0] ss:$8 sps:$4 sm:$0xff]  }
 0x18f   : > { %3465 = vmatpush1.bf16.msra.mxu0 %v9630_v27  ;;  %3586 = vmatpush1.bf16.msra.mxu1 %v9633_v28 }
 0x190   : > { %3466 = vmatprep.subr.bf16.mxu0 %v9638_v31  ;;  %3587 = vmatprep.subr.bf16.mxu1 %v9641_v32 }
 0x193   : > { %3467 = vmatpush1.bf16.msra.mxu0 %v9636_v33  ;;  %3588 = vmatpush1.bf16.msra.mxu1 %v9639_v34  ;;  %v9704_v33 = vld [vmem:[#allocation5 + $0xb74] ss:$8 sps:$4 sm:$0xff]  }
 0x194   : > { %3468 = vmatprep.subr.bf16.mxu0 %v9644_v35  ;;  %3589 = vmatprep.subr.bf16.mxu1 %v9647_v36  ;;  %v9707_v34 = vld [vmem:[#allocation5 + $0xbd4] ss:$8 sps:$4 sm:$0xff]  }
 0x197   : > { %3469 = vmatpush1.bf16.msra.mxu0 %v9642_v37  ;;  %3590 = vmatpush1.bf16.msra.mxu1 %v9645_v38 }
 0x198   : > { %3470 = vmatprep.subr.bf16.mxu0 %v9650_v39  ;;  %3591 = vmatprep.subr.bf16.mxu1 %v9653_v40  ;;  %v9702_v40 = vld [vmem:[#allocation5 + $0xb70] ss:$8 sps:$4 sm:$0xff]  }
 0x19b   : > { %3471 = vmatpush1.bf16.msra.mxu0 %v9648_v41  ;;  %3592 = vmatpush1.bf16.msra.mxu1 %v9651_v42  ;;  %v9705_v41 = vld [vmem:[#allocation5 + $0xbd0] ss:$8 sps:$4 sm:$0xff]  }
 0x19c   : > { %3702 = vmatprep.subr.bf16.mxu0 %v9656_v43  ;;  %3823 = vmatprep.subr.bf16.mxu1 %v9659_v44  ;;  %v9710_v44 = vld [vmem:[#allocation5 + $0xb64] ss:$8 sps:$4 sm:$0xff]  }
 0x19e   : > { %v1554_v51 = vpop.f32.mrf.mxu0  ;;  %v1675_v52 = vpop.f32.mrf.mxu1  ;;  %8528 = vmatmul.mubr.msk.bf16.vlgmr.msra.gmra.mxu0 %vm325_vm0, %v8515_v45  ;;  %8542 = vmatmul.mubr.msk.bf16.vlgmr.msra.gmra.mxu1 %vm325_vm0, %v8529_v46  ;;  %v9713_v45 = vld [vmem:[#allocation5 + $0xbc4] ss:$8 sps:$4 sm:$0xff]   ;;  %v9708_v46 = vld [vmem:[#allocation5 + $0xb60] ss:$8 sps:$4 sm:$0xff]  }
 0x19f   : > { %v1561_v53 = vadd.f32 %v1554_v51, %v1440_v22  ;;  %3703 = vmatpush1.bf16.msra.mxu0 %v9654_v47  ;;  %3824 = vmatpush1.bf16.msra.mxu1 %v9657_v48  ;;  %v9690_v22 = vld [vmem:[#allocation5 + $0xb90] ss:$8 sps:$4 sm:$0xff]   ;;  %v9711_v47 = vld [vmem:[#allocation5 + $0xbc0] ss:$8 sps:$4 sm:$0xff]   ;;  %v9716_v48 = vld [vmem:[#allocation5 + $0xb54] ss:$8 sps:$4 sm:$0xff]  }
 0x1a0   : > { %v1556_v56 = vpop.f32.mrf.mxu0  ;;  %v1677_v57 = vpop.f32.mrf.mxu1  ;;  %3704 = vmatprep.subr.bf16.mxu0 %v9662_v49  ;;  %3825 = vmatprep.subr.bf16.mxu1 %v9665_v50  ;;  %v9719_v49 = vld [vmem:[#allocation5 + $0xbb4] ss:$8 sps:$4 sm:$0xff]   ;;  %v9714_v50 = vld [vmem:[#allocation5 + $0xb50] ss:$8 sps:$4 sm:$0xff]  }
 0x1a1   : > { %v1682_v60 = vadd.f32 %v1675_v52, %v1561_v53  ;;  %v1562_v61 = vadd.f32 %v1556_v56, %v1441_v26  ;;  %3730 = vmatprep.mubr.bf16.mxu0 %v10475_v0  ;;  %3851 = vmatprep.mubr.bf16.mxu1 %v10475_v0  ;;  %v9717_v51 = vld [vmem:[#allocation5 + $0xbb0] ss:$8 sps:$4 sm:$0xff]   ;;  %v9722_v52 = vld [vmem:[#allocation5 + $0xb44] ss:$8 sps:$4 sm:$0xff]   ;;  %v9728_v56 = vld [vmem:[#allocation5 + $0xb4] ss:$8 sps:$4 sm:$0xff]  }
 0x1a2   : > { %v1558_v62 = vpop.f32.mrf.mxu0  ;;  %v1679_v63 = vpop.f32.mrf.mxu1  ;;  %v9725_v53 = vld [vmem:[#allocation5 + $0xba4] ss:$8 sps:$4 sm:$0xff]  }
 0x1a3   : > { %v1683_v1 = vadd.f32 %v1677_v57, %v1562_v61  ;;  %3705 = vmatpush1.bf16.msra.mxu0 %v9660_v54  ;;  %3826 = vmatpush1.bf16.msra.mxu1 %v9663_v55  ;;  %v9720_v54 = vld [vmem:[#allocation5 + $0xb40] ss:$8 sps:$4 sm:$0xff]   ;;  %v9731_v57 = vld [vmem:[#allocation5 + $0x54] ss:$8 sps:$4 sm:$0xff]   ;;  %v9729_v61 = vld [vmem:[#allocation5 + $0x50] ss:$8 sps:$4 sm:$0xff]  }
 0x1a4   : > { %v1559_v4 = vpop.f32.mrf.mxu0  ;;  %v1680_v5 = vpop.f32.mrf.mxu1  ;;  %3706 = vmatprep.subr.bf16.mxu0 %v9668_v58  ;;  %3827 = vmatprep.subr.bf16.mxu1 %v9671_v59  ;;  %v9723_v55 = vld [vmem:[#allocation5 + $0xba0] ss:$8 sps:$4 sm:$0xff]   ;;  %v8571_v58 = vld [vmem:[%s10626_s6 + $0x1e] sm:$0x1]  ;;  %v8585_v59 = vld [vmem:[%s10626_s6 + $0x1f] sm:$0x1] }
 0x1a5   : > { %v9734_v62 = vld [vmem:[#allocation5 + $0xa4] ss:$8 sps:$4 sm:$0xff]   ;;  %v9732_v4 = vld [vmem:[#allocation5 + $0xa0] ss:$8 sps:$4 sm:$0xff]  }
 0x1a6   : > { %v9737_v63 = vld [vmem:[#allocation5 + $0x44] ss:$8 sps:$4 sm:$0xff]   ;;  %v9735_v5 = vld [vmem:[#allocation5 + $0x40] ss:$8 sps:$4 sm:$0xff]  }
 0x1a7   : > { %3707 = vmatpush1.bf16.msra.mxu0 %v9666_v2  ;;  %3828 = vmatpush1.bf16.msra.mxu1 %v9669_v3 }
 0x1a8   : > { %3708 = vmatprep.subr.bf16.mxu0 %v9674_v6  ;;  %3829 = vmatprep.subr.bf16.mxu1 %v9677_v7 }
 0x1ab   : > { %3709 = vmatpush1.bf16.msra.mxu0 %v9672_v8  ;;  %3830 = vmatpush1.bf16.msra.mxu1 %v9675_v9  ;;  %v9740_v8 = vld [vmem:[#allocation5 + $0x94] ss:$8 sps:$4 sm:$0xff]  }
 0x1ac   : > { %3710 = vmatprep.subr.bf16.mxu0 %v9680_v10  ;;  %3831 = vmatprep.subr.bf16.mxu1 %v9683_v11  ;;  %v9743_v9 = vld [vmem:[#allocation5 + $0x34] ss:$8 sps:$4 sm:$0xff]  }
 0x1af   : > { %3711 = vmatpush1.bf16.msra.mxu0 %v9678_v12  ;;  %3832 = vmatpush1.bf16.msra.mxu1 %v9681_v13 }
 0x1b0   : > { %3712 = vmatprep.subr.bf16.mxu0 %v9686_v14  ;;  %3833 = vmatprep.subr.bf16.mxu1 %v9689_v15  ;;  %v9738_v15 = vld [vmem:[#allocation5 + $0x90] ss:$8 sps:$4 sm:$0xff]  }
 0x1b3   : > { %3713 = vmatpush1.bf16.msra.mxu0 %v9684_v16  ;;  %3834 = vmatpush1.bf16.msra.mxu1 %v9687_v17  ;;  %v9741_v16 = vld [vmem:[#allocation5 + $0x30] ss:$8 sps:$4 sm:$0xff]  }
 0x1b4   : > { %3944 = vmatprep.subr.bf16.mxu0 %v9692_v18  ;;  %4065 = vmatprep.subr.bf16.mxu1 %v9695_v19  ;;  %v9746_v19 = vld [vmem:[#allocation5 + $0x84] ss:$8 sps:$4 sm:$0xff]  }
 0x1b6   : > { %v1796_v26 = vpop.f32.mrf.mxu0  ;;  %v1917_v27 = vpop.f32.mrf.mxu1  ;;  %8556 = vmatmul.mubr.msk.bf16.vlgmr.msra.gmra.mxu0 %vm325_vm0, %v8543_v20  ;;  %8570 = vmatmul.mubr.msk.bf16.vlgmr.msra.gmra.mxu1 %vm325_vm0, %v8557_v21  ;;  %v9749_v20 = vld [vmem:[#allocation5 + $0x24] ss:$8 sps:$4 sm:$0xff]   ;;  %v9744_v21 = vld [vmem:[#allocation5 + $0x80] ss:$8 sps:$4 sm:$0xff]  }
 0x1b7   : > { %v1803_v28 = vadd.f32 %v1796_v26, %v1682_v60  ;;  %3945 = vmatpush1.bf16.msra.mxu0 %v9690_v22  ;;  %4066 = vmatpush1.bf16.msra.mxu1 %v9693_v23  ;;  %v9726_v60 = vld [vmem:[#allocation5 + $0xb0] ss:$8 sps:$4 sm:$0xff]   ;;  %v9747_v22 = vld [vmem:[#allocation5 + $0x20] ss:$8 sps:$4 sm:$0xff]   ;;  %v9752_v23 = vld [vmem:[#allocation5 + $0x74] ss:$8 sps:$4 sm:$0xff]  }
 0x1b8   : > { %v1798_v31 = vpop.f32.mrf.mxu0  ;;  %v1919_v32 = vpop.f32.mrf.mxu1  ;;  %3946 = vmatprep.subr.bf16.mxu0 %v9698_v24  ;;  %4067 = vmatprep.subr.bf16.mxu1 %v9701_v25  ;;  %v9755_v24 = vld [vmem:[#allocation5 + $0x14] ss:$8 sps:$4 sm:$0xff]   ;;  %v9750_v25 = vld [vmem:[#allocation5 + $0x70] ss:$8 sps:$4 sm:$0xff]  }
 0x1b9   : > { %v1924_v35 = vadd.f32 %v1917_v27, %v1803_v28  ;;  %v1804_v36 = vadd.f32 %v1798_v31, %v1683_v1  ;;  %3972 = vmatprep.mubr.bf16.mxu0 %v10475_v0  ;;  %4093 = vmatprep.mubr.bf16.mxu1 %v10475_v0  ;;  %v9753_v26 = vld [vmem:[#allocation5 + $0x10] ss:$8 sps:$4 sm:$0xff]   ;;  %v9758_v27 = vld [vmem:[#allocation5 + $0x64] ss:$8 sps:$4 sm:$0xff]   ;;  %v9764_v31 = vld [vmem:[#allocation5 + $0x114] ss:$8 sps:$4 sm:$0xff]  }
 0x1ba   : > { %v1800_v37 = vpop.f32.mrf.mxu0  ;;  %v1921_v38 = vpop.f32.mrf.mxu1  ;;  %v9761_v28 = vld [vmem:[#allocation5 + $0x4] ss:$8 sps:$4 sm:$0xff]  }
 0x1bb   : > { %v1925_v39 = vadd.f32 %v1919_v32, %v1804_v36  ;;  %3947 = vmatpush1.bf16.msra.mxu0 %v9696_v29  ;;  %4068 = vmatpush1.bf16.msra.mxu1 %v9699_v30  ;;  %v9756_v29 = vld [vmem:[#allocation5 + $0x60] ss:$8 sps:$4 sm:$0xff]   ;;  %v9767_v32 = vld [vmem:[#allocation5 + $0x174] ss:$8 sps:$4 sm:$0xff]   ;;  %v9765_v36 = vld [vmem:[#allocation5 + $0x170] ss:$8 sps:$4 sm:$0xff]  }
 0x1bc   : > { %v1801_v42 = vpop.f32.mrf.mxu0  ;;  %v1922_v43 = vpop.f32.mrf.mxu1  ;;  %3948 = vmatprep.subr.bf16.mxu0 %v9704_v33  ;;  %4069 = vmatprep.subr.bf16.mxu1 %v9707_v34  ;;  %v9759_v30 = vld [vmem:[#allocation5] ss:$8 sps:$4 sm:$0xff]   ;;  %v9770_v37 = vld [vmem:[#allocation5 + $0x104] ss:$8 sps:$4 sm:$0xff]  }
 0x1bd   : > { %v8602_v33 = vld [vmem:[%s10626_s6 + $0x21] sm:$0x1]  ;;  %v8601_v34 = vld [vmem:[%s10626_s6 + $0x20] sm:$0x1]  ;;  %v9773_v38 = vld [vmem:[#allocation5 + $0x164] ss:$8 sps:$4 sm:$0xff]  }
 0x1be   : > { %v9768_v42 = vld [vmem:[#allocation5 + $0x100] ss:$8 sps:$4 sm:$0xff]  }
 0x1bf   : > { %3949 = vmatpush1.bf16.msra.mxu0 %v9702_v40  ;;  %4070 = vmatpush1.bf16.msra.mxu1 %v9705_v41  ;;  %v9771_v43 = vld [vmem:[#allocation5 + $0x160] ss:$8 sps:$4 sm:$0xff]  }
 0x1c0   : > { %3950 = vmatprep.subr.bf16.mxu0 %v9710_v44  ;;  %4071 = vmatprep.subr.bf16.mxu1 %v9713_v45 }
 0x1c3   : > { %3951 = vmatpush1.bf16.msra.mxu0 %v9708_v46  ;;  %4072 = vmatpush1.bf16.msra.mxu1 %v9711_v47  ;;  %v9776_v46 = vld [vmem:[#allocation5 + $0xf4] ss:$8 sps:$4 sm:$0xff]  }
 0x1c4   : > { %3952 = vmatprep.subr.bf16.mxu0 %v9716_v48  ;;  %4073 = vmatprep.subr.bf16.mxu1 %v9719_v49  ;;  %v9779_v47 = vld [vmem:[#allocation5 + $0x154] ss:$8 sps:$4 sm:$0xff]  }
 0x1c7   : > { %3953 = vmatpush1.bf16.msra.mxu0 %v9714_v50  ;;  %4074 = vmatpush1.bf16.msra.mxu1 %v9717_v51 }
 0x1c8   : > { %3954 = vmatprep.subr.bf16.mxu0 %v9722_v52  ;;  %4075 = vmatprep.subr.bf16.mxu1 %v9725_v53  ;;  %v9774_v53 = vld [vmem:[#allocation5 + $0xf0] ss:$8 sps:$4 sm:$0xff]  }
 0x1cb   : > { %3955 = vmatpush1.bf16.msra.mxu0 %v9720_v54  ;;  %4076 = vmatpush1.bf16.msra.mxu1 %v9723_v55  ;;  %v9777_v54 = vld [vmem:[#allocation5 + $0x150] ss:$8 sps:$4 sm:$0xff]  }
 0x1cc   : > { %4236 = vmatprep.subr.bf16.mxu0 %v9728_v56  ;;  %4340 = vmatprep.subr.bf16.mxu1 %v9731_v57  ;;  %v9782_v57 = vld [vmem:[#allocation5 + $0xe4] ss:$8 sps:$4 sm:$0xff]  }
 0x1ce   : > { %v2038_v1 = vpop.f32.mrf.mxu0  ;;  %v2159_v2 = vpop.f32.mrf.mxu1  ;;  %8584 = vmatmul.mubr.msk.bf16.vlgmr.msra.gmra.mxu0 %vm325_vm0, %v8571_v58  ;;  %8598 = vmatmul.mubr.msk.bf16.vlgmr.msra.gmra.mxu1 %vm325_vm0, %v8585_v59  ;;  %v9785_v58 = vld [vmem:[#allocation5 + $0x144] ss:$8 sps:$4 sm:$0xff]   ;;  %v9780_v59 = vld [vmem:[#allocation5 + $0xe0] ss:$8 sps:$4 sm:$0xff]  }
 0x1cf   : > { %v2045_v3 = vadd.f32 %v2038_v1, %v1924_v35  ;;  %4237 = vmatpush1.bf16.msra.mxu0 %v9726_v60  ;;  %4341 = vmatpush1.bf16.msra.mxu1 %v9729_v61  ;;  %v9762_v35 = vld [vmem:[#allocation5 + $0x110] ss:$8 sps:$4 sm:$0xff]   ;;  %v9783_v60 = vld [vmem:[#allocation5 + $0x140] ss:$8 sps:$4 sm:$0xff]   ;;  %v9788_v61 = vld [vmem:[#allocation5 + $0xd4] ss:$8 sps:$4 sm:$0xff]  }
 0x1d0   : > { %v2040_v6 = vpop.f32.mrf.mxu0  ;;  %v2161_v7 = vpop.f32.mrf.mxu1  ;;  %4238 = vmatprep.subr.bf16.mxu0 %v9734_v62  ;;  %4342 = vmatprep.subr.bf16.mxu1 %v9737_v63  ;;  %v9791_v62 = vld [vmem:[#allocation5 + $0x134] ss:$8 sps:$4 sm:$0xff]   ;;  %v9786_v63 = vld [vmem:[#allocation5 + $0xd0] ss:$8 sps:$4 sm:$0xff]  }
 0x1d1   : > { %v2166_v10 = vadd.f32 %v2159_v2, %v2045_v3  ;;  %v2046_v11 = vadd.f32 %v2040_v6, %v1925_v39  ;;  %4264 = vmatprep.mubr.bf16.mxu0 %v10475_v0  ;;  %4368 = vmatprep.mubr.bf16.mxu1 %v10475_v0  ;;  %v9789_v1 = vld [vmem:[#allocation5 + $0x130] ss:$8 sps:$4 sm:$0xff]   ;;  %v9794_v2 = vld [vmem:[#allocation5 + $0xc4] ss:$8 sps:$4 sm:$0xff]   ;;  %v9800_v6 = vld [vmem:[#allocation5 + $0x1d4] ss:$8 sps:$4 sm:$0xff]  }
 0x1d2   : > { %v2042_v12 = vpop.f32.mrf.mxu0  ;;  %v2163_v13 = vpop.f32.mrf.mxu1  ;;  %v9797_v3 = vld [vmem:[#allocation5 + $0x124] ss:$8 sps:$4 sm:$0xff]  }
 0x1d3   : > { %v2167_v14 = vadd.f32 %v2161_v7, %v2046_v11  ;;  %4239 = vmatpush1.bf16.msra.mxu0 %v9732_v4  ;;  %4343 = vmatpush1.bf16.msra.mxu1 %v9735_v5  ;;  %v9792_v4 = vld [vmem:[#allocation5 + $0xc0] ss:$8 sps:$4 sm:$0xff]   ;;  %v9803_v7 = vld [vmem:[#allocation5 + $0x234] ss:$8 sps:$4 sm:$0xff]   ;;  %v9801_v11 = vld [vmem:[#allocation5 + $0x230] ss:$8 sps:$4 sm:$0xff]  }
 0x1d4   : > { %v2043_v17 = vpop.f32.mrf.mxu0  ;;  %v2164_v18 = vpop.f32.mrf.mxu1  ;;  %4240 = vmatprep.subr.bf16.mxu0 %v9740_v8  ;;  %4344 = vmatprep.subr.bf16.mxu1 %v9743_v9  ;;  %v9795_v5 = vld [vmem:[#allocation5 + $0x120] ss:$8 sps:$4 sm:$0xff]   ;;  %v9806_v12 = vld [vmem:[#allocation5 + $0x1c4] ss:$8 sps:$4 sm:$0xff]  }
 0x1d5   : > { %v8629_v8 = vld [vmem:[%s10626_s6 + $0x22] sm:$0x1]  ;;  %v8643_v9 = vld [vmem:[%s10626_s6 + $0x23] sm:$0x1]  ;;  %v9809_v13 = vld [vmem:[#allocation5 + $0x224] ss:$8 sps:$4 sm:$0xff]  }
 0x1d6   : > { %v9804_v17 = vld [vmem:[#allocation5 + $0x1c0] ss:$8 sps:$4 sm:$0xff]  }
 0x1d7   : > { %4241 = vmatpush1.bf16.msra.mxu0 %v9738_v15  ;;  %4345 = vmatpush1.bf16.msra.mxu1 %v9741_v16  ;;  %v9807_v18 = vld [vmem:[#allocation5 + $0x220] ss:$8 sps:$4 sm:$0xff]  }
 0x1d8   : > { %4242 = vmatprep.subr.bf16.mxu0 %v9746_v19  ;;  %4346 = vmatprep.subr.bf16.mxu1 %v9749_v20 }
 0x1db   : > { %4243 = vmatpush1.bf16.msra.mxu0 %v9744_v21  ;;  %4347 = vmatpush1.bf16.msra.mxu1 %v9747_v22  ;;  %v9812_v21 = vld [vmem:[#allocation5 + $0x1b4] ss:$8 sps:$4 sm:$0xff]  }
 0x1dc   : > { %4244 = vmatprep.subr.bf16.mxu0 %v9752_v23  ;;  %4348 = vmatprep.subr.bf16.mxu1 %v9755_v24  ;;  %v9815_v22 = vld [vmem:[#allocation5 + $0x214] ss:$8 sps:$4 sm:$0xff]  }
 0x1df   : > { %4245 = vmatpush1.bf16.msra.mxu0 %v9750_v25  ;;  %4349 = vmatpush1.bf16.msra.mxu1 %v9753_v26 }
 0x1e0   : > { %4246 = vmatprep.subr.bf16.mxu0 %v9758_v27  ;;  %4350 = vmatprep.subr.bf16.mxu1 %v9761_v28  ;;  %v9810_v28 = vld [vmem:[#allocation5 + $0x1b0] ss:$8 sps:$4 sm:$0xff]  }
 0x1e3   : > { %4247 = vmatpush1.bf16.msra.mxu0 %v9756_v29  ;;  %4351 = vmatpush1.bf16.msra.mxu1 %v9759_v30  ;;  %v9813_v29 = vld [vmem:[#allocation5 + $0x210] ss:$8 sps:$4 sm:$0xff]  }
 0x1e4   : > { %4458 = vmatprep.subr.bf16.mxu0 %v9764_v31  ;;  %4578 = vmatprep.subr.bf16.mxu1 %v9767_v32  ;;  %v9818_v32 = vld [vmem:[#allocation5 + $0x1a4] ss:$8 sps:$4 sm:$0xff]  }
 0x1e6   : > { %v2280_v39 = vpop.f32.mrf.mxu0  ;;  %v2401_v40 = vpop.f32.mrf.mxu1  ;;  %8615 = vmatmul.mubr.msk.bf16.vlgmr.msra.gmra.mxu0 %vm325_vm0, %v8602_v33  ;;  %8628 = vmatmul.mubr.msk.bf16.vlgmr.msra.gmra.mxu1 %vm325_vm0, %v8601_v34  ;;  %v9821_v33 = vld [vmem:[#allocation5 + $0x204] ss:$8 sps:$4 sm:$0xff]   ;;  %v9816_v34 = vld [vmem:[#allocation5 + $0x1a0] ss:$8 sps:$4 sm:$0xff]  }
 0x1e7   : > { %v2287_v41 = vadd.f32 %v2280_v39, %v2166_v10  ;;  %4459 = vmatpush1.bf16.msra.mxu0 %v9762_v35  ;;  %4579 = vmatpush1.bf16.msra.mxu1 %v9765_v36  ;;  %v9798_v10 = vld [vmem:[#allocation5 + $0x1d0] ss:$8 sps:$4 sm:$0xff]   ;;  %v9819_v35 = vld [vmem:[#allocation5 + $0x200] ss:$8 sps:$4 sm:$0xff]   ;;  %v9824_v36 = vld [vmem:[#allocation5 + $0x194] ss:$8 sps:$4 sm:$0xff]  }
 0x1e8   : > { %v2282_v44 = vpop.f32.mrf.mxu0  ;;  %v2403_v45 = vpop.f32.mrf.mxu1  ;;  %4460 = vmatprep.subr.bf16.mxu0 %v9770_v37  ;;  %4580 = vmatprep.subr.bf16.mxu1 %v9773_v38  ;;  %v9827_v37 = vld [vmem:[#allocation5 + $0x1f4] ss:$8 sps:$4 sm:$0xff]   ;;  %v9822_v38 = vld [vmem:[#allocation5 + $0x190] ss:$8 sps:$4 sm:$0xff]  }
 0x1e9   : > { %v2408_v48 = vadd.f32 %v2401_v40, %v2287_v41  ;;  %v2288_v49 = vadd.f32 %v2282_v44, %v2167_v14  ;;  %4486 = vmatprep.mubr.bf16.mxu0 %v10475_v0  ;;  %4606 = vmatprep.mubr.bf16.mxu1 %v10475_v0  ;;  %v9825_v39 = vld [vmem:[#allocation5 + $0x1f0] ss:$8 sps:$4 sm:$0xff]   ;;  %v9830_v40 = vld [vmem:[#allocation5 + $0x184] ss:$8 sps:$4 sm:$0xff]   ;;  %v9836_v44 = vld [vmem:[#allocation5 + $0x294] ss:$8 sps:$4 sm:$0xff]  }
 0x1ea   : > { %v2284_v50 = vpop.f32.mrf.mxu0  ;;  %v2405_v51 = vpop.f32.mrf.mxu1  ;;  %v9833_v41 = vld [vmem:[#allocation5 + $0x1e4] ss:$8 sps:$4 sm:$0xff]  }
 0x1eb   : > { %v2409_v52 = vadd.f32 %v2403_v45, %v2288_v49  ;;  %4461 = vmatpush1.bf16.msra.mxu0 %v9768_v42  ;;  %4581 = vmatpush1.bf16.msra.mxu1 %v9771_v43  ;;  %v9828_v42 = vld [vmem:[#allocation5 + $0x180] ss:$8 sps:$4 sm:$0xff]   ;;  %v9839_v45 = vld [vmem:[#allocation5 + $0x2f4] ss:$8 sps:$4 sm:$0xff]   ;;  %v9837_v49 = vld [vmem:[#allocation5 + $0x2f0] ss:$8 sps:$4 sm:$0xff]  }
 0x1ec   : > { %v2285_v55 = vpop.f32.mrf.mxu0  ;;  %v2406_v56 = vpop.f32.mrf.mxu1  ;;  %4462 = vmatprep.subr.bf16.mxu0 %v9776_v46  ;;  %4582 = vmatprep.subr.bf16.mxu1 %v9779_v47  ;;  %v9831_v43 = vld [vmem:[#allocation5 + $0x1e0] ss:$8 sps:$4 sm:$0xff]   ;;  %v8657_v46 = vld [vmem:[%s10626_s6 + $0x24] sm:$0x1]  ;;  %v8671_v47 = vld [vmem:[%s10626_s6 + $0x25] sm:$0x1] }
 0x1ed   : > { %v9842_v50 = vld [vmem:[#allocation5 + $0x284] ss:$8 sps:$4 sm:$0xff]  }
 0x1ee   : > { %v9845_v51 = vld [vmem:[#allocation5 + $0x2e4] ss:$8 sps:$4 sm:$0xff]  }
 0x1ef   : > { %4463 = vmatpush1.bf16.msra.mxu0 %v9774_v53  ;;  %4583 = vmatpush1.bf16.msra.mxu1 %v9777_v54  ;;  %v9843_v53 = vld [vmem:[#allocation5 + $0x2e0] ss:$8 sps:$4 sm:$0xff]  }
 0x1f0   : > { %4464 = vmatprep.subr.bf16.mxu0 %v9782_v57  ;;  %4584 = vmatprep.subr.bf16.mxu1 %v9785_v58 }
 0x1f3   : > { %4465 = vmatpush1.bf16.msra.mxu0 %v9780_v59  ;;  %4585 = vmatpush1.bf16.msra.mxu1 %v9783_v60  ;;  %v9848_v59 = vld [vmem:[#allocation5 + $0x274] ss:$8 sps:$4 sm:$0xff]  }
 0x1f4   : > { %4466 = vmatprep.subr.bf16.mxu0 %v9788_v61  ;;  %4586 = vmatprep.subr.bf16.mxu1 %v9791_v62  ;;  %v9851_v60 = vld [vmem:[#allocation5 + $0x2d4] ss:$8 sps:$4 sm:$0xff]  }
 0x1f7   : > { %4467 = vmatpush1.bf16.msra.mxu0 %v9786_v63  ;;  %4587 = vmatpush1.bf16.msra.mxu1 %v9789_v1  ;;  %v9846_v63 = vld [vmem:[#allocation5 + $0x270] ss:$8 sps:$4 sm:$0xff]  }
 0x1f8   : > { %4468 = vmatprep.subr.bf16.mxu0 %v9794_v2  ;;  %4588 = vmatprep.subr.bf16.mxu1 %v9797_v3  ;;  %v9849_v1 = vld [vmem:[#allocation5 + $0x2d0] ss:$8 sps:$4 sm:$0xff]  }
 0x1fb   : > { %4469 = vmatpush1.bf16.msra.mxu0 %v9792_v4  ;;  %4589 = vmatpush1.bf16.msra.mxu1 %v9795_v5 }
 0x1fc   : > { %4698 = vmatprep.subr.bf16.mxu0 %v9800_v6  ;;  %4818 = vmatprep.subr.bf16.mxu1 %v9803_v7  ;;  %v9854_v7 = vld [vmem:[#allocation5 + $0x264] ss:$8 sps:$4 sm:$0xff]  }
 0x1fe   : > { %v2522_v14 = vpop.f32.mrf.mxu0  ;;  %v2643_v15 = vpop.f32.mrf.mxu1  ;;  %8642 = vmatmul.mubr.msk.bf16.vlgmr.msra.gmra.mxu0 %vm325_vm0, %v8629_v8  ;;  %8656 = vmatmul.mubr.msk.bf16.vlgmr.msra.gmra.mxu1 %vm325_vm0, %v8643_v9  ;;  %v9857_v8 = vld [vmem:[#allocation5 + $0x2c4] ss:$8 sps:$4 sm:$0xff]   ;;  %v9852_v9 = vld [vmem:[#allocation5 + $0x260] ss:$8 sps:$4 sm:$0xff]  }
 0x1ff   : > { %v2529_v16 = vadd.f32 %v2522_v14, %v2408_v48  ;;  %4699 = vmatpush1.bf16.msra.mxu0 %v9798_v10  ;;  %4819 = vmatpush1.bf16.msra.mxu1 %v9801_v11  ;;  %v9834_v48 = vld [vmem:[#allocation5 + $0x290] ss:$8 sps:$4 sm:$0xff]   ;;  %v9855_v10 = vld [vmem:[#allocation5 + $0x2c0] ss:$8 sps:$4 sm:$0xff]   ;;  %v9860_v11 = vld [vmem:[#allocation5 + $0x254] ss:$8 sps:$4 sm:$0xff]  }
 0x200   : > { %v2524_v19 = vpop.f32.mrf.mxu0  ;;  %v2645_v20 = vpop.f32.mrf.mxu1  ;;  %4700 = vmatprep.subr.bf16.mxu0 %v9806_v12  ;;  %4820 = vmatprep.subr.bf16.mxu1 %v9809_v13  ;;  %v9863_v12 = vld [vmem:[#allocation5 + $0x2b4] ss:$8 sps:$4 sm:$0xff]   ;;  %v9858_v13 = vld [vmem:[#allocation5 + $0x250] ss:$8 sps:$4 sm:$0xff]  }
 0x201   : > { %v2650_v23 = vadd.f32 %v2643_v15, %v2529_v16  ;;  %v2530_v24 = vadd.f32 %v2524_v19, %v2409_v52  ;;  %4726 = vmatprep.mubr.bf16.mxu0 %v10475_v0  ;;  %4846 = vmatprep.mubr.bf16.mxu1 %v10475_v0  ;;  %v9840_v52 = vld [vmem:[#allocation5 + $0x280] ss:$8 sps:$4 sm:$0xff]   ;;  %v9861_v14 = vld [vmem:[#allocation5 + $0x2b0] ss:$8 sps:$4 sm:$0xff]   ;;  %v9866_v15 = vld [vmem:[#allocation5 + $0x244] ss:$8 sps:$4 sm:$0xff]  }
 0x202   : > { %v2526_v25 = vpop.f32.mrf.mxu0  ;;  %v2647_v26 = vpop.f32.mrf.mxu1  ;;  %v9869_v16 = vld [vmem:[#allocation5 + $0x2a4] ss:$8 sps:$4 sm:$0xff]   ;;  %v9872_v19 = vld [vmem:[#allocation5 + $0x354] ss:$8 sps:$4 sm:$0xff]  }
 0x203   : > { %v2651_v27 = vadd.f32 %v2645_v20, %v2530_v24  ;;  %4701 = vmatpush1.bf16.msra.mxu0 %v9804_v17  ;;  %4821 = vmatpush1.bf16.msra.mxu1 %v9807_v18  ;;  %v9864_v17 = vld [vmem:[#allocation5 + $0x240] ss:$8 sps:$4 sm:$0xff]   ;;  %v9875_v20 = vld [vmem:[#allocation5 + $0x3b4] ss:$8 sps:$4 sm:$0xff]   ;;  %v9873_v24 = vld [vmem:[#allocation5 + $0x3b0] ss:$8 sps:$4 sm:$0xff]  }
 0x204   : > { %v2527_v30 = vpop.f32.mrf.mxu0  ;;  %v2648_v31 = vpop.f32.mrf.mxu1  ;;  %4702 = vmatprep.subr.bf16.mxu0 %v9812_v21  ;;  %4822 = vmatprep.subr.bf16.mxu1 %v9815_v22  ;;  %v9867_v18 = vld [vmem:[#allocation5 + $0x2a0] ss:$8 sps:$4 sm:$0xff]   ;;  %v8685_v21 = vld [vmem:[%s10626_s6 + $0x26] sm:$0x1]  ;;  %v8699_v22 = vld [vmem:[%s10626_s6 + $0x27] sm:$0x1] }
 0x205   : > { %v9878_v25 = vld [vmem:[#allocation5 + $0x344] ss:$8 sps:$4 sm:$0xff]   ;;  %v9876_v30 = vld [vmem:[#allocation5 + $0x340] ss:$8 sps:$4 sm:$0xff]  }
 0x206   : > { %v9881_v26 = vld [vmem:[#allocation5 + $0x3a4] ss:$8 sps:$4 sm:$0xff]   ;;  %v9879_v31 = vld [vmem:[#allocation5 + $0x3a0] ss:$8 sps:$4 sm:$0xff]  }
 0x207   : > { %4703 = vmatpush1.bf16.msra.mxu0 %v9810_v28  ;;  %4823 = vmatpush1.bf16.msra.mxu1 %v9813_v29 }
 0x208   : > { %4704 = vmatprep.subr.bf16.mxu0 %v9818_v32  ;;  %4824 = vmatprep.subr.bf16.mxu1 %v9821_v33 }
 0x20b   : > { %4705 = vmatpush1.bf16.msra.mxu0 %v9816_v34  ;;  %4825 = vmatpush1.bf16.msra.mxu1 %v9819_v35  ;;  %v9884_v34 = vld [vmem:[#allocation5 + $0x334] ss:$8 sps:$4 sm:$0xff]  }
 0x20c   : > { %4706 = vmatprep.subr.bf16.mxu0 %v9824_v36  ;;  %4826 = vmatprep.subr.bf16.mxu1 %v9827_v37  ;;  %v9887_v35 = vld [vmem:[#allocation5 + $0x394] ss:$8 sps:$4 sm:$0xff]  }
 0x20f   : > { %4707 = vmatpush1.bf16.msra.mxu0 %v9822_v38  ;;  %4827 = vmatpush1.bf16.msra.mxu1 %v9825_v39 }
 0x210   : > { %4708 = vmatprep.subr.bf16.mxu0 %v9830_v40  ;;  %4828 = vmatprep.subr.bf16.mxu1 %v9833_v41  ;;  %v9882_v41 = vld [vmem:[#allocation5 + $0x330] ss:$8 sps:$4 sm:$0xff]  }
 0x213   : > { %4709 = vmatpush1.bf16.msra.mxu0 %v9828_v42  ;;  %4829 = vmatpush1.bf16.msra.mxu1 %v9831_v43  ;;  %v9885_v42 = vld [vmem:[#allocation5 + $0x390] ss:$8 sps:$4 sm:$0xff]  }
 0x214   : > { %4938 = vmatprep.subr.bf16.mxu0 %v9836_v44  ;;  %5058 = vmatprep.subr.bf16.mxu1 %v9839_v45  ;;  %v9890_v45 = vld [vmem:[#allocation5 + $0x324] ss:$8 sps:$4 sm:$0xff]  }
 0x216   : > { %v2764_v54 = vpop.f32.mrf.mxu0  ;;  %v2885_v55 = vpop.f32.mrf.mxu1  ;;  %8670 = vmatmul.mubr.msk.bf16.vlgmr.msra.gmra.mxu0 %vm325_vm0, %v8657_v46  ;;  %8684 = vmatmul.mubr.msk.bf16.vlgmr.msra.gmra.mxu1 %vm325_vm0, %v8671_v47  ;;  %v9893_v46 = vld [vmem:[#allocation5 + $0x384] ss:$8 sps:$4 sm:$0xff]   ;;  %v9888_v47 = vld [vmem:[#allocation5 + $0x320] ss:$8 sps:$4 sm:$0xff]  }
 0x217   : > { %v2771_v56 = vadd.f32 %v2764_v54, %v2650_v23  ;;  %4939 = vmatpush1.bf16.msra.mxu0 %v9834_v48  ;;  %5059 = vmatpush1.bf16.msra.mxu1 %v9837_v49  ;;  %v9870_v23 = vld [vmem:[#allocation5 + $0x350] ss:$8 sps:$4 sm:$0xff]   ;;  %v9891_v48 = vld [vmem:[#allocation5 + $0x380] ss:$8 sps:$4 sm:$0xff]   ;;  %v9896_v49 = vld [vmem:[#allocation5 + $0x314] ss:$8 sps:$4 sm:$0xff]  }
 0x218   : > { %v2766_v57 = vpop.f32.mrf.mxu0  ;;  %v2887_v58 = vpop.f32.mrf.mxu1  ;;  %4940 = vmatprep.subr.bf16.mxu0 %v9842_v50  ;;  %5060 = vmatprep.subr.bf16.mxu1 %v9845_v51  ;;  %v9899_v50 = vld [vmem:[#allocation5 + $0x374] ss:$8 sps:$4 sm:$0xff]   ;;  %v9894_v51 = vld [vmem:[#allocation5 + $0x310] ss:$8 sps:$4 sm:$0xff]   ;;  %v9905_v54 = vld [vmem:[#allocation5 + $0x364] ss:$8 sps:$4 sm:$0xff]  }
 0x219   : > { %v2892_v61 = vadd.f32 %v2885_v55, %v2771_v56  ;;  %v2772_v62 = vadd.f32 %v2766_v57, %v2651_v27  ;;  %4966 = vmatprep.mubr.bf16.mxu0 %v10475_v0  ;;  %5086 = vmatprep.mubr.bf16.mxu1 %v10475_v0  ;;  %v9900_v55 = vld [vmem:[#allocation5 + $0x300] ss:$8 sps:$4 sm:$0xff]   ;;  %v9908_v57 = vld [vmem:[#allocation5 + $0x414] ss:$8 sps:$4 sm:$0xff]  }
 0x21a   : > { %v2768_v2 = vpop.f32.mrf.mxu0  ;;  %v2889_v3 = vpop.f32.mrf.mxu1  ;;  %v9903_v56 = vld [vmem:[#allocation5 + $0x360] ss:$8 sps:$4 sm:$0xff]  }
 0x21b   : > { %v2893_v4 = vadd.f32 %v2887_v58, %v2772_v62  ;;  %4941 = vmatpush1.bf16.msra.mxu0 %v9840_v52  ;;  %5061 = vmatpush1.bf16.msra.mxu1 %v9843_v53  ;;  %v9897_v52 = vld [vmem:[#allocation5 + $0x370] ss:$8 sps:$4 sm:$0xff]   ;;  %v9902_v53 = vld [vmem:[#allocation5 + $0x304] ss:$8 sps:$4 sm:$0xff]   ;;  %v9911_v58 = vld [vmem:[#allocation5 + $0x474] ss:$8 sps:$4 sm:$0xff]  }
 0x21c   : > { %v2769_v5 = vpop.f32.mrf.mxu0  ;;  %v2890_v6 = vpop.f32.mrf.mxu1  ;;  %4942 = vmatprep.subr.bf16.mxu0 %v9848_v59  ;;  %5062 = vmatprep.subr.bf16.mxu1 %v9851_v60  ;;  %v8713_v59 = vld [vmem:[%s10626_s6 + $0x28] sm:$0x1]  ;;  %v8727_v60 = vld [vmem:[%s10626_s6 + $0x29] sm:$0x1]  ;;  %v9909_v62 = vld [vmem:[#allocation5 + $0x470] ss:$8 sps:$4 sm:$0xff]  }
 0x21d   : > { %v9912_v5 = vld [vmem:[#allocation5 + $0x400] ss:$8 sps:$4 sm:$0xff]  }
 0x21e   : > { %v9915_v6 = vld [vmem:[#allocation5 + $0x460] ss:$8 sps:$4 sm:$0xff]  }
 0x21f   : > { %4943 = vmatpush1.bf16.msra.mxu0 %v9846_v63  ;;  %5063 = vmatpush1.bf16.msra.mxu1 %v9849_v1  ;;  %v9914_v63 = vld [vmem:[#allocation5 + $0x404] ss:$8 sps:$4 sm:$0xff]  }
 0x220   : > { %4944 = vmatprep.subr.bf16.mxu0 %v9854_v7  ;;  %5064 = vmatprep.subr.bf16.mxu1 %v9857_v8  ;;  %v9917_v1 = vld [vmem:[#allocation5 + $0x464] ss:$8 sps:$4 sm:$0xff]  }
 0x223   : > { %4945 = vmatpush1.bf16.msra.mxu0 %v9852_v9  ;;  %5065 = vmatpush1.bf16.msra.mxu1 %v9855_v10  ;;  %v9920_v9 = vld [vmem:[#allocation5 + $0x3f4] ss:$8 sps:$4 sm:$0xff]  }
 0x224   : > { %4946 = vmatprep.subr.bf16.mxu0 %v9860_v11  ;;  %5066 = vmatprep.subr.bf16.mxu1 %v9863_v12  ;;  %v9923_v10 = vld [vmem:[#allocation5 + $0x454] ss:$8 sps:$4 sm:$0xff]  }
 0x227   : > { %4947 = vmatpush1.bf16.msra.mxu0 %v9858_v13  ;;  %5067 = vmatpush1.bf16.msra.mxu1 %v9861_v14  ;;  %v9918_v14 = vld [vmem:[#allocation5 + $0x3f0] ss:$8 sps:$4 sm:$0xff]  }
 0x228   : > { %4948 = vmatprep.subr.bf16.mxu0 %v9866_v15  ;;  %5068 = vmatprep.subr.bf16.mxu1 %v9869_v16  ;;  %v9921_v15 = vld [vmem:[#allocation5 + $0x450] ss:$8 sps:$4 sm:$0xff]  }
 0x22b   : > { %4949 = vmatpush1.bf16.msra.mxu0 %v9864_v17  ;;  %5069 = vmatpush1.bf16.msra.mxu1 %v9867_v18  ;;  %v9926_v18 = vld [vmem:[#allocation5 + $0x3e4] ss:$8 sps:$4 sm:$0xff]  }
 0x22c   : > { %5178 = vmatprep.subr.bf16.mxu0 %v9872_v19  ;;  %5298 = vmatprep.subr.bf16.mxu1 %v9875_v20  ;;  %v9929_v19 = vld [vmem:[#allocation5 + $0x444] ss:$8 sps:$4 sm:$0xff]   ;;  %v9924_v20 = vld [vmem:[#allocation5 + $0x3e0] ss:$8 sps:$4 sm:$0xff]  }
 0x22e   : > { %v3006_v27 = vpop.f32.mrf.mxu0  ;;  %v3127_v28 = vpop.f32.mrf.mxu1  ;;  %8698 = vmatmul.mubr.msk.bf16.vlgmr.msra.gmra.mxu0 %vm325_vm0, %v8685_v21  ;;  %8712 = vmatmul.mubr.msk.bf16.vlgmr.msra.gmra.mxu1 %vm325_vm0, %v8699_v22  ;;  %v9927_v21 = vld [vmem:[#allocation5 + $0x440] ss:$8 sps:$4 sm:$0xff]   ;;  %v9932_v22 = vld [vmem:[#allocation5 + $0x3d4] ss:$8 sps:$4 sm:$0xff]  }
 0x22f   : > { %v3013_v29 = vadd.f32 %v3006_v27, %v2892_v61  ;;  %5179 = vmatpush1.bf16.msra.mxu0 %v9870_v23  ;;  %5299 = vmatpush1.bf16.msra.mxu1 %v9873_v24  ;;  %v9906_v61 = vld [vmem:[#allocation5 + $0x410] ss:$8 sps:$4 sm:$0xff]   ;;  %v9935_v23 = vld [vmem:[#allocation5 + $0x434] ss:$8 sps:$4 sm:$0xff]   ;;  %v9941_v27 = vld [vmem:[#allocation5 + $0x424] ss:$8 sps:$4 sm:$0xff]  }
 0x230   : > { %v3008_v32 = vpop.f32.mrf.mxu0  ;;  %v3129_v33 = vpop.f32.mrf.mxu1  ;;  %5180 = vmatprep.subr.bf16.mxu0 %v9878_v25  ;;  %5300 = vmatprep.subr.bf16.mxu1 %v9881_v26  ;;  %v9930_v24 = vld [vmem:[#allocation5 + $0x3d0] ss:$8 sps:$4 sm:$0xff]   ;;  %v9938_v26 = vld [vmem:[#allocation5 + $0x3c4] ss:$8 sps:$4 sm:$0xff]  }
 0x231   : > { %v3134_v36 = vadd.f32 %v3127_v28, %v3013_v29  ;;  %v3014_v37 = vadd.f32 %v3008_v32, %v2893_v4  ;;  %5206 = vmatprep.mubr.bf16.mxu0 %v10475_v0  ;;  %5326 = vmatprep.mubr.bf16.mxu1 %v10475_v0  ;;  %v9933_v25 = vld [vmem:[#allocation5 + $0x430] ss:$8 sps:$4 sm:$0xff]   ;;  %v9936_v28 = vld [vmem:[#allocation5 + $0x3c0] ss:$8 sps:$4 sm:$0xff]  }
 0x232   : > { %v3010_v38 = vpop.f32.mrf.mxu0  ;;  %v3131_v39 = vpop.f32.mrf.mxu1  ;;  %v9939_v29 = vld [vmem:[#allocation5 + $0x420] ss:$8 sps:$4 sm:$0xff]  }
 0x233   : > { %v10764_v40 = vadd.f32 %v3129_v33, %v3014_v37  ;;  %5181 = vmatpush1.bf16.msra.mxu0 %v9876_v30  ;;  %5301 = vmatpush1.bf16.msra.mxu1 %v9879_v31  ;;  %v9944_v30 = vld [vmem:[#allocation5 + $0x4d4] ss:$8 sps:$4 sm:$0xff]   ;;  %v8741_v32 = vld [vmem:[%s10626_s6 + $0x2a] sm:$0x1]  ;;  %v8755_v33 = vld [vmem:[%s10626_s6 + $0x2b] sm:$0x1] }
 0x234   : > { %v3011_v43 = vpop.f32.mrf.mxu0  ;;  %v3132_v44 = vpop.f32.mrf.mxu1  ;;  %5182 = vmatprep.subr.bf16.mxu0 %v9884_v34  ;;  %5302 = vmatprep.subr.bf16.mxu1 %v9887_v35  ;;  %v9947_v31 = vld [vmem:[#allocation5 + $0x534] ss:$8 sps:$4 sm:$0xff]   ;;  %v9942_v34 = vld [vmem:[#allocation5 + $0x4d0] ss:$8 sps:$4 sm:$0xff]   ;;  %v9953_v37 = vld [vmem:[#allocation5 + $0x524] ss:$8 sps:$4 sm:$0xff]  }
 0x235   : > { %v9945_v35 = vld [vmem:[#allocation5 + $0x530] ss:$8 sps:$4 sm:$0xff]  }
 0x237   : > { %5183 = vmatpush1.bf16.msra.mxu0 %v9882_v41  ;;  %5303 = vmatpush1.bf16.msra.mxu1 %v9885_v42  ;;  %v9948_v41 = vld [vmem:[#allocation5 + $0x4c0] ss:$8 sps:$4 sm:$0xff]  }
 0x238   : > { %5184 = vmatprep.subr.bf16.mxu0 %v9890_v45  ;;  %5304 = vmatprep.subr.bf16.mxu1 %v9893_v46  ;;  %v9951_v42 = vld [vmem:[#allocation5 + $0x520] ss:$8 sps:$4 sm:$0xff]   ;;  %v9956_v45 = vld [vmem:[#allocation5 + $0x4b4] ss:$8 sps:$4 sm:$0xff]  }
 0x239   : > { %v9959_v46 = vld [vmem:[#allocation5 + $0x514] ss:$8 sps:$4 sm:$0xff]  }
 0x23b   : > { %5185 = vmatpush1.bf16.msra.mxu0 %v9888_v47  ;;  %5305 = vmatpush1.bf16.msra.mxu1 %v9891_v48 }
 0x23c   : > { %5186 = vmatprep.subr.bf16.mxu0 %v9896_v49  ;;  %5306 = vmatprep.subr.bf16.mxu1 %v9899_v50  ;;  %v9954_v49 = vld [vmem:[#allocation5 + $0x4b0] ss:$8 sps:$4 sm:$0xff]  }
 0x23d   : > { %v9957_v50 = vld [vmem:[#allocation5 + $0x510] ss:$8 sps:$4 sm:$0xff]  }
 0x23f   : > { %5187 = vmatpush1.bf16.msra.mxu0 %v9894_v51  ;;  %5307 = vmatpush1.bf16.msra.mxu1 %v9897_v52 }
 0x240   : > { %5188 = vmatprep.subr.bf16.mxu0 %v9902_v53  ;;  %5308 = vmatprep.subr.bf16.mxu1 %v9905_v54  ;;  %v9962_v53 = vld [vmem:[#allocation5 + $0x4a4] ss:$8 sps:$4 sm:$0xff]  }
 0x241   : > { %v9965_v54 = vld [vmem:[#allocation5 + $0x504] ss:$8 sps:$4 sm:$0xff]  }
 0x243   : > { %5189 = vmatpush1.bf16.msra.mxu0 %v9900_v55  ;;  %5309 = vmatpush1.bf16.msra.mxu1 %v9903_v56  ;;  %v9960_v55 = vld [vmem:[#allocation5 + $0x4a0] ss:$8 sps:$4 sm:$0xff]  }
 0x244   : > { %5418 = vmatprep.subr.bf16.mxu0 %v9908_v57  ;;  %5538 = vmatprep.subr.bf16.mxu1 %v9911_v58  ;;  %v9963_v56 = vld [vmem:[#allocation5 + $0x500] ss:$8 sps:$4 sm:$0xff]   ;;  %v9968_v57 = vld [vmem:[#allocation5 + $0x494] ss:$8 sps:$4 sm:$0xff]  }
 0x245   : > { %v9971_v58 = vld [vmem:[#allocation5 + $0x4f4] ss:$8 sps:$4 sm:$0xff]  }
 0x246   : > { %v3248_v2 = vpop.f32.mrf.mxu0  ;;  %v3369_v3 = vpop.f32.mrf.mxu1  ;;  %8726 = vmatmul.mubr.msk.bf16.vlgmr.msra.gmra.mxu0 %vm325_vm0, %v8713_v59  ;;  %8740 = vmatmul.mubr.msk.bf16.vlgmr.msra.gmra.mxu1 %vm325_vm0, %v8727_v60  ;;  %v9966_v59 = vld [vmem:[#allocation5 + $0x490] ss:$8 sps:$4 sm:$0xff]  }
 0x247   : > { %v3255_v4 = vadd.f32 %v3248_v2, %v3134_v36  ;;  %5419 = vmatpush1.bf16.msra.mxu0 %v9906_v61  ;;  %5539 = vmatpush1.bf16.msra.mxu1 %v9909_v62  ;;  %v9950_v36 = vld [vmem:[#allocation5 + $0x4c4] ss:$8 sps:$4 sm:$0xff]   ;;  %v9969_v60 = vld [vmem:[#allocation5 + $0x4f0] ss:$8 sps:$4 sm:$0xff]   ;;  %v9980_v2 = vld [vmem:[#allocation5 + $0x594] ss:$8 sps:$4 sm:$0xff]  }
 0x248   : > { %v10770_v7 = vpop.f32.mrf.mxu0  ;;  %v10772_v8 = vpop.f32.mrf.mxu1  ;;  %5420 = vmatprep.subr.bf16.mxu0 %v9914_v63  ;;  %5540 = vmatprep.subr.bf16.mxu1 %v9917_v1  ;;  %v9974_v61 = vld [vmem:[#allocation5 + $0x484] ss:$8 sps:$4 sm:$0xff]   ;;  %v9972_v63 = vld [vmem:[#allocation5 + $0x480] ss:$8 sps:$4 sm:$0xff]  }
 0x249   : > { %v10774_v11 = vadd.f32 %v3369_v3, %v3255_v4  ;;  %5446 = vmatprep.mubr.bf16.mxu0 %v10475_v0  ;;  %5566 = vmatprep.mubr.bf16.mxu1 %v10475_v0  ;;  %v9977_v62 = vld [vmem:[#allocation5 + $0x4e4] ss:$8 sps:$4 sm:$0xff]   ;;  %v9975_v1 = vld [vmem:[#allocation5 + $0x4e0] ss:$8 sps:$4 sm:$0xff]   ;;  %v9983_v3 = vld [vmem:[#allocation5 + $0x5f4] ss:$8 sps:$4 sm:$0xff]  }
 0x24a   : > { %v3252_v12 = vpop.f32.mrf.mxu0  ;;  %v3373_v13 = vpop.f32.mrf.mxu1  ;;  %v8769_v4 = vld [vmem:[%s10626_s6 + $0x2c] sm:$0x1] }
 0x24b   : > { %5421 = vmatpush1.bf16.msra.mxu0 %v9912_v5  ;;  %5541 = vmatpush1.bf16.msra.mxu1 %v9915_v6  ;;  %v8783_v5 = vld [vmem:[%s10626_s6 + $0x2d] sm:$0x1]  ;;  %v9978_v6 = vld [vmem:[#allocation5 + $0x590] ss:$8 sps:$4 sm:$0xff]  }
 0x24c   : > { %v3253_v16 = vpop.f32.mrf.mxu0  ;;  %v3374_v17 = vpop.f32.mrf.mxu1  ;;  %5422 = vmatprep.subr.bf16.mxu0 %v9920_v9  ;;  %5542 = vmatprep.subr.bf16.mxu1 %v9923_v10  ;;  %v9981_v9 = vld [vmem:[#allocation5 + $0x5f0] ss:$8 sps:$4 sm:$0xff]   ;;  %v9986_v10 = vld [vmem:[#allocation5 + $0x584] ss:$8 sps:$4 sm:$0xff]  }
 0x24d   : > { %v9989_v12 = vld [vmem:[#allocation5 + $0x5e4] ss:$8 sps:$4 sm:$0xff]   ;;  %v9987_v16 = vld [vmem:[#allocation5 + $0x5e0] ss:$8 sps:$4 sm:$0xff]  }
 0x24f   : > { %5423 = vmatpush1.bf16.msra.mxu0 %v9918_v14  ;;  %5543 = vmatpush1.bf16.msra.mxu1 %v9921_v15  ;;  %v9984_v15 = vld [vmem:[#allocation5 + $0x580] ss:$8 sps:$4 sm:$0xff]  }
 0x250   : > { %5424 = vmatprep.subr.bf16.mxu0 %v9926_v18  ;;  %5544 = vmatprep.subr.bf16.mxu1 %v9929_v19  ;;  %v9992_v19 = vld [vmem:[#allocation5 + $0x574] ss:$8 sps:$4 sm:$0xff]  }
 0x253   : > { %5425 = vmatpush1.bf16.msra.mxu0 %v9924_v20  ;;  %5545 = vmatpush1.bf16.msra.mxu1 %v9927_v21  ;;  %v9995_v20 = vld [vmem:[#allocation5 + $0x5d4] ss:$8 sps:$4 sm:$0xff]  }
 0x254   : > { %5426 = vmatprep.subr.bf16.mxu0 %v9932_v22  ;;  %5546 = vmatprep.subr.bf16.mxu1 %v9935_v23  ;;  %v9990_v23 = vld [vmem:[#allocation5 + $0x570] ss:$8 sps:$4 sm:$0xff]  }
 0x257   : > { %5427 = vmatpush1.bf16.msra.mxu0 %v9930_v24  ;;  %5547 = vmatpush1.bf16.msra.mxu1 %v9933_v25  ;;  %v9993_v24 = vld [vmem:[#allocation5 + $0x5d0] ss:$8 sps:$4 sm:$0xff]  }
 0x258   : > { %5428 = vmatprep.subr.bf16.mxu0 %v9938_v26  ;;  %5548 = vmatprep.subr.bf16.mxu1 %v9941_v27  ;;  %v9998_v27 = vld [vmem:[#allocation5 + $0x564] ss:$8 sps:$4 sm:$0xff]  }
 0x25b   : > { %5429 = vmatpush1.bf16.msra.mxu0 %v9936_v28  ;;  %5549 = vmatpush1.bf16.msra.mxu1 %v9939_v29  ;;  %v10001_v28 = vld [vmem:[#allocation5 + $0x5c4] ss:$8 sps:$4 sm:$0xff]   ;;  %v3256_v29 = vadd.f32 %v10770_v7, %v10764_v40 }
 0x25c   : > { %5658 = vmatprep.subr.bf16.mxu0 %v9944_v30  ;;  %5778 = vmatprep.subr.bf16.mxu1 %v9947_v31  ;;  %v9996_v30 = vld [vmem:[#allocation5 + $0x560] ss:$8 sps:$4 sm:$0xff]   ;;  %v10010_v40 = vld [vmem:[#allocation5 + $0x544] ss:$8 sps:$4 sm:$0xff]  }
 0x25d   : > { %v9999_v31 = vld [vmem:[#allocation5 + $0x5c0] ss:$8 sps:$4 sm:$0xff]   ;;  %v10013_v7 = vld [vmem:[#allocation5 + $0x5a4] ss:$8 sps:$4 sm:$0xff]  }
 0x25e   : > { %v10780_v38 = vpop.f32.mrf.mxu0  ;;  %v10782_v39 = vpop.f32.mrf.mxu1  ;;  %8754 = vmatmul.mubr.msk.bf16.vlgmr.msra.gmra.mxu0 %vm325_vm0, %v8741_v32  ;;  %8768 = vmatmul.mubr.msk.bf16.vlgmr.msra.gmra.mxu1 %vm325_vm0, %v8755_v33  ;;  %v10004_v32 = vld [vmem:[#allocation5 + $0x554] ss:$8 sps:$4 sm:$0xff]  }
 0x25f   : > { %5659 = vmatpush1.bf16.msra.mxu0 %v9942_v34  ;;  %5779 = vmatpush1.bf16.msra.mxu1 %v9945_v35  ;;  %v10007_v33 = vld [vmem:[#allocation5 + $0x5b4] ss:$8 sps:$4 sm:$0xff]   ;;  %v3377_v34 = vadd.f32 %v10772_v8, %v3256_v29  ;;  %v3497_v35 = vadd.f32 %v10780_v38, %v10774_v11  ;;  %v10008_v8 = vld [vmem:[#allocation5 + $0x540] ss:$8 sps:$4 sm:$0xff]  }
 0x260   : > { %v10786_v43 = vpop.f32.mrf.mxu0  ;;  %v10788_v44 = vpop.f32.mrf.mxu1  ;;  %5660 = vmatprep.subr.bf16.mxu0 %v9950_v36  ;;  %5780 = vmatprep.subr.bf16.mxu1 %v9953_v37  ;;  %v10002_v36 = vld [vmem:[#allocation5 + $0x550] ss:$8 sps:$4 sm:$0xff]   ;;  %v10016_v38 = vld [vmem:[#allocation5 + $0x654] ss:$8 sps:$4 sm:$0xff]   ;;  %v10032_v29 = vld [vmem:[#allocation5 + $0x620] ss:$8 sps:$4 sm:$0xff]  }
 0x261   : > { %5686 = vmatprep.mubr.bf16.mxu0 %v10475_v0  ;;  %5806 = vmatprep.mubr.bf16.mxu1 %v10475_v0  ;;  %v10005_v37 = vld [vmem:[#allocation5 + $0x5b0] ss:$8 sps:$4 sm:$0xff]  }
 0x262   : > { %v3494_v47 = vpop.f32.mrf.mxu0  ;;  %v3615_v48 = vpop.f32.mrf.mxu1 }
 0x263   : > { %5661 = vmatpush1.bf16.msra.mxu0 %v9948_v41  ;;  %5781 = vmatpush1.bf16.msra.mxu1 %v9951_v42  ;;  %v4106_v41 = vlaneseq  ;;  %v3498_v42 = vadd.f32 %v10786_v43, %v3377_v34  ;;  %v10019_v47 = vld [vmem:[#allocation5 + $0x6b4] ss:$8 sps:$4 sm:$0xff]  }
 0x264   : > { %v3495_v51 = vpop.f32.mrf.mxu0  ;;  %v3616_v52 = vpop.f32.mrf.mxu1  ;;  %5662 = vmatprep.subr.bf16.mxu0 %v9956_v45  ;;  %5782 = vmatprep.subr.bf16.mxu1 %v9959_v46  ;;  %v3618_v45 = vadd.f32 %v10782_v39, %v3497_v35  ;;  %v10011_v46 = vld [vmem:[#allocation5 + $0x5a0] ss:$8 sps:$4 sm:$0xff]   ;;  %v10038_v35 = vld [vmem:[#allocation5 + $0x610] ss:$8 sps:$4 sm:$0xff]  }
 0x265   : > { %v10809_v11 = vshrl.u32 %v4106_v41, 7  ;;  %v3619_v48 = vadd.f32 %v10788_v44, %v3498_v42  ;;  %v8811_v51 = vld [vmem:[%s10626_s6 + $0x2f] sm:$0x1]  ;;  %v10014_v52 = vld [vmem:[#allocation5 + $0x650] ss:$8 sps:$4 sm:$0xff]  }
 0x266   : > { %v4104_v39 = vld [vmem:[#allocation7] sm:$0x3]  ;;  %v10049_v41 = vld [vmem:[#allocation5 + $0x664] ss:$8 sps:$4 sm:$0xff]   ;;  %v10052_v42 = vld [vmem:[#allocation5 + $0x714] ss:$8 sps:$4 sm:$0xff]  }
 0x267   : > { %5663 = vmatpush1.bf16.msra.mxu0 %v9954_v49  ;;  %5783 = vmatpush1.bf16.msra.mxu1 %v9957_v50  ;;  %v8797_v50 = vld [vmem:[%s10626_s6 + $0x2e] sm:$0x1]  ;;  %v4108_v43 = vsub.s32 0, %v10809_v11 }
 0x268   : > { %5664 = vmatprep.subr.bf16.mxu0 %v9962_v53  ;;  %5784 = vmatprep.subr.bf16.mxu1 %v9965_v54  ;;  %v10017_v54 = vld [vmem:[#allocation5 + $0x6b0] ss:$8 sps:$4 sm:$0xff]  }
 0x26b   : > { %5665 = vmatpush1.bf16.msra.mxu0 %v9960_v55  ;;  %5785 = vmatpush1.bf16.msra.mxu1 %v9963_v56  ;;  %v10022_v55 = vld [vmem:[#allocation5 + $0x644] ss:$8 sps:$4 sm:$0xff]  }
 0x26c   : > { %5666 = vmatprep.subr.bf16.mxu0 %v9968_v57  ;;  %5786 = vmatprep.subr.bf16.mxu1 %v9971_v58  ;;  %v10025_v56 = vld [vmem:[#allocation5 + $0x6a4] ss:$8 sps:$4 sm:$0xff]   ;;  %v4112_v58 = vsub.s32 1, %v10809_v11 }
 0x26f   : > { %5667 = vmatpush1.bf16.msra.mxu0 %v9966_v59  ;;  %5787 = vmatpush1.bf16.msra.mxu1 %v9969_v60 }
 0x270   : > { %5668 = vmatprep.subr.bf16.mxu0 %v9974_v61  ;;  %5788 = vmatprep.subr.bf16.mxu1 %v9977_v62  ;;  %v4109_v62 = vrot.slane %v4104_v39, %v4108_v43 }
 0x273   : > { %5669 = vmatpush1.bf16.msra.mxu0 %v9972_v63  ;;  %5789 = vmatpush1.bf16.msra.mxu1 %v9975_v1  ;;  %v10476_v63 = vmov 1966171168  }
 0x274   : > { %5898 = vmatprep.subr.bf16.mxu0 %v9980_v2  ;;  %6018 = vmatprep.subr.bf16.mxu1 %v9983_v3  ;;  %v4126_v1 = vunpack.c.l.s4 %v10476_v63  ;;  %v10020_v2 = vld [vmem:[#allocation5 + $0x640] ss:$8 sps:$4 sm:$0xff]  }
 0x275   : > { %v10023_v3 = vld [vmem:[#allocation5 + $0x6a0] ss:$8 sps:$4 sm:$0xff]  }
 0x276   : > { %v3732_v13 = vpop.f32.mrf.mxu0  ;;  %v10794_v14 = vpop.f32.mrf.mxu1  ;;  %8782 = vmatmul.mubr.msk.bf16.vlgmr.msra.gmra.mxu0 %vm325_vm0, %v8769_v4  ;;  %8796 = vmatmul.mubr.msk.bf16.vlgmr.msra.gmra.mxu1 %vm325_vm0, %v8783_v5 }
 0x277   : > { %5899 = vmatpush1.bf16.msra.mxu0 %v9978_v6  ;;  %6019 = vmatpush1.bf16.msra.mxu1 %v9981_v9  ;;  %v3739_v49 = vadd.f32 %v3732_v13, %v3618_v45  ;;  %v10028_v6 = vld [vmem:[#allocation5 + $0x634] ss:$8 sps:$4 sm:$0xff]   ;;  %v4113_v13 = vrot.slane %v4104_v39, %v4112_v58  ;;  %v10059_v39 = vld [vmem:[#allocation5 + $0x760] ss:$8 sps:$4 sm:$0xff]  }
 0x278   : > { %v3734_v17 = vpop.f32.mrf.mxu0  ;;  %v10798_v18 = vpop.f32.mrf.mxu1  ;;  %5900 = vmatprep.subr.bf16.mxu0 %v9986_v10  ;;  %6020 = vmatprep.subr.bf16.mxu1 %v9989_v12  ;;  %v10031_v9 = vld [vmem:[#allocation5 + $0x694] ss:$8 sps:$4 sm:$0xff]  }
 0x279   : > { %5926 = vmatprep.mubr.bf16.mxu0 %v10475_v0  ;;  %6046 = vmatprep.mubr.bf16.mxu1 %v10475_v0  ;;  %v3740_v53 = vadd.f32 %v3734_v17, %v3619_v48  ;;  %v3860_v57 = vadd.f32 %v10794_v14, %v3739_v49  ;;  %v10055_v45 = vld [vmem:[#allocation5 + $0x774] ss:$8 sps:$4 sm:$0xff]   ;;  %v10058_v48 = vld [vmem:[#allocation5 + $0x704] ss:$8 sps:$4 sm:$0xff]  }
 0x27a   : > { %v3736_v21 = vpop.f32.mrf.mxu0  ;;  %v3857_v22 = vpop.f32.mrf.mxu1  ;;  %v10061_v49 = vld [vmem:[#allocation5 + $0x764] ss:$8 sps:$4 sm:$0xff]  }
 0x27b   : > { %5901 = vmatpush1.bf16.msra.mxu0 %v9984_v15  ;;  %6021 = vmatpush1.bf16.msra.mxu1 %v9987_v16  ;;  %v3861_v60 = vadd.f32 %v10798_v18, %v3740_v53  ;;  %v4127_v18 = vunpack.c.0.s8 %v4126_v1  ;;  %v10056_v53 = vld [vmem:[#allocation5 + $0x700] ss:$8 sps:$4 sm:$0xff]  }
 0x27c   : > { %v3737_v25 = vpop.f32.mrf.mxu0  ;;  %v3858_v26 = vpop.f32.mrf.mxu1  ;;  %5902 = vmatprep.subr.bf16.mxu0 %v9992_v19  ;;  %6022 = vmatprep.subr.bf16.mxu1 %v9995_v20  ;;  %v10026_v19 = vld [vmem:[#allocation5 + $0x630] ss:$8 sps:$4 sm:$0xff]  }
 0x27d   : > { %v10029_v20 = vld [vmem:[#allocation5 + $0x690] ss:$8 sps:$4 sm:$0xff]  }
 0x27f   : > { %5903 = vmatpush1.bf16.msra.mxu0 %v9990_v23  ;;  %6023 = vmatpush1.bf16.msra.mxu1 %v9993_v24  ;;  %v10034_v23 = vld [vmem:[#allocation5 + $0x624] ss:$8 sps:$4 sm:$0xff]  }
 0x280   : > { %5904 = vmatprep.subr.bf16.mxu0 %v9998_v27  ;;  %6024 = vmatprep.subr.bf16.mxu1 %v10001_v28  ;;  %v10037_v24 = vld [vmem:[#allocation5 + $0x684] ss:$8 sps:$4 sm:$0xff]   ;;  %v10828_v28 = vsub.s32 %v4127_v18, %v10809_v11  ;;  %v10091_v18 = vld [vmem:[#allocation5 + $0x834] ss:$8 sps:$4 sm:$0xff]  }
 0x283   : > { %5905 = vmatpush1.bf16.msra.mxu0 %v9996_v30  ;;  %6025 = vmatpush1.bf16.msra.mxu1 %v9999_v31  ;;  %v10035_v30 = vld [vmem:[#allocation5 + $0x680] ss:$8 sps:$4 sm:$0xff]   ;;  %v10040_v31 = vld [vmem:[#allocation5 + $0x614] ss:$8 sps:$4 sm:$0xff]  }
 0x284   : > { %5906 = vmatprep.subr.bf16.mxu0 %v10004_v32  ;;  %6026 = vmatprep.subr.bf16.mxu1 %v10007_v33  ;;  %v10043_v32 = vld [vmem:[#allocation5 + $0x674] ss:$8 sps:$4 sm:$0xff]  }
 0x287   : > { %5907 = vmatpush1.bf16.msra.mxu0 %v10002_v36  ;;  %6027 = vmatpush1.bf16.msra.mxu1 %v10005_v37  ;;  %v10041_v36 = vld [vmem:[#allocation5 + $0x670] ss:$8 sps:$4 sm:$0xff]   ;;  %v10046_v37 = vld [vmem:[#allocation5 + $0x604] ss:$8 sps:$4 sm:$0xff]  }
 0x288   : > { %5908 = vmatprep.subr.bf16.mxu0 %v10010_v40  ;;  %6028 = vmatprep.subr.bf16.mxu1 %v10013_v7  ;;  %v10044_v40 = vld [vmem:[#allocation5 + $0x600] ss:$8 sps:$4 sm:$0xff]  }
 0x289   : > { %v10047_v7 = vld [vmem:[#allocation5 + $0x660] ss:$8 sps:$4 sm:$0xff]  }
 0x28b   : > { %5909 = vmatpush1.bf16.msra.mxu0 %v10008_v8  ;;  %6029 = vmatpush1.bf16.msra.mxu1 %v10011_v46  ;;  %v8825_v8 = vld [vmem:[%s10626_s6 + $0x30] sm:$0x1]  ;;  %v8839_v46 = vld [vmem:[%s10626_s6 + $0x31] sm:$0x1] }
 0x28c   : > { %6138 = vmatprep.subr.bf16.mxu0 %v10016_v38  ;;  %6258 = vmatprep.subr.bf16.mxu1 %v10019_v47  ;;  %v10050_v38 = vld [vmem:[#allocation5 + $0x710] ss:$8 sps:$4 sm:$0xff]  }
 0x28d   : > { %v10053_v47 = vld [vmem:[#allocation5 + $0x770] ss:$8 sps:$4 sm:$0xff]  }
 0x28e   : > { %v3974_v44 = vpop.f32.mrf.mxu0  ;;  %v4095_v59 = vpop.f32.mrf.mxu1  ;;  %8810 = vmatmul.mubr.msk.bf16.vlgmr.msra.gmra.mxu0 %vm325_vm0, %v8797_v50  ;;  %8824 = vmatmul.mubr.msk.bf16.vlgmr.msra.gmra.mxu1 %vm325_vm0, %v8811_v51 }
 0x28f   : > { %v3981_v61 = vadd.f32 %v3974_v44, %v3860_v57  ;;  %6139 = vmatpush1.bf16.msra.mxu0 %v10014_v52  ;;  %6259 = vmatpush1.bf16.msra.mxu1 %v10017_v54  ;;  %v10067_v57 = vld [vmem:[#allocation5 + $0x754] ss:$8 sps:$4 sm:$0xff]  }
 0x290   : > { %v3976_v4 = vpop.f32.mrf.mxu0  ;;  %v4097_v5 = vpop.f32.mrf.mxu1  ;;  %6140 = vmatprep.subr.bf16.mxu0 %v10022_v55  ;;  %6260 = vmatprep.subr.bf16.mxu1 %v10025_v56  ;;  %v10064_v56 = vld [vmem:[#allocation5 + $0x6f4] ss:$8 sps:$4 sm:$0xff]  }
 0x291   : > { %v4102_v10 = vadd.f32 %v4095_v59, %v3981_v61  ;;  %v3982_v12 = vadd.f32 %v3976_v4, %v3861_v60  ;;  %6166 = vmatprep.mubr.bf16.mxu0 %v10475_v0  ;;  %6286 = vmatprep.mubr.bf16.mxu1 %v10475_v0  ;;  %v10062_v61 = vld [vmem:[#allocation5 + $0x6f0] ss:$8 sps:$4 sm:$0xff]   ;;  %v10068_v4 = vld [vmem:[#allocation5 + $0x6e0] ss:$8 sps:$4 sm:$0xff]  }
 0x292   : > { %v3978_v14 = vpop.f32.mrf.mxu0  ;;  %v4099_v15 = vpop.f32.mrf.mxu1 }
 0x293   : > { %v4116_v16 = vadd.f32 %v4109_v62, %v4102_v10  ;;  %v4103_v17 = vadd.f32 %v4097_v5, %v3982_v12  ;;  %6141 = vmatpush1.bf16.msra.mxu0 %v10020_v2  ;;  %6261 = vmatpush1.bf16.msra.mxu1 %v10023_v3  ;;  %v10065_v62 = vld [vmem:[#allocation5 + $0x750] ss:$8 sps:$4 sm:$0xff]   ;;  %v10070_v2 = vld [vmem:[#allocation5 + $0x6e4] ss:$8 sps:$4 sm:$0xff]   ;;  %v10071_v5 = vld [vmem:[#allocation5 + $0x740] ss:$8 sps:$4 sm:$0xff]  }
 0x294   : > { %v3979_v21 = vpop.f32.mrf.mxu0  ;;  %v4100_v22 = vpop.f32.mrf.mxu1  ;;  %6142 = vmatprep.subr.bf16.mxu0 %v10028_v6  ;;  %6262 = vmatprep.subr.bf16.mxu1 %v10031_v9  ;;  %v10073_v3 = vld [vmem:[#allocation5 + $0x744] ss:$8 sps:$4 sm:$0xff]   ;;  %v10076_v6 = vld [vmem:[#allocation5 + $0x6d4] ss:$8 sps:$4 sm:$0xff]   ;;  %v10074_v10 = vld [vmem:[#allocation5 + $0x6d0] ss:$8 sps:$4 sm:$0xff]  }
 0x295   : > { %v4117_v25 = vadd.f32 %v4113_v13, %v4103_v17  ;;  %v4118_v26 = vmax.f32 %v4116_v16, 0.0  ;;  %v10079_v9 = vld [vmem:[#allocation5 + $0x734] ss:$8 sps:$4 sm:$0xff]   ;;  %v10077_v12 = vld [vmem:[#allocation5 + $0x730] ss:$8 sps:$4 sm:$0xff]  }
 0x296   : > { %v10082_v13 = vld [vmem:[#allocation5 + $0x6c4] ss:$8 sps:$4 sm:$0xff]   ;;  %v10080_v15 = vld [vmem:[#allocation5 + $0x6c0] ss:$8 sps:$4 sm:$0xff]   ;;  %v10088_v17 = vld [vmem:[#allocation5 + $0x7d4] ss:$8 sps:$4 sm:$0xff]  }
 0x297   : > { %v4119_v27 = vmax.f32 %v4117_v25, 0.0  ;;  %6143 = vmatpush1.bf16.msra.mxu0 %v10026_v19  ;;  %6263 = vmatpush1.bf16.msra.mxu1 %v10029_v20  ;;  %v10085_v14 = vld [vmem:[#allocation5 + $0x724] ss:$8 sps:$4 sm:$0xff]   ;;  %v10083_v16 = vld [vmem:[#allocation5 + $0x720] ss:$8 sps:$4 sm:$0xff]  }
 0x298   : > { %6144 = vmatprep.subr.bf16.mxu0 %v10034_v23  ;;  %6264 = vmatprep.subr.bf16.mxu1 %v10037_v24  ;;  %v8853_v19 = vld [vmem:[%s10626_s6 + $0x32] sm:$0x1]  ;;  %v8867_v20 = vld [vmem:[%s10626_s6 + $0x33] sm:$0x1]  ;;  %v10094_v23 = vld [vmem:[#allocation5 + $0x7c4] ss:$8 sps:$4 sm:$0xff]  }
 0x299   : > { %v8599_v33 = vpack.c.bf16 %v4119_v27, %v4118_v26  ;;  %v10086_v21 = vld [vmem:[#allocation5 + $0x7d0] ss:$8 sps:$4 sm:$0xff]   ;;  %v10097_v24 = vld [vmem:[#allocation5 + $0x824] ss:$8 sps:$4 sm:$0xff]  }
 0x29a   : > { %v10089_v22 = vld [vmem:[#allocation5 + $0x830] ss:$8 sps:$4 sm:$0xff]  }
 0x29b   : > { %v4131_v34 = vrot.slane %v8599_v33, %v10828_v28  ;;  %6145 = vmatpush1.bf16.msra.mxu0 %v10032_v29  ;;  %6265 = vmatpush1.bf16.msra.mxu1 %v10035_v30  ;;  %v10092_v29 = vld [vmem:[#allocation5 + $0x7c0] ss:$8 sps:$4 sm:$0xff]   ;;  %v10100_v33 = vld [vmem:[#allocation5 + $0x7b4] ss:$8 sps:$4 sm:$0xff]  }
 0x29c   : > { %6146 = vmatprep.subr.bf16.mxu0 %v10040_v31  ;;  %6266 = vmatprep.subr.bf16.mxu1 %v10043_v32  ;;  %v10095_v30 = vld [vmem:[#allocation5 + $0x820] ss:$8 sps:$4 sm:$0xff]  }
 0x29d   : > { %8600 = vst.sshfl [vmem:[%s10831_s22] sm:$0x5 pattern:$0x73625140] %v4131_v34  ;;  %v10103_v34 = vld [vmem:[#allocation5 + $0x814] ss:$8 sps:$4 sm:$0xff]  }
 0x29f   : > { %6147 = vmatpush1.bf16.msra.mxu0 %v10038_v35  ;;  %6267 = vmatpush1.bf16.msra.mxu1 %v10041_v36 }
 0x2a0   : > { %6148 = vmatprep.subr.bf16.mxu0 %v10046_v37  ;;  %6268 = vmatprep.subr.bf16.mxu1 %v10049_v41 }
 0x2a3   : > { %6149 = vmatpush1.bf16.msra.mxu0 %v10044_v40  ;;  %6269 = vmatpush1.bf16.msra.mxu1 %v10047_v7  ;;  %v10098_v7 = vld [vmem:[#allocation5 + $0x7b0] ss:$8 sps:$4 sm:$0xff]  }
 0x2a4   : > { %6378 = vmatprep.subr.bf16.mxu0 %v10052_v42  ;;  %6498 = vmatprep.subr.bf16.mxu1 %v10055_v45  ;;  %v10101_v42 = vld [vmem:[#allocation5 + $0x810] ss:$8 sps:$4 sm:$0xff]  }
 0x2a6   : > { %v4266_v50 = vpop.f32.mrf.mxu0  ;;  %v4370_v51 = vpop.f32.mrf.mxu1  ;;  %8838 = vmatmul.mubr.msk.bf16.vlgmr.msra.gmra.mxu0 %vm325_vm0, %v8825_v8  ;;  %8852 = vmatmul.mubr.msk.bf16.vlgmr.msra.gmra.mxu1 %vm325_vm0, %v8839_v46  ;;  %v10106_v46 = vld [vmem:[#allocation5 + $0x7a4] ss:$8 sps:$4 sm:$0xff]  }
 0x2a7   : > { %v10838_v52 = vadd.f32 %v4370_v51, %v4266_v50  ;;  %6379 = vmatpush1.bf16.msra.mxu0 %v10050_v38  ;;  %6499 = vmatpush1.bf16.msra.mxu1 %v10053_v47  ;;  %v10109_v38 = vld [vmem:[#allocation5 + $0x804] ss:$8 sps:$4 sm:$0xff]   ;;  %v10104_v47 = vld [vmem:[#allocation5 + $0x7a0] ss:$8 sps:$4 sm:$0xff]   ;;  %v10115_v50 = vld [vmem:[#allocation5 + $0x7f4] ss:$8 sps:$4 sm:$0xff]  }
 0x2a8   : > { %v4268_v54 = vpop.f32.mrf.mxu0  ;;  %v4372_v55 = vpop.f32.mrf.mxu1  ;;  %6380 = vmatprep.subr.bf16.mxu0 %v10058_v48  ;;  %6500 = vmatprep.subr.bf16.mxu1 %v10061_v49  ;;  %v10107_v48 = vld [vmem:[#allocation5 + $0x800] ss:$8 sps:$4 sm:$0xff]   ;;  %v10112_v49 = vld [vmem:[#allocation5 + $0x794] ss:$8 sps:$4 sm:$0xff]   ;;  %v10110_v51 = vld [vmem:[#allocation5 + $0x790] ss:$8 sps:$4 sm:$0xff]  }
 0x2a9   : > { %v10840_v44 = vadd.f32 %v4372_v55, %v4268_v54  ;;  %6406 = vmatprep.mubr.bf16.mxu0 %v10475_v0  ;;  %6526 = vmatprep.mubr.bf16.mxu1 %v10475_v0  ;;  %v10116_v54 = vld [vmem:[#allocation5 + $0x780] ss:$8 sps:$4 sm:$0xff]  }
 0x2aa   : > { %v4270_v59 = vpop.f32.mrf.mxu0  ;;  %v4374_v60 = vpop.f32.mrf.mxu1  ;;  %v10119_v55 = vld [vmem:[#allocation5 + $0x7e0] ss:$8 sps:$4 sm:$0xff]  }
 0x2ab   : > { %6381 = vmatpush1.bf16.msra.mxu0 %v10056_v53  ;;  %6501 = vmatpush1.bf16.msra.mxu1 %v10059_v39  ;;  %v10118_v53 = vld [vmem:[#allocation5 + $0x784] ss:$8 sps:$4 sm:$0xff]   ;;  %v8895_v59 = vld [vmem:[%s10626_s6 + $0x35] sm:$0x1]  ;;  %v10122_v60 = vld [vmem:[#allocation5 + $0x890] ss:$8 sps:$4 sm:$0xff]  }
 0x2ac   : > { %v4271_v63 = vpop.f32.mrf.mxu0  ;;  %v4375_v1 = vpop.f32.mrf.mxu1  ;;  %6382 = vmatprep.subr.bf16.mxu0 %v10064_v56  ;;  %6502 = vmatprep.subr.bf16.mxu1 %v10067_v57  ;;  %v10121_v39 = vld [vmem:[#allocation5 + $0x7e4] ss:$8 sps:$4 sm:$0xff]   ;;  %v10124_v56 = vld [vmem:[#allocation5 + $0x894] ss:$8 sps:$4 sm:$0xff]  }
 0x2ad   : > { %v10127_v57 = vld [vmem:[#allocation5 + $0x8f4] ss:$8 sps:$4 sm:$0xff]   ;;  %v10133_v63 = vld [vmem:[#allocation5 + $0x8e4] ss:$8 sps:$4 sm:$0xff]  }
 0x2af   : > { %6383 = vmatpush1.bf16.msra.mxu0 %v10062_v61  ;;  %6503 = vmatpush1.bf16.msra.mxu1 %v10065_v62  ;;  %v10125_v61 = vld [vmem:[#allocation5 + $0x8f0] ss:$8 sps:$4 sm:$0xff]   ;;  %v10130_v62 = vld [vmem:[#allocation5 + $0x884] ss:$8 sps:$4 sm:$0xff]  }
 0x2b0   : > { %6384 = vmatprep.subr.bf16.mxu0 %v10070_v2  ;;  %6504 = vmatprep.subr.bf16.mxu1 %v10073_v3 }
 0x2b3   : > { %6385 = vmatpush1.bf16.msra.mxu0 %v10068_v4  ;;  %6505 = vmatpush1.bf16.msra.mxu1 %v10071_v5  ;;  %v10128_v4 = vld [vmem:[#allocation5 + $0x880] ss:$8 sps:$4 sm:$0xff]  }
 0x2b4   : > { %6386 = vmatprep.subr.bf16.mxu0 %v10076_v6  ;;  %6506 = vmatprep.subr.bf16.mxu1 %v10079_v9  ;;  %v10131_v5 = vld [vmem:[#allocation5 + $0x8e0] ss:$8 sps:$4 sm:$0xff]  }
 0x2b7   : > { %6387 = vmatpush1.bf16.msra.mxu0 %v10074_v10  ;;  %6507 = vmatpush1.bf16.msra.mxu1 %v10077_v12  ;;  %v10136_v10 = vld [vmem:[#allocation5 + $0x874] ss:$8 sps:$4 sm:$0xff]  }
 0x2b8   : > { %6388 = vmatprep.subr.bf16.mxu0 %v10082_v13  ;;  %6508 = vmatprep.subr.bf16.mxu1 %v10085_v14  ;;  %v10139_v12 = vld [vmem:[#allocation5 + $0x8d4] ss:$8 sps:$4 sm:$0xff]  }
 0x2bb   : > { %6389 = vmatpush1.bf16.msra.mxu0 %v10080_v15  ;;  %6509 = vmatpush1.bf16.msra.mxu1 %v10083_v16 }
 0x2bc   : > { %6618 = vmatprep.subr.bf16.mxu0 %v10088_v17  ;;  %6738 = vmatprep.subr.bf16.mxu1 %v10091_v18  ;;  %v10134_v18 = vld [vmem:[#allocation5 + $0x870] ss:$8 sps:$4 sm:$0xff]  }
 0x2be   : > { %v4488_v25 = vpop.f32.mrf.mxu0  ;;  %v4608_v26 = vpop.f32.mrf.mxu1  ;;  %8866 = vmatmul.mubr.msk.bf16.vlgmr.msra.gmra.mxu0 %vm325_vm0, %v8853_v19  ;;  %8880 = vmatmul.mubr.msk.bf16.vlgmr.msra.gmra.mxu1 %vm325_vm0, %v8867_v20  ;;  %v10137_v19 = vld [vmem:[#allocation5 + $0x8d0] ss:$8 sps:$4 sm:$0xff]  }
 0x2bf   : > { %v4495_v27 = vadd.f32 %v4488_v25, %v10838_v52  ;;  %6619 = vmatpush1.bf16.msra.mxu0 %v10086_v21  ;;  %6739 = vmatpush1.bf16.msra.mxu1 %v10089_v22  ;;  %v10113_v52 = vld [vmem:[#allocation5 + $0x7f0] ss:$8 sps:$4 sm:$0xff]   ;;  %v10142_v22 = vld [vmem:[#allocation5 + $0x864] ss:$8 sps:$4 sm:$0xff]   ;;  %v10143_v25 = vld [vmem:[#allocation5 + $0x8c0] ss:$8 sps:$4 sm:$0xff]  }
 0x2c0   : > { %v4490_v31 = vpop.f32.mrf.mxu0  ;;  %v4610_v32 = vpop.f32.mrf.mxu1  ;;  %6620 = vmatprep.subr.bf16.mxu0 %v10094_v23  ;;  %6740 = vmatprep.subr.bf16.mxu1 %v10097_v24  ;;  %v10145_v23 = vld [vmem:[#allocation5 + $0x8c4] ss:$8 sps:$4 sm:$0xff]   ;;  %v10140_v24 = vld [vmem:[#allocation5 + $0x860] ss:$8 sps:$4 sm:$0xff]  }
 0x2c1   : > { %v4615_v35 = vadd.f32 %v4608_v26, %v4495_v27  ;;  %v4496_v36 = vadd.f32 %v4490_v31, %v10840_v44  ;;  %6646 = vmatprep.mubr.bf16.mxu0 %v10475_v0  ;;  %6766 = vmatprep.mubr.bf16.mxu1 %v10475_v0  ;;  %v8881_v44 = vld [vmem:[%s10626_s6 + $0x34] sm:$0x1]  ;;  %v10154_v31 = vld [vmem:[#allocation5 + $0x844] ss:$8 sps:$4 sm:$0xff]  }
 0x2c2   : > { %v4492_v37 = vpop.f32.mrf.mxu0  ;;  %v4612_v41 = vpop.f32.mrf.mxu1  ;;  %v10148_v26 = vld [vmem:[#allocation5 + $0x854] ss:$8 sps:$4 sm:$0xff]  }
 0x2c3   : > { %v4616_v40 = vadd.f32 %v4610_v32, %v4496_v36  ;;  %6621 = vmatpush1.bf16.msra.mxu0 %v10092_v29  ;;  %6741 = vmatpush1.bf16.msra.mxu1 %v10095_v30  ;;  %v10151_v27 = vld [vmem:[#allocation5 + $0x8b4] ss:$8 sps:$4 sm:$0xff]   ;;  %v10146_v29 = vld [vmem:[#allocation5 + $0x850] ss:$8 sps:$4 sm:$0xff]   ;;  %v10157_v32 = vld [vmem:[#allocation5 + $0x8a4] ss:$8 sps:$4 sm:$0xff]  }
 0x2c4   : > { %v4493_v45 = vpop.f32.mrf.mxu0  ;;  %v4613_v8 = vpop.f32.mrf.mxu1  ;;  %6622 = vmatprep.subr.bf16.mxu0 %v10100_v33  ;;  %6742 = vmatprep.subr.bf16.mxu1 %v10103_v34  ;;  %v10149_v30 = vld [vmem:[#allocation5 + $0x8b0] ss:$8 sps:$4 sm:$0xff]   ;;  %v10152_v33 = vld [vmem:[#allocation5 + $0x840] ss:$8 sps:$4 sm:$0xff]   ;;  %v10163_v36 = vld [vmem:[#allocation5 + $0x9b4] ss:$8 sps:$4 sm:$0xff]  }
 0x2c5   : > { %v10155_v34 = vld [vmem:[#allocation5 + $0x8a0] ss:$8 sps:$4 sm:$0xff]   ;;  %v8909_v37 = vld [vmem:[%s10626_s6 + $0x36] sm:$0x1]  ;;  %v8923_v41 = vld [vmem:[%s10626_s6 + $0x37] sm:$0x1] }
 0x2c6   : > { %v10169_v45 = vld [vmem:[#allocation5 + $0x9a4] ss:$8 sps:$4 sm:$0xff]  }
 0x2c7   : > { %6623 = vmatpush1.bf16.msra.mxu0 %v10098_v7  ;;  %6743 = vmatpush1.bf16.msra.mxu1 %v10101_v42  ;;  %v10161_v7 = vld [vmem:[#allocation5 + $0x9b0] ss:$8 sps:$4 sm:$0xff]   ;;  %v10166_v42 = vld [vmem:[#allocation5 + $0x944] ss:$8 sps:$4 sm:$0xff]  }
 0x2c8   : > { %6624 = vmatprep.subr.bf16.mxu0 %v10106_v46  ;;  %6744 = vmatprep.subr.bf16.mxu1 %v10109_v38 }
 0x2cb   : > { %6625 = vmatpush1.bf16.msra.mxu0 %v10104_v47  ;;  %6745 = vmatpush1.bf16.msra.mxu1 %v10107_v48  ;;  %v10164_v47 = vld [vmem:[#allocation5 + $0x940] ss:$8 sps:$4 sm:$0xff]  }
 0x2cc   : > { %6626 = vmatprep.subr.bf16.mxu0 %v10112_v49  ;;  %6746 = vmatprep.subr.bf16.mxu1 %v10115_v50  ;;  %v10167_v48 = vld [vmem:[#allocation5 + $0x9a0] ss:$8 sps:$4 sm:$0xff]  }
 0x2cf   : > { %6627 = vmatpush1.bf16.msra.mxu0 %v10110_v51  ;;  %6747 = vmatpush1.bf16.msra.mxu1 %v10113_v52  ;;  %v10172_v51 = vld [vmem:[#allocation5 + $0x934] ss:$8 sps:$4 sm:$0xff]  }
 0x2d0   : > { %6628 = vmatprep.subr.bf16.mxu0 %v10118_v53  ;;  %6748 = vmatprep.subr.bf16.mxu1 %v10121_v39  ;;  %v10175_v52 = vld [vmem:[#allocation5 + $0x994] ss:$8 sps:$4 sm:$0xff]  }
 0x2d3   : > { %6629 = vmatpush1.bf16.msra.mxu0 %v10116_v54  ;;  %6749 = vmatpush1.bf16.msra.mxu1 %v10119_v55 }
 0x2d4   : > { %6858 = vmatprep.subr.bf16.mxu0 %v10124_v56  ;;  %6978 = vmatprep.subr.bf16.mxu1 %v10127_v57  ;;  %v10170_v57 = vld [vmem:[#allocation5 + $0x930] ss:$8 sps:$4 sm:$0xff]  }
 0x2d6   : > { %v4728_v1 = vpop.f32.mrf.mxu0  ;;  %v4848_v2 = vpop.f32.mrf.mxu1  ;;  %8894 = vmatmul.mubr.msk.bf16.vlgmr.msra.gmra.mxu0 %vm325_vm0, %v8881_v44  ;;  %8908 = vmatmul.mubr.msk.bf16.vlgmr.msra.gmra.mxu1 %vm325_vm0, %v8895_v59  ;;  %v10173_v44 = vld [vmem:[#allocation5 + $0x990] ss:$8 sps:$4 sm:$0xff]  }
 0x2d7   : > { %v4735_v3 = vadd.f32 %v4728_v1, %v4615_v35  ;;  %6859 = vmatpush1.bf16.msra.mxu0 %v10122_v60  ;;  %6979 = vmatpush1.bf16.msra.mxu1 %v10125_v61  ;;  %v10160_v35 = vld [vmem:[#allocation5 + $0x954] ss:$8 sps:$4 sm:$0xff]   ;;  %v10178_v61 = vld [vmem:[#allocation5 + $0x924] ss:$8 sps:$4 sm:$0xff]   ;;  %v10179_v1 = vld [vmem:[#allocation5 + $0x980] ss:$8 sps:$4 sm:$0xff]  }
 0x2d8   : > { %v4730_v6 = vpop.f32.mrf.mxu0  ;;  %v4850_v9 = vpop.f32.mrf.mxu1  ;;  %6860 = vmatprep.subr.bf16.mxu0 %v10130_v62  ;;  %6980 = vmatprep.subr.bf16.mxu1 %v10133_v63  ;;  %v10181_v62 = vld [vmem:[#allocation5 + $0x984] ss:$8 sps:$4 sm:$0xff]   ;;  %v10176_v63 = vld [vmem:[#allocation5 + $0x920] ss:$8 sps:$4 sm:$0xff]  }
 0x2d9   : > { %v4855_v13 = vadd.f32 %v4848_v2, %v4735_v3  ;;  %v4736_v14 = vadd.f32 %v4730_v6, %v4616_v40  ;;  %6886 = vmatprep.mubr.bf16.mxu0 %v10475_v0  ;;  %7006 = vmatprep.mubr.bf16.mxu1 %v10475_v0  ;;  %v10158_v40 = vld [vmem:[#allocation5 + $0x950] ss:$8 sps:$4 sm:$0xff]   ;;  %v10184_v2 = vld [vmem:[#allocation5 + $0x914] ss:$8 sps:$4 sm:$0xff]   ;;  %v10190_v6 = vld [vmem:[#allocation5 + $0x904] ss:$8 sps:$4 sm:$0xff]  }
 0x2da   : > { %v4732_v15 = vpop.f32.mrf.mxu0  ;;  %v4852_v16 = vpop.f32.mrf.mxu1  ;;  %v10187_v3 = vld [vmem:[#allocation5 + $0x974] ss:$8 sps:$4 sm:$0xff]  }
 0x2db   : > { %v4856_v17 = vadd.f32 %v4850_v9, %v4736_v14  ;;  %6861 = vmatpush1.bf16.msra.mxu0 %v10128_v4  ;;  %6981 = vmatpush1.bf16.msra.mxu1 %v10131_v5  ;;  %v10182_v4 = vld [vmem:[#allocation5 + $0x910] ss:$8 sps:$4 sm:$0xff]   ;;  %v10193_v9 = vld [vmem:[#allocation5 + $0x964] ss:$8 sps:$4 sm:$0xff]   ;;  %v10199_v14 = vld [vmem:[#allocation5 + $0xa74] ss:$8 sps:$4 sm:$0xff]  }
 0x2dc   : > { %v4733_v20 = vpop.f32.mrf.mxu0  ;;  %v4853_v21 = vpop.f32.mrf.mxu1  ;;  %6862 = vmatprep.subr.bf16.mxu0 %v10136_v10  ;;  %6982 = vmatprep.subr.bf16.mxu1 %v10139_v12  ;;  %v10185_v5 = vld [vmem:[#allocation5 + $0x970] ss:$8 sps:$4 sm:$0xff]   ;;  %v10188_v10 = vld [vmem:[#allocation5 + $0x900] ss:$8 sps:$4 sm:$0xff]  }
 0x2dd   : > { %v10191_v12 = vld [vmem:[#allocation5 + $0x960] ss:$8 sps:$4 sm:$0xff]   ;;  %v8937_v15 = vld [vmem:[%s10626_s6 + $0x38] sm:$0x1]  ;;  %v8951_v16 = vld [vmem:[%s10626_s6 + $0x39] sm:$0x1] }
 0x2de   : > { %v10205_v20 = vld [vmem:[#allocation5 + $0xa64] ss:$8 sps:$4 sm:$0xff]  }
 0x2df   : > { %6863 = vmatpush1.bf16.msra.mxu0 %v10134_v18  ;;  %6983 = vmatpush1.bf16.msra.mxu1 %v10137_v19  ;;  %v10197_v18 = vld [vmem:[#allocation5 + $0xa70] ss:$8 sps:$4 sm:$0xff]   ;;  %v10202_v19 = vld [vmem:[#allocation5 + $0xa04] ss:$8 sps:$4 sm:$0xff]  }
 0x2e0   : > { %6864 = vmatprep.subr.bf16.mxu0 %v10142_v22  ;;  %6984 = vmatprep.subr.bf16.mxu1 %v10145_v23 }
 0x2e3   : > { %6865 = vmatpush1.bf16.msra.mxu0 %v10140_v24  ;;  %6985 = vmatpush1.bf16.msra.mxu1 %v10143_v25  ;;  %v10200_v24 = vld [vmem:[#allocation5 + $0xa00] ss:$8 sps:$4 sm:$0xff]  }
 0x2e4   : > { %6866 = vmatprep.subr.bf16.mxu0 %v10148_v26  ;;  %6986 = vmatprep.subr.bf16.mxu1 %v10151_v27  ;;  %v10203_v25 = vld [vmem:[#allocation5 + $0xa60] ss:$8 sps:$4 sm:$0xff]  }
 0x2e7   : > { %6867 = vmatpush1.bf16.msra.mxu0 %v10146_v29  ;;  %6987 = vmatpush1.bf16.msra.mxu1 %v10149_v30  ;;  %v10208_v29 = vld [vmem:[#allocation5 + $0x9f4] ss:$8 sps:$4 sm:$0xff]  }
 0x2e8   : > { %6868 = vmatprep.subr.bf16.mxu0 %v10154_v31  ;;  %6988 = vmatprep.subr.bf16.mxu1 %v10157_v32  ;;  %v10211_v30 = vld [vmem:[#allocation5 + $0xa54] ss:$8 sps:$4 sm:$0xff]  }
 0x2eb   : > { %6869 = vmatpush1.bf16.msra.mxu0 %v10152_v33  ;;  %6989 = vmatpush1.bf16.msra.mxu1 %v10155_v34 }
 0x2ec   : > { %7098 = vmatprep.subr.bf16.mxu0 %v10160_v35  ;;  %7218 = vmatprep.subr.bf16.mxu1 %v10163_v36  ;;  %v10206_v36 = vld [vmem:[#allocation5 + $0x9f0] ss:$8 sps:$4 sm:$0xff]  }
 0x2ee   : > { %v4968_v8 = vpop.f32.mrf.mxu0  ;;  %v5088_v46 = vpop.f32.mrf.mxu1  ;;  %8922 = vmatmul.mubr.msk.bf16.vlgmr.msra.gmra.mxu0 %vm325_vm0, %v8909_v37  ;;  %8936 = vmatmul.mubr.msk.bf16.vlgmr.msra.gmra.mxu1 %vm325_vm0, %v8923_v41  ;;  %v10209_v37 = vld [vmem:[#allocation5 + $0xa50] ss:$8 sps:$4 sm:$0xff]  }
 0x2ef   : > { %v4975_v38 = vadd.f32 %v4968_v8, %v4855_v13  ;;  %7099 = vmatpush1.bf16.msra.mxu0 %v10158_v40  ;;  %7219 = vmatpush1.bf16.msra.mxu1 %v10161_v7  ;;  %v10196_v13 = vld [vmem:[#allocation5 + $0xa14] ss:$8 sps:$4 sm:$0xff]   ;;  %v10214_v7 = vld [vmem:[#allocation5 + $0x9e4] ss:$8 sps:$4 sm:$0xff]   ;;  %v10215_v8 = vld [vmem:[#allocation5 + $0xa40] ss:$8 sps:$4 sm:$0xff]  }
 0x2f0   : > { %v4970_v49 = vpop.f32.mrf.mxu0  ;;  %v5090_v50 = vpop.f32.mrf.mxu1  ;;  %7100 = vmatprep.subr.bf16.mxu0 %v10166_v42  ;;  %7220 = vmatprep.subr.bf16.mxu1 %v10169_v45  ;;  %v10217_v42 = vld [vmem:[#allocation5 + $0xa44] ss:$8 sps:$4 sm:$0xff]   ;;  %v10212_v45 = vld [vmem:[#allocation5 + $0x9e0] ss:$8 sps:$4 sm:$0xff]  }
 0x2f1   : > { %v5095_v53 = vadd.f32 %v5088_v46, %v4975_v38  ;;  %v4976_v39 = vadd.f32 %v4970_v49, %v4856_v17  ;;  %7126 = vmatprep.mubr.bf16.mxu0 %v10475_v0  ;;  %7246 = vmatprep.mubr.bf16.mxu1 %v10475_v0  ;;  %v10194_v17 = vld [vmem:[#allocation5 + $0xa10] ss:$8 sps:$4 sm:$0xff]   ;;  %v10220_v46 = vld [vmem:[#allocation5 + $0x9d4] ss:$8 sps:$4 sm:$0xff]   ;;  %v10226_v49 = vld [vmem:[#allocation5 + $0x9c4] ss:$8 sps:$4 sm:$0xff]  }
 0x2f2   : > { %v4972_v54 = vpop.f32.mrf.mxu0  ;;  %v5092_v55 = vpop.f32.mrf.mxu1  ;;  %v10223_v38 = vld [vmem:[#allocation5 + $0xa34] ss:$8 sps:$4 sm:$0xff]  }
 0x2f3   : > { %v5096_v56 = vadd.f32 %v5090_v50, %v4976_v39  ;;  %7101 = vmatpush1.bf16.msra.mxu0 %v10164_v47  ;;  %7221 = vmatpush1.bf16.msra.mxu1 %v10167_v48  ;;  %v10218_v47 = vld [vmem:[#allocation5 + $0x9d0] ss:$8 sps:$4 sm:$0xff]   ;;  %v10229_v50 = vld [vmem:[#allocation5 + $0xa24] ss:$8 sps:$4 sm:$0xff]   ;;  %v10235_v39 = vld [vmem:[#allocation5 + $0xb34] ss:$8 sps:$4 sm:$0xff]  }
 0x2f4   : > { %v4973_v59 = vpop.f32.mrf.mxu0  ;;  %v5093_v60 = vpop.f32.mrf.mxu1  ;;  %7102 = vmatprep.subr.bf16.mxu0 %v10172_v51  ;;  %7222 = vmatprep.subr.bf16.mxu1 %v10175_v52  ;;  %v10221_v48 = vld [vmem:[#allocation5 + $0xa30] ss:$8 sps:$4 sm:$0xff]   ;;  %v10224_v51 = vld [vmem:[#allocation5 + $0x9c0] ss:$8 sps:$4 sm:$0xff]  }
 0x2f5   : > { %v10227_v52 = vld [vmem:[#allocation5 + $0xa20] ss:$8 sps:$4 sm:$0xff]   ;;  %v8965_v54 = vld [vmem:[%s10626_s6 + $0x3a] sm:$0x1]  ;;  %v8979_v55 = vld [vmem:[%s10626_s6 + $0x3b] sm:$0x1] }
 0x2f6   : > { %v10241_v59 = vld [vmem:[#allocation5 + $0xb24] ss:$8 sps:$4 sm:$0xff]  }
 0x2f7   : > { %7103 = vmatpush1.bf16.msra.mxu0 %v10170_v57  ;;  %7223 = vmatpush1.bf16.msra.mxu1 %v10173_v44  ;;  %v10233_v57 = vld [vmem:[#allocation5 + $0xb30] ss:$8 sps:$4 sm:$0xff]   ;;  %v10238_v44 = vld [vmem:[#allocation5 + $0xac4] ss:$8 sps:$4 sm:$0xff]  }
 0x2f8   : > { %7104 = vmatprep.subr.bf16.mxu0 %v10178_v61  ;;  %7224 = vmatprep.subr.bf16.mxu1 %v10181_v62 }
 0x2fb   : > { %7105 = vmatpush1.bf16.msra.mxu0 %v10176_v63  ;;  %7225 = vmatpush1.bf16.msra.mxu1 %v10179_v1  ;;  %v10236_v63 = vld [vmem:[#allocation5 + $0xac0] ss:$8 sps:$4 sm:$0xff]  }
 0x2fc   : > { %7106 = vmatprep.subr.bf16.mxu0 %v10184_v2  ;;  %7226 = vmatprep.subr.bf16.mxu1 %v10187_v3  ;;  %v10239_v1 = vld [vmem:[#allocation5 + $0xb20] ss:$8 sps:$4 sm:$0xff]  }
 0x2ff   : > { %7107 = vmatpush1.bf16.msra.mxu0 %v10182_v4  ;;  %7227 = vmatpush1.bf16.msra.mxu1 %v10185_v5  ;;  %v10244_v4 = vld [vmem:[#allocation5 + $0xab4] ss:$8 sps:$4 sm:$0xff]  }
 0x300   : > { %7108 = vmatprep.subr.bf16.mxu0 %v10190_v6  ;;  %7228 = vmatprep.subr.bf16.mxu1 %v10193_v9  ;;  %v10247_v5 = vld [vmem:[#allocation5 + $0xb14] ss:$8 sps:$4 sm:$0xff]  }
 0x303   : > { %7109 = vmatpush1.bf16.msra.mxu0 %v10188_v10  ;;  %7229 = vmatpush1.bf16.msra.mxu1 %v10191_v12 }
 0x304   : > { %7338 = vmatprep.subr.bf16.mxu0 %v10196_v13  ;;  %7458 = vmatprep.subr.bf16.mxu1 %v10199_v14  ;;  %v10242_v14 = vld [vmem:[#allocation5 + $0xab0] ss:$8 sps:$4 sm:$0xff]  }
 0x306   : > { %v5208_v21 = vpop.f32.mrf.mxu0  ;;  %v5328_v22 = vpop.f32.mrf.mxu1  ;;  %8950 = vmatmul.mubr.msk.bf16.vlgmr.msra.gmra.mxu0 %vm325_vm0, %v8937_v15  ;;  %8964 = vmatmul.mubr.msk.bf16.vlgmr.msra.gmra.mxu1 %vm325_vm0, %v8951_v16  ;;  %v10245_v15 = vld [vmem:[#allocation5 + $0xb10] ss:$8 sps:$4 sm:$0xff]  }
 0x307   : > { %v5215_v23 = vadd.f32 %v5208_v21, %v5095_v53  ;;  %7339 = vmatpush1.bf16.msra.mxu0 %v10194_v17  ;;  %7459 = vmatpush1.bf16.msra.mxu1 %v10197_v18  ;;  %v10232_v53 = vld [vmem:[#allocation5 + $0xad4] ss:$8 sps:$4 sm:$0xff]   ;;  %v10250_v18 = vld [vmem:[#allocation5 + $0xaa4] ss:$8 sps:$4 sm:$0xff]   ;;  %v10251_v21 = vld [vmem:[#allocation5 + $0xb00] ss:$8 sps:$4 sm:$0xff]  }
 0x308   : > { %v5210_v26 = vpop.f32.mrf.mxu0  ;;  %v5330_v27 = vpop.f32.mrf.mxu1  ;;  %7340 = vmatprep.subr.bf16.mxu0 %v10202_v19  ;;  %7460 = vmatprep.subr.bf16.mxu1 %v10205_v20  ;;  %v10253_v19 = vld [vmem:[#allocation5 + $0xb04] ss:$8 sps:$4 sm:$0xff]   ;;  %v10248_v20 = vld [vmem:[#allocation5 + $0xaa0] ss:$8 sps:$4 sm:$0xff]  }
 0x309   : > { %v5335_v31 = vadd.f32 %v5328_v22, %v5215_v23  ;;  %v5216_v32 = vadd.f32 %v5210_v26, %v5096_v56  ;;  %7366 = vmatprep.mubr.bf16.mxu0 %v10475_v0  ;;  %7486 = vmatprep.mubr.bf16.mxu1 %v10475_v0  ;;  %v10230_v56 = vld [vmem:[#allocation5 + $0xad0] ss:$8 sps:$4 sm:$0xff]   ;;  %v10256_v22 = vld [vmem:[#allocation5 + $0xa94] ss:$8 sps:$4 sm:$0xff]   ;;  %v10262_v26 = vld [vmem:[#allocation5 + $0xa84] ss:$8 sps:$4 sm:$0xff]  }
 0x30a   : > { %v5212_v33 = vpop.f32.mrf.mxu0  ;;  %v5332_v34 = vpop.f32.mrf.mxu1  ;;  %v10259_v23 = vld [vmem:[#allocation5 + $0xaf4] ss:$8 sps:$4 sm:$0xff]  }
 0x30b   : > { %v5336_v35 = vadd.f32 %v5330_v27, %v5216_v32  ;;  %7341 = vmatpush1.bf16.msra.mxu0 %v10200_v24  ;;  %7461 = vmatpush1.bf16.msra.mxu1 %v10203_v25  ;;  %v10254_v24 = vld [vmem:[#allocation5 + $0xa90] ss:$8 sps:$4 sm:$0xff]   ;;  %v10265_v27 = vld [vmem:[#allocation5 + $0xae4] ss:$8 sps:$4 sm:$0xff]   ;;  %v10271_v32 = vld [vmem:[#allocation5 + $0xbf4] ss:$8 sps:$4 sm:$0xff]  }
 0x30c   : > { %v5213_v41 = vpop.f32.mrf.mxu0  ;;  %v5333_v40 = vpop.f32.mrf.mxu1  ;;  %7342 = vmatprep.subr.bf16.mxu0 %v10208_v29  ;;  %7462 = vmatprep.subr.bf16.mxu1 %v10211_v30  ;;  %v10257_v25 = vld [vmem:[#allocation5 + $0xaf0] ss:$8 sps:$4 sm:$0xff]   ;;  %v10260_v29 = vld [vmem:[#allocation5 + $0xa80] ss:$8 sps:$4 sm:$0xff]   ;;  %v8993_v33 = vld [vmem:[%s10626_s6 + $0x3c] sm:$0x1] }
 0x30d   : > { %v10263_v30 = vld [vmem:[#allocation5 + $0xae0] ss:$8 sps:$4 sm:$0xff]   ;;  %v9007_v34 = vld [vmem:[%s10626_s6 + $0x3d] sm:$0x1]  ;;  %v10277_v41 = vld [vmem:[#allocation5 + $0xbe4] ss:$8 sps:$4 sm:$0xff]  }
 0x30f   : > { %7343 = vmatpush1.bf16.msra.mxu0 %v10206_v36  ;;  %7463 = vmatpush1.bf16.msra.mxu1 %v10209_v37  ;;  %v10269_v36 = vld [vmem:[#allocation5 + $0xbf0] ss:$8 sps:$4 sm:$0xff]   ;;  %v10274_v37 = vld [vmem:[#allocation5 + $0xb84] ss:$8 sps:$4 sm:$0xff]  }
 0x310   : > { %7344 = vmatprep.subr.bf16.mxu0 %v10214_v7  ;;  %7464 = vmatprep.subr.bf16.mxu1 %v10217_v42 }
 0x313   : > { %7345 = vmatpush1.bf16.msra.mxu0 %v10212_v45  ;;  %7465 = vmatpush1.bf16.msra.mxu1 %v10215_v8  ;;  %v10272_v45 = vld [vmem:[#allocation5 + $0xb80] ss:$8 sps:$4 sm:$0xff]  }
 0x314   : > { %7346 = vmatprep.subr.bf16.mxu0 %v10220_v46  ;;  %7466 = vmatprep.subr.bf16.mxu1 %v10223_v38  ;;  %v10275_v8 = vld [vmem:[#allocation5 + $0xbe0] ss:$8 sps:$4 sm:$0xff]  }
 0x317   : > { %7347 = vmatpush1.bf16.msra.mxu0 %v10218_v47  ;;  %7467 = vmatpush1.bf16.msra.mxu1 %v10221_v48  ;;  %v10280_v47 = vld [vmem:[#allocation5 + $0xb74] ss:$8 sps:$4 sm:$0xff]  }
 0x318   : > { %7348 = vmatprep.subr.bf16.mxu0 %v10226_v49  ;;  %7468 = vmatprep.subr.bf16.mxu1 %v10229_v50  ;;  %v10283_v48 = vld [vmem:[#allocation5 + $0xbd4] ss:$8 sps:$4 sm:$0xff]  }
 0x31b   : > { %7349 = vmatpush1.bf16.msra.mxu0 %v10224_v51  ;;  %7469 = vmatpush1.bf16.msra.mxu1 %v10227_v52 }
 0x31c   : > { %7578 = vmatprep.subr.bf16.mxu0 %v10232_v53  ;;  %7698 = vmatprep.subr.bf16.mxu1 %v10235_v39  ;;  %v10278_v39 = vld [vmem:[#allocation5 + $0xb70] ss:$8 sps:$4 sm:$0xff]  }
 0x31e   : > { %v5448_v60 = vpop.f32.mrf.mxu0  ;;  %v5568_v61 = vpop.f32.mrf.mxu1  ;;  %8978 = vmatmul.mubr.msk.bf16.vlgmr.msra.gmra.mxu0 %vm325_vm0, %v8965_v54  ;;  %8992 = vmatmul.mubr.msk.bf16.vlgmr.msra.gmra.mxu1 %vm325_vm0, %v8979_v55  ;;  %v10281_v54 = vld [vmem:[#allocation5 + $0xbd0] ss:$8 sps:$4 sm:$0xff]  }
 0x31f   : > { %v5455_v62 = vadd.f32 %v5448_v60, %v5335_v31  ;;  %7579 = vmatpush1.bf16.msra.mxu0 %v10230_v56  ;;  %7699 = vmatpush1.bf16.msra.mxu1 %v10233_v57  ;;  %v10268_v31 = vld [vmem:[#allocation5 + $0xb94] ss:$8 sps:$4 sm:$0xff]   ;;  %v10286_v57 = vld [vmem:[#allocation5 + $0xb64] ss:$8 sps:$4 sm:$0xff]   ;;  %v10287_v60 = vld [vmem:[#allocation5 + $0xbc0] ss:$8 sps:$4 sm:$0xff]  }
 0x320   : > { %v5450_v2 = vpop.f32.mrf.mxu0  ;;  %v5570_v3 = vpop.f32.mrf.mxu1  ;;  %7580 = vmatprep.subr.bf16.mxu0 %v10238_v44  ;;  %7700 = vmatprep.subr.bf16.mxu1 %v10241_v59  ;;  %v10289_v44 = vld [vmem:[#allocation5 + $0xbc4] ss:$8 sps:$4 sm:$0xff]   ;;  %v10284_v59 = vld [vmem:[#allocation5 + $0xb60] ss:$8 sps:$4 sm:$0xff]  }
 0x321   : > { %v5575_v6 = vadd.f32 %v5568_v61, %v5455_v62  ;;  %v5456_v9 = vadd.f32 %v5450_v2, %v5336_v35  ;;  %7606 = vmatprep.mubr.bf16.mxu0 %v10475_v0  ;;  %7726 = vmatprep.mubr.bf16.mxu1 %v10475_v0  ;;  %v10266_v35 = vld [vmem:[#allocation5 + $0xb90] ss:$8 sps:$4 sm:$0xff]   ;;  %v10295_v61 = vld [vmem:[#allocation5 + $0xbb4] ss:$8 sps:$4 sm:$0xff]   ;;  %v10301_v2 = vld [vmem:[#allocation5 + $0xba4] ss:$8 sps:$4 sm:$0xff]  }
 0x322   : > { %v5452_v10 = vpop.f32.mrf.mxu0  ;;  %v5572_v12 = vpop.f32.mrf.mxu1  ;;  %v10290_v62 = vld [vmem:[#allocation5 + $0xb50] ss:$8 sps:$4 sm:$0xff]  }
 0x323   : > { %v5576_v13 = vadd.f32 %v5570_v3, %v5456_v9  ;;  %7581 = vmatpush1.bf16.msra.mxu0 %v10236_v63  ;;  %7701 = vmatpush1.bf16.msra.mxu1 %v10239_v1  ;;  %v10293_v63 = vld [vmem:[#allocation5 + $0xbb0] ss:$8 sps:$4 sm:$0xff]   ;;  %v10298_v1 = vld [vmem:[#allocation5 + $0xb44] ss:$8 sps:$4 sm:$0xff]   ;;  %v10296_v3 = vld [vmem:[#allocation5 + $0xb40] ss:$8 sps:$4 sm:$0xff]  }
 0x324   : > { %v5453_v16 = vpop.f32.mrf.mxu0  ;;  %v5573_v17 = vpop.f32.mrf.mxu1  ;;  %7582 = vmatprep.subr.bf16.mxu0 %v10244_v4  ;;  %7702 = vmatprep.subr.bf16.mxu1 %v10247_v5  ;;  %v10299_v4 = vld [vmem:[#allocation5 + $0xba0] ss:$8 sps:$4 sm:$0xff]   ;;  %v9021_v5 = vld [vmem:[%s10626_s6 + $0x3e] sm:$0x1] }
 0x327   : > { %7583 = vmatpush1.bf16.msra.mxu0 %v10242_v14  ;;  %7703 = vmatpush1.bf16.msra.mxu1 %v10245_v15 }
 0x328   : > { %7584 = vmatprep.subr.bf16.mxu0 %v10250_v18  ;;  %7704 = vmatprep.subr.bf16.mxu1 %v10253_v19 }
 0x32b   : > { %7585 = vmatpush1.bf16.msra.mxu0 %v10248_v20  ;;  %7705 = vmatpush1.bf16.msra.mxu1 %v10251_v21 }
 0x32c   : > { %7586 = vmatprep.subr.bf16.mxu0 %v10256_v22  ;;  %7706 = vmatprep.subr.bf16.mxu1 %v10259_v23 }
 0x32f   : > { %7587 = vmatpush1.bf16.msra.mxu0 %v10254_v24  ;;  %7707 = vmatpush1.bf16.msra.mxu1 %v10257_v25 }
 0x330   : > { %7588 = vmatprep.subr.bf16.mxu0 %v10262_v26  ;;  %7708 = vmatprep.subr.bf16.mxu1 %v10265_v27 }
 0x333   : > { %7589 = vmatpush1.bf16.msra.mxu0 %v10260_v29  ;;  %7709 = vmatpush1.bf16.msra.mxu1 %v10263_v30 }
 0x334   : > { %7818 = vmatprep.subr.bf16.mxu0 %v10268_v31  ;;  %7938 = vmatprep.subr.bf16.mxu1 %v10271_v32 }
 0x336   : > { %v5688_v40 = vpop.f32.mrf.mxu0  ;;  %v5808_v7 = vpop.f32.mrf.mxu1  ;;  %9006 = vmatmul.mubr.msk.bf16.vlgmr.msra.gmra.mxu0 %vm325_vm0, %v8993_v33  ;;  %9020 = vmatmul.mubr.msk.bf16.vlgmr.msra.gmra.mxu1 %vm325_vm0, %v9007_v34 }
 0x337   : > { %v5695_v42 = vadd.f32 %v5688_v40, %v5575_v6  ;;  %7819 = vmatpush1.bf16.msra.mxu0 %v10266_v35  ;;  %7939 = vmatpush1.bf16.msra.mxu1 %v10269_v36  ;;  %v9035_v6 = vld [vmem:[%s10626_s6 + $0x3f] sm:$0x1] }
 0x338   : > { %v5690_v46 = vpop.f32.mrf.mxu0  ;;  %v5810_v38 = vpop.f32.mrf.mxu1  ;;  %7820 = vmatprep.subr.bf16.mxu0 %v10274_v37  ;;  %7940 = vmatprep.subr.bf16.mxu1 %v10277_v41 }
 0x339   : > { %v5815_v49 = vadd.f32 %v5808_v7, %v5695_v42  ;;  %v5696_v50 = vadd.f32 %v5690_v46, %v5576_v13  ;;  %7846 = vmatprep.mubr.bf16.mxu0 %v10475_v0  ;;  %7966 = vmatprep.mubr.bf16.mxu1 %v10475_v0  ;;  %v10292_v0 = vld [vmem:[#allocation5 + $0xb54] ss:$8 sps:$4 sm:$0xff]  }
 0x33a   : > { %v5692_v51 = vpop.f32.mrf.mxu0  ;;  %v5812_v52 = vpop.f32.mrf.mxu1 }
 0x33b   : > { %v5816_v53 = vadd.f32 %v5810_v38, %v5696_v50  ;;  %7821 = vmatpush1.bf16.msra.mxu0 %v10272_v45  ;;  %7941 = vmatpush1.bf16.msra.mxu1 %v10275_v8 }
 0x33c   : > { %v5693_v55 = vpop.f32.mrf.mxu0  ;;  %v5813_v56 = vpop.f32.mrf.mxu1  ;;  %7822 = vmatprep.subr.bf16.mxu0 %v10280_v47  ;;  %7942 = vmatprep.subr.bf16.mxu1 %v10283_v48 }
 0x33f   : > { %7823 = vmatpush1.bf16.msra.mxu0 %v10278_v39  ;;  %7943 = vmatpush1.bf16.msra.mxu1 %v10281_v54 }
 0x340   : > { %7824 = vmatprep.subr.bf16.mxu0 %v10286_v57  ;;  %7944 = vmatprep.subr.bf16.mxu1 %v10289_v44 }
 0x343   : > { %7825 = vmatpush1.bf16.msra.mxu0 %v10284_v59  ;;  %7945 = vmatpush1.bf16.msra.mxu1 %v10287_v60 }
 0x344   : > { %7826 = vmatprep.subr.bf16.mxu0 %v10292_v0  ;;  %7946 = vmatprep.subr.bf16.mxu1 %v10295_v61 }
 0x347   : > { %7827 = vmatpush1.bf16.msra.mxu0 %v10290_v62  ;;  %7947 = vmatpush1.bf16.msra.mxu1 %v10293_v63 }
 0x348   : > { %7828 = vmatprep.subr.bf16.mxu0 %v10298_v1  ;;  %7948 = vmatprep.subr.bf16.mxu1 %v10301_v2 }
 0x34b   : > { %7829 = vmatpush1.bf16.msra.mxu0 %v10296_v3  ;;  %7949 = vmatpush1.bf16.msra.mxu1 %v10299_v4 }
 0x34e   : > { %v5928_v9 = vpop.f32.mrf.mxu0  ;;  %v6048_v10 = vpop.f32.mrf.mxu1  ;;  %9034 = vmatmul.mubr.msk.bf16.vlgmr.msra.gmra.mxu0 %vm325_vm0, %v9021_v5  ;;  %9048 = vmatmul.mubr.msk.bf16.vlgmr.msra.gmra.mxu1 %vm325_vm0, %v9035_v6 }
 0x34f   : > { %v5935_v12 = vadd.f32 %v5928_v9, %v5815_v49 }
 0x350   : > { %v5930_v13 = vpop.f32.mrf.mxu0  ;;  %v6050_v14 = vpop.f32.mrf.mxu1 }
 0x351   : > { %v6055_v15 = vadd.f32 %v6048_v10, %v5935_v12  ;;  %v5936_v16 = vadd.f32 %v5930_v13, %v5816_v53 }
 0x352   : > { %v5932_v17 = vpop.f32.mrf.mxu0  ;;  %v6052_v18 = vpop.f32.mrf.mxu1 }
 0x353   : > { %v6056_v19 = vadd.f32 %v6050_v14, %v5936_v16 }
 0x354   : > { %v5933_v20 = vpop.f32.mrf.mxu0  ;;  %v6053_v21 = vpop.f32.mrf.mxu1 }
 0x366   : > { %v6168_v22 = vpop.f32.mrf.mxu0  ;;  %v6288_v23 = vpop.f32.mrf.mxu1 }
 0x367   : > { %v6175_v24 = vadd.f32 %v6168_v22, %v6055_v15 }
 0x368   : > { %v6170_v25 = vpop.f32.mrf.mxu0  ;;  %v6290_v26 = vpop.f32.mrf.mxu1 }
 0x369   : > { %v6295_v27 = vadd.f32 %v6288_v23, %v6175_v24  ;;  %v6176_v29 = vadd.f32 %v6170_v25, %v6056_v19 }
 0x36a   : > { %v6172_v30 = vpop.f32.mrf.mxu0  ;;  %v6292_v31 = vpop.f32.mrf.mxu1 }
 0x36b   : > { %v6296_v32 = vadd.f32 %v6290_v26, %v6176_v29 }
 0x36c   : > { %v6173_v33 = vpop.f32.mrf.mxu0  ;;  %v6293_v34 = vpop.f32.mrf.mxu1 }
 0x37e   : > { %v6408_v35 = vpop.f32.mrf.mxu0  ;;  %v6528_v36 = vpop.f32.mrf.mxu1 }
 0x37f   : > { %v6415_v37 = vadd.f32 %v6408_v35, %v6295_v27 }
 0x380   : > { %v6410_v41 = vpop.f32.mrf.mxu0  ;;  %v6530_v40 = vpop.f32.mrf.mxu1 }
 0x381   : > { %v6535_v7 = vadd.f32 %v6528_v36, %v6415_v37  ;;  %v6416_v42 = vadd.f32 %v6410_v41, %v6296_v32 }
 0x382   : > { %v6412_v45 = vpop.f32.mrf.mxu0  ;;  %v6532_v8 = vpop.f32.mrf.mxu1 }
 0x383   : > { %v6536_v46 = vadd.f32 %v6530_v40, %v6416_v42 }
 0x384   : > { %v6413_v38 = vpop.f32.mrf.mxu0  ;;  %v6533_v47 = vpop.f32.mrf.mxu1 }
 0x385   : > { %v7977_v38 = vld [vmem:[#allocation7] sm:$0x3] }
 0x396   : > { %v6648_v48 = vpop.f32.mrf.mxu0  ;;  %v6768_v49 = vpop.f32.mrf.mxu1 }
 0x397   : > { %v6655_v50 = vadd.f32 %v6648_v48, %v6535_v7 }
 0x398   : > { %v6650_v51 = vpop.f32.mrf.mxu0  ;;  %v6770_v52 = vpop.f32.mrf.mxu1 }
 0x399   : > { %v6775_v53 = vadd.f32 %v6768_v49, %v6655_v50  ;;  %v6656_v39 = vadd.f32 %v6650_v51, %v6536_v46 }
 0x39a   : > { %v6652_v54 = vpop.f32.mrf.mxu0  ;;  %v6772_v55 = vpop.f32.mrf.mxu1 }
 0x39b   : > { %v6776_v56 = vadd.f32 %v6770_v52, %v6656_v39  ;;  %v7982_v52 = vrot.slane %v7977_v38, %v4108_v43 }
 0x39c   : > { %v6653_v57 = vpop.f32.mrf.mxu0  ;;  %v6773_v44 = vpop.f32.mrf.mxu1 }
 0x3ae   : > { %v6888_v59 = vpop.f32.mrf.mxu0  ;;  %v7008_v60 = vpop.f32.mrf.mxu1 }
 0x3af   : > { %v6895_v0 = vadd.f32 %v6888_v59, %v6775_v53 }
 0x3b0   : > { %v6890_v61 = vpop.f32.mrf.mxu0  ;;  %v7010_v62 = vpop.f32.mrf.mxu1 }
 0x3b1   : > { %v7015_v63 = vadd.f32 %v7008_v60, %v6895_v0  ;;  %v6896_v1 = vadd.f32 %v6890_v61, %v6776_v56  ;;  %v7986_v56 = vrot.slane %v7977_v38, %v4112_v58 }
 0x3b2   : > { %v6892_v2 = vpop.f32.mrf.mxu0  ;;  %v7012_v3 = vpop.f32.mrf.mxu1 }
 0x3b3   : > { %v7016_v4 = vadd.f32 %v7010_v62, %v6896_v1 }
 0x3b4   : > { %v6893_v5 = vpop.f32.mrf.mxu0  ;;  %v7013_v6 = vpop.f32.mrf.mxu1 }
 0x3c6   : > { %v7128_v9 = vpop.f32.mrf.mxu0  ;;  %v7248_v10 = vpop.f32.mrf.mxu1 }
 0x3c7   : > { %v7135_v12 = vadd.f32 %v7128_v9, %v7015_v63 }
 0x3c8   : > { %v7130_v13 = vpop.f32.mrf.mxu0  ;;  %v7250_v14 = vpop.f32.mrf.mxu1 }
 0x3c9   : > { %v7255_v15 = vadd.f32 %v7248_v10, %v7135_v12  ;;  %v7136_v37 = vadd.f32 %v7130_v13, %v7016_v4 }
 0x3ca   : > { %v7132_v16 = vpop.f32.mrf.mxu0  ;;  %v7252_v17 = vpop.f32.mrf.mxu1 }
 0x3cb   : > { %v7256_v41 = vadd.f32 %v7250_v14, %v7136_v37 }
 0x3cc   : > { %v7133_v18 = vpop.f32.mrf.mxu0  ;;  %v7253_v19 = vpop.f32.mrf.mxu1 }
 0x3de   : > { %v7368_v20 = vpop.f32.mrf.mxu0  ;;  %v7488_v21 = vpop.f32.mrf.mxu1 }
 0x3df   : > { %v7375_v40 = vadd.f32 %v7368_v20, %v7255_v15 }
 0x3e0   : > { %v7370_v22 = vpop.f32.mrf.mxu0  ;;  %v7490_v23 = vpop.f32.mrf.mxu1 }
 0x3e1   : > { %v7376_v7 = vadd.f32 %v7370_v22, %v7256_v41  ;;  %v7495_v42 = vadd.f32 %v7488_v21, %v7375_v40 }
 0x3e2   : > { %v7372_v24 = vpop.f32.mrf.mxu0  ;;  %v7492_v25 = vpop.f32.mrf.mxu1 }
 0x3e3   : > { %v7496_v45 = vadd.f32 %v7490_v23, %v7376_v7 }
 0x3e4   : > { %v7373_v26 = vpop.f32.mrf.mxu0  ;;  %v7493_v27 = vpop.f32.mrf.mxu1 }
 0x3f6   : > { %v7608_v29 = vpop.f32.mrf.mxu0  ;;  %v7728_v30 = vpop.f32.mrf.mxu1 }
 0x3f7   : > { %v7615_v8 = vadd.f32 %v7608_v29, %v7495_v42 }
 0x3f8   : > { %v7610_v31 = vpop.f32.mrf.mxu0  ;;  %v7730_v32 = vpop.f32.mrf.mxu1 }
 0x3f9   : > { %v7616_v46 = vadd.f32 %v7610_v31, %v7496_v45  ;;  %v7735_v47 = vadd.f32 %v7728_v30, %v7615_v8 }
 0x3fa   : > { %v7612_v33 = vpop.f32.mrf.mxu0  ;;  %v7732_v34 = vpop.f32.mrf.mxu1 }
 0x3fb   : > { %v7736_v50 = vadd.f32 %v7730_v32, %v7616_v46 }
 0x3fc   : > { %v7613_v35 = vpop.f32.mrf.mxu0  ;;  %v7733_v36 = vpop.f32.mrf.mxu1 }
 0x40e   : > { %v7848_v48 = vpop.f32.mrf.mxu0  ;;  %v7968_v49 = vpop.f32.mrf.mxu1 }
 0x40f   : > { %v7855_v51 = vadd.f32 %v7848_v48, %v7735_v47 }
 0x410   : > { %v7850_v53 = vpop.f32.mrf.mxu0  ;;  %v7970_v39 = vpop.f32.mrf.mxu1 }
 0x411   : > { %v7975_v54 = vadd.f32 %v7968_v49, %v7855_v51  ;;  %v7856_v55 = vadd.f32 %v7850_v53, %v7736_v50 }
 0x412   : > { %v7852_v57 = vpop.f32.mrf.mxu0  ;;  %v7972_v44 = vpop.f32.mrf.mxu1 }
 0x413   : > { %v7989_v59 = vadd.f32 %v7982_v52, %v7975_v54  ;;  %v7976_v60 = vadd.f32 %v7970_v39, %v7856_v55 }
 0x414   : > { %v7853_v0 = vpop.f32.mrf.mxu0  ;;  %v7973_v61 = vpop.f32.mrf.mxu1 }
 0x415   : > { %v7990_v62 = vadd.f32 %v7986_v56, %v7976_v60  ;;  %v7991_v63 = vmax.f32 %v7989_v59, 0.0 }
 0x417   : > { %v7992_v43 = vmax.f32 %v7990_v62, 0.0 }
 0x419   : > { %v9049_v1 = vpack.c.bf16 %v7992_v43, %v7991_v63 }
 0x41b   : > { %v8004_v11 = vrot.slane %v9049_v1, %v10828_v28 }
 0x41d   : > { %9057 = vst.sshfl [vmem:[%s10831_s22 + $0x2] sm:$0x5 pattern:$0x73625140] %v8004_v11 }
 0x41e   : > { %10395 = shalt.err (!%p10392_p5)
}
 0x41f   : > { %s10396_s27 = scalar_lea.hbm %s10895_s8, 64  ;;  %s10400_s4 = scalar_lea.hbm %s10950_s3, 128 }
 0x420   : > { %p10397_p10 = scmp.ne.s32.totalorder %s10895_s8, %s10396_s27  ;;  %p10401_p6 = scmp.lt.s32.totalorder %s10895_s8, %s10950_s3 }
 0x421   : > { %p10402_p12 = scmp.lt.s32.totalorder %s10400_s4, %s10396_s27 }
 0x422   : > { %p10398_p1 = pnand %p10397_p10, %p10595_p7 }
 0x423   : > { %p10403_p3 = por %p10402_p12, %p10401_p6 }
 0x424   : > { %p10399_p4 = pneg %p10398_p1 }
 0x426   : > { %p10404_p8 = pnand %p10403_p3, %p10399_p4 }
 0x428   : > { %10407 = shalt.err (!%p10404_p8)
}
 0x429   : > { %s10478_s22 = smov 32   ;;  %s10479_s24 = smov 2  }
 0x42a   : > { %9069 = dma.vmem_to_hbm [thread:$0]  (%p10595_p7), %s10897_s5, 64, %s10895_s8, %s8016_s9, %s10478_s22, %s10478_s22, %s10479_s24  }
 0x42b PF: > { %s8047_s7 = sand.u32 1, %s10446_s12   ;;  %p10964_p9 = scmp.ne.s32.totalorder %s10957_s23, 0 }
 0x42c   : > { %p10965_p11 = scmp.ge.s32.totalorder %s10466_s17, 2  ;;  %s8048_s21 = scalar_lea.sflag [#allocation4], %s8047_s7 }
 0x42e   : > { %p9083_p2 = pnand %p10965_p11, %p10964_p9 }
 0x430   : > { %p9084_p13 = pneg %p9083_p2 }
 0x432   : > { %10441 = dma.done.wait (%p9084_p13), %s8048_s21, 64  }
 0x433   : > { %10443 = vsyncadd (%p9084_p13), %s8048_s21, 4294967232  ;;  %s20_s17 = sadd.s32 1, %s10466_s17   ;;  %s10966_s12 = smov %s10450_s13 }
 0x434   : > { %p17_p0 = scmp.ge.s32.totalorder %s20_s17, 4   ;;  %s10967_s13 = smov %s10454_s14 }
 0x435   : > { %s10968_s14 = smov %s10604_s29  ;;  %s10969_s15 = smov %s10462_s16 }
 0x436   : > { %s10970_s16 = smov %s10972_s11  ;;  %19 = sbr.rel (!%p17_p0) target bundleno = 7 (0x7), region = 180 }
 0x43b   :  { %8053 = vsyncpa [#allocation3], 1 }
 0x43c   :  { %8055 = vsyncpa [#allocation3 + $0x1], 1 }
 0x43d   :  { %8056 = vsyncpa [#allocation6], 1 }
 0x43e   :  { %8057 = vsyncpa [#allocation4], 1 }
 0x43f   :  { %8059 = vsyncpa [#allocation4 + $0x1], 1 }

// kernel: tpu_custom_call.1
= control target key start
LH: loop header
LB: loop body
LE: loop exit
PB: predicated region body
PF: predicated region fallthrough
CT: control target
= control target key end

     0   :  { %8 = vsyncpa [#allocation3], 0  ;;  %s10947_s0 = inlined_call_operand.hbm [shape: bf16[2,64,2,96], index: 0, kind: input, shape index: {}]   ;;  %s10948_s1 = inlined_call_operand.hbm [shape: bf16[32,96,256], index: 1, kind: input, shape index: {}]   ;;  %s10949_s2 = inlined_call_operand.hbm [shape: f32[1,256], index: 2, kind: input, shape index: {}]   ;;  %s10950_s3 = inlined_call_operand.hbm [shape: bf16[2,2,2,256], index: 3, kind: output, shape index: {}]  }
   0x1   :  { %10 = vsyncpa [#allocation3 + $0x1], 0 }
   0x2   :  { %11 = vsyncpa [#allocation6], 0 }
   0x3   :  { %12 = vsyncpa [#allocation4], 0 }
   0x4   :  { %14 = vsyncpa [#allocation4 + $0x1], 0  ;;  %s10500_s12 = smov 0   ;;  %s10502_s13 = smov 0  }
   0x5   :  { %s10504_s14 = smov 0   ;;  %s10506_s15 = smov 0  }
   0x6   :  { %s10508_s16 = smov 0   ;;  %s10510_s17 = smov 0  }
   0x7 LB: > { %s8138_s18 = sadd.s32 4294967295, %s10466_s17   ;;  %s8139_s19 = sadd.s32 4294967294, %s10466_s17   ;;  %s10466_s17 = sphi %s10510_s17, %s20_s17   ;;  %s10462_s16 = sphi %s10508_s16, %s10970_s16   ;;  %s10458_s15 = sphi %s10506_s15, %s10969_s15   ;;  %s10454_s14 = sphi %s10504_s14, %s10968_s14   ;;  %s10450_s13 = sphi %s10502_s13, %s10967_s13   ;;  %s10446_s12 = sphi %s10500_s12, %s10966_s12  }
   0x8   : > { %p54_p0 = scmp.ne.s32.totalorder %s10450_s13, %s10446_s12  ;;  %p10534_p1 = scmp.eq.s32.totalorder %s8138_s18, 0 }
   0x9   : > { %p10538_p2 = scmp.eq.s32.totalorder %s8138_s18, 1  ;;  %p128_p3 = scmp.eq.s32.totalorder %s8139_s19, 1 }
   0xa   : > { %s10954_s20 = scalar_select %p10534_p1, 1, 0 }
   0xb   : > { %p10544_p4 = por %p10534_p1, %p54_p0  ;;  %p8140_p5 = scmp.ge.s32.totalorder %s10466_s17, 1 }
   0xc   : > { %p10549_p6 = por %p128_p3, %p54_p0  ;;  %p135_p7 = scmp.lt.s32.totalorder %s10466_s17, 3 }
   0xd   : > { %s10956_s22 = scalar_select %p10544_p4, 1, 0 }
   0xe   : > { %s10957_s23 = scalar_select %p10549_p6, 1, 0 }
   0xf   : > { %p10554_p8 = pnand %p8140_p5, %p135_p7  ;;  %s10468_s25 = smov [#allocation5]  }
  0x10   : > { %s147_s26 = sshll.u32 %s10468_s25, 4  ;;  %s10469_s28 = smov [#allocation7]   ;;  %s148_s26 = int_to_ptr.vmem [resolvable:$true] %s147_s26 }
  0x11   : > { %p9071_p9 = pneg %p10554_p8  ;;  %s161_s29 = sshll.u32 %s10469_s28, 4  ;;  %s162_s29 = int_to_ptr.vmem [resolvable:$true] %s161_s29 }
  0x12   : > { %s10313_s30 = scalar_lea.vmem %s148_s26, 49152  ;;  %p10321_p5 = scmp.lt.s32.totalorder %s148_s26, %s148_s26 }
  0x13   : > { %p10563_p11 = pnand %p9071_p9, %p10534_p1  ;;  %p10314_p13 = scmp.ne.s32.totalorder %s148_s26, %s10313_s30 }
  0x14   : > { %p10322_p7 = scmp.lt.s32.totalorder %s10313_s30, %s10313_s30 }
  0x15   : > { %p10304_p12 = pneg %p10563_p11 }
  0x16   : > { %p10323_p10 = por %p10322_p7, %p10321_p5 }
  0x17   : > { %p10316_p0 = pnand %p10314_p13, %p10304_p12 }
  0x19   : > { %p10317_p3 = pneg %p10316_p0 }
  0x1b   : > { %p10324_p9 = pnand %p10323_p10, %p10317_p3 }
  0x1d   : > { %10327 = shalt.err (!%p10324_p9)
}
  0x1e   : > { %s10470_s4 = smov 128   ;;  %s10471_s5 = smov 8  }
  0x1f   : > { %9074 = dma.hbm_to_vmem [thread:$0]  (!%p10563_p11), %s10948_s1, 49152, %s148_s26, [#allocation6], %s10470_s4, %s10470_s4, %s10471_s5  }
  0x20   : > { %s10339_s8 = scalar_lea.vmem %s162_s29, 32  ;;  %p10347_p1 = scmp.lt.s32.totalorder %s162_s29, %s162_s29 }
  0x21   : > { %p10340_p6 = scmp.ne.s32.totalorder %s162_s29, %s10339_s8  ;;  %p10348_p4 = scmp.lt.s32.totalorder %s10339_s8, %s10339_s8 }
  0x23   : > { %p10342_p13 = pnand %p10340_p6, %p10304_p12  ;;  %p10349_p5 = por %p10348_p4, %p10347_p1 }
  0x25   : > { %p10343_p0 = pneg %p10342_p13 }
  0x27   : > { %p10350_p10 = pnand %p10349_p5, %p10343_p0 }
  0x29   : > { %10353 = shalt.err (!%p10350_p10)
}
  0x2a   : > { %9077 = dma.hbm_to_vmem [thread:$0]  (!%p10563_p11), %s10949_s2, 32, %s162_s29, [#allocation6]  }
  0x2b   : > { %s32_s11 = sadd.s32 1, %s10462_s16  ;;  %s41_s18 = sadd.s32 1, %s10454_s14 }
  0x2c   : > { %p34_p1 = scmp.ge.s32.totalorder %s32_s11, 2  ;;  %p48_p4 = scmp.ne.s32.totalorder %s10454_s14, %s10450_s13 }
  0x2d   : > { %p49_p6 = scmp.eq.s32.totalorder %s10466_s17, 0  ;;  %p9088_p12 = scmp.lt.s32.totalorder %s10466_s17, 2 }
  0x2e   : > { %s10972_s11 = smov (%p34_p1, %s32_s11), 0  ;;  %p10595_p7 = por %p10538_p2, %p48_p4 }
  0x2f   : > { %p50_p3 = por %p49_p6, %p48_p4  ;;  %s36_s25 = ssub.s32 %s10462_s16, %s10972_s11 }
  0x30   : > { %s172_s26 = sand.u32 1, %s10454_s14   ;;  %p39_p9 = scmp.eq.s32.totalorder %s36_s25, 0 }
  0x31   : > { %s8144_s27 = sshll.u32 %s172_s26, 6  ;;  %s9056_s28 = sshll.u32 %s10462_s16, 10 }
  0x32   : > { %s10604_s29 = scalar_select %p39_p9, %s10454_s14, %s41_s18  }
  0x33   : > { %s184_s5 = scalar_lea.hbm %s10947_s0, %s9056_s28  ;;  %s176_s6 = scalar_lea.vmem [#allocation2], %s8144_s27 }
  0x34   : > { %s185_s7 = sshll.u32 %s176_s6, 4  ;;  %p10611_p11 = pnand %p9088_p12, %p50_p3  ;;  %s186_s7 = int_to_ptr.vmem [resolvable:$true] %s185_s7 }
  0x35   : > { %s173_s8 = scalar_lea.sflag [#allocation3], %s172_s26  ;;  %s10367_s9 = scalar_lea.vmem %s186_s7, 1024 }
  0x36   : > { %p10356_p2 = pneg %p10611_p11  ;;  %p10368_p13 = scmp.ne.s32.totalorder %s186_s7, %s10367_s9 }
  0x37   : > { %s10472_s10 = smov [#allocation2]  }
  0x38   : > { %p10370_p0 = pnand %p10368_p13, %p10356_p2  ;;  %s10372_s18 = sshll.u32 %s10472_s10, 4  ;;  %s10373_s18 = int_to_ptr.vmem [resolvable:$false] %s10372_s18 }
  0x39   : > { %s10374_s25 = scalar_lea.vmem %s10373_s18, 2048  ;;  %p10375_p10 = scmp.lt.s32.totalorder %s186_s7, %s10373_s18 }
  0x3a   : > { %p10371_p5 = pneg %p10370_p0  ;;  %p10376_p1 = scmp.lt.s32.totalorder %s10374_s25, %s10367_s9 }
  0x3c   : > { %p10377_p4 = por %p10376_p1, %p10375_p10 }
  0x3e   : > { %p10378_p6 = pnand %p10377_p4, %p10371_p5 }
  0x40   : > { %10381 = shalt.err (!%p10378_p6)
}
  0x41   : > { %s10473_s27 = smov 16   ;;  %s10474_s28 = smov 1  }
  0x42   : > { %9081 = dma.hbm_to_vmem [thread:$0]  (!%p10611_p11), %s184_s5, 1024, %s186_s7, %s173_s8, %s10473_s27, %s10473_s27, %s10474_s28  }
  0x43   : > { %197 = sbr.rel (%p10554_p8) target bundleno = 1067 (0x42b), region = 32  ;;  %s10622_s26 = sand.u32 (!%p10554_p8), 1, %s10450_s13  }
  0x44   : > { %s8148_s30 = sshll.u32 (!%p10554_p8), %s10622_s26, 6  ;;  %s200_s4 = scalar_lea.sflag (!%p10554_p8), [#allocation3], %s10622_s26 }
  0x45   : > { %s10626_s6 = scalar_lea.vmem (!%p10554_p8), [#allocation2], %s8148_s30  ;;  %p10962_p12 = scmp.ne.s32.totalorder (!%p10554_p8), %s10956_s22, 0 }
  0x48   : > { %10433 = dma.done.wait (%p10962_p12), %s200_s4, 1024  }
  0x49   : > { %10435 = vsyncadd (%p10962_p12), %s200_s4, 4294966272  ;;  %p10963_p3 = scmp.ne.s32.totalorder %s10954_s20, 0 }
  0x4b   : > { %10437 = dma.done.wait (%p10963_p3), [#allocation6], 49184  }
  0x4c   : > { %10439 = vsyncadd (%p10963_p3), [#allocation6], 4294918112  ;;  %v10475_v0 = vmov 0   ;;  %v9150_v1 = vld [vmem:[#allocation5 + $0xb4] ss:$8 sps:$4 sm:$0xff]   ;;  %vm325_vm0 = vcmask 785408  }
  0x4d   : > { %361 = vmatprep.mubr.bf16.mxu0 %v10475_v0  ;;  %465 = vmatprep.mubr.bf16.mxu1 %v10475_v0  ;;  %v9152_v2 = vld [vmem:[#allocation5 + $0x54] ss:$8 sps:$4 sm:$0xff]   ;;  %v9154_v3 = vld [vmem:[#allocation5 + $0xb0] ss:$8 sps:$4 sm:$0xff]   ;;  %v9156_v5 = vld [vmem:[#allocation5 + $0xa4] ss:$8 sps:$4 sm:$0xff]  }
  0x4e   : > { %333 = vmatprep.subr.bf16.mxu0 %v9150_v1  ;;  %v9155_v4 = vld [vmem:[#allocation5 + $0x50] ss:$8 sps:$4 sm:$0xff]   ;;  %437 = vmatprep.subr.bf16.mxu1 %v9152_v2  ;;  %v9158_v6 = vld [vmem:[#allocation5 + $0x44] ss:$8 sps:$4 sm:$0xff]   ;;  %v9160_v7 = vld [vmem:[#allocation5 + $0xa0] ss:$8 sps:$4 sm:$0xff]  }
  0x4f   : > { %334 = vmatpush1.bf16.msra.mxu0 %v9154_v3  ;;  %438 = vmatpush1.bf16.msra.mxu1 %v9155_v4  ;;  %v9161_v8 = vld [vmem:[#allocation5 + $0x40] ss:$8 sps:$4 sm:$0xff]   ;;  %v9162_v9 = vld [vmem:[#allocation5 + $0x94] ss:$8 sps:$4 sm:$0xff]   ;;  %v9166_v11 = vld [vmem:[#allocation5 + $0x90] ss:$8 sps:$4 sm:$0xff]  }
  0x50   : > { %335 = vmatprep.subr.bf16.mxu0 %v9156_v5  ;;  %439 = vmatprep.subr.bf16.mxu1 %v9158_v6  ;;  %v9164_v10 = vld [vmem:[#allocation5 + $0x34] ss:$8 sps:$4 sm:$0xff]   ;;  %v9167_v12 = vld [vmem:[#allocation5 + $0x30] ss:$8 sps:$4 sm:$0xff]   ;;  %v9168_v13 = vld [vmem:[#allocation5 + $0x84] ss:$8 sps:$4 sm:$0xff]  }
  0x51   : > { %v9170_v14 = vld [vmem:[#allocation5 + $0x24] ss:$8 sps:$4 sm:$0xff]   ;;  %v9172_v15 = vld [vmem:[#allocation5 + $0x80] ss:$8 sps:$4 sm:$0xff]   ;;  %v9174_v17 = vld [vmem:[#allocation5 + $0x74] ss:$8 sps:$4 sm:$0xff]  }
  0x52   : > { %v9173_v16 = vld [vmem:[#allocation5 + $0x20] ss:$8 sps:$4 sm:$0xff]   ;;  %v9176_v18 = vld [vmem:[#allocation5 + $0x14] ss:$8 sps:$4 sm:$0xff]   ;;  %v9178_v19 = vld [vmem:[#allocation5 + $0x70] ss:$8 sps:$4 sm:$0xff]  }
  0x53   : > { %336 = vmatpush1.bf16.msra.mxu0 %v9160_v7  ;;  %440 = vmatpush1.bf16.msra.mxu1 %v9161_v8  ;;  %v9179_v20 = vld [vmem:[#allocation5 + $0x10] ss:$8 sps:$4 sm:$0xff]   ;;  %v9180_v21 = vld [vmem:[#allocation5 + $0x64] ss:$8 sps:$4 sm:$0xff]   ;;  %v9184_v23 = vld [vmem:[#allocation5 + $0x60] ss:$8 sps:$4 sm:$0xff]  }
  0x54   : > { %337 = vmatprep.subr.bf16.mxu0 %v9162_v9  ;;  %441 = vmatprep.subr.bf16.mxu1 %v9164_v10  ;;  %v9182_v22 = vld [vmem:[#allocation5 + $0x4] ss:$8 sps:$4 sm:$0xff]   ;;  %v9185_v24 = vld [vmem:[#allocation5] ss:$8 sps:$4 sm:$0xff]   ;;  %v9188_v25 = vld [vmem:[#allocation5 + $0x114] ss:$8 sps:$4 sm:$0xff]  }
  0x55   : > { %v9191_v26 = vld [vmem:[#allocation5 + $0x174] ss:$8 sps:$4 sm:$0xff]   ;;  %v8152_v27 = vld [vmem:[%s10626_s6 + $0x1] sm:$0x1]  ;;  %v237_v28 = vld [vmem:[%s10626_s6] sm:$0x1] }
  0x56   : > { %v9186_v29 = vld [vmem:[#allocation5 + $0x110] ss:$8 sps:$4 sm:$0xff]   ;;  %v9194_v31 = vld [vmem:[#allocation5 + $0x104] ss:$8 sps:$4 sm:$0xff]   ;;  %v9192_v33 = vld [vmem:[#allocation5 + $0x100] ss:$8 sps:$4 sm:$0xff]  }
  0x57   : > { %338 = vmatpush1.bf16.msra.mxu0 %v9166_v11  ;;  %442 = vmatpush1.bf16.msra.mxu1 %v9167_v12  ;;  %v9189_v30 = vld [vmem:[#allocation5 + $0x170] ss:$8 sps:$4 sm:$0xff]   ;;  %v9197_v32 = vld [vmem:[#allocation5 + $0x164] ss:$8 sps:$4 sm:$0xff]   ;;  %v9195_v34 = vld [vmem:[#allocation5 + $0x160] ss:$8 sps:$4 sm:$0xff]  }
  0x58   : > { %339 = vmatprep.subr.bf16.mxu0 %v9168_v13  ;;  %443 = vmatprep.subr.bf16.mxu1 %v9170_v14  ;;  %v9200_v35 = vld [vmem:[#allocation5 + $0xf4] ss:$8 sps:$4 sm:$0xff]   ;;  %v9198_v37 = vld [vmem:[#allocation5 + $0xf0] ss:$8 sps:$4 sm:$0xff]   ;;  %v9206_v39 = vld [vmem:[#allocation5 + $0xe4] ss:$8 sps:$4 sm:$0xff]  }
  0x59   : > { %v9203_v36 = vld [vmem:[#allocation5 + $0x154] ss:$8 sps:$4 sm:$0xff]   ;;  %v9201_v38 = vld [vmem:[#allocation5 + $0x150] ss:$8 sps:$4 sm:$0xff]   ;;  %v9209_v40 = vld [vmem:[#allocation5 + $0x144] ss:$8 sps:$4 sm:$0xff]  }
  0x5a   : > { %v9204_v41 = vld [vmem:[#allocation5 + $0xe0] ss:$8 sps:$4 sm:$0xff]   ;;  %v9212_v43 = vld [vmem:[#allocation5 + $0xd4] ss:$8 sps:$4 sm:$0xff]   ;;  %v9210_v45 = vld [vmem:[#allocation5 + $0xd0] ss:$8 sps:$4 sm:$0xff]  }
  0x5b   : > { %340 = vmatpush1.bf16.msra.mxu0 %v9172_v15  ;;  %444 = vmatpush1.bf16.msra.mxu1 %v9173_v16  ;;  %v9207_v42 = vld [vmem:[#allocation5 + $0x140] ss:$8 sps:$4 sm:$0xff]   ;;  %v9215_v44 = vld [vmem:[#allocation5 + $0x134] ss:$8 sps:$4 sm:$0xff]   ;;  %v9213_v46 = vld [vmem:[#allocation5 + $0x130] ss:$8 sps:$4 sm:$0xff]  }
  0x5c   : > { %341 = vmatprep.subr.bf16.mxu0 %v9174_v17  ;;  %445 = vmatprep.subr.bf16.mxu1 %v9176_v18  ;;  %v9218_v47 = vld [vmem:[#allocation5 + $0xc4] ss:$8 sps:$4 sm:$0xff]   ;;  %v9216_v49 = vld [vmem:[#allocation5 + $0xc0] ss:$8 sps:$4 sm:$0xff]   ;;  %v9224_v51 = vld [vmem:[#allocation5 + $0x1d4] ss:$8 sps:$4 sm:$0xff]  }
  0x5d   : > { %v9221_v48 = vld [vmem:[#allocation5 + $0x124] ss:$8 sps:$4 sm:$0xff]   ;;  %v9219_v50 = vld [vmem:[#allocation5 + $0x120] ss:$8 sps:$4 sm:$0xff]   ;;  %v9227_v52 = vld [vmem:[#allocation5 + $0x234] ss:$8 sps:$4 sm:$0xff]  }
  0x5e   : > { %v8179_v53 = vld [vmem:[%s10626_s6 + $0x2] sm:$0x1]  ;;  %v8193_v54 = vld [vmem:[%s10626_s6 + $0x3] sm:$0x1]  ;;  %v9222_v55 = vld [vmem:[#allocation5 + $0x1d0] ss:$8 sps:$4 sm:$0xff]  }
  0x5f   : > { %342 = vmatpush1.bf16.msra.mxu0 %v9178_v19  ;;  %446 = vmatpush1.bf16.msra.mxu1 %v9179_v20  ;;  %v9225_v56 = vld [vmem:[#allocation5 + $0x230] ss:$8 sps:$4 sm:$0xff]   ;;  %v9230_v57 = vld [vmem:[#allocation5 + $0x1c4] ss:$8 sps:$4 sm:$0xff]   ;;  %v9228_v59 = vld [vmem:[#allocation5 + $0x1c0] ss:$8 sps:$4 sm:$0xff]  }
  0x60   : > { %343 = vmatprep.subr.bf16.mxu0 %v9180_v21  ;;  %447 = vmatprep.subr.bf16.mxu1 %v9182_v22  ;;  %v9233_v58 = vld [vmem:[#allocation5 + $0x224] ss:$8 sps:$4 sm:$0xff]   ;;  %v9231_v60 = vld [vmem:[#allocation5 + $0x220] ss:$8 sps:$4 sm:$0xff]   ;;  %v9236_v61 = vld [vmem:[#allocation5 + $0x1b4] ss:$8 sps:$4 sm:$0xff]  }
  0x61   : > { %v9239_v62 = vld [vmem:[#allocation5 + $0x214] ss:$8 sps:$4 sm:$0xff]   ;;  %v9234_v63 = vld [vmem:[#allocation5 + $0x1b0] ss:$8 sps:$4 sm:$0xff]   ;;  %v9242_v2 = vld [vmem:[#allocation5 + $0x1a4] ss:$8 sps:$4 sm:$0xff]  }
  0x62   : > { %v9237_v1 = vld [vmem:[#allocation5 + $0x210] ss:$8 sps:$4 sm:$0xff]   ;;  %v9245_v3 = vld [vmem:[#allocation5 + $0x204] ss:$8 sps:$4 sm:$0xff]   ;;  %v9240_v4 = vld [vmem:[#allocation5 + $0x1a0] ss:$8 sps:$4 sm:$0xff]  }
  0x63   : > { %344 = vmatpush1.bf16.msra.mxu0 %v9184_v23  ;;  %448 = vmatpush1.bf16.msra.mxu1 %v9185_v24  ;;  %v9243_v5 = vld [vmem:[#allocation5 + $0x200] ss:$8 sps:$4 sm:$0xff]   ;;  %v9248_v6 = vld [vmem:[#allocation5 + $0x194] ss:$8 sps:$4 sm:$0xff]   ;;  %v9246_v8 = vld [vmem:[#allocation5 + $0x190] ss:$8 sps:$4 sm:$0xff]  }
  0x64   : > { %556 = vmatprep.subr.bf16.mxu0 %v9188_v25  ;;  %677 = vmatprep.subr.bf16.mxu1 %v9191_v26  ;;  %v9251_v7 = vld [vmem:[#allocation5 + $0x1f4] ss:$8 sps:$4 sm:$0xff]   ;;  %v9249_v9 = vld [vmem:[#allocation5 + $0x1f0] ss:$8 sps:$4 sm:$0xff]   ;;  %v9254_v10 = vld [vmem:[#allocation5 + $0x184] ss:$8 sps:$4 sm:$0xff]  }
  0x65   : > { %v9257_v11 = vld [vmem:[#allocation5 + $0x1e4] ss:$8 sps:$4 sm:$0xff]   ;;  %v9252_v12 = vld [vmem:[#allocation5 + $0x180] ss:$8 sps:$4 sm:$0xff]   ;;  %v9260_v14 = vld [vmem:[#allocation5 + $0x294] ss:$8 sps:$4 sm:$0xff]  }
  0x66   : > { %8165 = vmatmul.mubr.msk.bf16.vlgmr.msra.gmra.mxu0 %vm325_vm0, %v8152_v27  ;;  %8178 = vmatmul.mubr.msk.bf16.vlgmr.msra.gmra.mxu1 %vm325_vm0, %v237_v28  ;;  %v9255_v13 = vld [vmem:[#allocation5 + $0x1e0] ss:$8 sps:$4 sm:$0xff]   ;;  %v9263_v15 = vld [vmem:[#allocation5 + $0x2f4] ss:$8 sps:$4 sm:$0xff]   ;;  %v8207_v16 = vld [vmem:[%s10626_s6 + $0x4] sm:$0x1] }
  0x67   : > { %557 = vmatpush1.bf16.msra.mxu0 %v9186_v29  ;;  %678 = vmatpush1.bf16.msra.mxu1 %v9189_v30  ;;  %v8221_v17 = vld [vmem:[%s10626_s6 + $0x5] sm:$0x1]  ;;  %v9258_v18 = vld [vmem:[#allocation5 + $0x290] ss:$8 sps:$4 sm:$0xff]   ;;  %v9264_v22 = vld [vmem:[#allocation5 + $0x280] ss:$8 sps:$4 sm:$0xff]  }
  0x68   : > { %558 = vmatprep.subr.bf16.mxu0 %v9194_v31  ;;  %679 = vmatprep.subr.bf16.mxu1 %v9197_v32  ;;  %v9261_v19 = vld [vmem:[#allocation5 + $0x2f0] ss:$8 sps:$4 sm:$0xff]   ;;  %v9266_v20 = vld [vmem:[#allocation5 + $0x284] ss:$8 sps:$4 sm:$0xff]   ;;  %v9267_v23 = vld [vmem:[#allocation5 + $0x2e0] ss:$8 sps:$4 sm:$0xff]  }
  0x69   : > { %584 = vmatprep.mubr.bf16.mxu0 %v10475_v0  ;;  %705 = vmatprep.mubr.bf16.mxu1 %v10475_v0  ;;  %v9269_v21 = vld [vmem:[#allocation5 + $0x2e4] ss:$8 sps:$4 sm:$0xff]   ;;  %v9272_v24 = vld [vmem:[#allocation5 + $0x274] ss:$8 sps:$4 sm:$0xff]   ;;  %v9270_v26 = vld [vmem:[#allocation5 + $0x270] ss:$8 sps:$4 sm:$0xff]  }
  0x6a   : > { %v9275_v25 = vld [vmem:[#allocation5 + $0x2d4] ss:$8 sps:$4 sm:$0xff]   ;;  %v9273_v27 = vld [vmem:[#allocation5 + $0x2d0] ss:$8 sps:$4 sm:$0xff]   ;;  %v9278_v28 = vld [vmem:[#allocation5 + $0x264] ss:$8 sps:$4 sm:$0xff]  }
  0x6b   : > { %559 = vmatpush1.bf16.msra.mxu0 %v9192_v33  ;;  %680 = vmatpush1.bf16.msra.mxu1 %v9195_v34  ;;  %v9281_v29 = vld [vmem:[#allocation5 + $0x2c4] ss:$8 sps:$4 sm:$0xff]   ;;  %v9276_v30 = vld [vmem:[#allocation5 + $0x260] ss:$8 sps:$4 sm:$0xff]   ;;  %v9284_v32 = vld [vmem:[#allocation5 + $0x254] ss:$8 sps:$4 sm:$0xff]  }
  0x6c   : > { %560 = vmatprep.subr.bf16.mxu0 %v9200_v35  ;;  %681 = vmatprep.subr.bf16.mxu1 %v9203_v36  ;;  %v9279_v31 = vld [vmem:[#allocation5 + $0x2c0] ss:$8 sps:$4 sm:$0xff]   ;;  %v9287_v33 = vld [vmem:[#allocation5 + $0x2b4] ss:$8 sps:$4 sm:$0xff]   ;;  %v9282_v34 = vld [vmem:[#allocation5 + $0x250] ss:$8 sps:$4 sm:$0xff]  }
  0x6d   : > { %v9285_v35 = vld [vmem:[#allocation5 + $0x2b0] ss:$8 sps:$4 sm:$0xff]   ;;  %v9290_v36 = vld [vmem:[#allocation5 + $0x244] ss:$8 sps:$4 sm:$0xff]   ;;  %s8151_s20 = sshll.u32 %s10622_s26, 2  ;;  %s9058_s24 = sshll.u32 %s10458_s15, 6 }
  0x6e   : > { %s10831_s22 = scalar_lea.vmem [#allocation8], %s8151_s20  ;;  %s10895_s8 = scalar_lea.hbm %s10950_s3, %s9058_s24 }
  0x6f   : > { %561 = vmatpush1.bf16.msra.mxu0 %v9198_v37  ;;  %682 = vmatpush1.bf16.msra.mxu1 %v9201_v38  ;;  %v9293_v37 = vld [vmem:[#allocation5 + $0x2a4] ss:$8 sps:$4 sm:$0xff]   ;;  %v9288_v38 = vld [vmem:[#allocation5 + $0x240] ss:$8 sps:$4 sm:$0xff]   ;;  %s8032_s5 = sshll.u32 %s10831_s22, 4  ;;  %s8016_s9 = scalar_lea.sflag [#allocation4], %s10622_s26  ;;  %s10897_s5 = int_to_ptr.vmem [resolvable:$true] %s8032_s5 }
  0x70   : > { %562 = vmatprep.subr.bf16.mxu0 %v9206_v39  ;;  %683 = vmatprep.subr.bf16.mxu1 %v9209_v40  ;;  %v9291_v39 = vld [vmem:[#allocation5 + $0x2a0] ss:$8 sps:$4 sm:$0xff]   ;;  %v9296_v40 = vld [vmem:[#allocation5 + $0x354] ss:$8 sps:$4 sm:$0xff]   ;;  %s10382_s10 = scalar_lea.vmem %s10897_s5, 64  ;;  %s10477_s15 = smov [#allocation8]  }
  0x71   : > { %p10383_p8 = scmp.ne.s32.totalorder %s10897_s5, %s10382_s10  ;;  %s10386_s18 = sshll.u32 %s10477_s15, 4  ;;  %s10387_s18 = int_to_ptr.vmem [resolvable:$false] %s10386_s18 }
  0x72   : > { %s10388_s25 = scalar_lea.vmem %s10387_s18, 128  ;;  %p10389_p2 = scmp.lt.s32.totalorder %s10897_s5, %s10387_s18 }
  0x73   : > { %563 = vmatpush1.bf16.msra.mxu0 %v9204_v41  ;;  %684 = vmatpush1.bf16.msra.mxu1 %v9207_v42  ;;  %v9299_v41 = vld [vmem:[#allocation5 + $0x3b4] ss:$8 sps:$4 sm:$0xff]   ;;  %v8235_v42 = vld [vmem:[%s10626_s6 + $0x6] sm:$0x1]  ;;  %p10384_p9 = pnand %p10383_p8, %p10595_p7  ;;  %p10390_p13 = scmp.lt.s32.totalorder %s10388_s25, %s10382_s10 }
  0x74   : > { %564 = vmatprep.subr.bf16.mxu0 %v9212_v43  ;;  %685 = vmatprep.subr.bf16.mxu1 %v9215_v44  ;;  %v8249_v43 = vld [vmem:[%s10626_s6 + $0x7] sm:$0x1]  ;;  %v9294_v44 = vld [vmem:[#allocation5 + $0x350] ss:$8 sps:$4 sm:$0xff]  }
  0x75   : > { %p10385_p11 = pneg %p10384_p9  ;;  %p10391_p0 = por %p10390_p13, %p10389_p2 }
  0x77   : > { %565 = vmatpush1.bf16.msra.mxu0 %v9210_v45  ;;  %686 = vmatpush1.bf16.msra.mxu1 %v9213_v46  ;;  %v9297_v45 = vld [vmem:[#allocation5 + $0x3b0] ss:$8 sps:$4 sm:$0xff]   ;;  %v9302_v46 = vld [vmem:[#allocation5 + $0x344] ss:$8 sps:$4 sm:$0xff]   ;;  %p10392_p5 = pnand %p10391_p0, %p10385_p11 }
  0x78   : > { %566 = vmatprep.subr.bf16.mxu0 %v9218_v47  ;;  %687 = vmatprep.subr.bf16.mxu1 %v9221_v48  ;;  %v9305_v47 = vld [vmem:[#allocation5 + $0x3a4] ss:$8 sps:$4 sm:$0xff]   ;;  %v9300_v48 = vld [vmem:[#allocation5 + $0x340] ss:$8 sps:$4 sm:$0xff]  }
  0x7b   : > { %567 = vmatpush1.bf16.msra.mxu0 %v9216_v49  ;;  %688 = vmatpush1.bf16.msra.mxu1 %v9219_v50  ;;  %v9303_v49 = vld [vmem:[#allocation5 + $0x3a0] ss:$8 sps:$4 sm:$0xff]   ;;  %v9308_v50 = vld [vmem:[#allocation5 + $0x334] ss:$8 sps:$4 sm:$0xff]  }
  0x7c   : > { %798 = vmatprep.subr.bf16.mxu0 %v9224_v51  ;;  %919 = vmatprep.subr.bf16.mxu1 %v9227_v52  ;;  %v9311_v51 = vld [vmem:[#allocation5 + $0x394] ss:$8 sps:$4 sm:$0xff]   ;;  %v9306_v52 = vld [vmem:[#allocation5 + $0x330] ss:$8 sps:$4 sm:$0xff]  }
  0x7e   : > { %8192 = vmatmul.mubr.msk.bf16.vlgmr.msra.gmra.mxu0 %vm325_vm0, %v8179_v53  ;;  %8206 = vmatmul.mubr.msk.bf16.vlgmr.msra.gmra.mxu1 %vm325_vm0, %v8193_v54  ;;  %v9309_v53 = vld [vmem:[#allocation5 + $0x390] ss:$8 sps:$4 sm:$0xff]   ;;  %v9314_v54 = vld [vmem:[#allocation5 + $0x324] ss:$8 sps:$4 sm:$0xff]  }
  0x7f   : > { %799 = vmatpush1.bf16.msra.mxu0 %v9222_v55  ;;  %920 = vmatpush1.bf16.msra.mxu1 %v9225_v56  ;;  %v9317_v55 = vld [vmem:[#allocation5 + $0x384] ss:$8 sps:$4 sm:$0xff]   ;;  %v9312_v56 = vld [vmem:[#allocation5 + $0x320] ss:$8 sps:$4 sm:$0xff]  }
  0x80   : > { %800 = vmatprep.subr.bf16.mxu0 %v9230_v57  ;;  %921 = vmatprep.subr.bf16.mxu1 %v9233_v58  ;;  %v9315_v57 = vld [vmem:[#allocation5 + $0x380] ss:$8 sps:$4 sm:$0xff]   ;;  %v9320_v58 = vld [vmem:[#allocation5 + $0x314] ss:$8 sps:$4 sm:$0xff]  }
  0x81   : > { %826 = vmatprep.mubr.bf16.mxu0 %v10475_v0  ;;  %947 = vmatprep.mubr.bf16.mxu1 %v10475_v0 }
  0x83   : > { %801 = vmatpush1.bf16.msra.mxu0 %v9228_v59  ;;  %922 = vmatpush1.bf16.msra.mxu1 %v9231_v60  ;;  %v9323_v59 = vld [vmem:[#allocation5 + $0x374] ss:$8 sps:$4 sm:$0xff]   ;;  %v9318_v60 = vld [vmem:[#allocation5 + $0x310] ss:$8 sps:$4 sm:$0xff]  }
  0x84   : > { %802 = vmatprep.subr.bf16.mxu0 %v9236_v61  ;;  %923 = vmatprep.subr.bf16.mxu1 %v9239_v62  ;;  %v9321_v61 = vld [vmem:[#allocation5 + $0x370] ss:$8 sps:$4 sm:$0xff]   ;;  %v9326_v62 = vld [vmem:[#allocation5 + $0x304] ss:$8 sps:$4 sm:$0xff]  }
  0x87   : > { %803 = vmatpush1.bf16.msra.mxu0 %v9234_v63  ;;  %924 = vmatpush1.bf16.msra.mxu1 %v9237_v1  ;;  %v9329_v63 = vld [vmem:[#allocation5 + $0x364] ss:$8 sps:$4 sm:$0xff]   ;;  %v9324_v1 = vld [vmem:[#allocation5 + $0x300] ss:$8 sps:$4 sm:$0xff]  }
  0x88   : > { %804 = vmatprep.subr.bf16.mxu0 %v9242_v2  ;;  %925 = vmatprep.subr.bf16.mxu1 %v9245_v3  ;;  %v9327_v2 = vld [vmem:[#allocation5 + $0x360] ss:$8 sps:$4 sm:$0xff]   ;;  %v9332_v3 = vld [vmem:[#allocation5 + $0x414] ss:$8 sps:$4 sm:$0xff]  }
  0x8b   : > { %805 = vmatpush1.bf16.msra.mxu0 %v9240_v4  ;;  %926 = vmatpush1.bf16.msra.mxu1 %v9243_v5  ;;  %v9335_v4 = vld [vmem:[#allocation5 + $0x474] ss:$8 sps:$4 sm:$0xff]   ;;  %v8263_v5 = vld [vmem:[%s10626_s6 + $0x8] sm:$0x1] }
  0x8c   : > { %806 = vmatprep.subr.bf16.mxu0 %v9248_v6  ;;  %927 = vmatprep.subr.bf16.mxu1 %v9251_v7  ;;  %v8277_v6 = vld [vmem:[%s10626_s6 + $0x9] sm:$0x1]  ;;  %v9330_v7 = vld [vmem:[#allocation5 + $0x410] ss:$8 sps:$4 sm:$0xff]  }
  0x8f   : > { %807 = vmatpush1.bf16.msra.mxu0 %v9246_v8  ;;  %928 = vmatpush1.bf16.msra.mxu1 %v9249_v9  ;;  %v9333_v8 = vld [vmem:[#allocation5 + $0x470] ss:$8 sps:$4 sm:$0xff]   ;;  %v9338_v9 = vld [vmem:[#allocation5 + $0x404] ss:$8 sps:$4 sm:$0xff]  }
  0x90   : > { %808 = vmatprep.subr.bf16.mxu0 %v9254_v10  ;;  %929 = vmatprep.subr.bf16.mxu1 %v9257_v11  ;;  %v9341_v10 = vld [vmem:[#allocation5 + $0x464] ss:$8 sps:$4 sm:$0xff]   ;;  %v9336_v11 = vld [vmem:[#allocation5 + $0x400] ss:$8 sps:$4 sm:$0xff]  }
  0x93   : > { %809 = vmatpush1.bf16.msra.mxu0 %v9252_v12  ;;  %930 = vmatpush1.bf16.msra.mxu1 %v9255_v13  ;;  %v9339_v12 = vld [vmem:[#allocation5 + $0x460] ss:$8 sps:$4 sm:$0xff]   ;;  %v9344_v13 = vld [vmem:[#allocation5 + $0x3f4] ss:$8 sps:$4 sm:$0xff]  }
  0x94   : > { %1040 = vmatprep.subr.bf16.mxu0 %v9260_v14  ;;  %1161 = vmatprep.subr.bf16.mxu1 %v9263_v15  ;;  %v9347_v14 = vld [vmem:[#allocation5 + $0x454] ss:$8 sps:$4 sm:$0xff]   ;;  %v9342_v15 = vld [vmem:[#allocation5 + $0x3f0] ss:$8 sps:$4 sm:$0xff]  }
  0x96   : > { %8220 = vmatmul.mubr.msk.bf16.vlgmr.msra.gmra.mxu0 %vm325_vm0, %v8207_v16  ;;  %8234 = vmatmul.mubr.msk.bf16.vlgmr.msra.gmra.mxu1 %vm325_vm0, %v8221_v17  ;;  %v9345_v16 = vld [vmem:[#allocation5 + $0x450] ss:$8 sps:$4 sm:$0xff]   ;;  %v9350_v17 = vld [vmem:[#allocation5 + $0x3e4] ss:$8 sps:$4 sm:$0xff]  }
  0x97   : > { %1041 = vmatpush1.bf16.msra.mxu0 %v9258_v18  ;;  %1162 = vmatpush1.bf16.msra.mxu1 %v9261_v19  ;;  %v9353_v18 = vld [vmem:[#allocation5 + $0x444] ss:$8 sps:$4 sm:$0xff]   ;;  %v9348_v19 = vld [vmem:[#allocation5 + $0x3e0] ss:$8 sps:$4 sm:$0xff]  }
  0x98   : > { %1042 = vmatprep.subr.bf16.mxu0 %v9266_v20  ;;  %1163 = vmatprep.subr.bf16.mxu1 %v9269_v21  ;;  %v9351_v20 = vld [vmem:[#allocation5 + $0x440] ss:$8 sps:$4 sm:$0xff]   ;;  %v9356_v21 = vld [vmem:[#allocation5 + $0x3d4] ss:$8 sps:$4 sm:$0xff]  }
  0x99   : > { %1068 = vmatprep.mubr.bf16.mxu0 %v10475_v0  ;;  %1189 = vmatprep.mubr.bf16.mxu1 %v10475_v0 }
  0x9b   : > { %1043 = vmatpush1.bf16.msra.mxu0 %v9264_v22  ;;  %1164 = vmatpush1.bf16.msra.mxu1 %v9267_v23  ;;  %v9359_v22 = vld [vmem:[#allocation5 + $0x434] ss:$8 sps:$4 sm:$0xff]   ;;  %v9354_v23 = vld [vmem:[#allocation5 + $0x3d0] ss:$8 sps:$4 sm:$0xff]  }
  0x9c   : > { %1044 = vmatprep.subr.bf16.mxu0 %v9272_v24  ;;  %1165 = vmatprep.subr.bf16.mxu1 %v9275_v25  ;;  %v9357_v24 = vld [vmem:[#allocation5 + $0x430] ss:$8 sps:$4 sm:$0xff]   ;;  %v9362_v25 = vld [vmem:[#allocation5 + $0x3c4] ss:$8 sps:$4 sm:$0xff]  }
  0x9f   : > { %1045 = vmatpush1.bf16.msra.mxu0 %v9270_v26  ;;  %1166 = vmatpush1.bf16.msra.mxu1 %v9273_v27  ;;  %v9365_v26 = vld [vmem:[#allocation5 + $0x424] ss:$8 sps:$4 sm:$0xff]   ;;  %v9360_v27 = vld [vmem:[#allocation5 + $0x3c0] ss:$8 sps:$4 sm:$0xff]  }
  0xa0   : > { %1046 = vmatprep.subr.bf16.mxu0 %v9278_v28  ;;  %1167 = vmatprep.subr.bf16.mxu1 %v9281_v29  ;;  %v9363_v28 = vld [vmem:[#allocation5 + $0x420] ss:$8 sps:$4 sm:$0xff]   ;;  %v9368_v29 = vld [vmem:[#allocation5 + $0x4d4] ss:$8 sps:$4 sm:$0xff]  }
  0xa3   : > { %1047 = vmatpush1.bf16.msra.mxu0 %v9276_v30  ;;  %1168 = vmatpush1.bf16.msra.mxu1 %v9279_v31  ;;  %v9371_v30 = vld [vmem:[#allocation5 + $0x534] ss:$8 sps:$4 sm:$0xff]   ;;  %v8291_v31 = vld [vmem:[%s10626_s6 + $0xa] sm:$0x1] }
  0xa4   : > { %1048 = vmatprep.subr.bf16.mxu0 %v9284_v32  ;;  %1169 = vmatprep.subr.bf16.mxu1 %v9287_v33  ;;  %v8305_v32 = vld [vmem:[%s10626_s6 + $0xb] sm:$0x1]  ;;  %v9366_v33 = vld [vmem:[#allocation5 + $0x4d0] ss:$8 sps:$4 sm:$0xff]  }
  0xa7   : > { %1049 = vmatpush1.bf16.msra.mxu0 %v9282_v34  ;;  %1170 = vmatpush1.bf16.msra.mxu1 %v9285_v35  ;;  %v9369_v34 = vld [vmem:[#allocation5 + $0x530] ss:$8 sps:$4 sm:$0xff]   ;;  %v9374_v35 = vld [vmem:[#allocation5 + $0x4c4] ss:$8 sps:$4 sm:$0xff]  }
  0xa8   : > { %1050 = vmatprep.subr.bf16.mxu0 %v9290_v36  ;;  %1171 = vmatprep.subr.bf16.mxu1 %v9293_v37  ;;  %v9377_v36 = vld [vmem:[#allocation5 + $0x524] ss:$8 sps:$4 sm:$0xff]   ;;  %v9372_v37 = vld [vmem:[#allocation5 + $0x4c0] ss:$8 sps:$4 sm:$0xff]  }
  0xab   : > { %1051 = vmatpush1.bf16.msra.mxu0 %v9288_v38  ;;  %1172 = vmatpush1.bf16.msra.mxu1 %v9291_v39  ;;  %v9375_v38 = vld [vmem:[#allocation5 + $0x520] ss:$8 sps:$4 sm:$0xff]   ;;  %v9380_v39 = vld [vmem:[#allocation5 + $0x4b4] ss:$8 sps:$4 sm:$0xff]  }
  0xac   : > { %1282 = vmatprep.subr.bf16.mxu0 %v9296_v40  ;;  %1403 = vmatprep.subr.bf16.mxu1 %v9299_v41  ;;  %v9383_v40 = vld [vmem:[#allocation5 + $0x514] ss:$8 sps:$4 sm:$0xff]   ;;  %v9378_v41 = vld [vmem:[#allocation5 + $0x4b0] ss:$8 sps:$4 sm:$0xff]  }
  0xae   : > { %8248 = vmatmul.mubr.msk.bf16.vlgmr.msra.gmra.mxu0 %vm325_vm0, %v8235_v42  ;;  %8262 = vmatmul.mubr.msk.bf16.vlgmr.msra.gmra.mxu1 %vm325_vm0, %v8249_v43  ;;  %v9381_v42 = vld [vmem:[#allocation5 + $0x510] ss:$8 sps:$4 sm:$0xff]   ;;  %v9386_v43 = vld [vmem:[#allocation5 + $0x4a4] ss:$8 sps:$4 sm:$0xff]  }
  0xaf   : > { %1283 = vmatpush1.bf16.msra.mxu0 %v9294_v44  ;;  %1404 = vmatpush1.bf16.msra.mxu1 %v9297_v45  ;;  %v9389_v44 = vld [vmem:[#allocation5 + $0x504] ss:$8 sps:$4 sm:$0xff]   ;;  %v9384_v45 = vld [vmem:[#allocation5 + $0x4a0] ss:$8 sps:$4 sm:$0xff]  }
  0xb0   : > { %1284 = vmatprep.subr.bf16.mxu0 %v9302_v46  ;;  %1405 = vmatprep.subr.bf16.mxu1 %v9305_v47  ;;  %v9387_v46 = vld [vmem:[#allocation5 + $0x500] ss:$8 sps:$4 sm:$0xff]   ;;  %v9392_v47 = vld [vmem:[#allocation5 + $0x494] ss:$8 sps:$4 sm:$0xff]  }
  0xb1   : > { %1310 = vmatprep.mubr.bf16.mxu0 %v10475_v0  ;;  %1431 = vmatprep.mubr.bf16.mxu1 %v10475_v0 }
  0xb3   : > { %1285 = vmatpush1.bf16.msra.mxu0 %v9300_v48  ;;  %1406 = vmatpush1.bf16.msra.mxu1 %v9303_v49  ;;  %v9395_v48 = vld [vmem:[#allocation5 + $0x4f4] ss:$8 sps:$4 sm:$0xff]   ;;  %v9390_v49 = vld [vmem:[#allocation5 + $0x490] ss:$8 sps:$4 sm:$0xff]  }
  0xb4   : > { %1286 = vmatprep.subr.bf16.mxu0 %v9308_v50  ;;  %1407 = vmatprep.subr.bf16.mxu1 %v9311_v51  ;;  %v9393_v50 = vld [vmem:[#allocation5 + $0x4f0] ss:$8 sps:$4 sm:$0xff]   ;;  %v9398_v51 = vld [vmem:[#allocation5 + $0x484] ss:$8 sps:$4 sm:$0xff]  }
  0xb7   : > { %1287 = vmatpush1.bf16.msra.mxu0 %v9306_v52  ;;  %1408 = vmatpush1.bf16.msra.mxu1 %v9309_v53  ;;  %v9401_v52 = vld [vmem:[#allocation5 + $0x4e4] ss:$8 sps:$4 sm:$0xff]   ;;  %v9396_v53 = vld [vmem:[#allocation5 + $0x480] ss:$8 sps:$4 sm:$0xff]  }
  0xb8   : > { %1288 = vmatprep.subr.bf16.mxu0 %v9314_v54  ;;  %1409 = vmatprep.subr.bf16.mxu1 %v9317_v55  ;;  %v9399_v54 = vld [vmem:[#allocation5 + $0x4e0] ss:$8 sps:$4 sm:$0xff]   ;;  %v9404_v55 = vld [vmem:[#allocation5 + $0x594] ss:$8 sps:$4 sm:$0xff]  }
  0xbb   : > { %1289 = vmatpush1.bf16.msra.mxu0 %v9312_v56  ;;  %1410 = vmatpush1.bf16.msra.mxu1 %v9315_v57  ;;  %v9407_v56 = vld [vmem:[#allocation5 + $0x5f4] ss:$8 sps:$4 sm:$0xff]   ;;  %v8319_v57 = vld [vmem:[%s10626_s6 + $0xc] sm:$0x1] }
  0xbc   : > { %1290 = vmatprep.subr.bf16.mxu0 %v9320_v58  ;;  %1411 = vmatprep.subr.bf16.mxu1 %v9323_v59  ;;  %v8333_v58 = vld [vmem:[%s10626_s6 + $0xd] sm:$0x1]  ;;  %v9402_v59 = vld [vmem:[#allocation5 + $0x590] ss:$8 sps:$4 sm:$0xff]  }
  0xbf   : > { %1291 = vmatpush1.bf16.msra.mxu0 %v9318_v60  ;;  %1412 = vmatpush1.bf16.msra.mxu1 %v9321_v61  ;;  %v9405_v60 = vld [vmem:[#allocation5 + $0x5f0] ss:$8 sps:$4 sm:$0xff]   ;;  %v9410_v61 = vld [vmem:[#allocation5 + $0x584] ss:$8 sps:$4 sm:$0xff]  }
  0xc0   : > { %1292 = vmatprep.subr.bf16.mxu0 %v9326_v62  ;;  %1413 = vmatprep.subr.bf16.mxu1 %v9329_v63  ;;  %v9413_v62 = vld [vmem:[#allocation5 + $0x5e4] ss:$8 sps:$4 sm:$0xff]   ;;  %v9408_v63 = vld [vmem:[#allocation5 + $0x580] ss:$8 sps:$4 sm:$0xff]  }
  0xc3   : > { %1293 = vmatpush1.bf16.msra.mxu0 %v9324_v1  ;;  %1414 = vmatpush1.bf16.msra.mxu1 %v9327_v2  ;;  %v9411_v1 = vld [vmem:[#allocation5 + $0x5e0] ss:$8 sps:$4 sm:$0xff]   ;;  %v9416_v2 = vld [vmem:[#allocation5 + $0x574] ss:$8 sps:$4 sm:$0xff]  }
  0xc4   : > { %1524 = vmatprep.subr.bf16.mxu0 %v9332_v3  ;;  %1645 = vmatprep.subr.bf16.mxu1 %v9335_v4  ;;  %v9419_v3 = vld [vmem:[#allocation5 + $0x5d4] ss:$8 sps:$4 sm:$0xff]   ;;  %v9414_v4 = vld [vmem:[#allocation5 + $0x570] ss:$8 sps:$4 sm:$0xff]  }
  0xc6   : > { %8276 = vmatmul.mubr.msk.bf16.vlgmr.msra.gmra.mxu0 %vm325_vm0, %v8263_v5  ;;  %8290 = vmatmul.mubr.msk.bf16.vlgmr.msra.gmra.mxu1 %vm325_vm0, %v8277_v6  ;;  %v9417_v5 = vld [vmem:[#allocation5 + $0x5d0] ss:$8 sps:$4 sm:$0xff]   ;;  %v9422_v6 = vld [vmem:[#allocation5 + $0x564] ss:$8 sps:$4 sm:$0xff]  }
  0xc7   : > { %1525 = vmatpush1.bf16.msra.mxu0 %v9330_v7  ;;  %1646 = vmatpush1.bf16.msra.mxu1 %v9333_v8  ;;  %v9425_v7 = vld [vmem:[#allocation5 + $0x5c4] ss:$8 sps:$4 sm:$0xff]   ;;  %v9420_v8 = vld [vmem:[#allocation5 + $0x560] ss:$8 sps:$4 sm:$0xff]  }
  0xc8   : > { %1526 = vmatprep.subr.bf16.mxu0 %v9338_v9  ;;  %1647 = vmatprep.subr.bf16.mxu1 %v9341_v10  ;;  %v9423_v9 = vld [vmem:[#allocation5 + $0x5c0] ss:$8 sps:$4 sm:$0xff]   ;;  %v9428_v10 = vld [vmem:[#allocation5 + $0x554] ss:$8 sps:$4 sm:$0xff]  }
  0xc9   : > { %1552 = vmatprep.mubr.bf16.mxu0 %v10475_v0  ;;  %1673 = vmatprep.mubr.bf16.mxu1 %v10475_v0 }
  0xcb   : > { %1527 = vmatpush1.bf16.msra.mxu0 %v9336_v11  ;;  %1648 = vmatpush1.bf16.msra.mxu1 %v9339_v12  ;;  %v9431_v11 = vld [vmem:[#allocation5 + $0x5b4] ss:$8 sps:$4 sm:$0xff]   ;;  %v9426_v12 = vld [vmem:[#allocation5 + $0x550] ss:$8 sps:$4 sm:$0xff]  }
  0xcc   : > { %1528 = vmatprep.subr.bf16.mxu0 %v9344_v13  ;;  %1649 = vmatprep.subr.bf16.mxu1 %v9347_v14  ;;  %v9429_v13 = vld [vmem:[#allocation5 + $0x5b0] ss:$8 sps:$4 sm:$0xff]   ;;  %v9434_v14 = vld [vmem:[#allocation5 + $0x544] ss:$8 sps:$4 sm:$0xff]  }
  0xcf   : > { %1529 = vmatpush1.bf16.msra.mxu0 %v9342_v15  ;;  %1650 = vmatpush1.bf16.msra.mxu1 %v9345_v16  ;;  %v9437_v15 = vld [vmem:[#allocation5 + $0x5a4] ss:$8 sps:$4 sm:$0xff]   ;;  %v9432_v16 = vld [vmem:[#allocation5 + $0x540] ss:$8 sps:$4 sm:$0xff]  }
  0xd0   : > { %1530 = vmatprep.subr.bf16.mxu0 %v9350_v17  ;;  %1651 = vmatprep.subr.bf16.mxu1 %v9353_v18  ;;  %v9435_v17 = vld [vmem:[#allocation5 + $0x5a0] ss:$8 sps:$4 sm:$0xff]   ;;  %v9440_v18 = vld [vmem:[#allocation5 + $0x654] ss:$8 sps:$4 sm:$0xff]  }
  0xd3   : > { %1531 = vmatpush1.bf16.msra.mxu0 %v9348_v19  ;;  %1652 = vmatpush1.bf16.msra.mxu1 %v9351_v20  ;;  %v9443_v19 = vld [vmem:[#allocation5 + $0x6b4] ss:$8 sps:$4 sm:$0xff]   ;;  %v8347_v20 = vld [vmem:[%s10626_s6 + $0xe] sm:$0x1] }
  0xd4   : > { %1532 = vmatprep.subr.bf16.mxu0 %v9356_v21  ;;  %1653 = vmatprep.subr.bf16.mxu1 %v9359_v22  ;;  %v8361_v21 = vld [vmem:[%s10626_s6 + $0xf] sm:$0x1]  ;;  %v9438_v22 = vld [vmem:[#allocation5 + $0x650] ss:$8 sps:$4 sm:$0xff]  }
  0xd7   : > { %1533 = vmatpush1.bf16.msra.mxu0 %v9354_v23  ;;  %1654 = vmatpush1.bf16.msra.mxu1 %v9357_v24  ;;  %v9441_v23 = vld [vmem:[#allocation5 + $0x6b0] ss:$8 sps:$4 sm:$0xff]   ;;  %v9446_v24 = vld [vmem:[#allocation5 + $0x644] ss:$8 sps:$4 sm:$0xff]  }
  0xd8   : > { %1534 = vmatprep.subr.bf16.mxu0 %v9362_v25  ;;  %1655 = vmatprep.subr.bf16.mxu1 %v9365_v26  ;;  %v9449_v25 = vld [vmem:[#allocation5 + $0x6a4] ss:$8 sps:$4 sm:$0xff]   ;;  %v9444_v26 = vld [vmem:[#allocation5 + $0x640] ss:$8 sps:$4 sm:$0xff]  }
  0xdb   : > { %1535 = vmatpush1.bf16.msra.mxu0 %v9360_v27  ;;  %1656 = vmatpush1.bf16.msra.mxu1 %v9363_v28  ;;  %v9447_v27 = vld [vmem:[#allocation5 + $0x6a0] ss:$8 sps:$4 sm:$0xff]   ;;  %v9452_v28 = vld [vmem:[#allocation5 + $0x634] ss:$8 sps:$4 sm:$0xff]  }
  0xdc   : > { %1766 = vmatprep.subr.bf16.mxu0 %v9368_v29  ;;  %1887 = vmatprep.subr.bf16.mxu1 %v9371_v30  ;;  %v9455_v29 = vld [vmem:[#allocation5 + $0x694] ss:$8 sps:$4 sm:$0xff]   ;;  %v9450_v30 = vld [vmem:[#allocation5 + $0x630] ss:$8 sps:$4 sm:$0xff]  }
  0xde   : > { %8304 = vmatmul.mubr.msk.bf16.vlgmr.msra.gmra.mxu0 %vm325_vm0, %v8291_v31  ;;  %8318 = vmatmul.mubr.msk.bf16.vlgmr.msra.gmra.mxu1 %vm325_vm0, %v8305_v32  ;;  %v9453_v31 = vld [vmem:[#allocation5 + $0x690] ss:$8 sps:$4 sm:$0xff]   ;;  %v9458_v32 = vld [vmem:[#allocation5 + $0x624] ss:$8 sps:$4 sm:$0xff]  }
  0xdf   : > { %1767 = vmatpush1.bf16.msra.mxu0 %v9366_v33  ;;  %1888 = vmatpush1.bf16.msra.mxu1 %v9369_v34  ;;  %v9461_v33 = vld [vmem:[#allocation5 + $0x684] ss:$8 sps:$4 sm:$0xff]   ;;  %v9456_v34 = vld [vmem:[#allocation5 + $0x620] ss:$8 sps:$4 sm:$0xff]  }
  0xe0   : > { %1768 = vmatprep.subr.bf16.mxu0 %v9374_v35  ;;  %1889 = vmatprep.subr.bf16.mxu1 %v9377_v36  ;;  %v9459_v35 = vld [vmem:[#allocation5 + $0x680] ss:$8 sps:$4 sm:$0xff]   ;;  %v9464_v36 = vld [vmem:[#allocation5 + $0x614] ss:$8 sps:$4 sm:$0xff]  }
  0xe1   : > { %1794 = vmatprep.mubr.bf16.mxu0 %v10475_v0  ;;  %1915 = vmatprep.mubr.bf16.mxu1 %v10475_v0 }
  0xe3   : > { %1769 = vmatpush1.bf16.msra.mxu0 %v9372_v37  ;;  %1890 = vmatpush1.bf16.msra.mxu1 %v9375_v38  ;;  %v9467_v37 = vld [vmem:[#allocation5 + $0x674] ss:$8 sps:$4 sm:$0xff]   ;;  %v9462_v38 = vld [vmem:[#allocation5 + $0x610] ss:$8 sps:$4 sm:$0xff]  }
  0xe4   : > { %1770 = vmatprep.subr.bf16.mxu0 %v9380_v39  ;;  %1891 = vmatprep.subr.bf16.mxu1 %v9383_v40  ;;  %v9465_v39 = vld [vmem:[#allocation5 + $0x670] ss:$8 sps:$4 sm:$0xff]   ;;  %v9470_v40 = vld [vmem:[#allocation5 + $0x604] ss:$8 sps:$4 sm:$0xff]  }
  0xe7   : > { %1771 = vmatpush1.bf16.msra.mxu0 %v9378_v41  ;;  %1892 = vmatpush1.bf16.msra.mxu1 %v9381_v42  ;;  %v9473_v41 = vld [vmem:[#allocation5 + $0x664] ss:$8 sps:$4 sm:$0xff]   ;;  %v9468_v42 = vld [vmem:[#allocation5 + $0x600] ss:$8 sps:$4 sm:$0xff]  }
  0xe8   : > { %1772 = vmatprep.subr.bf16.mxu0 %v9386_v43  ;;  %1893 = vmatprep.subr.bf16.mxu1 %v9389_v44  ;;  %v9471_v43 = vld [vmem:[#allocation5 + $0x660] ss:$8 sps:$4 sm:$0xff]   ;;  %v9476_v44 = vld [vmem:[#allocation5 + $0x714] ss:$8 sps:$4 sm:$0xff]  }
  0xeb   : > { %1773 = vmatpush1.bf16.msra.mxu0 %v9384_v45  ;;  %1894 = vmatpush1.bf16.msra.mxu1 %v9387_v46  ;;  %v9479_v45 = vld [vmem:[#allocation5 + $0x774] ss:$8 sps:$4 sm:$0xff]   ;;  %v8375_v46 = vld [vmem:[%s10626_s6 + $0x10] sm:$0x1] }
  0xec   : > { %1774 = vmatprep.subr.bf16.mxu0 %v9392_v47  ;;  %1895 = vmatprep.subr.bf16.mxu1 %v9395_v48  ;;  %v8389_v47 = vld [vmem:[%s10626_s6 + $0x11] sm:$0x1] }
  0xed   : > { %v9474_v48 = vld [vmem:[#allocation5 + $0x710] ss:$8 sps:$4 sm:$0xff]  }
  0xef   : > { %1775 = vmatpush1.bf16.msra.mxu0 %v9390_v49  ;;  %1896 = vmatpush1.bf16.msra.mxu1 %v9393_v50  ;;  %v9477_v49 = vld [vmem:[#allocation5 + $0x770] ss:$8 sps:$4 sm:$0xff]   ;;  %v9482_v50 = vld [vmem:[#allocation5 + $0x704] ss:$8 sps:$4 sm:$0xff]  }
  0xf0   : > { %1776 = vmatprep.subr.bf16.mxu0 %v9398_v51  ;;  %1897 = vmatprep.subr.bf16.mxu1 %v9401_v52  ;;  %v9485_v51 = vld [vmem:[#allocation5 + $0x764] ss:$8 sps:$4 sm:$0xff]  }
  0xf3   : > { %1777 = vmatpush1.bf16.msra.mxu0 %v9396_v53  ;;  %1898 = vmatpush1.bf16.msra.mxu1 %v9399_v54 }
  0xf4   : > { %2008 = vmatprep.subr.bf16.mxu0 %v9404_v55  ;;  %2129 = vmatprep.subr.bf16.mxu1 %v9407_v56  ;;  %v9480_v55 = vld [vmem:[#allocation5 + $0x700] ss:$8 sps:$4 sm:$0xff]  }
  0xf5   : > { %v9483_v56 = vld [vmem:[#allocation5 + $0x760] ss:$8 sps:$4 sm:$0xff]  }
  0xf6   : > { %8332 = vmatmul.mubr.msk.bf16.vlgmr.msra.gmra.mxu0 %vm325_vm0, %v8319_v57  ;;  %8346 = vmatmul.mubr.msk.bf16.vlgmr.msra.gmra.mxu1 %vm325_vm0, %v8333_v58 }
  0xf7   : > { %2009 = vmatpush1.bf16.msra.mxu0 %v9402_v59  ;;  %2130 = vmatpush1.bf16.msra.mxu1 %v9405_v60  ;;  %v9488_v59 = vld [vmem:[#allocation5 + $0x6f4] ss:$8 sps:$4 sm:$0xff]  }
  0xf8   : > { %2010 = vmatprep.subr.bf16.mxu0 %v9410_v61  ;;  %2131 = vmatprep.subr.bf16.mxu1 %v9413_v62  ;;  %v9491_v60 = vld [vmem:[#allocation5 + $0x754] ss:$8 sps:$4 sm:$0xff]  }
  0xf9   : > { %2036 = vmatprep.mubr.bf16.mxu0 %v10475_v0  ;;  %2157 = vmatprep.mubr.bf16.mxu1 %v10475_v0 }
  0xfb   : > { %2011 = vmatpush1.bf16.msra.mxu0 %v9408_v63  ;;  %2132 = vmatpush1.bf16.msra.mxu1 %v9411_v1  ;;  %v9486_v1 = vld [vmem:[#allocation5 + $0x6f0] ss:$8 sps:$4 sm:$0xff]  }
  0xfc   : > { %2012 = vmatprep.subr.bf16.mxu0 %v9416_v2  ;;  %2133 = vmatprep.subr.bf16.mxu1 %v9419_v3  ;;  %v9489_v2 = vld [vmem:[#allocation5 + $0x750] ss:$8 sps:$4 sm:$0xff]  }
  0xff   : > { %2013 = vmatpush1.bf16.msra.mxu0 %v9414_v4  ;;  %2134 = vmatpush1.bf16.msra.mxu1 %v9417_v5  ;;  %v9494_v5 = vld [vmem:[#allocation5 + $0x6e4] ss:$8 sps:$4 sm:$0xff]  }
 0x100   : > { %2014 = vmatprep.subr.bf16.mxu0 %v9422_v6  ;;  %2135 = vmatprep.subr.bf16.mxu1 %v9425_v7  ;;  %v9497_v6 = vld [vmem:[#allocation5 + $0x744] ss:$8 sps:$4 sm:$0xff]   ;;  %v9492_v7 = vld [vmem:[#allocation5 + $0x6e0] ss:$8 sps:$4 sm:$0xff]  }
 0x103   : > { %2015 = vmatpush1.bf16.msra.mxu0 %v9420_v8  ;;  %2136 = vmatpush1.bf16.msra.mxu1 %v9423_v9  ;;  %v9495_v8 = vld [vmem:[#allocation5 + $0x740] ss:$8 sps:$4 sm:$0xff]   ;;  %v9500_v9 = vld [vmem:[#allocation5 + $0x6d4] ss:$8 sps:$4 sm:$0xff]  }
 0x104   : > { %2016 = vmatprep.subr.bf16.mxu0 %v9428_v10  ;;  %2137 = vmatprep.subr.bf16.mxu1 %v9431_v11  ;;  %v9503_v10 = vld [vmem:[#allocation5 + $0x734] ss:$8 sps:$4 sm:$0xff]   ;;  %v9498_v11 = vld [vmem:[#allocation5 + $0x6d0] ss:$8 sps:$4 sm:$0xff]  }
 0x107   : > { %2017 = vmatpush1.bf16.msra.mxu0 %v9426_v12  ;;  %2138 = vmatpush1.bf16.msra.mxu1 %v9429_v13  ;;  %v9501_v12 = vld [vmem:[#allocation5 + $0x730] ss:$8 sps:$4 sm:$0xff]   ;;  %v9506_v13 = vld [vmem:[#allocation5 + $0x6c4] ss:$8 sps:$4 sm:$0xff]  }
 0x108   : > { %2018 = vmatprep.subr.bf16.mxu0 %v9434_v14  ;;  %2139 = vmatprep.subr.bf16.mxu1 %v9437_v15  ;;  %v9509_v14 = vld [vmem:[#allocation5 + $0x724] ss:$8 sps:$4 sm:$0xff]   ;;  %v9504_v15 = vld [vmem:[#allocation5 + $0x6c0] ss:$8 sps:$4 sm:$0xff]  }
 0x10b   : > { %2019 = vmatpush1.bf16.msra.mxu0 %v9432_v16  ;;  %2140 = vmatpush1.bf16.msra.mxu1 %v9435_v17  ;;  %v9507_v16 = vld [vmem:[#allocation5 + $0x720] ss:$8 sps:$4 sm:$0xff]   ;;  %v9512_v17 = vld [vmem:[#allocation5 + $0x7d4] ss:$8 sps:$4 sm:$0xff]  }
 0x10c   : > { %2250 = vmatprep.subr.bf16.mxu0 %v9440_v18  ;;  %2371 = vmatprep.subr.bf16.mxu1 %v9443_v19  ;;  %v9515_v18 = vld [vmem:[#allocation5 + $0x834] ss:$8 sps:$4 sm:$0xff]   ;;  %v8403_v19 = vld [vmem:[%s10626_s6 + $0x12] sm:$0x1] }
 0x10e   : > { %8360 = vmatmul.mubr.msk.bf16.vlgmr.msra.gmra.mxu0 %vm325_vm0, %v8347_v20  ;;  %8374 = vmatmul.mubr.msk.bf16.vlgmr.msra.gmra.mxu1 %vm325_vm0, %v8361_v21  ;;  %v8417_v20 = vld [vmem:[%s10626_s6 + $0x13] sm:$0x1] }
 0x10f   : > { %2251 = vmatpush1.bf16.msra.mxu0 %v9438_v22  ;;  %2372 = vmatpush1.bf16.msra.mxu1 %v9441_v23  ;;  %v9510_v21 = vld [vmem:[#allocation5 + $0x7d0] ss:$8 sps:$4 sm:$0xff]   ;;  %v9518_v23 = vld [vmem:[#allocation5 + $0x7c4] ss:$8 sps:$4 sm:$0xff]  }
 0x110   : > { %2252 = vmatprep.subr.bf16.mxu0 %v9446_v24  ;;  %2373 = vmatprep.subr.bf16.mxu1 %v9449_v25  ;;  %v9513_v22 = vld [vmem:[#allocation5 + $0x830] ss:$8 sps:$4 sm:$0xff]   ;;  %v9521_v24 = vld [vmem:[#allocation5 + $0x824] ss:$8 sps:$4 sm:$0xff]  }
 0x111   : > { %2278 = vmatprep.mubr.bf16.mxu0 %v10475_v0  ;;  %2399 = vmatprep.mubr.bf16.mxu1 %v10475_v0 }
 0x113   : > { %2253 = vmatpush1.bf16.msra.mxu0 %v9444_v26  ;;  %2374 = vmatpush1.bf16.msra.mxu1 %v9447_v27  ;;  %v9516_v27 = vld [vmem:[#allocation5 + $0x7c0] ss:$8 sps:$4 sm:$0xff]  }
 0x114   : > { %2254 = vmatprep.subr.bf16.mxu0 %v9452_v28  ;;  %2375 = vmatprep.subr.bf16.mxu1 %v9455_v29  ;;  %v9519_v28 = vld [vmem:[#allocation5 + $0x820] ss:$8 sps:$4 sm:$0xff]  }
 0x117   : > { %2255 = vmatpush1.bf16.msra.mxu0 %v9450_v30  ;;  %2376 = vmatpush1.bf16.msra.mxu1 %v9453_v31  ;;  %v9524_v30 = vld [vmem:[#allocation5 + $0x7b4] ss:$8 sps:$4 sm:$0xff]  }
 0x118   : > { %2256 = vmatprep.subr.bf16.mxu0 %v9458_v32  ;;  %2377 = vmatprep.subr.bf16.mxu1 %v9461_v33  ;;  %v9527_v33 = vld [vmem:[#allocation5 + $0x814] ss:$8 sps:$4 sm:$0xff]  }
 0x11b   : > { %2257 = vmatpush1.bf16.msra.mxu0 %v9456_v34  ;;  %2378 = vmatpush1.bf16.msra.mxu1 %v9459_v35 }
 0x11c   : > { %2258 = vmatprep.subr.bf16.mxu0 %v9464_v36  ;;  %2379 = vmatprep.subr.bf16.mxu1 %v9467_v37 }
 0x11f   : > { %2259 = vmatpush1.bf16.msra.mxu0 %v9462_v38  ;;  %2380 = vmatpush1.bf16.msra.mxu1 %v9465_v39  ;;  %v9522_v38 = vld [vmem:[#allocation5 + $0x7b0] ss:$8 sps:$4 sm:$0xff]  }
 0x120   : > { %2260 = vmatprep.subr.bf16.mxu0 %v9470_v40  ;;  %2381 = vmatprep.subr.bf16.mxu1 %v9473_v41  ;;  %v9525_v40 = vld [vmem:[#allocation5 + $0x810] ss:$8 sps:$4 sm:$0xff]  }
 0x123   : > { %2261 = vmatpush1.bf16.msra.mxu0 %v9468_v42  ;;  %2382 = vmatpush1.bf16.msra.mxu1 %v9471_v43  ;;  %v9530_v43 = vld [vmem:[#allocation5 + $0x7a4] ss:$8 sps:$4 sm:$0xff]  }
 0x124   : > { %2492 = vmatprep.subr.bf16.mxu0 %v9476_v44  ;;  %2613 = vmatprep.subr.bf16.mxu1 %v9479_v45  ;;  %v9533_v44 = vld [vmem:[#allocation5 + $0x804] ss:$8 sps:$4 sm:$0xff]   ;;  %v9528_v45 = vld [vmem:[#allocation5 + $0x7a0] ss:$8 sps:$4 sm:$0xff]  }
 0x126   : > { %v363_v52 = vpop.f32.mrf.mxu0  ;;  %v467_v53 = vpop.f32.mrf.mxu1  ;;  %8388 = vmatmul.mubr.msk.bf16.vlgmr.msra.gmra.mxu0 %vm325_vm0, %v8375_v46  ;;  %8402 = vmatmul.mubr.msk.bf16.vlgmr.msra.gmra.mxu1 %vm325_vm0, %v8389_v47  ;;  %v9531_v46 = vld [vmem:[#allocation5 + $0x800] ss:$8 sps:$4 sm:$0xff]   ;;  %v9536_v47 = vld [vmem:[#allocation5 + $0x794] ss:$8 sps:$4 sm:$0xff]  }
 0x127   : > { %v10690_v54 = vadd.f32 %v467_v53, %v363_v52  ;;  %2493 = vmatpush1.bf16.msra.mxu0 %v9474_v48  ;;  %2614 = vmatpush1.bf16.msra.mxu1 %v9477_v49  ;;  %v9539_v48 = vld [vmem:[#allocation5 + $0x7f4] ss:$8 sps:$4 sm:$0xff]   ;;  %v9534_v49 = vld [vmem:[#allocation5 + $0x790] ss:$8 sps:$4 sm:$0xff]   ;;  %v9545_v52 = vld [vmem:[#allocation5 + $0x7e4] ss:$8 sps:$4 sm:$0xff]  }
 0x128   : > { %v365_v57 = vpop.f32.mrf.mxu0  ;;  %v469_v58 = vpop.f32.mrf.mxu1  ;;  %2494 = vmatprep.subr.bf16.mxu0 %v9482_v50  ;;  %2615 = vmatprep.subr.bf16.mxu1 %v9485_v51  ;;  %v9537_v50 = vld [vmem:[#allocation5 + $0x7f0] ss:$8 sps:$4 sm:$0xff]   ;;  %v9542_v51 = vld [vmem:[#allocation5 + $0x784] ss:$8 sps:$4 sm:$0xff]   ;;  %v9540_v53 = vld [vmem:[#allocation5 + $0x780] ss:$8 sps:$4 sm:$0xff]  }
 0x129   : > { %v10692_v61 = vadd.f32 %v469_v58, %v365_v57  ;;  %2520 = vmatprep.mubr.bf16.mxu0 %v10475_v0  ;;  %2641 = vmatprep.mubr.bf16.mxu1 %v10475_v0  ;;  %v8431_v57 = vld [vmem:[%s10626_s6 + $0x14] sm:$0x1]  ;;  %v8445_v58 = vld [vmem:[%s10626_s6 + $0x15] sm:$0x1] }
 0x12a   : > { %v367_v62 = vpop.f32.mrf.mxu0  ;;  %v471_v63 = vpop.f32.mrf.mxu1 }
 0x12b   : > { %2495 = vmatpush1.bf16.msra.mxu0 %v9480_v55  ;;  %2616 = vmatpush1.bf16.msra.mxu1 %v9483_v56  ;;  %v9548_v55 = vld [vmem:[#allocation5 + $0x894] ss:$8 sps:$4 sm:$0xff]   ;;  %v9557_v62 = vld [vmem:[#allocation5 + $0x8e4] ss:$8 sps:$4 sm:$0xff]  }
 0x12c   : > { %v368_v3 = vpop.f32.mrf.mxu0  ;;  %v472_v4 = vpop.f32.mrf.mxu1  ;;  %2496 = vmatprep.subr.bf16.mxu0 %v9488_v59  ;;  %2617 = vmatprep.subr.bf16.mxu1 %v9491_v60  ;;  %v9551_v56 = vld [vmem:[#allocation5 + $0x8f4] ss:$8 sps:$4 sm:$0xff]   ;;  %v9546_v59 = vld [vmem:[#allocation5 + $0x890] ss:$8 sps:$4 sm:$0xff]  }
 0x12d   : > { %v9549_v60 = vld [vmem:[#allocation5 + $0x8f0] ss:$8 sps:$4 sm:$0xff]   ;;  %v9555_v3 = vld [vmem:[#allocation5 + $0x8e0] ss:$8 sps:$4 sm:$0xff]  }
 0x12f   : > { %2497 = vmatpush1.bf16.msra.mxu0 %v9486_v1  ;;  %2618 = vmatpush1.bf16.msra.mxu1 %v9489_v2  ;;  %v9552_v2 = vld [vmem:[#allocation5 + $0x880] ss:$8 sps:$4 sm:$0xff]  }
 0x130   : > { %2498 = vmatprep.subr.bf16.mxu0 %v9494_v5  ;;  %2619 = vmatprep.subr.bf16.mxu1 %v9497_v6  ;;  %v9560_v5 = vld [vmem:[#allocation5 + $0x874] ss:$8 sps:$4 sm:$0xff]  }
 0x133   : > { %2499 = vmatpush1.bf16.msra.mxu0 %v9492_v7  ;;  %2620 = vmatpush1.bf16.msra.mxu1 %v9495_v8  ;;  %v9563_v8 = vld [vmem:[#allocation5 + $0x8d4] ss:$8 sps:$4 sm:$0xff]  }
 0x134   : > { %2500 = vmatprep.subr.bf16.mxu0 %v9500_v9  ;;  %2621 = vmatprep.subr.bf16.mxu1 %v9503_v10 }
 0x137   : > { %2501 = vmatpush1.bf16.msra.mxu0 %v9498_v11  ;;  %2622 = vmatpush1.bf16.msra.mxu1 %v9501_v12 }
 0x138   : > { %2502 = vmatprep.subr.bf16.mxu0 %v9506_v13  ;;  %2623 = vmatprep.subr.bf16.mxu1 %v9509_v14  ;;  %v9558_v13 = vld [vmem:[#allocation5 + $0x870] ss:$8 sps:$4 sm:$0xff]  }
 0x139   : > { %v9561_v14 = vld [vmem:[#allocation5 + $0x8d0] ss:$8 sps:$4 sm:$0xff]  }
 0x13b   : > { %2503 = vmatpush1.bf16.msra.mxu0 %v9504_v15  ;;  %2624 = vmatpush1.bf16.msra.mxu1 %v9507_v16  ;;  %v9566_v16 = vld [vmem:[#allocation5 + $0x864] ss:$8 sps:$4 sm:$0xff]  }
 0x13c   : > { %2734 = vmatprep.subr.bf16.mxu0 %v9512_v17  ;;  %2855 = vmatprep.subr.bf16.mxu1 %v9515_v18 }
 0x13e   : > { %v586_v25 = vpop.f32.mrf.mxu0  ;;  %v707_v26 = vpop.f32.mrf.mxu1  ;;  %8416 = vmatmul.mubr.msk.bf16.vlgmr.msra.gmra.mxu0 %vm325_vm0, %v8403_v19  ;;  %8430 = vmatmul.mubr.msk.bf16.vlgmr.msra.gmra.mxu1 %vm325_vm0, %v8417_v20  ;;  %v9569_v19 = vld [vmem:[#allocation5 + $0x8c4] ss:$8 sps:$4 sm:$0xff]   ;;  %v9564_v20 = vld [vmem:[#allocation5 + $0x860] ss:$8 sps:$4 sm:$0xff]  }
 0x13f   : > { %v593_v29 = vadd.f32 %v586_v25, %v10690_v54  ;;  %2735 = vmatpush1.bf16.msra.mxu0 %v9510_v21  ;;  %2856 = vmatpush1.bf16.msra.mxu1 %v9513_v22  ;;  %v9543_v54 = vld [vmem:[#allocation5 + $0x7e0] ss:$8 sps:$4 sm:$0xff]   ;;  %v9572_v22 = vld [vmem:[#allocation5 + $0x854] ss:$8 sps:$4 sm:$0xff]   ;;  %v9573_v25 = vld [vmem:[#allocation5 + $0x8b0] ss:$8 sps:$4 sm:$0xff]  }
 0x140   : > { %v588_v31 = vpop.f32.mrf.mxu0  ;;  %v709_v32 = vpop.f32.mrf.mxu1  ;;  %2736 = vmatprep.subr.bf16.mxu0 %v9518_v23  ;;  %2857 = vmatprep.subr.bf16.mxu1 %v9521_v24  ;;  %v9567_v21 = vld [vmem:[#allocation5 + $0x8c0] ss:$8 sps:$4 sm:$0xff]   ;;  %v9575_v23 = vld [vmem:[#allocation5 + $0x8b4] ss:$8 sps:$4 sm:$0xff]   ;;  %v9570_v24 = vld [vmem:[#allocation5 + $0x850] ss:$8 sps:$4 sm:$0xff]  }
 0x141   : > { %v714_v34 = vadd.f32 %v707_v26, %v593_v29  ;;  %v594_v35 = vadd.f32 %v588_v31, %v10692_v61  ;;  %2762 = vmatprep.mubr.bf16.mxu0 %v10475_v0  ;;  %2883 = vmatprep.mubr.bf16.mxu1 %v10475_v0  ;;  %v9554_v61 = vld [vmem:[#allocation5 + $0x884] ss:$8 sps:$4 sm:$0xff]   ;;  %v9579_v29 = vld [vmem:[#allocation5 + $0x8a0] ss:$8 sps:$4 sm:$0xff]   ;;  %v9587_v31 = vld [vmem:[#allocation5 + $0x9b4] ss:$8 sps:$4 sm:$0xff]  }
 0x142   : > { %v590_v36 = vpop.f32.mrf.mxu0  ;;  %v711_v37 = vpop.f32.mrf.mxu1  ;;  %v9578_v26 = vld [vmem:[#allocation5 + $0x844] ss:$8 sps:$4 sm:$0xff]  }
 0x143   : > { %v715_v39 = vadd.f32 %v709_v32, %v594_v35  ;;  %2737 = vmatpush1.bf16.msra.mxu0 %v9516_v27  ;;  %2858 = vmatpush1.bf16.msra.mxu1 %v9519_v28  ;;  %v9581_v27 = vld [vmem:[#allocation5 + $0x8a4] ss:$8 sps:$4 sm:$0xff]   ;;  %v9576_v28 = vld [vmem:[#allocation5 + $0x840] ss:$8 sps:$4 sm:$0xff]   ;;  %v8459_v32 = vld [vmem:[%s10626_s6 + $0x16] sm:$0x1] }
 0x144   : > { %v591_v41 = vpop.f32.mrf.mxu0  ;;  %v712_v42 = vpop.f32.mrf.mxu1  ;;  %2738 = vmatprep.subr.bf16.mxu0 %v9524_v30  ;;  %2859 = vmatprep.subr.bf16.mxu1 %v9527_v33  ;;  %v9584_v30 = vld [vmem:[#allocation5 + $0x954] ss:$8 sps:$4 sm:$0xff]   ;;  %v9585_v35 = vld [vmem:[#allocation5 + $0x9b0] ss:$8 sps:$4 sm:$0xff]   ;;  %v9590_v36 = vld [vmem:[#allocation5 + $0x944] ss:$8 sps:$4 sm:$0xff]  }
 0x145   : > { %v8473_v33 = vld [vmem:[%s10626_s6 + $0x17] sm:$0x1]  ;;  %v9593_v37 = vld [vmem:[#allocation5 + $0x9a4] ss:$8 sps:$4 sm:$0xff]   ;;  %v9588_v41 = vld [vmem:[#allocation5 + $0x940] ss:$8 sps:$4 sm:$0xff]  }
 0x146   : > { %v9591_v42 = vld [vmem:[#allocation5 + $0x9a0] ss:$8 sps:$4 sm:$0xff]  }
 0x147   : > { %2739 = vmatpush1.bf16.msra.mxu0 %v9522_v38  ;;  %2860 = vmatpush1.bf16.msra.mxu1 %v9525_v40 }
 0x148   : > { %2740 = vmatprep.subr.bf16.mxu0 %v9530_v43  ;;  %2861 = vmatprep.subr.bf16.mxu1 %v9533_v44 }
 0x14b   : > { %2741 = vmatpush1.bf16.msra.mxu0 %v9528_v45  ;;  %2862 = vmatpush1.bf16.msra.mxu1 %v9531_v46  ;;  %v9596_v45 = vld [vmem:[#allocation5 + $0x934] ss:$8 sps:$4 sm:$0xff]  }
 0x14c   : > { %2742 = vmatprep.subr.bf16.mxu0 %v9536_v47  ;;  %2863 = vmatprep.subr.bf16.mxu1 %v9539_v48  ;;  %v9599_v46 = vld [vmem:[#allocation5 + $0x994] ss:$8 sps:$4 sm:$0xff]  }
 0x14f   : > { %2743 = vmatpush1.bf16.msra.mxu0 %v9534_v49  ;;  %2864 = vmatpush1.bf16.msra.mxu1 %v9537_v50 }
 0x150   : > { %2744 = vmatprep.subr.bf16.mxu0 %v9542_v51  ;;  %2865 = vmatprep.subr.bf16.mxu1 %v9545_v52  ;;  %v9594_v52 = vld [vmem:[#allocation5 + $0x930] ss:$8 sps:$4 sm:$0xff]  }
 0x153   : > { %2745 = vmatpush1.bf16.msra.mxu0 %v9540_v53  ;;  %2866 = vmatpush1.bf16.msra.mxu1 %v9543_v54  ;;  %v9597_v53 = vld [vmem:[#allocation5 + $0x990] ss:$8 sps:$4 sm:$0xff]  }
 0x154   : > { %2976 = vmatprep.subr.bf16.mxu0 %v9548_v55  ;;  %3097 = vmatprep.subr.bf16.mxu1 %v9551_v56  ;;  %v9602_v56 = vld [vmem:[#allocation5 + $0x924] ss:$8 sps:$4 sm:$0xff]  }
 0x156   : > { %v828_v63 = vpop.f32.mrf.mxu0  ;;  %v949_v1 = vpop.f32.mrf.mxu1  ;;  %8444 = vmatmul.mubr.msk.bf16.vlgmr.msra.gmra.mxu0 %vm325_vm0, %v8431_v57  ;;  %8458 = vmatmul.mubr.msk.bf16.vlgmr.msra.gmra.mxu1 %vm325_vm0, %v8445_v58  ;;  %v9605_v57 = vld [vmem:[#allocation5 + $0x984] ss:$8 sps:$4 sm:$0xff]   ;;  %v9600_v58 = vld [vmem:[#allocation5 + $0x920] ss:$8 sps:$4 sm:$0xff]  }
 0x157   : > { %v835_v4 = vadd.f32 %v828_v63, %v714_v34  ;;  %2977 = vmatpush1.bf16.msra.mxu0 %v9546_v59  ;;  %3098 = vmatpush1.bf16.msra.mxu1 %v9549_v60  ;;  %v9582_v34 = vld [vmem:[#allocation5 + $0x950] ss:$8 sps:$4 sm:$0xff]   ;;  %v9603_v59 = vld [vmem:[#allocation5 + $0x980] ss:$8 sps:$4 sm:$0xff]   ;;  %v9608_v60 = vld [vmem:[#allocation5 + $0x914] ss:$8 sps:$4 sm:$0xff]  }
 0x158   : > { %v830_v6 = vpop.f32.mrf.mxu0  ;;  %v951_v7 = vpop.f32.mrf.mxu1  ;;  %2978 = vmatprep.subr.bf16.mxu0 %v9554_v61  ;;  %3099 = vmatprep.subr.bf16.mxu1 %v9557_v62  ;;  %v9611_v61 = vld [vmem:[#allocation5 + $0x974] ss:$8 sps:$4 sm:$0xff]   ;;  %v9606_v62 = vld [vmem:[#allocation5 + $0x910] ss:$8 sps:$4 sm:$0xff]  }
 0x159   : > { %v956_v9 = vadd.f32 %v949_v1, %v835_v4  ;;  %v836_v10 = vadd.f32 %v830_v6, %v715_v39  ;;  %3004 = vmatprep.mubr.bf16.mxu0 %v10475_v0  ;;  %3125 = vmatprep.mubr.bf16.mxu1 %v10475_v0  ;;  %v9609_v63 = vld [vmem:[#allocation5 + $0x970] ss:$8 sps:$4 sm:$0xff]   ;;  %v9614_v1 = vld [vmem:[#allocation5 + $0x904] ss:$8 sps:$4 sm:$0xff]   ;;  %v9615_v4 = vld [vmem:[#allocation5 + $0x960] ss:$8 sps:$4 sm:$0xff]  }
 0x15a   : > { %v832_v11 = vpop.f32.mrf.mxu0  ;;  %v953_v12 = vpop.f32.mrf.mxu1  ;;  %v9623_v6 = vld [vmem:[#allocation5 + $0xa74] ss:$8 sps:$4 sm:$0xff]  }
 0x15b   : > { %v957_v15 = vadd.f32 %v951_v7, %v836_v10  ;;  %2979 = vmatpush1.bf16.msra.mxu0 %v9552_v2  ;;  %3100 = vmatpush1.bf16.msra.mxu1 %v9555_v3  ;;  %v9617_v2 = vld [vmem:[#allocation5 + $0x964] ss:$8 sps:$4 sm:$0xff]   ;;  %v9612_v3 = vld [vmem:[#allocation5 + $0x900] ss:$8 sps:$4 sm:$0xff]   ;;  %v8487_v7 = vld [vmem:[%s10626_s6 + $0x18] sm:$0x1] }
 0x15c   : > { %v833_v17 = vpop.f32.mrf.mxu0  ;;  %v954_v18 = vpop.f32.mrf.mxu1  ;;  %2980 = vmatprep.subr.bf16.mxu0 %v9560_v5  ;;  %3101 = vmatprep.subr.bf16.mxu1 %v9563_v8  ;;  %v9620_v5 = vld [vmem:[#allocation5 + $0xa14] ss:$8 sps:$4 sm:$0xff]   ;;  %v8501_v8 = vld [vmem:[%s10626_s6 + $0x19] sm:$0x1]  ;;  %v9626_v11 = vld [vmem:[#allocation5 + $0xa04] ss:$8 sps:$4 sm:$0xff]  }
 0x15d   : > { %v9621_v10 = vld [vmem:[#allocation5 + $0xa70] ss:$8 sps:$4 sm:$0xff]   ;;  %v9629_v12 = vld [vmem:[#allocation5 + $0xa64] ss:$8 sps:$4 sm:$0xff]   ;;  %v9627_v17 = vld [vmem:[#allocation5 + $0xa60] ss:$8 sps:$4 sm:$0xff]  }
 0x15f   : > { %2981 = vmatpush1.bf16.msra.mxu0 %v9558_v13  ;;  %3102 = vmatpush1.bf16.msra.mxu1 %v9561_v14 }
 0x160   : > { %2982 = vmatprep.subr.bf16.mxu0 %v9566_v16  ;;  %3103 = vmatprep.subr.bf16.mxu1 %v9569_v19  ;;  %v9624_v16 = vld [vmem:[#allocation5 + $0xa00] ss:$8 sps:$4 sm:$0xff]  }
 0x163   : > { %2983 = vmatpush1.bf16.msra.mxu0 %v9564_v20  ;;  %3104 = vmatpush1.bf16.msra.mxu1 %v9567_v21  ;;  %v9632_v20 = vld [vmem:[#allocation5 + $0x9f4] ss:$8 sps:$4 sm:$0xff]  }
 0x164   : > { %2984 = vmatprep.subr.bf16.mxu0 %v9572_v22  ;;  %3105 = vmatprep.subr.bf16.mxu1 %v9575_v23  ;;  %v9635_v21 = vld [vmem:[#allocation5 + $0xa54] ss:$8 sps:$4 sm:$0xff]  }
 0x167   : > { %2985 = vmatpush1.bf16.msra.mxu0 %v9570_v24  ;;  %3106 = vmatpush1.bf16.msra.mxu1 %v9573_v25 }
 0x168   : > { %2986 = vmatprep.subr.bf16.mxu0 %v9578_v26  ;;  %3107 = vmatprep.subr.bf16.mxu1 %v9581_v27  ;;  %v9630_v27 = vld [vmem:[#allocation5 + $0x9f0] ss:$8 sps:$4 sm:$0xff]  }
 0x16b   : > { %2987 = vmatpush1.bf16.msra.mxu0 %v9576_v28  ;;  %3108 = vmatpush1.bf16.msra.mxu1 %v9579_v29  ;;  %v9633_v28 = vld [vmem:[#allocation5 + $0xa50] ss:$8 sps:$4 sm:$0xff]  }
 0x16c   : > { %3218 = vmatprep.subr.bf16.mxu0 %v9584_v30  ;;  %3339 = vmatprep.subr.bf16.mxu1 %v9587_v31  ;;  %v9638_v31 = vld [vmem:[#allocation5 + $0x9e4] ss:$8 sps:$4 sm:$0xff]  }
 0x16e   : > { %v1070_v38 = vpop.f32.mrf.mxu0  ;;  %v1191_v39 = vpop.f32.mrf.mxu1  ;;  %8472 = vmatmul.mubr.msk.bf16.vlgmr.msra.gmra.mxu0 %vm325_vm0, %v8459_v32  ;;  %8486 = vmatmul.mubr.msk.bf16.vlgmr.msra.gmra.mxu1 %vm325_vm0, %v8473_v33  ;;  %v9641_v32 = vld [vmem:[#allocation5 + $0xa44] ss:$8 sps:$4 sm:$0xff]   ;;  %v9636_v33 = vld [vmem:[#allocation5 + $0x9e0] ss:$8 sps:$4 sm:$0xff]  }
 0x16f   : > { %v1077_v40 = vadd.f32 %v1070_v38, %v956_v9  ;;  %3219 = vmatpush1.bf16.msra.mxu0 %v9582_v34  ;;  %3340 = vmatpush1.bf16.msra.mxu1 %v9585_v35  ;;  %v9618_v9 = vld [vmem:[#allocation5 + $0xa10] ss:$8 sps:$4 sm:$0xff]   ;;  %v9639_v34 = vld [vmem:[#allocation5 + $0xa40] ss:$8 sps:$4 sm:$0xff]   ;;  %v9644_v35 = vld [vmem:[#allocation5 + $0x9d4] ss:$8 sps:$4 sm:$0xff]  }
 0x170   : > { %v1072_v43 = vpop.f32.mrf.mxu0  ;;  %v1193_v44 = vpop.f32.mrf.mxu1  ;;  %3220 = vmatprep.subr.bf16.mxu0 %v9590_v36  ;;  %3341 = vmatprep.subr.bf16.mxu1 %v9593_v37  ;;  %v9647_v36 = vld [vmem:[#allocation5 + $0xa34] ss:$8 sps:$4 sm:$0xff]   ;;  %v9642_v37 = vld [vmem:[#allocation5 + $0x9d0] ss:$8 sps:$4 sm:$0xff]  }
 0x171   : > { %v1198_v47 = vadd.f32 %v1191_v39, %v1077_v40  ;;  %v1078_v48 = vadd.f32 %v1072_v43, %v957_v15  ;;  %3246 = vmatprep.mubr.bf16.mxu0 %v10475_v0  ;;  %3367 = vmatprep.mubr.bf16.mxu1 %v10475_v0  ;;  %v9645_v38 = vld [vmem:[#allocation5 + $0xa30] ss:$8 sps:$4 sm:$0xff]   ;;  %v9650_v39 = vld [vmem:[#allocation5 + $0x9c4] ss:$8 sps:$4 sm:$0xff]   ;;  %v9656_v43 = vld [vmem:[#allocation5 + $0xad4] ss:$8 sps:$4 sm:$0xff]  }
 0x172   : > { %v1074_v49 = vpop.f32.mrf.mxu0  ;;  %v1195_v50 = vpop.f32.mrf.mxu1  ;;  %v9653_v40 = vld [vmem:[#allocation5 + $0xa24] ss:$8 sps:$4 sm:$0xff]  }
 0x173   : > { %v1199_v51 = vadd.f32 %v1193_v44, %v1078_v48  ;;  %3221 = vmatpush1.bf16.msra.mxu0 %v9588_v41  ;;  %3342 = vmatpush1.bf16.msra.mxu1 %v9591_v42  ;;  %v9648_v41 = vld [vmem:[#allocation5 + $0x9c0] ss:$8 sps:$4 sm:$0xff]   ;;  %v9659_v44 = vld [vmem:[#allocation5 + $0xb34] ss:$8 sps:$4 sm:$0xff]   ;;  %v9657_v48 = vld [vmem:[#allocation5 + $0xb30] ss:$8 sps:$4 sm:$0xff]  }
 0x174   : > { %v1075_v54 = vpop.f32.mrf.mxu0  ;;  %v1196_v55 = vpop.f32.mrf.mxu1  ;;  %3222 = vmatprep.subr.bf16.mxu0 %v9596_v45  ;;  %3343 = vmatprep.subr.bf16.mxu1 %v9599_v46  ;;  %v9651_v42 = vld [vmem:[#allocation5 + $0xa20] ss:$8 sps:$4 sm:$0xff]   ;;  %v8515_v45 = vld [vmem:[%s10626_s6 + $0x1a] sm:$0x1]  ;;  %v8529_v46 = vld [vmem:[%s10626_s6 + $0x1b] sm:$0x1] }
 0x175   : > { %v9662_v49 = vld [vmem:[#allocation5 + $0xac4] ss:$8 sps:$4 sm:$0xff]   ;;  %v9660_v54 = vld [vmem:[#allocation5 + $0xac0] ss:$8 sps:$4 sm:$0xff]  }
 0x176   : > { %v9665_v50 = vld [vmem:[#allocation5 + $0xb24] ss:$8 sps:$4 sm:$0xff]   ;;  %v9663_v55 = vld [vmem:[#allocation5 + $0xb20] ss:$8 sps:$4 sm:$0xff]  }
 0x177   : > { %3223 = vmatpush1.bf16.msra.mxu0 %v9594_v52  ;;  %3344 = vmatpush1.bf16.msra.mxu1 %v9597_v53 }
 0x178   : > { %3224 = vmatprep.subr.bf16.mxu0 %v9602_v56  ;;  %3345 = vmatprep.subr.bf16.mxu1 %v9605_v57 }
 0x17b   : > { %3225 = vmatpush1.bf16.msra.mxu0 %v9600_v58  ;;  %3346 = vmatpush1.bf16.msra.mxu1 %v9603_v59  ;;  %v9668_v58 = vld [vmem:[#allocation5 + $0xab4] ss:$8 sps:$4 sm:$0xff]  }
 0x17c   : > { %3226 = vmatprep.subr.bf16.mxu0 %v9608_v60  ;;  %3347 = vmatprep.subr.bf16.mxu1 %v9611_v61  ;;  %v9671_v59 = vld [vmem:[#allocation5 + $0xb14] ss:$8 sps:$4 sm:$0xff]  }
 0x17f   : > { %3227 = vmatpush1.bf16.msra.mxu0 %v9606_v62  ;;  %3348 = vmatpush1.bf16.msra.mxu1 %v9609_v63 }
 0x180   : > { %3228 = vmatprep.subr.bf16.mxu0 %v9614_v1  ;;  %3349 = vmatprep.subr.bf16.mxu1 %v9617_v2  ;;  %v9666_v2 = vld [vmem:[#allocation5 + $0xab0] ss:$8 sps:$4 sm:$0xff]  }
 0x183   : > { %3229 = vmatpush1.bf16.msra.mxu0 %v9612_v3  ;;  %3350 = vmatpush1.bf16.msra.mxu1 %v9615_v4  ;;  %v9669_v3 = vld [vmem:[#allocation5 + $0xb10] ss:$8 sps:$4 sm:$0xff]  }
 0x184   : > { %3460 = vmatprep.subr.bf16.mxu0 %v9620_v5  ;;  %3581 = vmatprep.subr.bf16.mxu1 %v9623_v6  ;;  %v9674_v6 = vld [vmem:[#allocation5 + $0xaa4] ss:$8 sps:$4 sm:$0xff]  }
 0x186   : > { %v1312_v13 = vpop.f32.mrf.mxu0  ;;  %v1433_v14 = vpop.f32.mrf.mxu1  ;;  %8500 = vmatmul.mubr.msk.bf16.vlgmr.msra.gmra.mxu0 %vm325_vm0, %v8487_v7  ;;  %8514 = vmatmul.mubr.msk.bf16.vlgmr.msra.gmra.mxu1 %vm325_vm0, %v8501_v8  ;;  %v9677_v7 = vld [vmem:[#allocation5 + $0xb04] ss:$8 sps:$4 sm:$0xff]   ;;  %v9672_v8 = vld [vmem:[#allocation5 + $0xaa0] ss:$8 sps:$4 sm:$0xff]  }
 0x187   : > { %v1319_v15 = vadd.f32 %v1312_v13, %v1198_v47  ;;  %3461 = vmatpush1.bf16.msra.mxu0 %v9618_v9  ;;  %3582 = vmatpush1.bf16.msra.mxu1 %v9621_v10  ;;  %v9654_v47 = vld [vmem:[#allocation5 + $0xad0] ss:$8 sps:$4 sm:$0xff]   ;;  %v9675_v9 = vld [vmem:[#allocation5 + $0xb00] ss:$8 sps:$4 sm:$0xff]   ;;  %v9680_v10 = vld [vmem:[#allocation5 + $0xa94] ss:$8 sps:$4 sm:$0xff]  }
 0x188   : > { %v1314_v18 = vpop.f32.mrf.mxu0  ;;  %v1435_v19 = vpop.f32.mrf.mxu1  ;;  %3462 = vmatprep.subr.bf16.mxu0 %v9626_v11  ;;  %3583 = vmatprep.subr.bf16.mxu1 %v9629_v12  ;;  %v9683_v11 = vld [vmem:[#allocation5 + $0xaf4] ss:$8 sps:$4 sm:$0xff]   ;;  %v9678_v12 = vld [vmem:[#allocation5 + $0xa90] ss:$8 sps:$4 sm:$0xff]  }
 0x189   : > { %v1440_v22 = vadd.f32 %v1433_v14, %v1319_v15  ;;  %v1320_v23 = vadd.f32 %v1314_v18, %v1199_v51  ;;  %3488 = vmatprep.mubr.bf16.mxu0 %v10475_v0  ;;  %3609 = vmatprep.mubr.bf16.mxu1 %v10475_v0  ;;  %v9681_v13 = vld [vmem:[#allocation5 + $0xaf0] ss:$8 sps:$4 sm:$0xff]   ;;  %v9686_v14 = vld [vmem:[#allocation5 + $0xa84] ss:$8 sps:$4 sm:$0xff]   ;;  %v9692_v18 = vld [vmem:[#allocation5 + $0xb94] ss:$8 sps:$4 sm:$0xff]  }
 0x18a   : > { %v1316_v24 = vpop.f32.mrf.mxu0  ;;  %v1437_v25 = vpop.f32.mrf.mxu1  ;;  %v9689_v15 = vld [vmem:[#allocation5 + $0xae4] ss:$8 sps:$4 sm:$0xff]  }
 0x18b   : > { %v1441_v26 = vadd.f32 %v1435_v19, %v1320_v23  ;;  %3463 = vmatpush1.bf16.msra.mxu0 %v9624_v16  ;;  %3584 = vmatpush1.bf16.msra.mxu1 %v9627_v17  ;;  %v9684_v16 = vld [vmem:[#allocation5 + $0xa80] ss:$8 sps:$4 sm:$0xff]   ;;  %v9695_v19 = vld [vmem:[#allocation5 + $0xbf4] ss:$8 sps:$4 sm:$0xff]   ;;  %v9693_v23 = vld [vmem:[#allocation5 + $0xbf0] ss:$8 sps:$4 sm:$0xff]  }
 0x18c   : > { %v1317_v29 = vpop.f32.mrf.mxu0  ;;  %v1438_v30 = vpop.f32.mrf.mxu1  ;;  %3464 = vmatprep.subr.bf16.mxu0 %v9632_v20  ;;  %3585 = vmatprep.subr.bf16.mxu1 %v9635_v21  ;;  %v9687_v17 = vld [vmem:[#allocation5 + $0xae0] ss:$8 sps:$4 sm:$0xff]   ;;  %v8543_v20 = vld [vmem:[%s10626_s6 + $0x1c] sm:$0x1]  ;;  %v8557_v21 = vld [vmem:[%s10626_s6 + $0x1d] sm:$0x1] }
 0x18d   : > { %v9698_v24 = vld [vmem:[#allocation5 + $0xb84] ss:$8 sps:$4 sm:$0xff]   ;;  %v9696_v29 = vld [vmem:[#allocation5 + $0xb80] ss:$8 sps:$4 sm:$0xff]  }
 0x18e   : > { %v9701_v25 = vld [vmem:[#allocation5 + $0xbe4] ss:$8 sps:$4 sm:$0xff]   ;;  %v9699_v30 = vld [vmem:[#allocation5 + $0xbe0] ss:$8 sps:$4 sm:$0xff]  }
 0x18f   : > { %3465 = vmatpush1.bf16.msra.mxu0 %v9630_v27  ;;  %3586 = vmatpush1.bf16.msra.mxu1 %v9633_v28 }
 0x190   : > { %3466 = vmatprep.subr.bf16.mxu0 %v9638_v31  ;;  %3587 = vmatprep.subr.bf16.mxu1 %v9641_v32 }
 0x193   : > { %3467 = vmatpush1.bf16.msra.mxu0 %v9636_v33  ;;  %3588 = vmatpush1.bf16.msra.mxu1 %v9639_v34  ;;  %v9704_v33 = vld [vmem:[#allocation5 + $0xb74] ss:$8 sps:$4 sm:$0xff]  }
 0x194   : > { %3468 = vmatprep.subr.bf16.mxu0 %v9644_v35  ;;  %3589 = vmatprep.subr.bf16.mxu1 %v9647_v36  ;;  %v9707_v34 = vld [vmem:[#allocation5 + $0xbd4] ss:$8 sps:$4 sm:$0xff]  }
 0x197   : > { %3469 = vmatpush1.bf16.msra.mxu0 %v9642_v37  ;;  %3590 = vmatpush1.bf16.msra.mxu1 %v9645_v38 }
 0x198   : > { %3470 = vmatprep.subr.bf16.mxu0 %v9650_v39  ;;  %3591 = vmatprep.subr.bf16.mxu1 %v9653_v40  ;;  %v9702_v40 = vld [vmem:[#allocation5 + $0xb70] ss:$8 sps:$4 sm:$0xff]  }
 0x19b   : > { %3471 = vmatpush1.bf16.msra.mxu0 %v9648_v41  ;;  %3592 = vmatpush1.bf16.msra.mxu1 %v9651_v42  ;;  %v9705_v41 = vld [vmem:[#allocation5 + $0xbd0] ss:$8 sps:$4 sm:$0xff]  }
 0x19c   : > { %3702 = vmatprep.subr.bf16.mxu0 %v9656_v43  ;;  %3823 = vmatprep.subr.bf16.mxu1 %v9659_v44  ;;  %v9710_v44 = vld [vmem:[#allocation5 + $0xb64] ss:$8 sps:$4 sm:$0xff]  }
 0x19e   : > { %v1554_v51 = vpop.f32.mrf.mxu0  ;;  %v1675_v52 = vpop.f32.mrf.mxu1  ;;  %8528 = vmatmul.mubr.msk.bf16.vlgmr.msra.gmra.mxu0 %vm325_vm0, %v8515_v45  ;;  %8542 = vmatmul.mubr.msk.bf16.vlgmr.msra.gmra.mxu1 %vm325_vm0, %v8529_v46  ;;  %v9713_v45 = vld [vmem:[#allocation5 + $0xbc4] ss:$8 sps:$4 sm:$0xff]   ;;  %v9708_v46 = vld [vmem:[#allocation5 + $0xb60] ss:$8 sps:$4 sm:$0xff]  }
 0x19f   : > { %v1561_v53 = vadd.f32 %v1554_v51, %v1440_v22  ;;  %3703 = vmatpush1.bf16.msra.mxu0 %v9654_v47  ;;  %3824 = vmatpush1.bf16.msra.mxu1 %v9657_v48  ;;  %v9690_v22 = vld [vmem:[#allocation5 + $0xb90] ss:$8 sps:$4 sm:$0xff]   ;;  %v9711_v47 = vld [vmem:[#allocation5 + $0xbc0] ss:$8 sps:$4 sm:$0xff]   ;;  %v9716_v48 = vld [vmem:[#allocation5 + $0xb54] ss:$8 sps:$4 sm:$0xff]  }
 0x1a0   : > { %v1556_v56 = vpop.f32.mrf.mxu0  ;;  %v1677_v57 = vpop.f32.mrf.mxu1  ;;  %3704 = vmatprep.subr.bf16.mxu0 %v9662_v49  ;;  %3825 = vmatprep.subr.bf16.mxu1 %v9665_v50  ;;  %v9719_v49 = vld [vmem:[#allocation5 + $0xbb4] ss:$8 sps:$4 sm:$0xff]   ;;  %v9714_v50 = vld [vmem:[#allocation5 + $0xb50] ss:$8 sps:$4 sm:$0xff]  }
 0x1a1   : > { %v1682_v60 = vadd.f32 %v1675_v52, %v1561_v53  ;;  %v1562_v61 = vadd.f32 %v1556_v56, %v1441_v26  ;;  %3730 = vmatprep.mubr.bf16.mxu0 %v10475_v0  ;;  %3851 = vmatprep.mubr.bf16.mxu1 %v10475_v0  ;;  %v9717_v51 = vld [vmem:[#allocation5 + $0xbb0] ss:$8 sps:$4 sm:$0xff]   ;;  %v9722_v52 = vld [vmem:[#allocation5 + $0xb44] ss:$8 sps:$4 sm:$0xff]   ;;  %v9728_v56 = vld [vmem:[#allocation5 + $0xb4] ss:$8 sps:$4 sm:$0xff]  }
 0x1a2   : > { %v1558_v62 = vpop.f32.mrf.mxu0  ;;  %v1679_v63 = vpop.f32.mrf.mxu1  ;;  %v9725_v53 = vld [vmem:[#allocation5 + $0xba4] ss:$8 sps:$4 sm:$0xff]  }
 0x1a3   : > { %v1683_v1 = vadd.f32 %v1677_v57, %v1562_v61  ;;  %3705 = vmatpush1.bf16.msra.mxu0 %v9660_v54  ;;  %3826 = vmatpush1.bf16.msra.mxu1 %v9663_v55  ;;  %v9720_v54 = vld [vmem:[#allocation5 + $0xb40] ss:$8 sps:$4 sm:$0xff]   ;;  %v9731_v57 = vld [vmem:[#allocation5 + $0x54] ss:$8 sps:$4 sm:$0xff]   ;;  %v9729_v61 = vld [vmem:[#allocation5 + $0x50] ss:$8 sps:$4 sm:$0xff]  }
 0x1a4   : > { %v1559_v4 = vpop.f32.mrf.mxu0  ;;  %v1680_v5 = vpop.f32.mrf.mxu1  ;;  %3706 = vmatprep.subr.bf16.mxu0 %v9668_v58  ;;  %3827 = vmatprep.subr.bf16.mxu1 %v9671_v59  ;;  %v9723_v55 = vld [vmem:[#allocation5 + $0xba0] ss:$8 sps:$4 sm:$0xff]   ;;  %v8571_v58 = vld [vmem:[%s10626_s6 + $0x1e] sm:$0x1]  ;;  %v8585_v59 = vld [vmem:[%s10626_s6 + $0x1f] sm:$0x1] }
 0x1a5   : > { %v9734_v62 = vld [vmem:[#allocation5 + $0xa4] ss:$8 sps:$4 sm:$0xff]   ;;  %v9732_v4 = vld [vmem:[#allocation5 + $0xa0] ss:$8 sps:$4 sm:$0xff]  }
 0x1a6   : > { %v9737_v63 = vld [vmem:[#allocation5 + $0x44] ss:$8 sps:$4 sm:$0xff]   ;;  %v9735_v5 = vld [vmem:[#allocation5 + $0x40] ss:$8 sps:$4 sm:$0xff]  }
 0x1a7   : > { %3707 = vmatpush1.bf16.msra.mxu0 %v9666_v2  ;;  %3828 = vmatpush1.bf16.msra.mxu1 %v9669_v3 }
 0x1a8   : > { %3708 = vmatprep.subr.bf16.mxu0 %v9674_v6  ;;  %3829 = vmatprep.subr.bf16.mxu1 %v9677_v7 }
 0x1ab   : > { %3709 = vmatpush1.bf16.msra.mxu0 %v9672_v8  ;;  %3830 = vmatpush1.bf16.msra.mxu1 %v9675_v9  ;;  %v9740_v8 = vld [vmem:[#allocation5 + $0x94] ss:$8 sps:$4 sm:$0xff]  }
 0x1ac   : > { %3710 = vmatprep.subr.bf16.mxu0 %v9680_v10  ;;  %3831 = vmatprep.subr.bf16.mxu1 %v9683_v11  ;;  %v9743_v9 = vld [vmem:[#allocation5 + $0x34] ss:$8 sps:$4 sm:$0xff]  }
 0x1af   : > { %3711 = vmatpush1.bf16.msra.mxu0 %v9678_v12  ;;  %3832 = vmatpush1.bf16.msra.mxu1 %v9681_v13 }
 0x1b0   : > { %3712 = vmatprep.subr.bf16.mxu0 %v9686_v14  ;;  %3833 = vmatprep.subr.bf16.mxu1 %v9689_v15  ;;  %v9738_v15 = vld [vmem:[#allocation5 + $0x90] ss:$8 sps:$4 sm:$0xff]  }
 0x1b3   : > { %3713 = vmatpush1.bf16.msra.mxu0 %v9684_v16  ;;  %3834 = vmatpush1.bf16.msra.mxu1 %v9687_v17  ;;  %v9741_v16 = vld [vmem:[#allocation5 + $0x30] ss:$8 sps:$4 sm:$0xff]  }
 0x1b4   : > { %3944 = vmatprep.subr.bf16.mxu0 %v9692_v18  ;;  %4065 = vmatprep.subr.bf16.mxu1 %v9695_v19  ;;  %v9746_v19 = vld [vmem:[#allocation5 + $0x84] ss:$8 sps:$4 sm:$0xff]  }
 0x1b6   : > { %v1796_v26 = vpop.f32.mrf.mxu0  ;;  %v1917_v27 = vpop.f32.mrf.mxu1  ;;  %8556 = vmatmul.mubr.msk.bf16.vlgmr.msra.gmra.mxu0 %vm325_vm0, %v8543_v20  ;;  %8570 = vmatmul.mubr.msk.bf16.vlgmr.msra.gmra.mxu1 %vm325_vm0, %v8557_v21  ;;  %v9749_v20 = vld [vmem:[#allocation5 + $0x24] ss:$8 sps:$4 sm:$0xff]   ;;  %v9744_v21 = vld [vmem:[#allocation5 + $0x80] ss:$8 sps:$4 sm:$0xff]  }
 0x1b7   : > { %v1803_v28 = vadd.f32 %v1796_v26, %v1682_v60  ;;  %3945 = vmatpush1.bf16.msra.mxu0 %v9690_v22  ;;  %4066 = vmatpush1.bf16.msra.mxu1 %v9693_v23  ;;  %v9726_v60 = vld [vmem:[#allocation5 + $0xb0] ss:$8 sps:$4 sm:$0xff]   ;;  %v9747_v22 = vld [vmem:[#allocation5 + $0x20] ss:$8 sps:$4 sm:$0xff]   ;;  %v9752_v23 = vld [vmem:[#allocation5 + $0x74] ss:$8 sps:$4 sm:$0xff]  }
 0x1b8   : > { %v1798_v31 = vpop.f32.mrf.mxu0  ;;  %v1919_v32 = vpop.f32.mrf.mxu1  ;;  %3946 = vmatprep.subr.bf16.mxu0 %v9698_v24  ;;  %4067 = vmatprep.subr.bf16.mxu1 %v9701_v25  ;;  %v9755_v24 = vld [vmem:[#allocation5 + $0x14] ss:$8 sps:$4 sm:$0xff]   ;;  %v9750_v25 = vld [vmem:[#allocation5 + $0x70] ss:$8 sps:$4 sm:$0xff]  }
 0x1b9   : > { %v1924_v35 = vadd.f32 %v1917_v27, %v1803_v28  ;;  %v1804_v36 = vadd.f32 %v1798_v31, %v1683_v1  ;;  %3972 = vmatprep.mubr.bf16.mxu0 %v10475_v0  ;;  %4093 = vmatprep.mubr.bf16.mxu1 %v10475_v0  ;;  %v9753_v26 = vld [vmem:[#allocation5 + $0x10] ss:$8 sps:$4 sm:$0xff]   ;;  %v9758_v27 = vld [vmem:[#allocation5 + $0x64] ss:$8 sps:$4 sm:$0xff]   ;;  %v9764_v31 = vld [vmem:[#allocation5 + $0x114] ss:$8 sps:$4 sm:$0xff]  }
 0x1ba   : > { %v1800_v37 = vpop.f32.mrf.mxu0  ;;  %v1921_v38 = vpop.f32.mrf.mxu1  ;;  %v9761_v28 = vld [vmem:[#allocation5 + $0x4] ss:$8 sps:$4 sm:$0xff]  }
 0x1bb   : > { %v1925_v39 = vadd.f32 %v1919_v32, %v1804_v36  ;;  %3947 = vmatpush1.bf16.msra.mxu0 %v9696_v29  ;;  %4068 = vmatpush1.bf16.msra.mxu1 %v9699_v30  ;;  %v9756_v29 = vld [vmem:[#allocation5 + $0x60] ss:$8 sps:$4 sm:$0xff]   ;;  %v9767_v32 = vld [vmem:[#allocation5 + $0x174] ss:$8 sps:$4 sm:$0xff]   ;;  %v9765_v36 = vld [vmem:[#allocation5 + $0x170] ss:$8 sps:$4 sm:$0xff]  }
 0x1bc   : > { %v1801_v42 = vpop.f32.mrf.mxu0  ;;  %v1922_v43 = vpop.f32.mrf.mxu1  ;;  %3948 = vmatprep.subr.bf16.mxu0 %v9704_v33  ;;  %4069 = vmatprep.subr.bf16.mxu1 %v9707_v34  ;;  %v9759_v30 = vld [vmem:[#allocation5] ss:$8 sps:$4 sm:$0xff]   ;;  %v9770_v37 = vld [vmem:[#allocation5 + $0x104] ss:$8 sps:$4 sm:$0xff]  }
 0x1bd   : > { %v8602_v33 = vld [vmem:[%s10626_s6 + $0x21] sm:$0x1]  ;;  %v8601_v34 = vld [vmem:[%s10626_s6 + $0x20] sm:$0x1]  ;;  %v9773_v38 = vld [vmem:[#allocation5 + $0x164] ss:$8 sps:$4 sm:$0xff]  }
 0x1be   : > { %v9768_v42 = vld [vmem:[#allocation5 + $0x100] ss:$8 sps:$4 sm:$0xff]  }
 0x1bf   : > { %3949 = vmatpush1.bf16.msra.mxu0 %v9702_v40  ;;  %4070 = vmatpush1.bf16.msra.mxu1 %v9705_v41  ;;  %v9771_v43 = vld [vmem:[#allocation5 + $0x160] ss:$8 sps:$4 sm:$0xff]  }
 0x1c0   : > { %3950 = vmatprep.subr.bf16.mxu0 %v9710_v44  ;;  %4071 = vmatprep.subr.bf16.mxu1 %v9713_v45 }
 0x1c3   : > { %3951 = vmatpush1.bf16.msra.mxu0 %v9708_v46  ;;  %4072 = vmatpush1.bf16.msra.mxu1 %v9711_v47  ;;  %v9776_v46 = vld [vmem:[#allocation5 + $0xf4] ss:$8 sps:$4 sm:$0xff]  }
 0x1c4   : > { %3952 = vmatprep.subr.bf16.mxu0 %v9716_v48  ;;  %4073 = vmatprep.subr.bf16.mxu1 %v9719_v49  ;;  %v9779_v47 = vld [vmem:[#allocation5 + $0x154] ss:$8 sps:$4 sm:$0xff]  }
 0x1c7   : > { %3953 = vmatpush1.bf16.msra.mxu0 %v9714_v50  ;;  %4074 = vmatpush1.bf16.msra.mxu1 %v9717_v51 }
 0x1c8   : > { %3954 = vmatprep.subr.bf16.mxu0 %v9722_v52  ;;  %4075 = vmatprep.subr.bf16.mxu1 %v9725_v53  ;;  %v9774_v53 = vld [vmem:[#allocation5 + $0xf0] ss:$8 sps:$4 sm:$0xff]  }
 0x1cb   : > { %3955 = vmatpush1.bf16.msra.mxu0 %v9720_v54  ;;  %4076 = vmatpush1.bf16.msra.mxu1 %v9723_v55  ;;  %v9777_v54 = vld [vmem:[#allocation5 + $0x150] ss:$8 sps:$4 sm:$0xff]  }
 0x1cc   : > { %4236 = vmatprep.subr.bf16.mxu0 %v9728_v56  ;;  %4340 = vmatprep.subr.bf16.mxu1 %v9731_v57  ;;  %v9782_v57 = vld [vmem:[#allocation5 + $0xe4] ss:$8 sps:$4 sm:$0xff]  }
 0x1ce   : > { %v2038_v1 = vpop.f32.mrf.mxu0  ;;  %v2159_v2 = vpop.f32.mrf.mxu1  ;;  %8584 = vmatmul.mubr.msk.bf16.vlgmr.msra.gmra.mxu0 %vm325_vm0, %v8571_v58  ;;  %8598 = vmatmul.mubr.msk.bf16.vlgmr.msra.gmra.mxu1 %vm325_vm0, %v8585_v59  ;;  %v9785_v58 = vld [vmem:[#allocation5 + $0x144] ss:$8 sps:$4 sm:$0xff]   ;;  %v9780_v59 = vld [vmem:[#allocation5 + $0xe0] ss:$8 sps:$4 sm:$0xff]  }
 0x1cf   : > { %v2045_v3 = vadd.f32 %v2038_v1, %v1924_v35  ;;  %4237 = vmatpush1.bf16.msra.mxu0 %v9726_v60  ;;  %4341 = vmatpush1.bf16.msra.mxu1 %v9729_v61  ;;  %v9762_v35 = vld [vmem:[#allocation5 + $0x110] ss:$8 sps:$4 sm:$0xff]   ;;  %v9783_v60 = vld [vmem:[#allocation5 + $0x140] ss:$8 sps:$4 sm:$0xff]   ;;  %v9788_v61 = vld [vmem:[#allocation5 + $0xd4] ss:$8 sps:$4 sm:$0xff]  }
 0x1d0   : > { %v2040_v6 = vpop.f32.mrf.mxu0  ;;  %v2161_v7 = vpop.f32.mrf.mxu1  ;;  %4238 = vmatprep.subr.bf16.mxu0 %v9734_v62  ;;  %4342 = vmatprep.subr.bf16.mxu1 %v9737_v63  ;;  %v9791_v62 = vld [vmem:[#allocation5 + $0x134] ss:$8 sps:$4 sm:$0xff]   ;;  %v9786_v63 = vld [vmem:[#allocation5 + $0xd0] ss:$8 sps:$4 sm:$0xff]  }
 0x1d1   : > { %v2166_v10 = vadd.f32 %v2159_v2, %v2045_v3  ;;  %v2046_v11 = vadd.f32 %v2040_v6, %v1925_v39  ;;  %4264 = vmatprep.mubr.bf16.mxu0 %v10475_v0  ;;  %4368 = vmatprep.mubr.bf16.mxu1 %v10475_v0  ;;  %v9789_v1 = vld [vmem:[#allocation5 + $0x130] ss:$8 sps:$4 sm:$0xff]   ;;  %v9794_v2 = vld [vmem:[#allocation5 + $0xc4] ss:$8 sps:$4 sm:$0xff]   ;;  %v9800_v6 = vld [vmem:[#allocation5 + $0x1d4] ss:$8 sps:$4 sm:$0xff]  }
 0x1d2   : > { %v2042_v12 = vpop.f32.mrf.mxu0  ;;  %v2163_v13 = vpop.f32.mrf.mxu1  ;;  %v9797_v3 = vld [vmem:[#allocation5 + $0x124] ss:$8 sps:$4 sm:$0xff]  }
 0x1d3   : > { %v2167_v14 = vadd.f32 %v2161_v7, %v2046_v11  ;;  %4239 = vmatpush1.bf16.msra.mxu0 %v9732_v4  ;;  %4343 = vmatpush1.bf16.msra.mxu1 %v9735_v5  ;;  %v9792_v4 = vld [vmem:[#allocation5 + $0xc0] ss:$8 sps:$4 sm:$0xff]   ;;  %v9803_v7 = vld [vmem:[#allocation5 + $0x234] ss:$8 sps:$4 sm:$0xff]   ;;  %v9801_v11 = vld [vmem:[#allocation5 + $0x230] ss:$8 sps:$4 sm:$0xff]  }
 0x1d4   : > { %v2043_v17 = vpop.f32.mrf.mxu0  ;;  %v2164_v18 = vpop.f32.mrf.mxu1  ;;  %4240 = vmatprep.subr.bf16.mxu0 %v9740_v8  ;;  %4344 = vmatprep.subr.bf16.mxu1 %v9743_v9  ;;  %v9795_v5 = vld [vmem:[#allocation5 + $0x120] ss:$8 sps:$4 sm:$0xff]   ;;  %v9806_v12 = vld [vmem:[#allocation5 + $0x1c4] ss:$8 sps:$4 sm:$0xff]  }
 0x1d5   : > { %v8629_v8 = vld [vmem:[%s10626_s6 + $0x22] sm:$0x1]  ;;  %v8643_v9 = vld [vmem:[%s10626_s6 + $0x23] sm:$0x1]  ;;  %v9809_v13 = vld [vmem:[#allocation5 + $0x224] ss:$8 sps:$4 sm:$0xff]  }
 0x1d6   : > { %v9804_v17 = vld [vmem:[#allocation5 + $0x1c0] ss:$8 sps:$4 sm:$0xff]  }
 0x1d7   : > { %4241 = vmatpush1.bf16.msra.mxu0 %v9738_v15  ;;  %4345 = vmatpush1.bf16.msra.mxu1 %v9741_v16  ;;  %v9807_v18 = vld [vmem:[#allocation5 + $0x220] ss:$8 sps:$4 sm:$0xff]  }
 0x1d8   : > { %4242 = vmatprep.subr.bf16.mxu0 %v9746_v19  ;;  %4346 = vmatprep.subr.bf16.mxu1 %v9749_v20 }
 0x1db   : > { %4243 = vmatpush1.bf16.msra.mxu0 %v9744_v21  ;;  %4347 = vmatpush1.bf16.msra.mxu1 %v9747_v22  ;;  %v9812_v21 = vld [vmem:[#allocation5 + $0x1b4] ss:$8 sps:$4 sm:$0xff]  }
 0x1dc   : > { %4244 = vmatprep.subr.bf16.mxu0 %v9752_v23  ;;  %4348 = vmatprep.subr.bf16.mxu1 %v9755_v24  ;;  %v9815_v22 = vld [vmem:[#allocation5 + $0x214] ss:$8 sps:$4 sm:$0xff]  }
 0x1df   : > { %4245 = vmatpush1.bf16.msra.mxu0 %v9750_v25  ;;  %4349 = vmatpush1.bf16.msra.mxu1 %v9753_v26 }
 0x1e0   : > { %4246 = vmatprep.subr.bf16.mxu0 %v9758_v27  ;;  %4350 = vmatprep.subr.bf16.mxu1 %v9761_v28  ;;  %v9810_v28 = vld [vmem:[#allocation5 + $0x1b0] ss:$8 sps:$4 sm:$0xff]  }
 0x1e3   : > { %4247 = vmatpush1.bf16.msra.mxu0 %v9756_v29  ;;  %4351 = vmatpush1.bf16.msra.mxu1 %v9759_v30  ;;  %v9813_v29 = vld [vmem:[#allocation5 + $0x210] ss:$8 sps:$4 sm:$0xff]  }
 0x1e4   : > { %4458 = vmatprep.subr.bf16.mxu0 %v9764_v31  ;;  %4578 = vmatprep.subr.bf16.mxu1 %v9767_v32  ;;  %v9818_v32 = vld [vmem:[#allocation5 + $0x1a4] ss:$8 sps:$4 sm:$0xff]  }
 0x1e6   : > { %v2280_v39 = vpop.f32.mrf.mxu0  ;;  %v2401_v40 = vpop.f32.mrf.mxu1  ;;  %8615 = vmatmul.mubr.msk.bf16.vlgmr.msra.gmra.mxu0 %vm325_vm0, %v8602_v33  ;;  %8628 = vmatmul.mubr.msk.bf16.vlgmr.msra.gmra.mxu1 %vm325_vm0, %v8601_v34  ;;  %v9821_v33 = vld [vmem:[#allocation5 + $0x204] ss:$8 sps:$4 sm:$0xff]   ;;  %v9816_v34 = vld [vmem:[#allocation5 + $0x1a0] ss:$8 sps:$4 sm:$0xff]  }
 0x1e7   : > { %v2287_v41 = vadd.f32 %v2280_v39, %v2166_v10  ;;  %4459 = vmatpush1.bf16.msra.mxu0 %v9762_v35  ;;  %4579 = vmatpush1.bf16.msra.mxu1 %v9765_v36  ;;  %v9798_v10 = vld [vmem:[#allocation5 + $0x1d0] ss:$8 sps:$4 sm:$0xff]   ;;  %v9819_v35 = vld [vmem:[#allocation5 + $0x200] ss:$8 sps:$4 sm:$0xff]   ;;  %v9824_v36 = vld [vmem:[#allocation5 + $0x194] ss:$8 sps:$4 sm:$0xff]  }
 0x1e8   : > { %v2282_v44 = vpop.f32.mrf.mxu0  ;;  %v2403_v45 = vpop.f32.mrf.mxu1  ;;  %4460 = vmatprep.subr.bf16.mxu0 %v9770_v37  ;;  %4580 = vmatprep.subr.bf16.mxu1 %v9773_v38  ;;  %v9827_v37 = vld [vmem:[#allocation5 + $0x1f4] ss:$8 sps:$4 sm:$0xff]   ;;  %v9822_v38 = vld [vmem:[#allocation5 + $0x190] ss:$8 sps:$4 sm:$0xff]  }
 0x1e9   : > { %v2408_v48 = vadd.f32 %v2401_v40, %v2287_v41  ;;  %v2288_v49 = vadd.f32 %v2282_v44, %v2167_v14  ;;  %4486 = vmatprep.mubr.bf16.mxu0 %v10475_v0  ;;  %4606 = vmatprep.mubr.bf16.mxu1 %v10475_v0  ;;  %v9825_v39 = vld [vmem:[#allocation5 + $0x1f0] ss:$8 sps:$4 sm:$0xff]   ;;  %v9830_v40 = vld [vmem:[#allocation5 + $0x184] ss:$8 sps:$4 sm:$0xff]   ;;  %v9836_v44 = vld [vmem:[#allocation5 + $0x294] ss:$8 sps:$4 sm:$0xff]  }
 0x1ea   : > { %v2284_v50 = vpop.f32.mrf.mxu0  ;;  %v2405_v51 = vpop.f32.mrf.mxu1  ;;  %v9833_v41 = vld [vmem:[#allocation5 + $0x1e4] ss:$8 sps:$4 sm:$0xff]  }
 0x1eb   : > { %v2409_v52 = vadd.f32 %v2403_v45, %v2288_v49  ;;  %4461 = vmatpush1.bf16.msra.mxu0 %v9768_v42  ;;  %4581 = vmatpush1.bf16.msra.mxu1 %v9771_v43  ;;  %v9828_v42 = vld [vmem:[#allocation5 + $0x180] ss:$8 sps:$4 sm:$0xff]   ;;  %v9839_v45 = vld [vmem:[#allocation5 + $0x2f4] ss:$8 sps:$4 sm:$0xff]   ;;  %v9837_v49 = vld [vmem:[#allocation5 + $0x2f0] ss:$8 sps:$4 sm:$0xff]  }
 0x1ec   : > { %v2285_v55 = vpop.f32.mrf.mxu0  ;;  %v2406_v56 = vpop.f32.mrf.mxu1  ;;  %4462 = vmatprep.subr.bf16.mxu0 %v9776_v46  ;;  %4582 = vmatprep.subr.bf16.mxu1 %v9779_v47  ;;  %v9831_v43 = vld [vmem:[#allocation5 + $0x1e0] ss:$8 sps:$4 sm:$0xff]   ;;  %v8657_v46 = vld [vmem:[%s10626_s6 + $0x24] sm:$0x1]  ;;  %v8671_v47 = vld [vmem:[%s10626_s6 + $0x25] sm:$0x1] }
 0x1ed   : > { %v9842_v50 = vld [vmem:[#allocation5 + $0x284] ss:$8 sps:$4 sm:$0xff]  }
 0x1ee   : > { %v9845_v51 = vld [vmem:[#allocation5 + $0x2e4] ss:$8 sps:$4 sm:$0xff]  }
 0x1ef   : > { %4463 = vmatpush1.bf16.msra.mxu0 %v9774_v53  ;;  %4583 = vmatpush1.bf16.msra.mxu1 %v9777_v54  ;;  %v9843_v53 = vld [vmem:[#allocation5 + $0x2e0] ss:$8 sps:$4 sm:$0xff]  }
 0x1f0   : > { %4464 = vmatprep.subr.bf16.mxu0 %v9782_v57  ;;  %4584 = vmatprep.subr.bf16.mxu1 %v9785_v58 }
 0x1f3   : > { %4465 = vmatpush1.bf16.msra.mxu0 %v9780_v59  ;;  %4585 = vmatpush1.bf16.msra.mxu1 %v9783_v60  ;;  %v9848_v59 = vld [vmem:[#allocation5 + $0x274] ss:$8 sps:$4 sm:$0xff]  }
 0x1f4   : > { %4466 = vmatprep.subr.bf16.mxu0 %v9788_v61  ;;  %4586 = vmatprep.subr.bf16.mxu1 %v9791_v62  ;;  %v9851_v60 = vld [vmem:[#allocation5 + $0x2d4] ss:$8 sps:$4 sm:$0xff]  }
 0x1f7   : > { %4467 = vmatpush1.bf16.msra.mxu0 %v9786_v63  ;;  %4587 = vmatpush1.bf16.msra.mxu1 %v9789_v1  ;;  %v9846_v63 = vld [vmem:[#allocation5 + $0x270] ss:$8 sps:$4 sm:$0xff]  }
 0x1f8   : > { %4468 = vmatprep.subr.bf16.mxu0 %v9794_v2  ;;  %4588 = vmatprep.subr.bf16.mxu1 %v9797_v3  ;;  %v9849_v1 = vld [vmem:[#allocation5 + $0x2d0] ss:$8 sps:$4 sm:$0xff]  }
 0x1fb   : > { %4469 = vmatpush1.bf16.msra.mxu0 %v9792_v4  ;;  %4589 = vmatpush1.bf16.msra.mxu1 %v9795_v5 }
 0x1fc   : > { %4698 = vmatprep.subr.bf16.mxu0 %v9800_v6  ;;  %4818 = vmatprep.subr.bf16.mxu1 %v9803_v7  ;;  %v9854_v7 = vld [vmem:[#allocation5 + $0x264] ss:$8 sps:$4 sm:$0xff]  }
 0x1fe   : > { %v2522_v14 = vpop.f32.mrf.mxu0  ;;  %v2643_v15 = vpop.f32.mrf.mxu1  ;;  %8642 = vmatmul.mubr.msk.bf16.vlgmr.msra.gmra.mxu0 %vm325_vm0, %v8629_v8  ;;  %8656 = vmatmul.mubr.msk.bf16.vlgmr.msra.gmra.mxu1 %vm325_vm0, %v8643_v9  ;;  %v9857_v8 = vld [vmem:[#allocation5 + $0x2c4] ss:$8 sps:$4 sm:$0xff]   ;;  %v9852_v9 = vld [vmem:[#allocation5 + $0x260] ss:$8 sps:$4 sm:$0xff]  }
 0x1ff   : > { %v2529_v16 = vadd.f32 %v2522_v14, %v2408_v48  ;;  %4699 = vmatpush1.bf16.msra.mxu0 %v9798_v10  ;;  %4819 = vmatpush1.bf16.msra.mxu1 %v9801_v11  ;;  %v9834_v48 = vld [vmem:[#allocation5 + $0x290] ss:$8 sps:$4 sm:$0xff]   ;;  %v9855_v10 = vld [vmem:[#allocation5 + $0x2c0] ss:$8 sps:$4 sm:$0xff]   ;;  %v9860_v11 = vld [vmem:[#allocation5 + $0x254] ss:$8 sps:$4 sm:$0xff]  }
 0x200   : > { %v2524_v19 = vpop.f32.mrf.mxu0  ;;  %v2645_v20 = vpop.f32.mrf.mxu1  ;;  %4700 = vmatprep.subr.bf16.mxu0 %v9806_v12  ;;  %4820 = vmatprep.subr.bf16.mxu1 %v9809_v13  ;;  %v9863_v12 = vld [vmem:[#allocation5 + $0x2b4] ss:$8 sps:$4 sm:$0xff]   ;;  %v9858_v13 = vld [vmem:[#allocation5 + $0x250] ss:$8 sps:$4 sm:$0xff]  }
 0x201   : > { %v2650_v23 = vadd.f32 %v2643_v15, %v2529_v16  ;;  %v2530_v24 = vadd.f32 %v2524_v19, %v2409_v52  ;;  %4726 = vmatprep.mubr.bf16.mxu0 %v10475_v0  ;;  %4846 = vmatprep.mubr.bf16.mxu1 %v10475_v0  ;;  %v9840_v52 = vld [vmem:[#allocation5 + $0x280] ss:$8 sps:$4 sm:$0xff]   ;;  %v9861_v14 = vld [vmem:[#allocation5 + $0x2b0] ss:$8 sps:$4 sm:$0xff]   ;;  %v9866_v15 = vld [vmem:[#allocation5 + $0x244] ss:$8 sps:$4 sm:$0xff]  }
 0x202   : > { %v2526_v25 = vpop.f32.mrf.mxu0  ;;  %v2647_v26 = vpop.f32.mrf.mxu1  ;;  %v9869_v16 = vld [vmem:[#allocation5 + $0x2a4] ss:$8 sps:$4 sm:$0xff]   ;;  %v9872_v19 = vld [vmem:[#allocation5 + $0x354] ss:$8 sps:$4 sm:$0xff]  }
 0x203   : > { %v2651_v27 = vadd.f32 %v2645_v20, %v2530_v24  ;;  %4701 = vmatpush1.bf16.msra.mxu0 %v9804_v17  ;;  %4821 = vmatpush1.bf16.msra.mxu1 %v9807_v18  ;;  %v9864_v17 = vld [vmem:[#allocation5 + $0x240] ss:$8 sps:$4 sm:$0xff]   ;;  %v9875_v20 = vld [vmem:[#allocation5 + $0x3b4] ss:$8 sps:$4 sm:$0xff]   ;;  %v9873_v24 = vld [vmem:[#allocation5 + $0x3b0] ss:$8 sps:$4 sm:$0xff]  }
 0x204   : > { %v2527_v30 = vpop.f32.mrf.mxu0  ;;  %v2648_v31 = vpop.f32.mrf.mxu1  ;;  %4702 = vmatprep.subr.bf16.mxu0 %v9812_v21  ;;  %4822 = vmatprep.subr.bf16.mxu1 %v9815_v22  ;;  %v9867_v18 = vld [vmem:[#allocation5 + $0x2a0] ss:$8 sps:$4 sm:$0xff]   ;;  %v8685_v21 = vld [vmem:[%s10626_s6 + $0x26] sm:$0x1]  ;;  %v8699_v22 = vld [vmem:[%s10626_s6 + $0x27] sm:$0x1] }
 0x205   : > { %v9878_v25 = vld [vmem:[#allocation5 + $0x344] ss:$8 sps:$4 sm:$0xff]   ;;  %v9876_v30 = vld [vmem:[#allocation5 + $0x340] ss:$8 sps:$4 sm:$0xff]  }
 0x206   : > { %v9881_v26 = vld [vmem:[#allocation5 + $0x3a4] ss:$8 sps:$4 sm:$0xff]   ;;  %v9879_v31 = vld [vmem:[#allocation5 + $0x3a0] ss:$8 sps:$4 sm:$0xff]  }
 0x207   : > { %4703 = vmatpush1.bf16.msra.mxu0 %v9810_v28  ;;  %4823 = vmatpush1.bf16.msra.mxu1 %v9813_v29 }
 0x208   : > { %4704 = vmatprep.subr.bf16.mxu0 %v9818_v32  ;;  %4824 = vmatprep.subr.bf16.mxu1 %v9821_v33 }
 0x20b   : > { %4705 = vmatpush1.bf16.msra.mxu0 %v9816_v34  ;;  %4825 = vmatpush1.bf16.msra.mxu1 %v9819_v35  ;;  %v9884_v34 = vld [vmem:[#allocation5 + $0x334] ss:$8 sps:$4 sm:$0xff]  }
 0x20c   : > { %4706 = vmatprep.subr.bf16.mxu0 %v9824_v36  ;;  %4826 = vmatprep.subr.bf16.mxu1 %v9827_v37  ;;  %v9887_v35 = vld [vmem:[#allocation5 + $0x394] ss:$8 sps:$4 sm:$0xff]  }
 0x20f   : > { %4707 = vmatpush1.bf16.msra.mxu0 %v9822_v38  ;;  %4827 = vmatpush1.bf16.msra.mxu1 %v9825_v39 }
 0x210   : > { %4708 = vmatprep.subr.bf16.mxu0 %v9830_v40  ;;  %4828 = vmatprep.subr.bf16.mxu1 %v9833_v41  ;;  %v9882_v41 = vld [vmem:[#allocation5 + $0x330] ss:$8 sps:$4 sm:$0xff]  }
 0x213   : > { %4709 = vmatpush1.bf16.msra.mxu0 %v9828_v42  ;;  %4829 = vmatpush1.bf16.msra.mxu1 %v9831_v43  ;;  %v9885_v42 = vld [vmem:[#allocation5 + $0x390] ss:$8 sps:$4 sm:$0xff]  }
 0x214   : > { %4938 = vmatprep.subr.bf16.mxu0 %v9836_v44  ;;  %5058 = vmatprep.subr.bf16.mxu1 %v9839_v45  ;;  %v9890_v45 = vld [vmem:[#allocation5 + $0x324] ss:$8 sps:$4 sm:$0xff]  }
 0x216   : > { %v2764_v54 = vpop.f32.mrf.mxu0  ;;  %v2885_v55 = vpop.f32.mrf.mxu1  ;;  %8670 = vmatmul.mubr.msk.bf16.vlgmr.msra.gmra.mxu0 %vm325_vm0, %v8657_v46  ;;  %8684 = vmatmul.mubr.msk.bf16.vlgmr.msra.gmra.mxu1 %vm325_vm0, %v8671_v47  ;;  %v9893_v46 = vld [vmem:[#allocation5 + $0x384] ss:$8 sps:$4 sm:$0xff]   ;;  %v9888_v47 = vld [vmem:[#allocation5 + $0x320] ss:$8 sps:$4 sm:$0xff]  }
 0x217   : > { %v2771_v56 = vadd.f32 %v2764_v54, %v2650_v23  ;;  %4939 = vmatpush1.bf16.msra.mxu0 %v9834_v48  ;;  %5059 = vmatpush1.bf16.msra.mxu1 %v9837_v49  ;;  %v9870_v23 = vld [vmem:[#allocation5 + $0x350] ss:$8 sps:$4 sm:$0xff]   ;;  %v9891_v48 = vld [vmem:[#allocation5 + $0x380] ss:$8 sps:$4 sm:$0xff]   ;;  %v9896_v49 = vld [vmem:[#allocation5 + $0x314] ss:$8 sps:$4 sm:$0xff]  }
 0x218   : > { %v2766_v57 = vpop.f32.mrf.mxu0  ;;  %v2887_v58 = vpop.f32.mrf.mxu1  ;;  %4940 = vmatprep.subr.bf16.mxu0 %v9842_v50  ;;  %5060 = vmatprep.subr.bf16.mxu1 %v9845_v51  ;;  %v9899_v50 = vld [vmem:[#allocation5 + $0x374] ss:$8 sps:$4 sm:$0xff]   ;;  %v9894_v51 = vld [vmem:[#allocation5 + $0x310] ss:$8 sps:$4 sm:$0xff]   ;;  %v9905_v54 = vld [vmem:[#allocation5 + $0x364] ss:$8 sps:$4 sm:$0xff]  }
 0x219   : > { %v2892_v61 = vadd.f32 %v2885_v55, %v2771_v56  ;;  %v2772_v62 = vadd.f32 %v2766_v57, %v2651_v27  ;;  %4966 = vmatprep.mubr.bf16.mxu0 %v10475_v0  ;;  %5086 = vmatprep.mubr.bf16.mxu1 %v10475_v0  ;;  %v9900_v55 = vld [vmem:[#allocation5 + $0x300] ss:$8 sps:$4 sm:$0xff]   ;;  %v9908_v57 = vld [vmem:[#allocation5 + $0x414] ss:$8 sps:$4 sm:$0xff]  }
 0x21a   : > { %v2768_v2 = vpop.f32.mrf.mxu0  ;;  %v2889_v3 = vpop.f32.mrf.mxu1  ;;  %v9903_v56 = vld [vmem:[#allocation5 + $0x360] ss:$8 sps:$4 sm:$0xff]  }
 0x21b   : > { %v2893_v4 = vadd.f32 %v2887_v58, %v2772_v62  ;;  %4941 = vmatpush1.bf16.msra.mxu0 %v9840_v52  ;;  %5061 = vmatpush1.bf16.msra.mxu1 %v9843_v53  ;;  %v9897_v52 = vld [vmem:[#allocation5 + $0x370] ss:$8 sps:$4 sm:$0xff]   ;;  %v9902_v53 = vld [vmem:[#allocation5 + $0x304] ss:$8 sps:$4 sm:$0xff]   ;;  %v9911_v58 = vld [vmem:[#allocation5 + $0x474] ss:$8 sps:$4 sm:$0xff]  }
 0x21c   : > { %v2769_v5 = vpop.f32.mrf.mxu0  ;;  %v2890_v6 = vpop.f32.mrf.mxu1  ;;  %4942 = vmatprep.subr.bf16.mxu0 %v9848_v59  ;;  %5062 = vmatprep.subr.bf16.mxu1 %v9851_v60  ;;  %v8713_v59 = vld [vmem:[%s10626_s6 + $0x28] sm:$0x1]  ;;  %v8727_v60 = vld [vmem:[%s10626_s6 + $0x29] sm:$0x1]  ;;  %v9909_v62 = vld [vmem:[#allocation5 + $0x470] ss:$8 sps:$4 sm:$0xff]  }
 0x21d   : > { %v9912_v5 = vld [vmem:[#allocation5 + $0x400] ss:$8 sps:$4 sm:$0xff]  }
 0x21e   : > { %v9915_v6 = vld [vmem:[#allocation5 + $0x460] ss:$8 sps:$4 sm:$0xff]  }
 0x21f   : > { %4943 = vmatpush1.bf16.msra.mxu0 %v9846_v63  ;;  %5063 = vmatpush1.bf16.msra.mxu1 %v9849_v1  ;;  %v9914_v63 = vld [vmem:[#allocation5 + $0x404] ss:$8 sps:$4 sm:$0xff]  }
 0x220   : > { %4944 = vmatprep.subr.bf16.mxu0 %v9854_v7  ;;  %5064 = vmatprep.subr.bf16.mxu1 %v9857_v8  ;;  %v9917_v1 = vld [vmem:[#allocation5 + $0x464] ss:$8 sps:$4 sm:$0xff]  }
 0x223   : > { %4945 = vmatpush1.bf16.msra.mxu0 %v9852_v9  ;;  %5065 = vmatpush1.bf16.msra.mxu1 %v9855_v10  ;;  %v9920_v9 = vld [vmem:[#allocation5 + $0x3f4] ss:$8 sps:$4 sm:$0xff]  }
 0x224   : > { %4946 = vmatprep.subr.bf16.mxu0 %v9860_v11  ;;  %5066 = vmatprep.subr.bf16.mxu1 %v9863_v12  ;;  %v9923_v10 = vld [vmem:[#allocation5 + $0x454] ss:$8 sps:$4 sm:$0xff]  }
 0x227   : > { %4947 = vmatpush1.bf16.msra.mxu0 %v9858_v13  ;;  %5067 = vmatpush1.bf16.msra.mxu1 %v9861_v14  ;;  %v9918_v14 = vld [vmem:[#allocation5 + $0x3f0] ss:$8 sps:$4 sm:$0xff]  }
 0x228   : > { %4948 = vmatprep.subr.bf16.mxu0 %v9866_v15  ;;  %5068 = vmatprep.subr.bf16.mxu1 %v9869_v16  ;;  %v9921_v15 = vld [vmem:[#allocation5 + $0x450] ss:$8 sps:$4 sm:$0xff]  }
 0x22b   : > { %4949 = vmatpush1.bf16.msra.mxu0 %v9864_v17  ;;  %5069 = vmatpush1.bf16.msra.mxu1 %v9867_v18  ;;  %v9926_v18 = vld [vmem:[#allocation5 + $0x3e4] ss:$8 sps:$4 sm:$0xff]  }
 0x22c   : > { %5178 = vmatprep.subr.bf16.mxu0 %v9872_v19  ;;  %5298 = vmatprep.subr.bf16.mxu1 %v9875_v20  ;;  %v9929_v19 = vld [vmem:[#allocation5 + $0x444] ss:$8 sps:$4 sm:$0xff]   ;;  %v9924_v20 = vld [vmem:[#allocation5 + $0x3e0] ss:$8 sps:$4 sm:$0xff]  }
 0x22e   : > { %v3006_v27 = vpop.f32.mrf.mxu0  ;;  %v3127_v28 = vpop.f32.mrf.mxu1  ;;  %8698 = vmatmul.mubr.msk.bf16.vlgmr.msra.gmra.mxu0 %vm325_vm0, %v8685_v21  ;;  %8712 = vmatmul.mubr.msk.bf16.vlgmr.msra.gmra.mxu1 %vm325_vm0, %v8699_v22  ;;  %v9927_v21 = vld [vmem:[#allocation5 + $0x440] ss:$8 sps:$4 sm:$0xff]   ;;  %v9932_v22 = vld [vmem:[#allocation5 + $0x3d4] ss:$8 sps:$4 sm:$0xff]  }
 0x22f   : > { %v3013_v29 = vadd.f32 %v3006_v27, %v2892_v61  ;;  %5179 = vmatpush1.bf16.msra.mxu0 %v9870_v23  ;;  %5299 = vmatpush1.bf16.msra.mxu1 %v9873_v24  ;;  %v9906_v61 = vld [vmem:[#allocation5 + $0x410] ss:$8 sps:$4 sm:$0xff]   ;;  %v9935_v23 = vld [vmem:[#allocation5 + $0x434] ss:$8 sps:$4 sm:$0xff]   ;;  %v9941_v27 = vld [vmem:[#allocation5 + $0x424] ss:$8 sps:$4 sm:$0xff]  }
 0x230   : > { %v3008_v32 = vpop.f32.mrf.mxu0  ;;  %v3129_v33 = vpop.f32.mrf.mxu1  ;;  %5180 = vmatprep.subr.bf16.mxu0 %v9878_v25  ;;  %5300 = vmatprep.subr.bf16.mxu1 %v9881_v26  ;;  %v9930_v24 = vld [vmem:[#allocation5 + $0x3d0] ss:$8 sps:$4 sm:$0xff]   ;;  %v9938_v26 = vld [vmem:[#allocation5 + $0x3c4] ss:$8 sps:$4 sm:$0xff]  }
 0x231   : > { %v3134_v36 = vadd.f32 %v3127_v28, %v3013_v29  ;;  %v3014_v37 = vadd.f32 %v3008_v32, %v2893_v4  ;;  %5206 = vmatprep.mubr.bf16.mxu0 %v10475_v0  ;;  %5326 = vmatprep.mubr.bf16.mxu1 %v10475_v0  ;;  %v9933_v25 = vld [vmem:[#allocation5 + $0x430] ss:$8 sps:$4 sm:$0xff]   ;;  %v9936_v28 = vld [vmem:[#allocation5 + $0x3c0] ss:$8 sps:$4 sm:$0xff]  }
 0x232   : > { %v3010_v38 = vpop.f32.mrf.mxu0  ;;  %v3131_v39 = vpop.f32.mrf.mxu1  ;;  %v9939_v29 = vld [vmem:[#allocation5 + $0x420] ss:$8 sps:$4 sm:$0xff]  }
 0x233   : > { %v10764_v40 = vadd.f32 %v3129_v33, %v3014_v37  ;;  %5181 = vmatpush1.bf16.msra.mxu0 %v9876_v30  ;;  %5301 = vmatpush1.bf16.msra.mxu1 %v9879_v31  ;;  %v9944_v30 = vld [vmem:[#allocation5 + $0x4d4] ss:$8 sps:$4 sm:$0xff]   ;;  %v8741_v32 = vld [vmem:[%s10626_s6 + $0x2a] sm:$0x1]  ;;  %v8755_v33 = vld [vmem:[%s10626_s6 + $0x2b] sm:$0x1] }
 0x234   : > { %v3011_v43 = vpop.f32.mrf.mxu0  ;;  %v3132_v44 = vpop.f32.mrf.mxu1  ;;  %5182 = vmatprep.subr.bf16.mxu0 %v9884_v34  ;;  %5302 = vmatprep.subr.bf16.mxu1 %v9887_v35  ;;  %v9947_v31 = vld [vmem:[#allocation5 + $0x534] ss:$8 sps:$4 sm:$0xff]   ;;  %v9942_v34 = vld [vmem:[#allocation5 + $0x4d0] ss:$8 sps:$4 sm:$0xff]   ;;  %v9953_v37 = vld [vmem:[#allocation5 + $0x524] ss:$8 sps:$4 sm:$0xff]  }
 0x235   : > { %v9945_v35 = vld [vmem:[#allocation5 + $0x530] ss:$8 sps:$4 sm:$0xff]  }
 0x237   : > { %5183 = vmatpush1.bf16.msra.mxu0 %v9882_v41  ;;  %5303 = vmatpush1.bf16.msra.mxu1 %v9885_v42  ;;  %v9948_v41 = vld [vmem:[#allocation5 + $0x4c0] ss:$8 sps:$4 sm:$0xff]  }
 0x238   : > { %5184 = vmatprep.subr.bf16.mxu0 %v9890_v45  ;;  %5304 = vmatprep.subr.bf16.mxu1 %v9893_v46  ;;  %v9951_v42 = vld [vmem:[#allocation5 + $0x520] ss:$8 sps:$4 sm:$0xff]   ;;  %v9956_v45 = vld [vmem:[#allocation5 + $0x4b4] ss:$8 sps:$4 sm:$0xff]  }
 0x239   : > { %v9959_v46 = vld [vmem:[#allocation5 + $0x514] ss:$8 sps:$4 sm:$0xff]  }
 0x23b   : > { %5185 = vmatpush1.bf16.msra.mxu0 %v9888_v47  ;;  %5305 = vmatpush1.bf16.msra.mxu1 %v9891_v48 }
 0x23c   : > { %5186 = vmatprep.subr.bf16.mxu0 %v9896_v49  ;;  %5306 = vmatprep.subr.bf16.mxu1 %v9899_v50  ;;  %v9954_v49 = vld [vmem:[#allocation5 + $0x4b0] ss:$8 sps:$4 sm:$0xff]  }
 0x23d   : > { %v9957_v50 = vld [vmem:[#allocation5 + $0x510] ss:$8 sps:$4 sm:$0xff]  }
 0x23f   : > { %5187 = vmatpush1.bf16.msra.mxu0 %v9894_v51  ;;  %5307 = vmatpush1.bf16.msra.mxu1 %v9897_v52 }
 0x240   : > { %5188 = vmatprep.subr.bf16.mxu0 %v9902_v53  ;;  %5308 = vmatprep.subr.bf16.mxu1 %v9905_v54  ;;  %v9962_v53 = vld [vmem:[#allocation5 + $0x4a4] ss:$8 sps:$4 sm:$0xff]  }
 0x241   : > { %v9965_v54 = vld [vmem:[#allocation5 + $0x504] ss:$8 sps:$4 sm:$0xff]  }
 0x243   : > { %5189 = vmatpush1.bf16.msra.mxu0 %v9900_v55  ;;  %5309 = vmatpush1.bf16.msra.mxu1 %v9903_v56  ;;  %v9960_v55 = vld [vmem:[#allocation5 + $0x4a0] ss:$8 sps:$4 sm:$0xff]  }
 0x244   : > { %5418 = vmatprep.subr.bf16.mxu0 %v9908_v57  ;;  %5538 = vmatprep.subr.bf16.mxu1 %v9911_v58  ;;  %v9963_v56 = vld [vmem:[#allocation5 + $0x500] ss:$8 sps:$4 sm:$0xff]   ;;  %v9968_v57 = vld [vmem:[#allocation5 + $0x494] ss:$8 sps:$4 sm:$0xff]  }
 0x245   : > { %v9971_v58 = vld [vmem:[#allocation5 + $0x4f4] ss:$8 sps:$4 sm:$0xff]  }
 0x246   : > { %v3248_v2 = vpop.f32.mrf.mxu0  ;;  %v3369_v3 = vpop.f32.mrf.mxu1  ;;  %8726 = vmatmul.mubr.msk.bf16.vlgmr.msra.gmra.mxu0 %vm325_vm0, %v8713_v59  ;;  %8740 = vmatmul.mubr.msk.bf16.vlgmr.msra.gmra.mxu1 %vm325_vm0, %v8727_v60  ;;  %v9966_v59 = vld [vmem:[#allocation5 + $0x490] ss:$8 sps:$4 sm:$0xff]  }
 0x247   : > { %v3255_v4 = vadd.f32 %v3248_v2, %v3134_v36  ;;  %5419 = vmatpush1.bf16.msra.mxu0 %v9906_v61  ;;  %5539 = vmatpush1.bf16.msra.mxu1 %v9909_v62  ;;  %v9950_v36 = vld [vmem:[#allocation5 + $0x4c4] ss:$8 sps:$4 sm:$0xff]   ;;  %v9969_v60 = vld [vmem:[#allocation5 + $0x4f0] ss:$8 sps:$4 sm:$0xff]   ;;  %v9980_v2 = vld [vmem:[#allocation5 + $0x594] ss:$8 sps:$4 sm:$0xff]  }
 0x248   : > { %v10770_v7 = vpop.f32.mrf.mxu0  ;;  %v10772_v8 = vpop.f32.mrf.mxu1  ;;  %5420 = vmatprep.subr.bf16.mxu0 %v9914_v63  ;;  %5540 = vmatprep.subr.bf16.mxu1 %v9917_v1  ;;  %v9974_v61 = vld [vmem:[#allocation5 + $0x484] ss:$8 sps:$4 sm:$0xff]   ;;  %v9972_v63 = vld [vmem:[#allocation5 + $0x480] ss:$8 sps:$4 sm:$0xff]  }
 0x249   : > { %v10774_v11 = vadd.f32 %v3369_v3, %v3255_v4  ;;  %5446 = vmatprep.mubr.bf16.mxu0 %v10475_v0  ;;  %5566 = vmatprep.mubr.bf16.mxu1 %v10475_v0  ;;  %v9977_v62 = vld [vmem:[#allocation5 + $0x4e4] ss:$8 sps:$4 sm:$0xff]   ;;  %v9975_v1 = vld [vmem:[#allocation5 + $0x4e0] ss:$8 sps:$4 sm:$0xff]   ;;  %v9983_v3 = vld [vmem:[#allocation5 + $0x5f4] ss:$8 sps:$4 sm:$0xff]  }
 0x24a   : > { %v3252_v12 = vpop.f32.mrf.mxu0  ;;  %v3373_v13 = vpop.f32.mrf.mxu1  ;;  %v8769_v4 = vld [vmem:[%s10626_s6 + $0x2c] sm:$0x1] }
 0x24b   : > { %5421 = vmatpush1.bf16.msra.mxu0 %v9912_v5  ;;  %5541 = vmatpush1.bf16.msra.mxu1 %v9915_v6  ;;  %v8783_v5 = vld [vmem:[%s10626_s6 + $0x2d] sm:$0x1]  ;;  %v9978_v6 = vld [vmem:[#allocation5 + $0x590] ss:$8 sps:$4 sm:$0xff]  }
 0x24c   : > { %v3253_v16 = vpop.f32.mrf.mxu0  ;;  %v3374_v17 = vpop.f32.mrf.mxu1  ;;  %5422 = vmatprep.subr.bf16.mxu0 %v9920_v9  ;;  %5542 = vmatprep.subr.bf16.mxu1 %v9923_v10  ;;  %v9981_v9 = vld [vmem:[#allocation5 + $0x5f0] ss:$8 sps:$4 sm:$0xff]   ;;  %v9986_v10 = vld [vmem:[#allocation5 + $0x584] ss:$8 sps:$4 sm:$0xff]  }
 0x24d   : > { %v9989_v12 = vld [vmem:[#allocation5 + $0x5e4] ss:$8 sps:$4 sm:$0xff]   ;;  %v9987_v16 = vld [vmem:[#allocation5 + $0x5e0] ss:$8 sps:$4 sm:$0xff]  }
 0x24f   : > { %5423 = vmatpush1.bf16.msra.mxu0 %v9918_v14  ;;  %5543 = vmatpush1.bf16.msra.mxu1 %v9921_v15  ;;  %v9984_v15 = vld [vmem:[#allocation5 + $0x580] ss:$8 sps:$4 sm:$0xff]  }
 0x250   : > { %5424 = vmatprep.subr.bf16.mxu0 %v9926_v18  ;;  %5544 = vmatprep.subr.bf16.mxu1 %v9929_v19  ;;  %v9992_v19 = vld [vmem:[#allocation5 + $0x574] ss:$8 sps:$4 sm:$0xff]  }
 0x253   : > { %5425 = vmatpush1.bf16.msra.mxu0 %v9924_v20  ;;  %5545 = vmatpush1.bf16.msra.mxu1 %v9927_v21  ;;  %v9995_v20 = vld [vmem:[#allocation5 + $0x5d4] ss:$8 sps:$4 sm:$0xff]  }
 0x254   : > { %5426 = vmatprep.subr.bf16.mxu0 %v9932_v22  ;;  %5546 = vmatprep.subr.bf16.mxu1 %v9935_v23  ;;  %v9990_v23 = vld [vmem:[#allocation5 + $0x570] ss:$8 sps:$4 sm:$0xff]  }
 0x257   : > { %5427 = vmatpush1.bf16.msra.mxu0 %v9930_v24  ;;  %5547 = vmatpush1.bf16.msra.mxu1 %v9933_v25  ;;  %v9993_v24 = vld [vmem:[#allocation5 + $0x5d0] ss:$8 sps:$4 sm:$0xff]  }
 0x258   : > { %5428 = vmatprep.subr.bf16.mxu0 %v9938_v26  ;;  %5548 = vmatprep.subr.bf16.mxu1 %v9941_v27  ;;  %v9998_v27 = vld [vmem:[#allocation5 + $0x564] ss:$8 sps:$4 sm:$0xff]  }
 0x25b   : > { %5429 = vmatpush1.bf16.msra.mxu0 %v9936_v28  ;;  %5549 = vmatpush1.bf16.msra.mxu1 %v9939_v29  ;;  %v10001_v28 = vld [vmem:[#allocation5 + $0x5c4] ss:$8 sps:$4 sm:$0xff]   ;;  %v3256_v29 = vadd.f32 %v10770_v7, %v10764_v40 }
 0x25c   : > { %5658 = vmatprep.subr.bf16.mxu0 %v9944_v30  ;;  %5778 = vmatprep.subr.bf16.mxu1 %v9947_v31  ;;  %v9996_v30 = vld [vmem:[#allocation5 + $0x560] ss:$8 sps:$4 sm:$0xff]   ;;  %v10010_v40 = vld [vmem:[#allocation5 + $0x544] ss:$8 sps:$4 sm:$0xff]  }
 0x25d   : > { %v9999_v31 = vld [vmem:[#allocation5 + $0x5c0] ss:$8 sps:$4 sm:$0xff]   ;;  %v10013_v7 = vld [vmem:[#allocation5 + $0x5a4] ss:$8 sps:$4 sm:$0xff]  }
 0x25e   : > { %v10780_v38 = vpop.f32.mrf.mxu0  ;;  %v10782_v39 = vpop.f32.mrf.mxu1  ;;  %8754 = vmatmul.mubr.msk.bf16.vlgmr.msra.gmra.mxu0 %vm325_vm0, %v8741_v32  ;;  %8768 = vmatmul.mubr.msk.bf16.vlgmr.msra.gmra.mxu1 %vm325_vm0, %v8755_v33  ;;  %v10004_v32 = vld [vmem:[#allocation5 + $0x554] ss:$8 sps:$4 sm:$0xff]  }
 0x25f   : > { %5659 = vmatpush1.bf16.msra.mxu0 %v9942_v34  ;;  %5779 = vmatpush1.bf16.msra.mxu1 %v9945_v35  ;;  %v10007_v33 = vld [vmem:[#allocation5 + $0x5b4] ss:$8 sps:$4 sm:$0xff]   ;;  %v3377_v34 = vadd.f32 %v10772_v8, %v3256_v29  ;;  %v3497_v35 = vadd.f32 %v10780_v38, %v10774_v11  ;;  %v10008_v8 = vld [vmem:[#allocation5 + $0x540] ss:$8 sps:$4 sm:$0xff]  }
 0x260   : > { %v10786_v43 = vpop.f32.mrf.mxu0  ;;  %v10788_v44 = vpop.f32.mrf.mxu1  ;;  %5660 = vmatprep.subr.bf16.mxu0 %v9950_v36  ;;  %5780 = vmatprep.subr.bf16.mxu1 %v9953_v37  ;;  %v10002_v36 = vld [vmem:[#allocation5 + $0x550] ss:$8 sps:$4 sm:$0xff]   ;;  %v10016_v38 = vld [vmem:[#allocation5 + $0x654] ss:$8 sps:$4 sm:$0xff]   ;;  %v10032_v29 = vld [vmem:[#allocation5 + $0x620] ss:$8 sps:$4 sm:$0xff]  }
 0x261   : > { %5686 = vmatprep.mubr.bf16.mxu0 %v10475_v0  ;;  %5806 = vmatprep.mubr.bf16.mxu1 %v10475_v0  ;;  %v10005_v37 = vld [vmem:[#allocation5 + $0x5b0] ss:$8 sps:$4 sm:$0xff]  }
 0x262   : > { %v3494_v47 = vpop.f32.mrf.mxu0  ;;  %v3615_v48 = vpop.f32.mrf.mxu1 }
 0x263   : > { %5661 = vmatpush1.bf16.msra.mxu0 %v9948_v41  ;;  %5781 = vmatpush1.bf16.msra.mxu1 %v9951_v42  ;;  %v4106_v41 = vlaneseq  ;;  %v3498_v42 = vadd.f32 %v10786_v43, %v3377_v34  ;;  %v10019_v47 = vld [vmem:[#allocation5 + $0x6b4] ss:$8 sps:$4 sm:$0xff]  }
 0x264   : > { %v3495_v51 = vpop.f32.mrf.mxu0  ;;  %v3616_v52 = vpop.f32.mrf.mxu1  ;;  %5662 = vmatprep.subr.bf16.mxu0 %v9956_v45  ;;  %5782 = vmatprep.subr.bf16.mxu1 %v9959_v46  ;;  %v3618_v45 = vadd.f32 %v10782_v39, %v3497_v35  ;;  %v10011_v46 = vld [vmem:[#allocation5 + $0x5a0] ss:$8 sps:$4 sm:$0xff]   ;;  %v10038_v35 = vld [vmem:[#allocation5 + $0x610] ss:$8 sps:$4 sm:$0xff]  }
 0x265   : > { %v10809_v11 = vshrl.u32 %v4106_v41, 7  ;;  %v3619_v48 = vadd.f32 %v10788_v44, %v3498_v42  ;;  %v8811_v51 = vld [vmem:[%s10626_s6 + $0x2f] sm:$0x1]  ;;  %v10014_v52 = vld [vmem:[#allocation5 + $0x650] ss:$8 sps:$4 sm:$0xff]  }
 0x266   : > { %v4104_v39 = vld [vmem:[#allocation7] sm:$0x3]  ;;  %v10049_v41 = vld [vmem:[#allocation5 + $0x664] ss:$8 sps:$4 sm:$0xff]   ;;  %v10052_v42 = vld [vmem:[#allocation5 + $0x714] ss:$8 sps:$4 sm:$0xff]  }
 0x267   : > { %5663 = vmatpush1.bf16.msra.mxu0 %v9954_v49  ;;  %5783 = vmatpush1.bf16.msra.mxu1 %v9957_v50  ;;  %v8797_v50 = vld [vmem:[%s10626_s6 + $0x2e] sm:$0x1]  ;;  %v4108_v43 = vsub.s32 0, %v10809_v11 }
 0x268   : > { %5664 = vmatprep.subr.bf16.mxu0 %v9962_v53  ;;  %5784 = vmatprep.subr.bf16.mxu1 %v9965_v54  ;;  %v10017_v54 = vld [vmem:[#allocation5 + $0x6b0] ss:$8 sps:$4 sm:$0xff]  }
 0x26b   : > { %5665 = vmatpush1.bf16.msra.mxu0 %v9960_v55  ;;  %5785 = vmatpush1.bf16.msra.mxu1 %v9963_v56  ;;  %v10022_v55 = vld [vmem:[#allocation5 + $0x644] ss:$8 sps:$4 sm:$0xff]  }
 0x26c   : > { %5666 = vmatprep.subr.bf16.mxu0 %v9968_v57  ;;  %5786 = vmatprep.subr.bf16.mxu1 %v9971_v58  ;;  %v10025_v56 = vld [vmem:[#allocation5 + $0x6a4] ss:$8 sps:$4 sm:$0xff]   ;;  %v4112_v58 = vsub.s32 1, %v10809_v11 }
 0x26f   : > { %5667 = vmatpush1.bf16.msra.mxu0 %v9966_v59  ;;  %5787 = vmatpush1.bf16.msra.mxu1 %v9969_v60 }
 0x270   : > { %5668 = vmatprep.subr.bf16.mxu0 %v9974_v61  ;;  %5788 = vmatprep.subr.bf16.mxu1 %v9977_v62  ;;  %v4109_v62 = vrot.slane %v4104_v39, %v4108_v43 }
 0x273   : > { %5669 = vmatpush1.bf16.msra.mxu0 %v9972_v63  ;;  %5789 = vmatpush1.bf16.msra.mxu1 %v9975_v1  ;;  %v10476_v63 = vmov 1966171168  }
 0x274   : > { %5898 = vmatprep.subr.bf16.mxu0 %v9980_v2  ;;  %6018 = vmatprep.subr.bf16.mxu1 %v9983_v3  ;;  %v4126_v1 = vunpack.c.l.s4 %v10476_v63  ;;  %v10020_v2 = vld [vmem:[#allocation5 + $0x640] ss:$8 sps:$4 sm:$0xff]  }
 0x275   : > { %v10023_v3 = vld [vmem:[#allocation5 + $0x6a0] ss:$8 sps:$4 sm:$0xff]  }
 0x276   : > { %v3732_v13 = vpop.f32.mrf.mxu0  ;;  %v10794_v14 = vpop.f32.mrf.mxu1  ;;  %8782 = vmatmul.mubr.msk.bf16.vlgmr.msra.gmra.mxu0 %vm325_vm0, %v8769_v4  ;;  %8796 = vmatmul.mubr.msk.bf16.vlgmr.msra.gmra.mxu1 %vm325_vm0, %v8783_v5 }
 0x277   : > { %5899 = vmatpush1.bf16.msra.mxu0 %v9978_v6  ;;  %6019 = vmatpush1.bf16.msra.mxu1 %v9981_v9  ;;  %v3739_v49 = vadd.f32 %v3732_v13, %v3618_v45  ;;  %v10028_v6 = vld [vmem:[#allocation5 + $0x634] ss:$8 sps:$4 sm:$0xff]   ;;  %v4113_v13 = vrot.slane %v4104_v39, %v4112_v58  ;;  %v10059_v39 = vld [vmem:[#allocation5 + $0x760] ss:$8 sps:$4 sm:$0xff]  }
 0x278   : > { %v3734_v17 = vpop.f32.mrf.mxu0  ;;  %v10798_v18 = vpop.f32.mrf.mxu1  ;;  %5900 = vmatprep.subr.bf16.mxu0 %v9986_v10  ;;  %6020 = vmatprep.subr.bf16.mxu1 %v9989_v12  ;;  %v10031_v9 = vld [vmem:[#allocation5 + $0x694] ss:$8 sps:$4 sm:$0xff]  }
 0x279   : > { %5926 = vmatprep.mubr.bf16.mxu0 %v10475_v0  ;;  %6046 = vmatprep.mubr.bf16.mxu1 %v10475_v0  ;;  %v3740_v53 = vadd.f32 %v3734_v17, %v3619_v48  ;;  %v3860_v57 = vadd.f32 %v10794_v14, %v3739_v49  ;;  %v10055_v45 = vld [vmem:[#allocation5 + $0x774] ss:$8 sps:$4 sm:$0xff]   ;;  %v10058_v48 = vld [vmem:[#allocation5 + $0x704] ss:$8 sps:$4 sm:$0xff]  }
 0x27a   : > { %v3736_v21 = vpop.f32.mrf.mxu0  ;;  %v3857_v22 = vpop.f32.mrf.mxu1  ;;  %v10061_v49 = vld [vmem:[#allocation5 + $0x764] ss:$8 sps:$4 sm:$0xff]  }
 0x27b   : > { %5901 = vmatpush1.bf16.msra.mxu0 %v9984_v15  ;;  %6021 = vmatpush1.bf16.msra.mxu1 %v9987_v16  ;;  %v3861_v60 = vadd.f32 %v10798_v18, %v3740_v53  ;;  %v4127_v18 = vunpack.c.0.s8 %v4126_v1  ;;  %v10056_v53 = vld [vmem:[#allocation5 + $0x700] ss:$8 sps:$4 sm:$0xff]  }
 0x27c   : > { %v3737_v25 = vpop.f32.mrf.mxu0  ;;  %v3858_v26 = vpop.f32.mrf.mxu1  ;;  %5902 = vmatprep.subr.bf16.mxu0 %v9992_v19  ;;  %6022 = vmatprep.subr.bf16.mxu1 %v9995_v20  ;;  %v10026_v19 = vld [vmem:[#allocation5 + $0x630] ss:$8 sps:$4 sm:$0xff]  }
 0x27d   : > { %v10029_v20 = vld [vmem:[#allocation5 + $0x690] ss:$8 sps:$4 sm:$0xff]  }
 0x27f   : > { %5903 = vmatpush1.bf16.msra.mxu0 %v9990_v23  ;;  %6023 = vmatpush1.bf16.msra.mxu1 %v9993_v24  ;;  %v10034_v23 = vld [vmem:[#allocation5 + $0x624] ss:$8 sps:$4 sm:$0xff]  }
 0x280   : > { %5904 = vmatprep.subr.bf16.mxu0 %v9998_v27  ;;  %6024 = vmatprep.subr.bf16.mxu1 %v10001_v28  ;;  %v10037_v24 = vld [vmem:[#allocation5 + $0x684] ss:$8 sps:$4 sm:$0xff]   ;;  %v10828_v28 = vsub.s32 %v4127_v18, %v10809_v11  ;;  %v10091_v18 = vld [vmem:[#allocation5 + $0x834] ss:$8 sps:$4 sm:$0xff]  }
 0x283   : > { %5905 = vmatpush1.bf16.msra.mxu0 %v9996_v30  ;;  %6025 = vmatpush1.bf16.msra.mxu1 %v9999_v31  ;;  %v10035_v30 = vld [vmem:[#allocation5 + $0x680] ss:$8 sps:$4 sm:$0xff]   ;;  %v10040_v31 = vld [vmem:[#allocation5 + $0x614] ss:$8 sps:$4 sm:$0xff]  }
 0x284   : > { %5906 = vmatprep.subr.bf16.mxu0 %v10004_v32  ;;  %6026 = vmatprep.subr.bf16.mxu1 %v10007_v33  ;;  %v10043_v32 = vld [vmem:[#allocation5 + $0x674] ss:$8 sps:$4 sm:$0xff]  }
 0x287   : > { %5907 = vmatpush1.bf16.msra.mxu0 %v10002_v36  ;;  %6027 = vmatpush1.bf16.msra.mxu1 %v10005_v37  ;;  %v10041_v36 = vld [vmem:[#allocation5 + $0x670] ss:$8 sps:$4 sm:$0xff]   ;;  %v10046_v37 = vld [vmem:[#allocation5 + $0x604] ss:$8 sps:$4 sm:$0xff]  }
 0x288   : > { %5908 = vmatprep.subr.bf16.mxu0 %v10010_v40  ;;  %6028 = vmatprep.subr.bf16.mxu1 %v10013_v7  ;;  %v10044_v40 = vld [vmem:[#allocation5 + $0x600] ss:$8 sps:$4 sm:$0xff]  }
 0x289   : > { %v10047_v7 = vld [vmem:[#allocation5 + $0x660] ss:$8 sps:$4 sm:$0xff]  }
 0x28b   : > { %5909 = vmatpush1.bf16.msra.mxu0 %v10008_v8  ;;  %6029 = vmatpush1.bf16.msra.mxu1 %v10011_v46  ;;  %v8825_v8 = vld [vmem:[%s10626_s6 + $0x30] sm:$0x1]  ;;  %v8839_v46 = vld [vmem:[%s10626_s6 + $0x31] sm:$0x1] }
 0x28c   : > { %6138 = vmatprep.subr.bf16.mxu0 %v10016_v38  ;;  %6258 = vmatprep.subr.bf16.mxu1 %v10019_v47  ;;  %v10050_v38 = vld [vmem:[#allocation5 + $0x710] ss:$8 sps:$4 sm:$0xff]  }
 0x28d   : > { %v10053_v47 = vld [vmem:[#allocation5 + $0x770] ss:$8 sps:$4 sm:$0xff]  }
 0x28e   : > { %v3974_v44 = vpop.f32.mrf.mxu0  ;;  %v4095_v59 = vpop.f32.mrf.mxu1  ;;  %8810 = vmatmul.mubr.msk.bf16.vlgmr.msra.gmra.mxu0 %vm325_vm0, %v8797_v50  ;;  %8824 = vmatmul.mubr.msk.bf16.vlgmr.msra.gmra.mxu1 %vm325_vm0, %v8811_v51 }
 0x28f   : > { %v3981_v61 = vadd.f32 %v3974_v44, %v3860_v57  ;;  %6139 = vmatpush1.bf16.msra.mxu0 %v10014_v52  ;;  %6259 = vmatpush1.bf16.msra.mxu1 %v10017_v54  ;;  %v10067_v57 = vld [vmem:[#allocation5 + $0x754] ss:$8 sps:$4 sm:$0xff]  }
 0x290   : > { %v3976_v4 = vpop.f32.mrf.mxu0  ;;  %v4097_v5 = vpop.f32.mrf.mxu1  ;;  %6140 = vmatprep.subr.bf16.mxu0 %v10022_v55  ;;  %6260 = vmatprep.subr.bf16.mxu1 %v10025_v56  ;;  %v10064_v56 = vld [vmem:[#allocation5 + $0x6f4] ss:$8 sps:$4 sm:$0xff]  }
 0x291   : > { %v4102_v10 = vadd.f32 %v4095_v59, %v3981_v61  ;;  %v3982_v12 = vadd.f32 %v3976_v4, %v3861_v60  ;;  %6166 = vmatprep.mubr.bf16.mxu0 %v10475_v0  ;;  %6286 = vmatprep.mubr.bf16.mxu1 %v10475_v0  ;;  %v10062_v61 = vld [vmem:[#allocation5 + $0x6f0] ss:$8 sps:$4 sm:$0xff]   ;;  %v10068_v4 = vld [vmem:[#allocation5 + $0x6e0] ss:$8 sps:$4 sm:$0xff]  }
 0x292   : > { %v3978_v14 = vpop.f32.mrf.mxu0  ;;  %v4099_v15 = vpop.f32.mrf.mxu1 }
 0x293   : > { %v4116_v16 = vadd.f32 %v4109_v62, %v4102_v10  ;;  %v4103_v17 = vadd.f32 %v4097_v5, %v3982_v12  ;;  %6141 = vmatpush1.bf16.msra.mxu0 %v10020_v2  ;;  %6261 = vmatpush1.bf16.msra.mxu1 %v10023_v3  ;;  %v10065_v62 = vld [vmem:[#allocation5 + $0x750] ss:$8 sps:$4 sm:$0xff]   ;;  %v10070_v2 = vld [vmem:[#allocation5 + $0x6e4] ss:$8 sps:$4 sm:$0xff]   ;;  %v10071_v5 = vld [vmem:[#allocation5 + $0x740] ss:$8 sps:$4 sm:$0xff]  }
 0x294   : > { %v3979_v21 = vpop.f32.mrf.mxu0  ;;  %v4100_v22 = vpop.f32.mrf.mxu1  ;;  %6142 = vmatprep.subr.bf16.mxu0 %v10028_v6  ;;  %6262 = vmatprep.subr.bf16.mxu1 %v10031_v9  ;;  %v10073_v3 = vld [vmem:[#allocation5 + $0x744] ss:$8 sps:$4 sm:$0xff]   ;;  %v10076_v6 = vld [vmem:[#allocation5 + $0x6d4] ss:$8 sps:$4 sm:$0xff]   ;;  %v10074_v10 = vld [vmem:[#allocation5 + $0x6d0] ss:$8 sps:$4 sm:$0xff]  }
 0x295   : > { %v4117_v25 = vadd.f32 %v4113_v13, %v4103_v17  ;;  %v4118_v26 = vmax.f32 %v4116_v16, 0.0  ;;  %v10079_v9 = vld [vmem:[#allocation5 + $0x734] ss:$8 sps:$4 sm:$0xff]   ;;  %v10077_v12 = vld [vmem:[#allocation5 + $0x730] ss:$8 sps:$4 sm:$0xff]  }
 0x296   : > { %v10082_v13 = vld [vmem:[#allocation5 + $0x6c4] ss:$8 sps:$4 sm:$0xff]   ;;  %v10080_v15 = vld [vmem:[#allocation5 + $0x6c0] ss:$8 sps:$4 sm:$0xff]   ;;  %v10088_v17 = vld [vmem:[#allocation5 + $0x7d4] ss:$8 sps:$4 sm:$0xff]  }
 0x297   : > { %v4119_v27 = vmax.f32 %v4117_v25, 0.0  ;;  %6143 = vmatpush1.bf16.msra.mxu0 %v10026_v19  ;;  %6263 = vmatpush1.bf16.msra.mxu1 %v10029_v20  ;;  %v10085_v14 = vld [vmem:[#allocation5 + $0x724] ss:$8 sps:$4 sm:$0xff]   ;;  %v10083_v16 = vld [vmem:[#allocation5 + $0x720] ss:$8 sps:$4 sm:$0xff]  }
 0x298   : > { %6144 = vmatprep.subr.bf16.mxu0 %v10034_v23  ;;  %6264 = vmatprep.subr.bf16.mxu1 %v10037_v24  ;;  %v8853_v19 = vld [vmem:[%s10626_s6 + $0x32] sm:$0x1]  ;;  %v8867_v20 = vld [vmem:[%s10626_s6 + $0x33] sm:$0x1]  ;;  %v10094_v23 = vld [vmem:[#allocation5 + $0x7c4] ss:$8 sps:$4 sm:$0xff]  }
 0x299   : > { %v8599_v33 = vpack.c.bf16 %v4119_v27, %v4118_v26  ;;  %v10086_v21 = vld [vmem:[#allocation5 + $0x7d0] ss:$8 sps:$4 sm:$0xff]   ;;  %v10097_v24 = vld [vmem:[#allocation5 + $0x824] ss:$8 sps:$4 sm:$0xff]  }
 0x29a   : > { %v10089_v22 = vld [vmem:[#allocation5 + $0x830] ss:$8 sps:$4 sm:$0xff]  }
 0x29b   : > { %v4131_v34 = vrot.slane %v8599_v33, %v10828_v28  ;;  %6145 = vmatpush1.bf16.msra.mxu0 %v10032_v29  ;;  %6265 = vmatpush1.bf16.msra.mxu1 %v10035_v30  ;;  %v10092_v29 = vld [vmem:[#allocation5 + $0x7c0] ss:$8 sps:$4 sm:$0xff]   ;;  %v10100_v33 = vld [vmem:[#allocation5 + $0x7b4] ss:$8 sps:$4 sm:$0xff]  }
 0x29c   : > { %6146 = vmatprep.subr.bf16.mxu0 %v10040_v31  ;;  %6266 = vmatprep.subr.bf16.mxu1 %v10043_v32  ;;  %v10095_v30 = vld [vmem:[#allocation5 + $0x820] ss:$8 sps:$4 sm:$0xff]  }
 0x29d   : > { %8600 = vst.sshfl [vmem:[%s10831_s22] sm:$0x5 pattern:$0x73625140] %v4131_v34  ;;  %v10103_v34 = vld [vmem:[#allocation5 + $0x814] ss:$8 sps:$4 sm:$0xff]  }
 0x29f   : > { %6147 = vmatpush1.bf16.msra.mxu0 %v10038_v35  ;;  %6267 = vmatpush1.bf16.msra.mxu1 %v10041_v36 }
 0x2a0   : > { %6148 = vmatprep.subr.bf16.mxu0 %v10046_v37  ;;  %6268 = vmatprep.subr.bf16.mxu1 %v10049_v41 }
 0x2a3   : > { %6149 = vmatpush1.bf16.msra.mxu0 %v10044_v40  ;;  %6269 = vmatpush1.bf16.msra.mxu1 %v10047_v7  ;;  %v10098_v7 = vld [vmem:[#allocation5 + $0x7b0] ss:$8 sps:$4 sm:$0xff]  }
 0x2a4   : > { %6378 = vmatprep.subr.bf16.mxu0 %v10052_v42  ;;  %6498 = vmatprep.subr.bf16.mxu1 %v10055_v45  ;;  %v10101_v42 = vld [vmem:[#allocation5 + $0x810] ss:$8 sps:$4 sm:$0xff]  }
 0x2a6   : > { %v4266_v50 = vpop.f32.mrf.mxu0  ;;  %v4370_v51 = vpop.f32.mrf.mxu1  ;;  %8838 = vmatmul.mubr.msk.bf16.vlgmr.msra.gmra.mxu0 %vm325_vm0, %v8825_v8  ;;  %8852 = vmatmul.mubr.msk.bf16.vlgmr.msra.gmra.mxu1 %vm325_vm0, %v8839_v46  ;;  %v10106_v46 = vld [vmem:[#allocation5 + $0x7a4] ss:$8 sps:$4 sm:$0xff]  }
 0x2a7   : > { %v10838_v52 = vadd.f32 %v4370_v51, %v4266_v50  ;;  %6379 = vmatpush1.bf16.msra.mxu0 %v10050_v38  ;;  %6499 = vmatpush1.bf16.msra.mxu1 %v10053_v47  ;;  %v10109_v38 = vld [vmem:[#allocation5 + $0x804] ss:$8 sps:$4 sm:$0xff]   ;;  %v10104_v47 = vld [vmem:[#allocation5 + $0x7a0] ss:$8 sps:$4 sm:$0xff]   ;;  %v10115_v50 = vld [vmem:[#allocation5 + $0x7f4] ss:$8 sps:$4 sm:$0xff]  }
 0x2a8   : > { %v4268_v54 = vpop.f32.mrf.mxu0  ;;  %v4372_v55 = vpop.f32.mrf.mxu1  ;;  %6380 = vmatprep.subr.bf16.mxu0 %v10058_v48  ;;  %6500 = vmatprep.subr.bf16.mxu1 %v10061_v49  ;;  %v10107_v48 = vld [vmem:[#allocation5 + $0x800] ss:$8 sps:$4 sm:$0xff]   ;;  %v10112_v49 = vld [vmem:[#allocation5 + $0x794] ss:$8 sps:$4 sm:$0xff]   ;;  %v10110_v51 = vld [vmem:[#allocation5 + $0x790] ss:$8 sps:$4 sm:$0xff]  }
 0x2a9   : > { %v10840_v44 = vadd.f32 %v4372_v55, %v4268_v54  ;;  %6406 = vmatprep.mubr.bf16.mxu0 %v10475_v0  ;;  %6526 = vmatprep.mubr.bf16.mxu1 %v10475_v0  ;;  %v10116_v54 = vld [vmem:[#allocation5 + $0x780] ss:$8 sps:$4 sm:$0xff]  }
 0x2aa   : > { %v4270_v59 = vpop.f32.mrf.mxu0  ;;  %v4374_v60 = vpop.f32.mrf.mxu1  ;;  %v10119_v55 = vld [vmem:[#allocation5 + $0x7e0] ss:$8 sps:$4 sm:$0xff]  }
 0x2ab   : > { %6381 = vmatpush1.bf16.msra.mxu0 %v10056_v53  ;;  %6501 = vmatpush1.bf16.msra.mxu1 %v10059_v39  ;;  %v10118_v53 = vld [vmem:[#allocation5 + $0x784] ss:$8 sps:$4 sm:$0xff]   ;;  %v8895_v59 = vld [vmem:[%s10626_s6 + $0x35] sm:$0x1]  ;;  %v10122_v60 = vld [vmem:[#allocation5 + $0x890] ss:$8 sps:$4 sm:$0xff]  }
 0x2ac   : > { %v4271_v63 = vpop.f32.mrf.mxu0  ;;  %v4375_v1 = vpop.f32.mrf.mxu1  ;;  %6382 = vmatprep.subr.bf16.mxu0 %v10064_v56  ;;  %6502 = vmatprep.subr.bf16.mxu1 %v10067_v57  ;;  %v10121_v39 = vld [vmem:[#allocation5 + $0x7e4] ss:$8 sps:$4 sm:$0xff]   ;;  %v10124_v56 = vld [vmem:[#allocation5 + $0x894] ss:$8 sps:$4 sm:$0xff]  }
 0x2ad   : > { %v10127_v57 = vld [vmem:[#allocation5 + $0x8f4] ss:$8 sps:$4 sm:$0xff]   ;;  %v10133_v63 = vld [vmem:[#allocation5 + $0x8e4] ss:$8 sps:$4 sm:$0xff]  }
 0x2af   : > { %6383 = vmatpush1.bf16.msra.mxu0 %v10062_v61  ;;  %6503 = vmatpush1.bf16.msra.mxu1 %v10065_v62  ;;  %v10125_v61 = vld [vmem:[#allocation5 + $0x8f0] ss:$8 sps:$4 sm:$0xff]   ;;  %v10130_v62 = vld [vmem:[#allocation5 + $0x884] ss:$8 sps:$4 sm:$0xff]  }
 0x2b0   : > { %6384 = vmatprep.subr.bf16.mxu0 %v10070_v2  ;;  %6504 = vmatprep.subr.bf16.mxu1 %v10073_v3 }
 0x2b3   : > { %6385 = vmatpush1.bf16.msra.mxu0 %v10068_v4  ;;  %6505 = vmatpush1.bf16.msra.mxu1 %v10071_v5  ;;  %v10128_v4 = vld [vmem:[#allocation5 + $0x880] ss:$8 sps:$4 sm:$0xff]  }
 0x2b4   : > { %6386 = vmatprep.subr.bf16.mxu0 %v10076_v6  ;;  %6506 = vmatprep.subr.bf16.mxu1 %v10079_v9  ;;  %v10131_v5 = vld [vmem:[#allocation5 + $0x8e0] ss:$8 sps:$4 sm:$0xff]  }
 0x2b7   : > { %6387 = vmatpush1.bf16.msra.mxu0 %v10074_v10  ;;  %6507 = vmatpush1.bf16.msra.mxu1 %v10077_v12  ;;  %v10136_v10 = vld [vmem:[#allocation5 + $0x874] ss:$8 sps:$4 sm:$0xff]  }
 0x2b8   : > { %6388 = vmatprep.subr.bf16.mxu0 %v10082_v13  ;;  %6508 = vmatprep.subr.bf16.mxu1 %v10085_v14  ;;  %v10139_v12 = vld [vmem:[#allocation5 + $0x8d4] ss:$8 sps:$4 sm:$0xff]  }
 0x2bb   : > { %6389 = vmatpush1.bf16.msra.mxu0 %v10080_v15  ;;  %6509 = vmatpush1.bf16.msra.mxu1 %v10083_v16 }
 0x2bc   : > { %6618 = vmatprep.subr.bf16.mxu0 %v10088_v17  ;;  %6738 = vmatprep.subr.bf16.mxu1 %v10091_v18  ;;  %v10134_v18 = vld [vmem:[#allocation5 + $0x870] ss:$8 sps:$4 sm:$0xff]  }
 0x2be   : > { %v4488_v25 = vpop.f32.mrf.mxu0  ;;  %v4608_v26 = vpop.f32.mrf.mxu1  ;;  %8866 = vmatmul.mubr.msk.bf16.vlgmr.msra.gmra.mxu0 %vm325_vm0, %v8853_v19  ;;  %8880 = vmatmul.mubr.msk.bf16.vlgmr.msra.gmra.mxu1 %vm325_vm0, %v8867_v20  ;;  %v10137_v19 = vld [vmem:[#allocation5 + $0x8d0] ss:$8 sps:$4 sm:$0xff]  }
 0x2bf   : > { %v4495_v27 = vadd.f32 %v4488_v25, %v10838_v52  ;;  %6619 = vmatpush1.bf16.msra.mxu0 %v10086_v21  ;;  %6739 = vmatpush1.bf16.msra.mxu1 %v10089_v22  ;;  %v10113_v52 = vld [vmem:[#allocation5 + $0x7f0] ss:$8 sps:$4 sm:$0xff]   ;;  %v10142_v22 = vld [vmem:[#allocation5 + $0x864] ss:$8 sps:$4 sm:$0xff]   ;;  %v10143_v25 = vld [vmem:[#allocation5 + $0x8c0] ss:$8 sps:$4 sm:$0xff]  }
 0x2c0   : > { %v4490_v31 = vpop.f32.mrf.mxu0  ;;  %v4610_v32 = vpop.f32.mrf.mxu1  ;;  %6620 = vmatprep.subr.bf16.mxu0 %v10094_v23  ;;  %6740 = vmatprep.subr.bf16.mxu1 %v10097_v24  ;;  %v10145_v23 = vld [vmem:[#allocation5 + $0x8c4] ss:$8 sps:$4 sm:$0xff]   ;;  %v10140_v24 = vld [vmem:[#allocation5 + $0x860] ss:$8 sps:$4 sm:$0xff]  }
 0x2c1   : > { %v4615_v35 = vadd.f32 %v4608_v26, %v4495_v27  ;;  %v4496_v36 = vadd.f32 %v4490_v31, %v10840_v44  ;;  %6646 = vmatprep.mubr.bf16.mxu0 %v10475_v0  ;;  %6766 = vmatprep.mubr.bf16.mxu1 %v10475_v0  ;;  %v8881_v44 = vld [vmem:[%s10626_s6 + $0x34] sm:$0x1]  ;;  %v10154_v31 = vld [vmem:[#allocation5 + $0x844] ss:$8 sps:$4 sm:$0xff]  }
 0x2c2   : > { %v4492_v37 = vpop.f32.mrf.mxu0  ;;  %v4612_v41 = vpop.f32.mrf.mxu1  ;;  %v10148_v26 = vld [vmem:[#allocation5 + $0x854] ss:$8 sps:$4 sm:$0xff]  }
 0x2c3   : > { %v4616_v40 = vadd.f32 %v4610_v32, %v4496_v36  ;;  %6621 = vmatpush1.bf16.msra.mxu0 %v10092_v29  ;;  %6741 = vmatpush1.bf16.msra.mxu1 %v10095_v30  ;;  %v10151_v27 = vld [vmem:[#allocation5 + $0x8b4] ss:$8 sps:$4 sm:$0xff]   ;;  %v10146_v29 = vld [vmem:[#allocation5 + $0x850] ss:$8 sps:$4 sm:$0xff]   ;;  %v10157_v32 = vld [vmem:[#allocation5 + $0x8a4] ss:$8 sps:$4 sm:$0xff]  }
 0x2c4   : > { %v4493_v45 = vpop.f32.mrf.mxu0  ;;  %v4613_v8 = vpop.f32.mrf.mxu1  ;;  %6622 = vmatprep.subr.bf16.mxu0 %v10100_v33  ;;  %6742 = vmatprep.subr.bf16.mxu1 %v10103_v34  ;;  %v10149_v30 = vld [vmem:[#allocation5 + $0x8b0] ss:$8 sps:$4 sm:$0xff]   ;;  %v10152_v33 = vld [vmem:[#allocation5 + $0x840] ss:$8 sps:$4 sm:$0xff]   ;;  %v10163_v36 = vld [vmem:[#allocation5 + $0x9b4] ss:$8 sps:$4 sm:$0xff]  }
 0x2c5   : > { %v10155_v34 = vld [vmem:[#allocation5 + $0x8a0] ss:$8 sps:$4 sm:$0xff]   ;;  %v8909_v37 = vld [vmem:[%s10626_s6 + $0x36] sm:$0x1]  ;;  %v8923_v41 = vld [vmem:[%s10626_s6 + $0x37] sm:$0x1] }
 0x2c6   : > { %v10169_v45 = vld [vmem:[#allocation5 + $0x9a4] ss:$8 sps:$4 sm:$0xff]  }
 0x2c7   : > { %6623 = vmatpush1.bf16.msra.mxu0 %v10098_v7  ;;  %6743 = vmatpush1.bf16.msra.mxu1 %v10101_v42  ;;  %v10161_v7 = vld [vmem:[#allocation5 + $0x9b0] ss:$8 sps:$4 sm:$0xff]   ;;  %v10166_v42 = vld [vmem:[#allocation5 + $0x944] ss:$8 sps:$4 sm:$0xff]  }
 0x2c8   : > { %6624 = vmatprep.subr.bf16.mxu0 %v10106_v46  ;;  %6744 = vmatprep.subr.bf16.mxu1 %v10109_v38 }
 0x2cb   : > { %6625 = vmatpush1.bf16.msra.mxu0 %v10104_v47  ;;  %6745 = vmatpush1.bf16.msra.mxu1 %v10107_v48  ;;  %v10164_v47 = vld [vmem:[#allocation5 + $0x940] ss:$8 sps:$4 sm:$0xff]  }
 0x2cc   : > { %6626 = vmatprep.subr.bf16.mxu0 %v10112_v49  ;;  %6746 = vmatprep.subr.bf16.mxu1 %v10115_v50  ;;  %v10167_v48 = vld [vmem:[#allocation5 + $0x9a0] ss:$8 sps:$4 sm:$0xff]  }
 0x2cf   : > { %6627 = vmatpush1.bf16.msra.mxu0 %v10110_v51  ;;  %6747 = vmatpush1.bf16.msra.mxu1 %v10113_v52  ;;  %v10172_v51 = vld [vmem:[#allocation5 + $0x934] ss:$8 sps:$4 sm:$0xff]  }
 0x2d0   : > { %6628 = vmatprep.subr.bf16.mxu0 %v10118_v53  ;;  %6748 = vmatprep.subr.bf16.mxu1 %v10121_v39  ;;  %v10175_v52 = vld [vmem:[#allocation5 + $0x994] ss:$8 sps:$4 sm:$0xff]  }
 0x2d3   : > { %6629 = vmatpush1.bf16.msra.mxu0 %v10116_v54  ;;  %6749 = vmatpush1.bf16.msra.mxu1 %v10119_v55 }
 0x2d4   : > { %6858 = vmatprep.subr.bf16.mxu0 %v10124_v56  ;;  %6978 = vmatprep.subr.bf16.mxu1 %v10127_v57  ;;  %v10170_v57 = vld [vmem:[#allocation5 + $0x930] ss:$8 sps:$4 sm:$0xff]  }
 0x2d6   : > { %v4728_v1 = vpop.f32.mrf.mxu0  ;;  %v4848_v2 = vpop.f32.mrf.mxu1  ;;  %8894 = vmatmul.mubr.msk.bf16.vlgmr.msra.gmra.mxu0 %vm325_vm0, %v8881_v44  ;;  %8908 = vmatmul.mubr.msk.bf16.vlgmr.msra.gmra.mxu1 %vm325_vm0, %v8895_v59  ;;  %v10173_v44 = vld [vmem:[#allocation5 + $0x990] ss:$8 sps:$4 sm:$0xff]  }
 0x2d7   : > { %v4735_v3 = vadd.f32 %v4728_v1, %v4615_v35  ;;  %6859 = vmatpush1.bf16.msra.mxu0 %v10122_v60  ;;  %6979 = vmatpush1.bf16.msra.mxu1 %v10125_v61  ;;  %v10160_v35 = vld [vmem:[#allocation5 + $0x954] ss:$8 sps:$4 sm:$0xff]   ;;  %v10178_v61 = vld [vmem:[#allocation5 + $0x924] ss:$8 sps:$4 sm:$0xff]   ;;  %v10179_v1 = vld [vmem:[#allocation5 + $0x980] ss:$8 sps:$4 sm:$0xff]  }
 0x2d8   : > { %v4730_v6 = vpop.f32.mrf.mxu0  ;;  %v4850_v9 = vpop.f32.mrf.mxu1  ;;  %6860 = vmatprep.subr.bf16.mxu0 %v10130_v62  ;;  %6980 = vmatprep.subr.bf16.mxu1 %v10133_v63  ;;  %v10181_v62 = vld [vmem:[#allocation5 + $0x984] ss:$8 sps:$4 sm:$0xff]   ;;  %v10176_v63 = vld [vmem:[#allocation5 + $0x920] ss:$8 sps:$4 sm:$0xff]  }
 0x2d9   : > { %v4855_v13 = vadd.f32 %v4848_v2, %v4735_v3  ;;  %v4736_v14 = vadd.f32 %v4730_v6, %v4616_v40  ;;  %6886 = vmatprep.mubr.bf16.mxu0 %v10475_v0  ;;  %7006 = vmatprep.mubr.bf16.mxu1 %v10475_v0  ;;  %v10158_v40 = vld [vmem:[#allocation5 + $0x950] ss:$8 sps:$4 sm:$0xff]   ;;  %v10184_v2 = vld [vmem:[#allocation5 + $0x914] ss:$8 sps:$4 sm:$0xff]   ;;  %v10190_v6 = vld [vmem:[#allocation5 + $0x904] ss:$8 sps:$4 sm:$0xff]  }
 0x2da   : > { %v4732_v15 = vpop.f32.mrf.mxu0  ;;  %v4852_v16 = vpop.f32.mrf.mxu1  ;;  %v10187_v3 = vld [vmem:[#allocation5 + $0x974] ss:$8 sps:$4 sm:$0xff]  }
 0x2db   : > { %v4856_v17 = vadd.f32 %v4850_v9, %v4736_v14  ;;  %6861 = vmatpush1.bf16.msra.mxu0 %v10128_v4  ;;  %6981 = vmatpush1.bf16.msra.mxu1 %v10131_v5  ;;  %v10182_v4 = vld [vmem:[#allocation5 + $0x910] ss:$8 sps:$4 sm:$0xff]   ;;  %v10193_v9 = vld [vmem:[#allocation5 + $0x964] ss:$8 sps:$4 sm:$0xff]   ;;  %v10199_v14 = vld [vmem:[#allocation5 + $0xa74] ss:$8 sps:$4 sm:$0xff]  }
 0x2dc   : > { %v4733_v20 = vpop.f32.mrf.mxu0  ;;  %v4853_v21 = vpop.f32.mrf.mxu1  ;;  %6862 = vmatprep.subr.bf16.mxu0 %v10136_v10  ;;  %6982 = vmatprep.subr.bf16.mxu1 %v10139_v12  ;;  %v10185_v5 = vld [vmem:[#allocation5 + $0x970] ss:$8 sps:$4 sm:$0xff]   ;;  %v10188_v10 = vld [vmem:[#allocation5 + $0x900] ss:$8 sps:$4 sm:$0xff]  }
 0x2dd   : > { %v10191_v12 = vld [vmem:[#allocation5 + $0x960] ss:$8 sps:$4 sm:$0xff]   ;;  %v8937_v15 = vld [vmem:[%s10626_s6 + $0x38] sm:$0x1]  ;;  %v8951_v16 = vld [vmem:[%s10626_s6 + $0x39] sm:$0x1] }
 0x2de   : > { %v10205_v20 = vld [vmem:[#allocation5 + $0xa64] ss:$8 sps:$4 sm:$0xff]  }
 0x2df   : > { %6863 = vmatpush1.bf16.msra.mxu0 %v10134_v18  ;;  %6983 = vmatpush1.bf16.msra.mxu1 %v10137_v19  ;;  %v10197_v18 = vld [vmem:[#allocation5 + $0xa70] ss:$8 sps:$4 sm:$0xff]   ;;  %v10202_v19 = vld [vmem:[#allocation5 + $0xa04] ss:$8 sps:$4 sm:$0xff]  }
 0x2e0   : > { %6864 = vmatprep.subr.bf16.mxu0 %v10142_v22  ;;  %6984 = vmatprep.subr.bf16.mxu1 %v10145_v23 }
 0x2e3   : > { %6865 = vmatpush1.bf16.msra.mxu0 %v10140_v24  ;;  %6985 = vmatpush1.bf16.msra.mxu1 %v10143_v25  ;;  %v10200_v24 = vld [vmem:[#allocation5 + $0xa00] ss:$8 sps:$4 sm:$0xff]  }
 0x2e4   : > { %6866 = vmatprep.subr.bf16.mxu0 %v10148_v26  ;;  %6986 = vmatprep.subr.bf16.mxu1 %v10151_v27  ;;  %v10203_v25 = vld [vmem:[#allocation5 + $0xa60] ss:$8 sps:$4 sm:$0xff]  }
 0x2e7   : > { %6867 = vmatpush1.bf16.msra.mxu0 %v10146_v29  ;;  %6987 = vmatpush1.bf16.msra.mxu1 %v10149_v30  ;;  %v10208_v29 = vld [vmem:[#allocation5 + $0x9f4] ss:$8 sps:$4 sm:$0xff]  }
 0x2e8   : > { %6868 = vmatprep.subr.bf16.mxu0 %v10154_v31  ;;  %6988 = vmatprep.subr.bf16.mxu1 %v10157_v32  ;;  %v10211_v30 = vld [vmem:[#allocation5 + $0xa54] ss:$8 sps:$4 sm:$0xff]  }
 0x2eb   : > { %6869 = vmatpush1.bf16.msra.mxu0 %v10152_v33  ;;  %6989 = vmatpush1.bf16.msra.mxu1 %v10155_v34 }
 0x2ec   : > { %7098 = vmatprep.subr.bf16.mxu0 %v10160_v35  ;;  %7218 = vmatprep.subr.bf16.mxu1 %v10163_v36  ;;  %v10206_v36 = vld [vmem:[#allocation5 + $0x9f0] ss:$8 sps:$4 sm:$0xff]  }
 0x2ee   : > { %v4968_v8 = vpop.f32.mrf.mxu0  ;;  %v5088_v46 = vpop.f32.mrf.mxu1  ;;  %8922 = vmatmul.mubr.msk.bf16.vlgmr.msra.gmra.mxu0 %vm325_vm0, %v8909_v37  ;;  %8936 = vmatmul.mubr.msk.bf16.vlgmr.msra.gmra.mxu1 %vm325_vm0, %v8923_v41  ;;  %v10209_v37 = vld [vmem:[#allocation5 + $0xa50] ss:$8 sps:$4 sm:$0xff]  }
 0x2ef   : > { %v4975_v38 = vadd.f32 %v4968_v8, %v4855_v13  ;;  %7099 = vmatpush1.bf16.msra.mxu0 %v10158_v40  ;;  %7219 = vmatpush1.bf16.msra.mxu1 %v10161_v7  ;;  %v10196_v13 = vld [vmem:[#allocation5 + $0xa14] ss:$8 sps:$4 sm:$0xff]   ;;  %v10214_v7 = vld [vmem:[#allocation5 + $0x9e4] ss:$8 sps:$4 sm:$0xff]   ;;  %v10215_v8 = vld [vmem:[#allocation5 + $0xa40] ss:$8 sps:$4 sm:$0xff]  }
 0x2f0   : > { %v4970_v49 = vpop.f32.mrf.mxu0  ;;  %v5090_v50 = vpop.f32.mrf.mxu1  ;;  %7100 = vmatprep.subr.bf16.mxu0 %v10166_v42  ;;  %7220 = vmatprep.subr.bf16.mxu1 %v10169_v45  ;;  %v10217_v42 = vld [vmem:[#allocation5 + $0xa44] ss:$8 sps:$4 sm:$0xff]   ;;  %v10212_v45 = vld [vmem:[#allocation5 + $0x9e0] ss:$8 sps:$4 sm:$0xff]  }
 0x2f1   : > { %v5095_v53 = vadd.f32 %v5088_v46, %v4975_v38  ;;  %v4976_v39 = vadd.f32 %v4970_v49, %v4856_v17  ;;  %7126 = vmatprep.mubr.bf16.mxu0 %v10475_v0  ;;  %7246 = vmatprep.mubr.bf16.mxu1 %v10475_v0  ;;  %v10194_v17 = vld [vmem:[#allocation5 + $0xa10] ss:$8 sps:$4 sm:$0xff]   ;;  %v10220_v46 = vld [vmem:[#allocation5 + $0x9d4] ss:$8 sps:$4 sm:$0xff]   ;;  %v10226_v49 = vld [vmem:[#allocation5 + $0x9c4] ss:$8 sps:$4 sm:$0xff]  }
 0x2f2   : > { %v4972_v54 = vpop.f32.mrf.mxu0  ;;  %v5092_v55 = vpop.f32.mrf.mxu1  ;;  %v10223_v38 = vld [vmem:[#allocation5 + $0xa34] ss:$8 sps:$4 sm:$0xff]  }
 0x2f3   : > { %v5096_v56 = vadd.f32 %v5090_v50, %v4976_v39  ;;  %7101 = vmatpush1.bf16.msra.mxu0 %v10164_v47  ;;  %7221 = vmatpush1.bf16.msra.mxu1 %v10167_v48  ;;  %v10218_v47 = vld [vmem:[#allocation5 + $0x9d0] ss:$8 sps:$4 sm:$0xff]   ;;  %v10229_v50 = vld [vmem:[#allocation5 + $0xa24] ss:$8 sps:$4 sm:$0xff]   ;;  %v10235_v39 = vld [vmem:[#allocation5 + $0xb34] ss:$8 sps:$4 sm:$0xff]  }
 0x2f4   : > { %v4973_v59 = vpop.f32.mrf.mxu0  ;;  %v5093_v60 = vpop.f32.mrf.mxu1  ;;  %7102 = vmatprep.subr.bf16.mxu0 %v10172_v51  ;;  %7222 = vmatprep.subr.bf16.mxu1 %v10175_v52  ;;  %v10221_v48 = vld [vmem:[#allocation5 + $0xa30] ss:$8 sps:$4 sm:$0xff]   ;;  %v10224_v51 = vld [vmem:[#allocation5 + $0x9c0] ss:$8 sps:$4 sm:$0xff]  }
 0x2f5   : > { %v10227_v52 = vld [vmem:[#allocation5 + $0xa20] ss:$8 sps:$4 sm:$0xff]   ;;  %v8965_v54 = vld [vmem:[%s10626_s6 + $0x3a] sm:$0x1]  ;;  %v8979_v55 = vld [vmem:[%s10626_s6 + $0x3b] sm:$0x1] }
 0x2f6   : > { %v10241_v59 = vld [vmem:[#allocation5 + $0xb24] ss:$8 sps:$4 sm:$0xff]  }
 0x2f7   : > { %7103 = vmatpush1.bf16.msra.mxu0 %v10170_v57  ;;  %7223 = vmatpush1.bf16.msra.mxu1 %v10173_v44  ;;  %v10233_v57 = vld [vmem:[#allocation5 + $0xb30] ss:$8 sps:$4 sm:$0xff]   ;;  %v10238_v44 = vld [vmem:[#allocation5 + $0xac4] ss:$8 sps:$4 sm:$0xff]  }
 0x2f8   : > { %7104 = vmatprep.subr.bf16.mxu0 %v10178_v61  ;;  %7224 = vmatprep.subr.bf16.mxu1 %v10181_v62 }
 0x2fb   : > { %7105 = vmatpush1.bf16.msra.mxu0 %v10176_v63  ;;  %7225 = vmatpush1.bf16.msra.mxu1 %v10179_v1  ;;  %v10236_v63 = vld [vmem:[#allocation5 + $0xac0] ss:$8 sps:$4 sm:$0xff]  }
 0x2fc   : > { %7106 = vmatprep.subr.bf16.mxu0 %v10184_v2  ;;  %7226 = vmatprep.subr.bf16.mxu1 %v10187_v3  ;;  %v10239_v1 = vld [vmem:[#allocation5 + $0xb20] ss:$8 sps:$4 sm:$0xff]  }
 0x2ff   : > { %7107 = vmatpush1.bf16.msra.mxu0 %v10182_v4  ;;  %7227 = vmatpush1.bf16.msra.mxu1 %v10185_v5  ;;  %v10244_v4 = vld [vmem:[#allocation5 + $0xab4] ss:$8 sps:$4 sm:$0xff]  }
 0x300   : > { %7108 = vmatprep.subr.bf16.mxu0 %v10190_v6  ;;  %7228 = vmatprep.subr.bf16.mxu1 %v10193_v9  ;;  %v10247_v5 = vld [vmem:[#allocation5 + $0xb14] ss:$8 sps:$4 sm:$0xff]  }
 0x303   : > { %7109 = vmatpush1.bf16.msra.mxu0 %v10188_v10  ;;  %7229 = vmatpush1.bf16.msra.mxu1 %v10191_v12 }
 0x304   : > { %7338 = vmatprep.subr.bf16.mxu0 %v10196_v13  ;;  %7458 = vmatprep.subr.bf16.mxu1 %v10199_v14  ;;  %v10242_v14 = vld [vmem:[#allocation5 + $0xab0] ss:$8 sps:$4 sm:$0xff]  }
 0x306   : > { %v5208_v21 = vpop.f32.mrf.mxu0  ;;  %v5328_v22 = vpop.f32.mrf.mxu1  ;;  %8950 = vmatmul.mubr.msk.bf16.vlgmr.msra.gmra.mxu0 %vm325_vm0, %v8937_v15  ;;  %8964 = vmatmul.mubr.msk.bf16.vlgmr.msra.gmra.mxu1 %vm325_vm0, %v8951_v16  ;;  %v10245_v15 = vld [vmem:[#allocation5 + $0xb10] ss:$8 sps:$4 sm:$0xff]  }
 0x307   : > { %v5215_v23 = vadd.f32 %v5208_v21, %v5095_v53  ;;  %7339 = vmatpush1.bf16.msra.mxu0 %v10194_v17  ;;  %7459 = vmatpush1.bf16.msra.mxu1 %v10197_v18  ;;  %v10232_v53 = vld [vmem:[#allocation5 + $0xad4] ss:$8 sps:$4 sm:$0xff]   ;;  %v10250_v18 = vld [vmem:[#allocation5 + $0xaa4] ss:$8 sps:$4 sm:$0xff]   ;;  %v10251_v21 = vld [vmem:[#allocation5 + $0xb00] ss:$8 sps:$4 sm:$0xff]  }
 0x308   : > { %v5210_v26 = vpop.f32.mrf.mxu0  ;;  %v5330_v27 = vpop.f32.mrf.mxu1  ;;  %7340 = vmatprep.subr.bf16.mxu0 %v10202_v19  ;;  %7460 = vmatprep.subr.bf16.mxu1 %v10205_v20  ;;  %v10253_v19 = vld [vmem:[#allocation5 + $0xb04] ss:$8 sps:$4 sm:$0xff]   ;;  %v10248_v20 = vld [vmem:[#allocation5 + $0xaa0] ss:$8 sps:$4 sm:$0xff]  }
 0x309   : > { %v5335_v31 = vadd.f32 %v5328_v22, %v5215_v23  ;;  %v5216_v32 = vadd.f32 %v5210_v26, %v5096_v56  ;;  %7366 = vmatprep.mubr.bf16.mxu0 %v10475_v0  ;;  %7486 = vmatprep.mubr.bf16.mxu1 %v10475_v0  ;;  %v10230_v56 = vld [vmem:[#allocation5 + $0xad0] ss:$8 sps:$4 sm:$0xff]   ;;  %v10256_v22 = vld [vmem:[#allocation5 + $0xa94] ss:$8 sps:$4 sm:$0xff]   ;;  %v10262_v26 = vld [vmem:[#allocation5 + $0xa84] ss:$8 sps:$4 sm:$0xff]  }
 0x30a   : > { %v5212_v33 = vpop.f32.mrf.mxu0  ;;  %v5332_v34 = vpop.f32.mrf.mxu1  ;;  %v10259_v23 = vld [vmem:[#allocation5 + $0xaf4] ss:$8 sps:$4 sm:$0xff]  }
 0x30b   : > { %v5336_v35 = vadd.f32 %v5330_v27, %v5216_v32  ;;  %7341 = vmatpush1.bf16.msra.mxu0 %v10200_v24  ;;  %7461 = vmatpush1.bf16.msra.mxu1 %v10203_v25  ;;  %v10254_v24 = vld [vmem:[#allocation5 + $0xa90] ss:$8 sps:$4 sm:$0xff]   ;;  %v10265_v27 = vld [vmem:[#allocation5 + $0xae4] ss:$8 sps:$4 sm:$0xff]   ;;  %v10271_v32 = vld [vmem:[#allocation5 + $0xbf4] ss:$8 sps:$4 sm:$0xff]  }
 0x30c   : > { %v5213_v41 = vpop.f32.mrf.mxu0  ;;  %v5333_v40 = vpop.f32.mrf.mxu1  ;;  %7342 = vmatprep.subr.bf16.mxu0 %v10208_v29  ;;  %7462 = vmatprep.subr.bf16.mxu1 %v10211_v30  ;;  %v10257_v25 = vld [vmem:[#allocation5 + $0xaf0] ss:$8 sps:$4 sm:$0xff]   ;;  %v10260_v29 = vld [vmem:[#allocation5 + $0xa80] ss:$8 sps:$4 sm:$0xff]   ;;  %v8993_v33 = vld [vmem:[%s10626_s6 + $0x3c] sm:$0x1] }
 0x30d   : > { %v10263_v30 = vld [vmem:[#allocation5 + $0xae0] ss:$8 sps:$4 sm:$0xff]   ;;  %v9007_v34 = vld [vmem:[%s10626_s6 + $0x3d] sm:$0x1]  ;;  %v10277_v41 = vld [vmem:[#allocation5 + $0xbe4] ss:$8 sps:$4 sm:$0xff]  }
 0x30f   : > { %7343 = vmatpush1.bf16.msra.mxu0 %v10206_v36  ;;  %7463 = vmatpush1.bf16.msra.mxu1 %v10209_v37  ;;  %v10269_v36 = vld [vmem:[#allocation5 + $0xbf0] ss:$8 sps:$4 sm:$0xff]   ;;  %v10274_v37 = vld [vmem:[#allocation5 + $0xb84] ss:$8 sps:$4 sm:$0xff]  }
 0x310   : > { %7344 = vmatprep.subr.bf16.mxu0 %v10214_v7  ;;  %7464 = vmatprep.subr.bf16.mxu1 %v10217_v42 }
 0x313   : > { %7345 = vmatpush1.bf16.msra.mxu0 %v10212_v45  ;;  %7465 = vmatpush1.bf16.msra.mxu1 %v10215_v8  ;;  %v10272_v45 = vld [vmem:[#allocation5 + $0xb80] ss:$8 sps:$4 sm:$0xff]  }
 0x314   : > { %7346 = vmatprep.subr.bf16.mxu0 %v10220_v46  ;;  %7466 = vmatprep.subr.bf16.mxu1 %v10223_v38  ;;  %v10275_v8 = vld [vmem:[#allocation5 + $0xbe0] ss:$8 sps:$4 sm:$0xff]  }
 0x317   : > { %7347 = vmatpush1.bf16.msra.mxu0 %v10218_v47  ;;  %7467 = vmatpush1.bf16.msra.mxu1 %v10221_v48  ;;  %v10280_v47 = vld [vmem:[#allocation5 + $0xb74] ss:$8 sps:$4 sm:$0xff]  }
 0x318   : > { %7348 = vmatprep.subr.bf16.mxu0 %v10226_v49  ;;  %7468 = vmatprep.subr.bf16.mxu1 %v10229_v50  ;;  %v10283_v48 = vld [vmem:[#allocation5 + $0xbd4] ss:$8 sps:$4 sm:$0xff]  }
 0x31b   : > { %7349 = vmatpush1.bf16.msra.mxu0 %v10224_v51  ;;  %7469 = vmatpush1.bf16.msra.mxu1 %v10227_v52 }
 0x31c   : > { %7578 = vmatprep.subr.bf16.mxu0 %v10232_v53  ;;  %7698 = vmatprep.subr.bf16.mxu1 %v10235_v39  ;;  %v10278_v39 = vld [vmem:[#allocation5 + $0xb70] ss:$8 sps:$4 sm:$0xff]  }
 0x31e   : > { %v5448_v60 = vpop.f32.mrf.mxu0  ;;  %v5568_v61 = vpop.f32.mrf.mxu1  ;;  %8978 = vmatmul.mubr.msk.bf16.vlgmr.msra.gmra.mxu0 %vm325_vm0, %v8965_v54  ;;  %8992 = vmatmul.mubr.msk.bf16.vlgmr.msra.gmra.mxu1 %vm325_vm0, %v8979_v55  ;;  %v10281_v54 = vld [vmem:[#allocation5 + $0xbd0] ss:$8 sps:$4 sm:$0xff]  }
 0x31f   : > { %v5455_v62 = vadd.f32 %v5448_v60, %v5335_v31  ;;  %7579 = vmatpush1.bf16.msra.mxu0 %v10230_v56  ;;  %7699 = vmatpush1.bf16.msra.mxu1 %v10233_v57  ;;  %v10268_v31 = vld [vmem:[#allocation5 + $0xb94] ss:$8 sps:$4 sm:$0xff]   ;;  %v10286_v57 = vld [vmem:[#allocation5 + $0xb64] ss:$8 sps:$4 sm:$0xff]   ;;  %v10287_v60 = vld [vmem:[#allocation5 + $0xbc0] ss:$8 sps:$4 sm:$0xff]  }
 0x320   : > { %v5450_v2 = vpop.f32.mrf.mxu0  ;;  %v5570_v3 = vpop.f32.mrf.mxu1  ;;  %7580 = vmatprep.subr.bf16.mxu0 %v10238_v44  ;;  %7700 = vmatprep.subr.bf16.mxu1 %v10241_v59  ;;  %v10289_v44 = vld [vmem:[#allocation5 + $0xbc4] ss:$8 sps:$4 sm:$0xff]   ;;  %v10284_v59 = vld [vmem:[#allocation5 + $0xb60] ss:$8 sps:$4 sm:$0xff]  }
 0x321   : > { %v5575_v6 = vadd.f32 %v5568_v61, %v5455_v62  ;;  %v5456_v9 = vadd.f32 %v5450_v2, %v5336_v35  ;;  %7606 = vmatprep.mubr.bf16.mxu0 %v10475_v0  ;;  %7726 = vmatprep.mubr.bf16.mxu1 %v10475_v0  ;;  %v10266_v35 = vld [vmem:[#allocation5 + $0xb90] ss:$8 sps:$4 sm:$0xff]   ;;  %v10295_v61 = vld [vmem:[#allocation5 + $0xbb4] ss:$8 sps:$4 sm:$0xff]   ;;  %v10301_v2 = vld [vmem:[#allocation5 + $0xba4] ss:$8 sps:$4 sm:$0xff]  }
 0x322   : > { %v5452_v10 = vpop.f32.mrf.mxu0  ;;  %v5572_v12 = vpop.f32.mrf.mxu1  ;;  %v10290_v62 = vld [vmem:[#allocation5 + $0xb50] ss:$8 sps:$4 sm:$0xff]  }
 0x323   : > { %v5576_v13 = vadd.f32 %v5570_v3, %v5456_v9  ;;  %7581 = vmatpush1.bf16.msra.mxu0 %v10236_v63  ;;  %7701 = vmatpush1.bf16.msra.mxu1 %v10239_v1  ;;  %v10293_v63 = vld [vmem:[#allocation5 + $0xbb0] ss:$8 sps:$4 sm:$0xff]   ;;  %v10298_v1 = vld [vmem:[#allocation5 + $0xb44] ss:$8 sps:$4 sm:$0xff]   ;;  %v10296_v3 = vld [vmem:[#allocation5 + $0xb40] ss:$8 sps:$4 sm:$0xff]  }
 0x324   : > { %v5453_v16 = vpop.f32.mrf.mxu0  ;;  %v5573_v17 = vpop.f32.mrf.mxu1  ;;  %7582 = vmatprep.subr.bf16.mxu0 %v10244_v4  ;;  %7702 = vmatprep.subr.bf16.mxu1 %v10247_v5  ;;  %v10299_v4 = vld [vmem:[#allocation5 + $0xba0] ss:$8 sps:$4 sm:$0xff]   ;;  %v9021_v5 = vld [vmem:[%s10626_s6 + $0x3e] sm:$0x1] }
 0x327   : > { %7583 = vmatpush1.bf16.msra.mxu0 %v10242_v14  ;;  %7703 = vmatpush1.bf16.msra.mxu1 %v10245_v15 }
 0x328   : > { %7584 = vmatprep.subr.bf16.mxu0 %v10250_v18  ;;  %7704 = vmatprep.subr.bf16.mxu1 %v10253_v19 }
 0x32b   : > { %7585 = vmatpush1.bf16.msra.mxu0 %v10248_v20  ;;  %7705 = vmatpush1.bf16.msra.mxu1 %v10251_v21 }
 0x32c   : > { %7586 = vmatprep.subr.bf16.mxu0 %v10256_v22  ;;  %7706 = vmatprep.subr.bf16.mxu1 %v10259_v23 }
 0x32f   : > { %7587 = vmatpush1.bf16.msra.mxu0 %v10254_v24  ;;  %7707 = vmatpush1.bf16.msra.mxu1 %v10257_v25 }
 0x330   : > { %7588 = vmatprep.subr.bf16.mxu0 %v10262_v26  ;;  %7708 = vmatprep.subr.bf16.mxu1 %v10265_v27 }
 0x333   : > { %7589 = vmatpush1.bf16.msra.mxu0 %v10260_v29  ;;  %7709 = vmatpush1.bf16.msra.mxu1 %v10263_v30 }
 0x334   : > { %7818 = vmatprep.subr.bf16.mxu0 %v10268_v31  ;;  %7938 = vmatprep.subr.bf16.mxu1 %v10271_v32 }
 0x336   : > { %v5688_v40 = vpop.f32.mrf.mxu0  ;;  %v5808_v7 = vpop.f32.mrf.mxu1  ;;  %9006 = vmatmul.mubr.msk.bf16.vlgmr.msra.gmra.mxu0 %vm325_vm0, %v8993_v33  ;;  %9020 = vmatmul.mubr.msk.bf16.vlgmr.msra.gmra.mxu1 %vm325_vm0, %v9007_v34 }
 0x337   : > { %v5695_v42 = vadd.f32 %v5688_v40, %v5575_v6  ;;  %7819 = vmatpush1.bf16.msra.mxu0 %v10266_v35  ;;  %7939 = vmatpush1.bf16.msra.mxu1 %v10269_v36  ;;  %v9035_v6 = vld [vmem:[%s10626_s6 + $0x3f] sm:$0x1] }
 0x338   : > { %v5690_v46 = vpop.f32.mrf.mxu0  ;;  %v5810_v38 = vpop.f32.mrf.mxu1  ;;  %7820 = vmatprep.subr.bf16.mxu0 %v10274_v37  ;;  %7940 = vmatprep.subr.bf16.mxu1 %v10277_v41 }
 0x339   : > { %v5815_v49 = vadd.f32 %v5808_v7, %v5695_v42  ;;  %v5696_v50 = vadd.f32 %v5690_v46, %v5576_v13  ;;  %7846 = vmatprep.mubr.bf16.mxu0 %v10475_v0  ;;  %7966 = vmatprep.mubr.bf16.mxu1 %v10475_v0  ;;  %v10292_v0 = vld [vmem:[#allocation5 + $0xb54] ss:$8 sps:$4 sm:$0xff]  }
 0x33a   : > { %v5692_v51 = vpop.f32.mrf.mxu0  ;;  %v5812_v52 = vpop.f32.mrf.mxu1 }
 0x33b   : > { %v5816_v53 = vadd.f32 %v5810_v38, %v5696_v50  ;;  %7821 = vmatpush1.bf16.msra.mxu0 %v10272_v45  ;;  %7941 = vmatpush1.bf16.msra.mxu1 %v10275_v8 }
 0x33c   : > { %v5693_v55 = vpop.f32.mrf.mxu0  ;;  %v5813_v56 = vpop.f32.mrf.mxu1  ;;  %7822 = vmatprep.subr.bf16.mxu0 %v10280_v47  ;;  %7942 = vmatprep.subr.bf16.mxu1 %v10283_v48 }
 0x33f   : > { %7823 = vmatpush1.bf16.msra.mxu0 %v10278_v39  ;;  %7943 = vmatpush1.bf16.msra.mxu1 %v10281_v54 }
 0x340   : > { %7824 = vmatprep.subr.bf16.mxu0 %v10286_v57  ;;  %7944 = vmatprep.subr.bf16.mxu1 %v10289_v44 }
 0x343   : > { %7825 = vmatpush1.bf16.msra.mxu0 %v10284_v59  ;;  %7945 = vmatpush1.bf16.msra.mxu1 %v10287_v60 }
 0x344   : > { %7826 = vmatprep.subr.bf16.mxu0 %v10292_v0  ;;  %7946 = vmatprep.subr.bf16.mxu1 %v10295_v61 }
 0x347   : > { %7827 = vmatpush1.bf16.msra.mxu0 %v10290_v62  ;;  %7947 = vmatpush1.bf16.msra.mxu1 %v10293_v63 }
 0x348   : > { %7828 = vmatprep.subr.bf16.mxu0 %v10298_v1  ;;  %7948 = vmatprep.subr.bf16.mxu1 %v10301_v2 }
 0x34b   : > { %7829 = vmatpush1.bf16.msra.mxu0 %v10296_v3  ;;  %7949 = vmatpush1.bf16.msra.mxu1 %v10299_v4 }
 0x34e   : > { %v5928_v9 = vpop.f32.mrf.mxu0  ;;  %v6048_v10 = vpop.f32.mrf.mxu1  ;;  %9034 = vmatmul.mubr.msk.bf16.vlgmr.msra.gmra.mxu0 %vm325_vm0, %v9021_v5  ;;  %9048 = vmatmul.mubr.msk.bf16.vlgmr.msra.gmra.mxu1 %vm325_vm0, %v9035_v6 }
 0x34f   : > { %v5935_v12 = vadd.f32 %v5928_v9, %v5815_v49 }
 0x350   : > { %v5930_v13 = vpop.f32.mrf.mxu0  ;;  %v6050_v14 = vpop.f32.mrf.mxu1 }
 0x351   : > { %v6055_v15 = vadd.f32 %v6048_v10, %v5935_v12  ;;  %v5936_v16 = vadd.f32 %v5930_v13, %v5816_v53 }
 0x352   : > { %v5932_v17 = vpop.f32.mrf.mxu0  ;;  %v6052_v18 = vpop.f32.mrf.mxu1 }
 0x353   : > { %v6056_v19 = vadd.f32 %v6050_v14, %v5936_v16 }
 0x354   : > { %v5933_v20 = vpop.f32.mrf.mxu0  ;;  %v6053_v21 = vpop.f32.mrf.mxu1 }
 0x366   : > { %v6168_v22 = vpop.f32.mrf.mxu0  ;;  %v6288_v23 = vpop.f32.mrf.mxu1 }
 0x367   : > { %v6175_v24 = vadd.f32 %v6168_v22, %v6055_v15 }
 0x368   : > { %v6170_v25 = vpop.f32.mrf.mxu0  ;;  %v6290_v26 = vpop.f32.mrf.mxu1 }
 0x369   : > { %v6295_v27 = vadd.f32 %v6288_v23, %v6175_v24  ;;  %v6176_v29 = vadd.f32 %v6170_v25, %v6056_v19 }
 0x36a   : > { %v6172_v30 = vpop.f32.mrf.mxu0  ;;  %v6292_v31 = vpop.f32.mrf.mxu1 }
 0x36b   : > { %v6296_v32 = vadd.f32 %v6290_v26, %v6176_v29 }
 0x36c   : > { %v6173_v33 = vpop.f32.mrf.mxu0  ;;  %v6293_v34 = vpop.f32.mrf.mxu1 }
 0x37e   : > { %v6408_v35 = vpop.f32.mrf.mxu0  ;;  %v6528_v36 = vpop.f32.mrf.mxu1 }
 0x37f   : > { %v6415_v37 = vadd.f32 %v6408_v35, %v6295_v27 }
 0x380   : > { %v6410_v41 = vpop.f32.mrf.mxu0  ;;  %v6530_v40 = vpop.f32.mrf.mxu1 }
 0x381   : > { %v6535_v7 = vadd.f32 %v6528_v36, %v6415_v37  ;;  %v6416_v42 = vadd.f32 %v6410_v41, %v6296_v32 }
 0x382   : > { %v6412_v45 = vpop.f32.mrf.mxu0  ;;  %v6532_v8 = vpop.f32.mrf.mxu1 }
 0x383   : > { %v6536_v46 = vadd.f32 %v6530_v40, %v6416_v42 }
 0x384   : > { %v6413_v38 = vpop.f32.mrf.mxu0  ;;  %v6533_v47 = vpop.f32.mrf.mxu1 }
 0x385   : > { %v7977_v38 = vld [vmem:[#allocation7] sm:$0x3] }
 0x396   : > { %v6648_v48 = vpop.f32.mrf.mxu0  ;;  %v6768_v49 = vpop.f32.mrf.mxu1 }
 0x397   : > { %v6655_v50 = vadd.f32 %v6648_v48, %v6535_v7 }
 0x398   : > { %v6650_v51 = vpop.f32.mrf.mxu0  ;;  %v6770_v52 = vpop.f32.mrf.mxu1 }
 0x399   : > { %v6775_v53 = vadd.f32 %v6768_v49, %v6655_v50  ;;  %v6656_v39 = vadd.f32 %v6650_v51, %v6536_v46 }
 0x39a   : > { %v6652_v54 = vpop.f32.mrf.mxu0  ;;  %v6772_v55 = vpop.f32.mrf.mxu1 }
 0x39b   : > { %v6776_v56 = vadd.f32 %v6770_v52, %v6656_v39  ;;  %v7982_v52 = vrot.slane %v7977_v38, %v4108_v43 }
 0x39c   : > { %v6653_v57 = vpop.f32.mrf.mxu0  ;;  %v6773_v44 = vpop.f32.mrf.mxu1 }
 0x3ae   : > { %v6888_v59 = vpop.f32.mrf.mxu0  ;;  %v7008_v60 = vpop.f32.mrf.mxu1 }
 0x3af   : > { %v6895_v0 = vadd.f32 %v6888_v59, %v6775_v53 }
 0x3b0   : > { %v6890_v61 = vpop.f32.mrf.mxu0  ;;  %v7010_v62 = vpop.f32.mrf.mxu1 }
 0x3b1   : > { %v7015_v63 = vadd.f32 %v7008_v60, %v6895_v0  ;;  %v6896_v1 = vadd.f32 %v6890_v61, %v6776_v56  ;;  %v7986_v56 = vrot.slane %v7977_v38, %v4112_v58 }
 0x3b2   : > { %v6892_v2 = vpop.f32.mrf.mxu0  ;;  %v7012_v3 = vpop.f32.mrf.mxu1 }
 0x3b3   : > { %v7016_v4 = vadd.f32 %v7010_v62, %v6896_v1 }
 0x3b4   : > { %v6893_v5 = vpop.f32.mrf.mxu0  ;;  %v7013_v6 = vpop.f32.mrf.mxu1 }
 0x3c6   : > { %v7128_v9 = vpop.f32.mrf.mxu0  ;;  %v7248_v10 = vpop.f32.mrf.mxu1 }
 0x3c7   : > { %v7135_v12 = vadd.f32 %v7128_v9, %v7015_v63 }
 0x3c8   : > { %v7130_v13 = vpop.f32.mrf.mxu0  ;;  %v7250_v14 = vpop.f32.mrf.mxu1 }
 0x3c9   : > { %v7255_v15 = vadd.f32 %v7248_v10, %v7135_v12  ;;  %v7136_v37 = vadd.f32 %v7130_v13, %v7016_v4 }
 0x3ca   : > { %v7132_v16 = vpop.f32.mrf.mxu0  ;;  %v7252_v17 = vpop.f32.mrf.mxu1 }
 0x3cb   : > { %v7256_v41 = vadd.f32 %v7250_v14, %v7136_v37 }
 0x3cc   : > { %v7133_v18 = vpop.f32.mrf.mxu0  ;;  %v7253_v19 = vpop.f32.mrf.mxu1 }
 0x3de   : > { %v7368_v20 = vpop.f32.mrf.mxu0  ;;  %v7488_v21 = vpop.f32.mrf.mxu1 }
 0x3df   : > { %v7375_v40 = vadd.f32 %v7368_v20, %v7255_v15 }
 0x3e0   : > { %v7370_v22 = vpop.f32.mrf.mxu0  ;;  %v7490_v23 = vpop.f32.mrf.mxu1 }
 0x3e1   : > { %v7376_v7 = vadd.f32 %v7370_v22, %v7256_v41  ;;  %v7495_v42 = vadd.f32 %v7488_v21, %v7375_v40 }
 0x3e2   : > { %v7372_v24 = vpop.f32.mrf.mxu0  ;;  %v7492_v25 = vpop.f32.mrf.mxu1 }
 0x3e3   : > { %v7496_v45 = vadd.f32 %v7490_v23, %v7376_v7 }
 0x3e4   : > { %v7373_v26 = vpop.f32.mrf.mxu0  ;;  %v7493_v27 = vpop.f32.mrf.mxu1 }
 0x3f6   : > { %v7608_v29 = vpop.f32.mrf.mxu0  ;;  %v7728_v30 = vpop.f32.mrf.mxu1 }
 0x3f7   : > { %v7615_v8 = vadd.f32 %v7608_v29, %v7495_v42 }
 0x3f8   : > { %v7610_v31 = vpop.f32.mrf.mxu0  ;;  %v7730_v32 = vpop.f32.mrf.mxu1 }
 0x3f9   : > { %v7616_v46 = vadd.f32 %v7610_v31, %v7496_v45  ;;  %v7735_v47 = vadd.f32 %v7728_v30, %v7615_v8 }
 0x3fa   : > { %v7612_v33 = vpop.f32.mrf.mxu0  ;;  %v7732_v34 = vpop.f32.mrf.mxu1 }
 0x3fb   : > { %v7736_v50 = vadd.f32 %v7730_v32, %v7616_v46 }
 0x3fc   : > { %v7613_v35 = vpop.f32.mrf.mxu0  ;;  %v7733_v36 = vpop.f32.mrf.mxu1 }
 0x40e   : > { %v7848_v48 = vpop.f32.mrf.mxu0  ;;  %v7968_v49 = vpop.f32.mrf.mxu1 }
 0x40f   : > { %v7855_v51 = vadd.f32 %v7848_v48, %v7735_v47 }
 0x410   : > { %v7850_v53 = vpop.f32.mrf.mxu0  ;;  %v7970_v39 = vpop.f32.mrf.mxu1 }
 0x411   : > { %v7975_v54 = vadd.f32 %v7968_v49, %v7855_v51  ;;  %v7856_v55 = vadd.f32 %v7850_v53, %v7736_v50 }
 0x412   : > { %v7852_v57 = vpop.f32.mrf.mxu0  ;;  %v7972_v44 = vpop.f32.mrf.mxu1 }
 0x413   : > { %v7989_v59 = vadd.f32 %v7982_v52, %v7975_v54  ;;  %v7976_v60 = vadd.f32 %v7970_v39, %v7856_v55 }
 0x414   : > { %v7853_v0 = vpop.f32.mrf.mxu0  ;;  %v7973_v61 = vpop.f32.mrf.mxu1 }
 0x415   : > { %v7990_v62 = vadd.f32 %v7986_v56, %v7976_v60  ;;  %v7991_v63 = vmax.f32 %v7989_v59, 0.0 }
 0x417   : > { %v7992_v43 = vmax.f32 %v7990_v62, 0.0 }
 0x419   : > { %v9049_v1 = vpack.c.bf16 %v7992_v43, %v7991_v63 }
 0x41b   : > { %v8004_v11 = vrot.slane %v9049_v1, %v10828_v28 }
 0x41d   : > { %9057 = vst.sshfl [vmem:[%s10831_s22 + $0x2] sm:$0x5 pattern:$0x73625140] %v8004_v11 }
 0x41e   : > { %10395 = shalt.err (!%p10392_p5)
}
 0x41f   : > { %s10396_s27 = scalar_lea.hbm %s10895_s8, 64  ;;  %s10400_s4 = scalar_lea.hbm %s10950_s3, 128 }
 0x420   : > { %p10397_p10 = scmp.ne.s32.totalorder %s10895_s8, %s10396_s27  ;;  %p10401_p6 = scmp.lt.s32.totalorder %s10895_s8, %s10950_s3 }
 0x421   : > { %p10402_p12 = scmp.lt.s32.totalorder %s10400_s4, %s10396_s27 }
 0x422   : > { %p10398_p1 = pnand %p10397_p10, %p10595_p7 }
 0x423   : > { %p10403_p3 = por %p10402_p12, %p10401_p6 }
 0x424   : > { %p10399_p4 = pneg %p10398_p1 }
 0x426   : > { %p10404_p8 = pnand %p10403_p3, %p10399_p4 }
 0x428   : > { %10407 = shalt.err (!%p10404_p8)
}
 0x429   : > { %s10478_s22 = smov 32   ;;  %s10479_s24 = smov 2  }
 0x42a   : > { %9069 = dma.vmem_to_hbm [thread:$0]  (%p10595_p7), %s10897_s5, 64, %s10895_s8, %s8016_s9, %s10478_s22, %s10478_s22, %s10479_s24  }
 0x42b PF: > { %s8047_s7 = sand.u32 1, %s10446_s12   ;;  %p10964_p9 = scmp.ne.s32.totalorder %s10957_s23, 0 }
 0x42c   : > { %p10965_p11 = scmp.ge.s32.totalorder %s10466_s17, 2  ;;  %s8048_s21 = scalar_lea.sflag [#allocation4], %s8047_s7 }
 0x42e   : > { %p9083_p2 = pnand %p10965_p11, %p10964_p9 }
 0x430   : > { %p9084_p13 = pneg %p9083_p2 }
 0x432   : > { %10441 = dma.done.wait (%p9084_p13), %s8048_s21, 64  }
 0x433   : > { %10443 = vsyncadd (%p9084_p13), %s8048_s21, 4294967232  ;;  %s20_s17 = sadd.s32 1, %s10466_s17   ;;  %s10966_s12 = smov %s10450_s13 }
 0x434   : > { %p17_p0 = scmp.ge.s32.totalorder %s20_s17, 4   ;;  %s10967_s13 = smov %s10454_s14 }
 0x435   : > { %s10968_s14 = smov %s10604_s29  ;;  %s10969_s15 = smov %s10462_s16 }
 0x436   : > { %s10970_s16 = smov %s10972_s11  ;;  %19 = sbr.rel (!%p17_p0) target bundleno = 7 (0x7), region = 180 }
 0x43b   :  { %8053 = vsyncpa [#allocation3], 1 }
 0x43c   :  { %8055 = vsyncpa [#allocation3 + $0x1], 1 }
 0x43d   :  { %8056 = vsyncpa [#allocation6], 1 }
 0x43e   :  { %8057 = vsyncpa [#allocation4], 1 }
 0x43f   :  { %8059 = vsyncpa [#allocation4 + $0x1], 1 }

</bundles_post_ra>
